<compile_context>
chip_gen: v6e
topology: v6e:2x2x1
jax: 0.10.0
libtpu: 0.0.40
codegen_flags: <defaults>
</compile_context>

<pallas_src>
import jax
import jax.numpy as jnp
from jax import lax
from jax.experimental import pallas as pl
from jax.experimental.pallas import tpu as pltpu


def _gru_fc_logsoftmax_kernel(
    emb_ref,    # (T*Bp, E)  bf16  time-major flattened embeddings
    wih0_ref,   # (E, 3H)    bf16  layer-0 input weights (transposed)
    wbig_ref,   # (2H, 9H)   bf16  block-diag fused [[whh0 | wih1 | 0], [0 | 0 | whh1]]
    bi0_ref,    # (1, 3H)    f32   layer-0 input bias [bih_rz + bhh_rz | bih_n]
    bhn0_ref,   # (1, H)     f32   layer-0 hidden n-gate bias (inside r-gated term)
    brz1_ref,   # (1, 2H)    f32   layer-1 combined r/z bias
    bin1_ref,   # (1, H)     f32   layer-1 input n-gate bias
    bhn1_ref,   # (1, H)     f32   layer-1 hidden n-gate bias
    fcw_ref,    # (H, V)     bf16
    fcb_ref,    # (1, V)     f32
    out_ref,    # (Bp, V)    f32   log-probabilities
    gi0_scr,    # (T*Bp, 3H) f32   VMEM scratch: hoisted layer-0 projection
):
    Bp = out_ref.shape[0]
    T = emb_ref.shape[0] // Bp
    H = bhn0_ref.shape[1]
    H2, H3 = 2 * H, 3 * H
    mxu_dt = wbig_ref.dtype

    # ---- prologue: one big MXU matmul projects every timestep's embedding
    # through wih0; layer-0 input-side biases folded in; result parked in
    # VMEM scratch so it does not stay live in vregs across the recurrence. ----
    gi0_scr[...] = (
        jnp.dot(emb_ref[...], wih0_ref[...], preferred_element_type=jnp.float32)
        + bi0_ref[...]
    )

    wbig = wbig_ref[...]
    bhn0 = bhn0_ref[...]
    brz1 = brz1_ref[...]
    bin1 = bin1_ref[...]
    bhn1 = bhn1_ref[...]

    h0 = jnp.zeros((Bp, H), jnp.float32)
    h1 = jnp.zeros((Bp, H), jnp.float32)

    # ---- skewed recurrence: T+1 pipeline steps.  Step s advances layer-0 to
    # time s and layer-1 to time s-1.  One fused block-diagonal matmul per
    # step (LHS = [h0(s-1) | h1(s-2)], K=2H, N=9H), then two independent gate
    # blocks.  Statically unrolled (T is a small compile-time constant). ----
    for s in range(T + 1):
        if s >= 1:
            lhs = jnp.concatenate([h0, h1], axis=-1).astype(mxu_dt)  # one cast/step
            big = jnp.dot(lhs, wbig, preferred_element_type=jnp.float32)  # (Bp, 9H)
            gh0 = big[:, :H3]            # h0(s-1) @ whh0   (layer-0, time s)
            gi1 = big[:, H3:2 * H3]      # h0(s-1) @ wih1   (layer-1, time s-1)
            gh1 = big[:, 2 * H3:]        # h1(s-2) @ whh1   (layer-1, time s-1)

            # layer-1 GRU cell for time s-1 (f32 gate math):
            rz1 = jax.nn.sigmoid(gi1[:, :H2] + gh1[:, :H2] + brz1)
            n1 = jnp.tanh(gi1[:, H2:] + bin1 + rz1[:, :H] * (gh1[:, H2:] + bhn1))
            h1_new = n1 + rz1[:, H:] * (h1 - n1)
        else:
            h1_new = h1

        if s < T:
            # layer-0 GRU cell for time s; input biases already folded in scratch.
            gi0 = gi0_scr[s * Bp:(s + 1) * Bp, :]
            if s == 0:
                # h0(-1) == 0  =>  gh0 == 0 (no matmul needed at step 0)
                rz0 = jax.nn.sigmoid(gi0[:, :H2])
                n0 = jnp.tanh(gi0[:, H2:] + rz0[:, :H] * bhn0)
                h0 = (1.0 - rz0[:, H:]) * n0
            else:
                rz0 = jax.nn.sigmoid(gi0[:, :H2] + gh0[:, :H2])
                n0 = jnp.tanh(gi0[:, H2:] + rz0[:, :H] * (gh0[:, H2:] + bhn0))
                h0 = n0 + rz0[:, H:] * (h0 - n0)
        h1 = h1_new

    # ---- fc + log-softmax on the last layer-1 hidden state (f32 math) ----
    logits = jnp.dot(h1.astype(mxu_dt), fcw_ref[...],
                     preferred_element_type=jnp.float32) + fcb_ref[...]
    m = jnp.max(logits, axis=-1, keepdims=True)
    lse = jnp.log(jnp.sum(jnp.exp(logits - m), axis=-1, keepdims=True)) + m
    out_ref[...] = logits - lse


def moj_model_forward(input_ids, params):
    """input_ids: (B, T) int32 token ids. Returns (B, V) f32 log-probs."""
    B, T = input_ids.shape
    emb_table = params["embedding"]            # (V, E)
    V, E = emb_table.shape
    H = params["whh_l0"].shape[1]              # whh_l0 is (3H, H)
    mxu_dt = jnp.bfloat16
    f32 = jnp.float32

    # Pad batch to the bf16 sublane tile so matmul LHS / gate vregs / the
    # (Bp, V) output store are full unmasked tiles; slice back afterwards.
    Bp = ((B + 15) // 16) * 16
    ids = jnp.pad(input_ids, ((0, Bp - B), (0, 0)))

    # Time-major gather directly: (T, Bp, E) -> (T*Bp, E), no transpose round trip.
    # TODO(synk): at production T*B, gather inside the kernel (scalar-prefetch
    # ids) or pre-project the table once (emb @ wih0) to kill the duplicated
    # HBM round trip; negligible at these shapes.
    emb_tm = jnp.take(emb_table, ids.T, axis=0)
    emb2d = emb_tm.reshape(T * Bp, E).astype(mxu_dt)

    # Weights pre-transposed for row-major (x @ W) MXU matmuls.
    wih0 = params["wih_l0"].T.astype(mxu_dt)   # (E, 3H)
    whh0 = params["whh_l0"].T.astype(f32)      # (H, 3H)
    wih1 = params["wih_l1"].T.astype(f32)      # (H, 3H)
    whh1 = params["whh_l1"].T.astype(f32)      # (H, 3H)
    fcw = params["fc_w"].T.astype(mxu_dt)      # (H, V)

    # Block-diagonal fused recurrent weight (2H, 9H):
    #   [ whh0 | wih1 |  0   ]
    #   [  0   |  0   | whh1 ]
    zero_h3 = jnp.zeros((H, 3 * H), f32)
    wbig = jnp.concatenate(
        [jnp.concatenate([whh0, wih1, zero_h3], axis=1),
         jnp.concatenate([zero_h3, zero_h3, whh1], axis=1)],
        axis=0).astype(mxu_dt)                 # (2H, 9H)

    # Layer-0 input bias folded into the hoisted projection:
    #   r/z gates use (bih + bhh) jointly; the n gate's bih_n is also additive
    #   on the input side.  bhh_n (bhn0) stays separate (inside the r-gated term).
    bi0 = jnp.concatenate(
        [params["bih_l0"][:2 * H] + params["bhh_l0"][:2 * H],
         params["bih_l0"][2 * H:]])[None, :].astype(f32)     # (1, 3H)
    bhn0 = params["bhh_l0"][2 * H:][None, :].astype(f32)     # (1, H)
    brz1 = (params["bih_l1"][:2 * H] + params["bhh_l1"][:2 * H])[None, :].astype(f32)
    bin1 = params["bih_l1"][2 * H:][None, :].astype(f32)
    bhn1 = params["bhh_l1"][2 * H:][None, :].astype(f32)
    fcb = params["fc_b"][None, :].astype(f32)

    operands = (emb2d, wih0, wbig, bi0, bhn0, brz1, bin1, bhn1, fcw, fcb)

    # VMEM budget: resident operands + gi0 scratch + output, capped well below
    # physical capacity (v7x has only 64 MiB per TC).
    resident = (sum(int(x.size) * x.dtype.itemsize for x in operands)
                + T * Bp * 3 * H * 4        # gi0 scratch (f32)
                + Bp * V * 4)               # output tile (f32)
    try:
        vmem_phys = int(pltpu.get_tpu_info().vmem_capacity_bytes)
    except Exception:
        vmem_phys = 64 * 2 ** 20            # conservative: v7x per-TC VMEM
    vmem_limit = int(min(int(0.75 * vmem_phys),
                         max(16 * 2 ** 20, 2 * resident)))

    vmem = pl.BlockSpec(memory_space=pltpu.MemorySpace.VMEM)

    out = pl.pallas_call(
        _gru_fc_logsoftmax_kernel,
        out_shape=jax.ShapeDtypeStruct((Bp, V), jnp.float32),
        in_specs=[vmem] * len(operands),
        out_specs=vmem,
        scratch_shapes=[pltpu.VMEM((T * Bp, 3 * H), jnp.float32)],
        compiler_params=pltpu.CompilerParams(vmem_limit_bytes=vmem_limit),
    )(*operands)
    return out[:B]


def _ref_forward(input_ids, params):
    """Pure-JAX f32 reference (same math, lax.scan) for correctness check."""
    emb = jnp.take(params["embedding"], input_ids, axis=0)  # (B, T, E)
    B, T, E = emb.shape
    H = params["whh_l0"].shape[1]

    def cell(x, h, wih, whh, bih, bhh):
        gi = x @ wih.T + bih
        gh = h @ whh.T + bhh
        i_r, i_z, i_n = jnp.split(gi, 3, axis=-1)
        h_r, h_z, h_n = jnp.split(gh, 3, axis=-1)
        r = jax.nn.sigmoid(i_r + h_r)
        z = jax.nn.sigmoid(i_z + h_z)
        n = jnp.tanh(i_n + r * h_n)
        return (1.0 - z) * n + z * h

    def scan_step(carry, x_t):
        h0, h1 = carry
        h0 = cell(x_t, h0, params["wih_l0"], params["whh_l0"],
                  params["bih_l0"], params["bhh_l0"])
        h1 = cell(h0, h1, params["wih_l1"], params["whh_l1"],
                  params["bih_l1"], params["bhh_l1"])
        return (h0, h1), None

    h0 = jnp.zeros((B, H), jnp.float32)
    h1 = jnp.zeros((B, H), jnp.float32)
    (h0, h1), _ = lax.scan(scan_step, (h0, h1), jnp.transpose(emb, (1, 0, 2)))
    logits = h1 @ params["fc_w"].T + params["fc_b"]
    return jax.nn.log_softmax(logits, axis=-1)


def init_params(key, vocab_size, embedding_dim, hidden_units):
    ks = jax.random.split(key, 12)
    s = 1.0 / jnp.sqrt(hidden_units)
    u = lambda k, shape: jax.random.uniform(k, shape, jnp.float32, -s, s)
    return {
        "embedding": jax.random.normal(ks[0], (vocab_size, embedding_dim),
                                       jnp.float32),
        "wih_l0": u(ks[1], (3 * hidden_units, embedding_dim)),
        "whh_l0": u(ks[2], (3 * hidden_units, hidden_units)),
        "bih_l0": u(ks[3], (3 * hidden_units,)),
        "bhh_l0": u(ks[4], (3 * hidden_units,)),
        "wih_l1": u(ks[5], (3 * hidden_units, hidden_units)),
        "whh_l1": u(ks[6], (3 * hidden_units, hidden_units)),
        "bih_l1": u(ks[7], (3 * hidden_units,)),
        "bhh_l1": u(ks[8], (3 * hidden_units,)),
        "fc_w": u(ks[9], (vocab_size, hidden_units)),
        "fc_b": u(ks[10], (vocab_size,)),
    }


if __name__ == "__main__":
    # Small, module-consistent shapes: batch=4, seq=8, vocab=128,
    # embedding_dim=128, hidden_units=128, num_layers=2.
    B, T = 4, 8
    VOCAB, EMB, HID = 128, 128, 128

    key = jax.random.PRNGKey(0)
    k_par, k_in = jax.random.split(key)
    params = init_params(k_par, VOCAB, EMB, HID)
    input_ids = jax.random.randint(k_in, (B, T), 0, VOCAB, dtype=jnp.int32)

    out = jax.jit(moj_model_forward)(input_ids, params)
    out = jax.block_until_ready(out)

    ref = _ref_forward(input_ids, params)
    assert out.shape == (B, VOCAB)
    # bf16 MXU operands -> loosened tolerance vs. the f32 reference.
    assert jnp.allclose(out, ref, atol=5e-2, rtol=5e-2), "mismatch vs reference"
    # log-softmax rows must sum to ~1 in prob space (computed in f32).
    assert jnp.allclose(jnp.sum(jnp.exp(out), axis=-1), 1.0, atol=1e-4)

    print("KERNEL_OK")
</pallas_src>

<mosaic_0001>
module attributes {stable_mosaic.version = 11 : i64} {
  func.func @_gru_fc_logsoftmax_kernel(%arg0: memref<128x128xbf16, #tpu.memory_space<vmem>>, %arg1: memref<128x384xbf16, #tpu.memory_space<vmem>>, %arg2: memref<256x1152xbf16, #tpu.memory_space<vmem>>, %arg3: memref<1x384xf32, #tpu.memory_space<vmem>>, %arg4: memref<1x128xf32, #tpu.memory_space<vmem>>, %arg5: memref<1x256xf32, #tpu.memory_space<vmem>>, %arg6: memref<1x128xf32, #tpu.memory_space<vmem>>, %arg7: memref<1x128xf32, #tpu.memory_space<vmem>>, %arg8: memref<128x128xbf16, #tpu.memory_space<vmem>>, %arg9: memref<1x128xf32, #tpu.memory_space<vmem>>, %arg10: memref<16x128xf32, #tpu.memory_space<vmem>>, %arg11: memref<128x384xf32, #tpu.memory_space<vmem>>) attributes {dimension_semantics = [], scalar_prefetch = 0 : i64, scratch_operands = 1 : i64, tpu.core_type = #tpu.core_type<tc>} {
    %c0 = arith.constant 0 : index
    %c0_0 = arith.constant 0 : index
    %0 = vector.load %arg0[%c0, %c0_0] : memref<128x128xbf16, #tpu.memory_space<vmem>>, vector<128x128xbf16>
    %c0_1 = arith.constant 0 : index
    %c0_2 = arith.constant 0 : index
    %1 = vector.load %arg1[%c0_1, %c0_2] : memref<128x384xbf16, #tpu.memory_space<vmem>>, vector<128x384xbf16>
    %cst = arith.constant dense<0.000000e+00> : vector<128x384xf32>
    %2 = tpu.matmul %0, %1, %cst {dimension_numbers = #tpu.dot_dimension_numbers<[1], [0], [0], [1], [0, 0, 1, 1], [], []>} : vector<128x128xbf16>, vector<128x384xbf16>, vector<128x384xf32> -> vector<128x384xf32>
    %c0_3 = arith.constant 0 : index
    %c0_4 = arith.constant 0 : index
    %3 = vector.load %arg3[%c0_3, %c0_4] : memref<1x384xf32, #tpu.memory_space<vmem>>, vector<1x384xf32>
    %4 = vector.broadcast %3 : vector<1x384xf32> to vector<128x384xf32>
    %5 = arith.addf %2, %4 : vector<128x384xf32>
    %c0_5 = arith.constant 0 : index
    %c0_6 = arith.constant 0 : index
    %6 = vector.load %arg11[%c0_5, %c0_6] : memref<128x384xf32, #tpu.memory_space<vmem>>, vector<128x384xf32>
    tpu.vector_store %arg11[%c0_5, %c0_6], %5 {strides = array<i32>} : memref<128x384xf32, #tpu.memory_space<vmem>>, vector<128x384xf32>,
    %c0_7 = arith.constant 0 : index
    %c0_8 = arith.constant 0 : index
    %7 = vector.load %arg2[%c0_7, %c0_8] : memref<256x1152xbf16, #tpu.memory_space<vmem>>, vector<256x1152xbf16>
    %c0_9 = arith.constant 0 : index
    %c0_10 = arith.constant 0 : index
    %8 = vector.load %arg4[%c0_9, %c0_10] : memref<1x128xf32, #tpu.memory_space<vmem>>, vector<1x128xf32>
    %c0_11 = arith.constant 0 : index
    %c0_12 = arith.constant 0 : index
    %9 = vector.load %arg5[%c0_11, %c0_12] : memref<1x256xf32, #tpu.memory_space<vmem>>, vector<1x256xf32>
    %c0_13 = arith.constant 0 : index
    %c0_14 = arith.constant 0 : index
    %10 = vector.load %arg6[%c0_13, %c0_14] : memref<1x128xf32, #tpu.memory_space<vmem>>, vector<1x128xf32>
    %c0_15 = arith.constant 0 : index
    %c0_16 = arith.constant 0 : index
    %11 = vector.load %arg7[%c0_15, %c0_16] : memref<1x128xf32, #tpu.memory_space<vmem>>, vector<1x128xf32>
    %cst_17 = arith.constant 0.000000e+00 : f32
    %12 = vector.broadcast %cst_17 : f32 to vector<16x128xf32>
    %c0_18 = arith.constant 0 : index
    %c0_19 = arith.constant 0 : index
    %13 = vector.load %arg11[%c0_18, %c0_19] : memref<128x384xf32, #tpu.memory_space<vmem>>, vector<16x384xf32>
    %14 = vector.extract_strided_slice %13 {offsets = [0, 0], sizes = [16, 256], strides = [1, 1]} : vector<16x384xf32> to vector<16x256xf32>
    %15 = arith.negf %14 : vector<16x256xf32>
    %16 = math.exp %15 : vector<16x256xf32>
    %cst_20 = arith.constant 1.000000e+00 : f32
    %17 = vector.broadcast %cst_20 : f32 to vector<16x256xf32>
    %18 = arith.addf %17, %16 : vector<16x256xf32>
    %19 = arith.divf %17, %18 : vector<16x256xf32>
    %20 = vector.extract_strided_slice %13 {offsets = [0, 256], sizes = [16, 128], strides = [1, 1]} : vector<16x384xf32> to vector<16x128xf32>
    %21 = vector.extract_strided_slice %19 {offsets = [0, 0], sizes = [16, 128], strides = [1, 1]} : vector<16x256xf32> to vector<16x128xf32>
    %22 = vector.broadcast %8 : vector<1x128xf32> to vector<16x128xf32>
    %23 = arith.mulf %21, %22 : vector<16x128xf32>
    %24 = arith.addf %20, %23 : vector<16x128xf32>
    %25 = math.tanh %24 : vector<16x128xf32>
    %26 = vector.extract_strided_slice %19 {offsets = [0, 128], sizes = [16, 128], strides = [1, 1]} : vector<16x256xf32> to vector<16x128xf32>
    %cst_21 = arith.constant 1.000000e+00 : f32
    %27 = vector.broadcast %cst_21 : f32 to vector<16x128xf32>
    %28 = arith.subf %27, %26 : vector<16x128xf32>
    %29 = arith.mulf %28, %25 : vector<16x128xf32>
    %30 = tpu.concatenate %29, %12 in 1 : vector<16x128xf32>, vector<16x128xf32> -> vector<16x256xf32>
    %31 = arith.truncf %30 : vector<16x256xf32> to vector<16x256xbf16>
    %cst_22 = arith.constant dense<0.000000e+00> : vector<16x1152xf32>
    %32 = tpu.matmul %31, %7, %cst_22 {dimension_numbers = #tpu.dot_dimension_numbers<[1], [0], [0], [1], [0, 0, 1, 1], [], []>} : vector<16x256xbf16>, vector<256x1152xbf16>, vector<16x1152xf32> -> vector<16x1152xf32>
    %33 = vector.extract_strided_slice %32 {offsets = [0, 0], sizes = [16, 384], strides = [1, 1]} : vector<16x1152xf32> to vector<16x384xf32>
    %34 = vector.extract_strided_slice %32 {offsets = [0, 384], sizes = [16, 384], strides = [1, 1]} : vector<16x1152xf32> to vector<16x384xf32>
    %35 = vector.extract_strided_slice %32 {offsets = [0, 768], sizes = [16, 384], strides = [1, 1]} : vector<16x1152xf32> to vector<16x384xf32>
    %36 = vector.extract_strided_slice %34 {offsets = [0, 0], sizes = [16, 256], strides = [1, 1]} : vector<16x384xf32> to vector<16x256xf32>
    %37 = vector.extract_strided_slice %35 {offsets = [0, 0], sizes = [16, 256], strides = [1, 1]} : vector<16x384xf32> to vector<16x256xf32>
    %38 = arith.addf %36, %37 : vector<16x256xf32>
    %39 = vector.broadcast %9 : vector<1x256xf32> to vector<16x256xf32>
    %40 = arith.addf %38, %39 : vector<16x256xf32>
    %41 = arith.negf %40 : vector<16x256xf32>
    %42 = math.exp %41 : vector<16x256xf32>
    %cst_23 = arith.constant 1.000000e+00 : f32
    %43 = vector.broadcast %cst_23 : f32 to vector<16x256xf32>
    %44 = arith.addf %43, %42 : vector<16x256xf32>
    %45 = arith.divf %43, %44 : vector<16x256xf32>
    %46 = vector.extract_strided_slice %34 {offsets = [0, 256], sizes = [16, 128], strides = [1, 1]} : vector<16x384xf32> to vector<16x128xf32>
    %47 = vector.broadcast %10 : vector<1x128xf32> to vector<16x128xf32>
    %48 = arith.addf %46, %47 : vector<16x128xf32>
    %49 = vector.extract_strided_slice %45 {offsets = [0, 0], sizes = [16, 128], strides = [1, 1]} : vector<16x256xf32> to vector<16x128xf32>
    %50 = vector.extract_strided_slice %35 {offsets = [0, 256], sizes = [16, 128], strides = [1, 1]} : vector<16x384xf32> to vector<16x128xf32>
    %51 = vector.broadcast %11 : vector<1x128xf32> to vector<16x128xf32>
    %52 = arith.addf %50, %51 : vector<16x128xf32>
    %53 = arith.mulf %49, %52 : vector<16x128xf32>
    %54 = arith.addf %48, %53 : vector<16x128xf32>
    %55 = math.tanh %54 : vector<16x128xf32>
    %56 = vector.extract_strided_slice %45 {offsets = [0, 128], sizes = [16, 128], strides = [1, 1]} : vector<16x256xf32> to vector<16x128xf32>
    %57 = arith.subf %12, %55 : vector<16x128xf32>
    %58 = arith.mulf %56, %57 : vector<16x128xf32>
    %59 = arith.addf %55, %58 : vector<16x128xf32>
    %c16 = arith.constant 16 : index
    %c0_24 = arith.constant 0 : index
    %60 = vector.load %arg11[%c16, %c0_24] : memref<128x384xf32, #tpu.memory_space<vmem>>, vector<16x384xf32>
    %61 = vector.extract_strided_slice %60 {offsets = [0, 0], sizes = [16, 256], strides = [1, 1]} : vector<16x384xf32> to vector<16x256xf32>
    %62 = vector.extract_strided_slice %33 {offsets = [0, 0], sizes = [16, 256], strides = [1, 1]} : vector<16x384xf32> to vector<16x256xf32>
    %63 = arith.addf %61, %62 : vector<16x256xf32>
    %64 = arith.negf %63 : vector<16x256xf32>
    %65 = math.exp %64 : vector<16x256xf32>
    %cst_25 = arith.constant 1.000000e+00 : f32
    %66 = vector.broadcast %cst_25 : f32 to vector<16x256xf32>
    %67 = arith.addf %66, %65 : vector<16x256xf32>
    %68 = arith.divf %66, %67 : vector<16x256xf32>
    %69 = vector.extract_strided_slice %60 {offsets = [0, 256], sizes = [16, 128], strides = [1, 1]} : vector<16x384xf32> to vector<16x128xf32>
    %70 = vector.extract_strided_slice %68 {offsets = [0, 0], sizes = [16, 128], strides = [1, 1]} : vector<16x256xf32> to vector<16x128xf32>
    %71 = vector.extract_strided_slice %33 {offsets = [0, 256], sizes = [16, 128], strides = [1, 1]} : vector<16x384xf32> to vector<16x128xf32>
    %72 = vector.broadcast %8 : vector<1x128xf32> to vector<16x128xf32>
    %73 = arith.addf %71, %72 : vector<16x128xf32>
    %74 = arith.mulf %70, %73 : vector<16x128xf32>
    %75 = arith.addf %69, %74 : vector<16x128xf32>
    %76 = math.tanh %75 : vector<16x128xf32>
    %77 = vector.extract_strided_slice %68 {offsets = [0, 128], sizes = [16, 128], strides = [1, 1]} : vector<16x256xf32> to vector<16x128xf32>
    %78 = arith.subf %29, %76 : vector<16x128xf32>
    %79 = arith.mulf %77, %78 : vector<16x128xf32>
    %80 = arith.addf %76, %79 : vector<16x128xf32>
    %81 = tpu.concatenate %80, %59 in 1 : vector<16x128xf32>, vector<16x128xf32> -> vector<16x256xf32>
    %82 = arith.truncf %81 : vector<16x256xf32> to vector<16x256xbf16>
    %cst_26 = arith.constant dense<0.000000e+00> : vector<16x1152xf32>
    %83 = tpu.matmul %82, %7, %cst_26 {dimension_numbers = #tpu.dot_dimension_numbers<[1], [0], [0], [1], [0, 0, 1, 1], [], []>} : vector<16x256xbf16>, vector<256x1152xbf16>, vector<16x1152xf32> -> vector<16x1152xf32>
    %84 = vector.extract_strided_slice %83 {offsets = [0, 0], sizes = [16, 384], strides = [1, 1]} : vector<16x1152xf32> to vector<16x384xf32>
    %85 = vector.extract_strided_slice %83 {offsets = [0, 384], sizes = [16, 384], strides = [1, 1]} : vector<16x1152xf32> to vector<16x384xf32>
    %86 = vector.extract_strided_slice %83 {offsets = [0, 768], sizes = [16, 384], strides = [1, 1]} : vector<16x1152xf32> to vector<16x384xf32>
    %87 = vector.extract_strided_slice %85 {offsets = [0, 0], sizes = [16, 256], strides = [1, 1]} : vector<16x384xf32> to vector<16x256xf32>
    %88 = vector.extract_strided_slice %86 {offsets = [0, 0], sizes = [16, 256], strides = [1, 1]} : vector<16x384xf32> to vector<16x256xf32>
    %89 = arith.addf %87, %88 : vector<16x256xf32>
    %90 = vector.broadcast %9 : vector<1x256xf32> to vector<16x256xf32>
    %91 = arith.addf %89, %90 : vector<16x256xf32>
    %92 = arith.negf %91 : vector<16x256xf32>
    %93 = math.exp %92 : vector<16x256xf32>
    %cst_27 = arith.constant 1.000000e+00 : f32
    %94 = vector.broadcast %cst_27 : f32 to vector<16x256xf32>
    %95 = arith.addf %94, %93 : vector<16x256xf32>
    %96 = arith.divf %94, %95 : vector<16x256xf32>
    %97 = vector.extract_strided_slice %85 {offsets = [0, 256], sizes = [16, 128], strides = [1, 1]} : vector<16x384xf32> to vector<16x128xf32>
    %98 = vector.broadcast %10 : vector<1x128xf32> to vector<16x128xf32>
    %99 = arith.addf %97, %98 : vector<16x128xf32>
    %100 = vector.extract_strided_slice %96 {offsets = [0, 0], sizes = [16, 128], strides = [1, 1]} : vector<16x256xf32> to vector<16x128xf32>
    %101 = vector.extract_strided_slice %86 {offsets = [0, 256], sizes = [16, 128], strides = [1, 1]} : vector<16x384xf32> to vector<16x128xf32>
    %102 = vector.broadcast %11 : vector<1x128xf32> to vector<16x128xf32>
    %103 = arith.addf %101, %102 : vector<16x128xf32>
    %104 = arith.mulf %100, %103 : vector<16x128xf32>
    %105 = arith.addf %99, %104 : vector<16x128xf32>
    %106 = math.tanh %105 : vector<16x128xf32>
    %107 = vector.extract_strided_slice %96 {offsets = [0, 128], sizes = [16, 128], strides = [1, 1]} : vector<16x256xf32> to vector<16x128xf32>
    %108 = arith.subf %59, %106 : vector<16x128xf32>
    %109 = arith.mulf %107, %108 : vector<16x128xf32>
    %110 = arith.addf %106, %109 : vector<16x128xf32>
    %c32 = arith.constant 32 : index
    %c0_28 = arith.constant 0 : index
    %111 = vector.load %arg11[%c32, %c0_28] : memref<128x384xf32, #tpu.memory_space<vmem>>, vector<16x384xf32>
    %112 = vector.extract_strided_slice %111 {offsets = [0, 0], sizes = [16, 256], strides = [1, 1]} : vector<16x384xf32> to vector<16x256xf32>
    %113 = vector.extract_strided_slice %84 {offsets = [0, 0], sizes = [16, 256], strides = [1, 1]} : vector<16x384xf32> to vector<16x256xf32>
    %114 = arith.addf %112, %113 : vector<16x256xf32>
    %115 = arith.negf %114 : vector<16x256xf32>
    %116 = math.exp %115 : vector<16x256xf32>
    %cst_29 = arith.constant 1.000000e+00 : f32
    %117 = vector.broadcast %cst_29 : f32 to vector<16x256xf32>
    %118 = arith.addf %117, %116 : vector<16x256xf32>
    %119 = arith.divf %117, %118 : vector<16x256xf32>
    %120 = vector.extract_strided_slice %111 {offsets = [0, 256], sizes = [16, 128], strides = [1, 1]} : vector<16x384xf32> to vector<16x128xf32>
    %121 = vector.extract_strided_slice %119 {offsets = [0, 0], sizes = [16, 128], strides = [1, 1]} : vector<16x256xf32> to vector<16x128xf32>
    %122 = vector.extract_strided_slice %84 {offsets = [0, 256], sizes = [16, 128], strides = [1, 1]} : vector<16x384xf32> to vector<16x128xf32>
    %123 = vector.broadcast %8 : vector<1x128xf32> to vector<16x128xf32>
    %124 = arith.addf %122, %123 : vector<16x128xf32>
    %125 = arith.mulf %121, %124 : vector<16x128xf32>
    %126 = arith.addf %120, %125 : vector<16x128xf32>
    %127 = math.tanh %126 : vector<16x128xf32>
    %128 = vector.extract_strided_slice %119 {offsets = [0, 128], sizes = [16, 128], strides = [1, 1]} : vector<16x256xf32> to vector<16x128xf32>
    %129 = arith.subf %80, %127 : vector<16x128xf32>
    %130 = arith.mulf %128, %129 : vector<16x128xf32>
    %131 = arith.addf %127, %130 : vector<16x128xf32>
    %132 = tpu.concatenate %131, %110 in 1 : vector<16x128xf32>, vector<16x128xf32> -> vector<16x256xf32>
    %133 = arith.truncf %132 : vector<16x256xf32> to vector<16x256xbf16>
    %cst_30 = arith.constant dense<0.000000e+00> : vector<16x1152xf32>
    %134 = tpu.matmul %133, %7, %cst_30 {dimension_numbers = #tpu.dot_dimension_numbers<[1], [0], [0], [1], [0, 0, 1, 1], [], []>} : vector<16x256xbf16>, vector<256x1152xbf16>, vector<16x1152xf32> -> vector<16x1152xf32>
    %135 = vector.extract_strided_slice %134 {offsets = [0, 0], sizes = [16, 384], strides = [1, 1]} : vector<16x1152xf32> to vector<16x384xf32>
    %136 = vector.extract_strided_slice %134 {offsets = [0, 384], sizes = [16, 384], strides = [1, 1]} : vector<16x1152xf32> to vector<16x384xf32>
    %137 = vector.extract_strided_slice %134 {offsets = [0, 768], sizes = [16, 384], strides = [1, 1]} : vector<16x1152xf32> to vector<16x384xf32>
    %138 = vector.extract_strided_slice %136 {offsets = [0, 0], sizes = [16, 256], strides = [1, 1]} : vector<16x384xf32> to vector<16x256xf32>
    %139 = vector.extract_strided_slice %137 {offsets = [0, 0], sizes = [16, 256], strides = [1, 1]} : vector<16x384xf32> to vector<16x256xf32>
    %140 = arith.addf %138, %139 : vector<16x256xf32>
    %141 = vector.broadcast %9 : vector<1x256xf32> to vector<16x256xf32>
    %142 = arith.addf %140, %141 : vector<16x256xf32>
    %143 = arith.negf %142 : vector<16x256xf32>
    %144 = math.exp %143 : vector<16x256xf32>
    %cst_31 = arith.constant 1.000000e+00 : f32
    %145 = vector.broadcast %cst_31 : f32 to vector<16x256xf32>
    %146 = arith.addf %145, %144 : vector<16x256xf32>
    %147 = arith.divf %145, %146 : vector<16x256xf32>
    %148 = vector.extract_strided_slice %136 {offsets = [0, 256], sizes = [16, 128], strides = [1, 1]} : vector<16x384xf32> to vector<16x128xf32>
    %149 = vector.broadcast %10 : vector<1x128xf32> to vector<16x128xf32>
    %150 = arith.addf %148, %149 : vector<16x128xf32>
    %151 = vector.extract_strided_slice %147 {offsets = [0, 0], sizes = [16, 128], strides = [1, 1]} : vector<16x256xf32> to vector<16x128xf32>
    %152 = vector.extract_strided_slice %137 {offsets = [0, 256], sizes = [16, 128], strides = [1, 1]} : vector<16x384xf32> to vector<16x128xf32>
    %153 = vector.broadcast %11 : vector<1x128xf32> to vector<16x128xf32>
    %154 = arith.addf %152, %153 : vector<16x128xf32>
    %155 = arith.mulf %151, %154 : vector<16x128xf32>
    %156 = arith.addf %150, %155 : vector<16x128xf32>
    %157 = math.tanh %156 : vector<16x128xf32>
    %158 = vector.extract_strided_slice %147 {offsets = [0, 128], sizes = [16, 128], strides = [1, 1]} : vector<16x256xf32> to vector<16x128xf32>
    %159 = arith.subf %110, %157 : vector<16x128xf32>
    %160 = arith.mulf %158, %159 : vector<16x128xf32>
    %161 = arith.addf %157, %160 : vector<16x128xf32>
    %c48 = arith.constant 48 : index
    %c0_32 = arith.constant 0 : index
    %162 = vector.load %arg11[%c48, %c0_32] : memref<128x384xf32, #tpu.memory_space<vmem>>, vector<16x384xf32>
    %163 = vector.extract_strided_slice %162 {offsets = [0, 0], sizes = [16, 256], strides = [1, 1]} : vector<16x384xf32> to vector<16x256xf32>
    %164 = vector.extract_strided_slice %135 {offsets = [0, 0], sizes = [16, 256], strides = [1, 1]} : vector<16x384xf32> to vector<16x256xf32>
    %165 = arith.addf %163, %164 : vector<16x256xf32>
    %166 = arith.negf %165 : vector<16x256xf32>
    %167 = math.exp %166 : vector<16x256xf32>
    %cst_33 = arith.constant 1.000000e+00 : f32
    %168 = vector.broadcast %cst_33 : f32 to vector<16x256xf32>
    %169 = arith.addf %168, %167 : vector<16x256xf32>
    %170 = arith.divf %168, %169 : vector<16x256xf32>
    %171 = vector.extract_strided_slice %162 {offsets = [0, 256], sizes = [16, 128], strides = [1, 1]} : vector<16x384xf32> to vector<16x128xf32>
    %172 = vector.extract_strided_slice %170 {offsets = [0, 0], sizes = [16, 128], strides = [1, 1]} : vector<16x256xf32> to vector<16x128xf32>
    %173 = vector.extract_strided_slice %135 {offsets = [0, 256], sizes = [16, 128], strides = [1, 1]} : vector<16x384xf32> to vector<16x128xf32>
    %174 = vector.broadcast %8 : vector<1x128xf32> to vector<16x128xf32>
    %175 = arith.addf %173, %174 : vector<16x128xf32>
    %176 = arith.mulf %172, %175 : vector<16x128xf32>
    %177 = arith.addf %171, %176 : vector<16x128xf32>
    %178 = math.tanh %177 : vector<16x128xf32>
    %179 = vector.extract_strided_slice %170 {offsets = [0, 128], sizes = [16, 128], strides = [1, 1]} : vector<16x256xf32> to vector<16x128xf32>
    %180 = arith.subf %131, %178 : vector<16x128xf32>
    %181 = arith.mulf %179, %180 : vector<16x128xf32>
    %182 = arith.addf %178, %181 : vector<16x128xf32>
    %183 = tpu.concatenate %182, %161 in 1 : vector<16x128xf32>, vector<16x128xf32> -> vector<16x256xf32>
    %184 = arith.truncf %183 : vector<16x256xf32> to vector<16x256xbf16>
    %cst_34 = arith.constant dense<0.000000e+00> : vector<16x1152xf32>
    %185 = tpu.matmul %184, %7, %cst_34 {dimension_numbers = #tpu.dot_dimension_numbers<[1], [0], [0], [1], [0, 0, 1, 1], [], []>} : vector<16x256xbf16>, vector<256x1152xbf16>, vector<16x1152xf32> -> vector<16x1152xf32>
    %186 = vector.extract_strided_slice %185 {offsets = [0, 0], sizes = [16, 384], strides = [1, 1]} : vector<16x1152xf32> to vector<16x384xf32>
    %187 = vector.extract_strided_slice %185 {offsets = [0, 384], sizes = [16, 384], strides = [1, 1]} : vector<16x1152xf32> to vector<16x384xf32>
    %188 = vector.extract_strided_slice %185 {offsets = [0, 768], sizes = [16, 384], strides = [1, 1]} : vector<16x1152xf32> to vector<16x384xf32>
    %189 = vector.extract_strided_slice %187 {offsets = [0, 0], sizes = [16, 256], strides = [1, 1]} : vector<16x384xf32> to vector<16x256xf32>
    %190 = vector.extract_strided_slice %188 {offsets = [0, 0], sizes = [16, 256], strides = [1, 1]} : vector<16x384xf32> to vector<16x256xf32>
    %191 = arith.addf %189, %190 : vector<16x256xf32>
    %192 = vector.broadcast %9 : vector<1x256xf32> to vector<16x256xf32>
    %193 = arith.addf %191, %192 : vector<16x256xf32>
    %194 = arith.negf %193 : vector<16x256xf32>
    %195 = math.exp %194 : vector<16x256xf32>
    %cst_35 = arith.constant 1.000000e+00 : f32
    %196 = vector.broadcast %cst_35 : f32 to vector<16x256xf32>
    %197 = arith.addf %196, %195 : vector<16x256xf32>
    %198 = arith.divf %196, %197 : vector<16x256xf32>
    %199 = vector.extract_strided_slice %187 {offsets = [0, 256], sizes = [16, 128], strides = [1, 1]} : vector<16x384xf32> to vector<16x128xf32>
    %200 = vector.broadcast %10 : vector<1x128xf32> to vector<16x128xf32>
    %201 = arith.addf %199, %200 : vector<16x128xf32>
    %202 = vector.extract_strided_slice %198 {offsets = [0, 0], sizes = [16, 128], strides = [1, 1]} : vector<16x256xf32> to vector<16x128xf32>
    %203 = vector.extract_strided_slice %188 {offsets = [0, 256], sizes = [16, 128], strides = [1, 1]} : vector<16x384xf32> to vector<16x128xf32>
    %204 = vector.broadcast %11 : vector<1x128xf32> to vector<16x128xf32>
    %205 = arith.addf %203, %204 : vector<16x128xf32>
    %206 = arith.mulf %202, %205 : vector<16x128xf32>
    %207 = arith.addf %201, %206 : vector<16x128xf32>
    %208 = math.tanh %207 : vector<16x128xf32>
    %209 = vector.extract_strided_slice %198 {offsets = [0, 128], sizes = [16, 128], strides = [1, 1]} : vector<16x256xf32> to vector<16x128xf32>
    %210 = arith.subf %161, %208 : vector<16x128xf32>
    %211 = arith.mulf %209, %210 : vector<16x128xf32>
    %212 = arith.addf %208, %211 : vector<16x128xf32>
    %c64 = arith.constant 64 : index
    %c0_36 = arith.constant 0 : index
    %213 = vector.load %arg11[%c64, %c0_36] : memref<128x384xf32, #tpu.memory_space<vmem>>, vector<16x384xf32>
    %214 = vector.extract_strided_slice %213 {offsets = [0, 0], sizes = [16, 256], strides = [1, 1]} : vector<16x384xf32> to vector<16x256xf32>
    %215 = vector.extract_strided_slice %186 {offsets = [0, 0], sizes = [16, 256], strides = [1, 1]} : vector<16x384xf32> to vector<16x256xf32>
    %216 = arith.addf %214, %215 : vector<16x256xf32>
    %217 = arith.negf %216 : vector<16x256xf32>
    %218 = math.exp %217 : vector<16x256xf32>
    %cst_37 = arith.constant 1.000000e+00 : f32
    %219 = vector.broadcast %cst_37 : f32 to vector<16x256xf32>
    %220 = arith.addf %219, %218 : vector<16x256xf32>
    %221 = arith.divf %219, %220 : vector<16x256xf32>
    %222 = vector.extract_strided_slice %213 {offsets = [0, 256], sizes = [16, 128], strides = [1, 1]} : vector<16x384xf32> to vector<16x128xf32>
    %223 = vector.extract_strided_slice %221 {offsets = [0, 0], sizes = [16, 128], strides = [1, 1]} : vector<16x256xf32> to vector<16x128xf32>
    %224 = vector.extract_strided_slice %186 {offsets = [0, 256], sizes = [16, 128], strides = [1, 1]} : vector<16x384xf32> to vector<16x128xf32>
    %225 = vector.broadcast %8 : vector<1x128xf32> to vector<16x128xf32>
    %226 = arith.addf %224, %225 : vector<16x128xf32>
    %227 = arith.mulf %223, %226 : vector<16x128xf32>
    %228 = arith.addf %222, %227 : vector<16x128xf32>
    %229 = math.tanh %228 : vector<16x128xf32>
    %230 = vector.extract_strided_slice %221 {offsets = [0, 128], sizes = [16, 128], strides = [1, 1]} : vector<16x256xf32> to vector<16x128xf32>
    %231 = arith.subf %182, %229 : vector<16x128xf32>
    %232 = arith.mulf %230, %231 : vector<16x128xf32>
    %233 = arith.addf %229, %232 : vector<16x128xf32>
    %234 = tpu.concatenate %233, %212 in 1 : vector<16x128xf32>, vector<16x128xf32> -> vector<16x256xf32>
    %235 = arith.truncf %234 : vector<16x256xf32> to vector<16x256xbf16>
    %cst_38 = arith.constant dense<0.000000e+00> : vector<16x1152xf32>
    %236 = tpu.matmul %235, %7, %cst_38 {dimension_numbers = #tpu.dot_dimension_numbers<[1], [0], [0], [1], [0, 0, 1, 1], [], []>} : vector<16x256xbf16>, vector<256x1152xbf16>, vector<16x1152xf32> -> vector<16x1152xf32>
    %237 = vector.extract_strided_slice %236 {offsets = [0, 0], sizes = [16, 384], strides = [1, 1]} : vector<16x1152xf32> to vector<16x384xf32>
    %238 = vector.extract_strided_slice %236 {offsets = [0, 384], sizes = [16, 384], strides = [1, 1]} : vector<16x1152xf32> to vector<16x384xf32>
    %239 = vector.extract_strided_slice %236 {offsets = [0, 768], sizes = [16, 384], strides = [1, 1]} : vector<16x1152xf32> to vector<16x384xf32>
    %240 = vector.extract_strided_slice %238 {offsets = [0, 0], sizes = [16, 256], strides = [1, 1]} : vector<16x384xf32> to vector<16x256xf32>
    %241 = vector.extract_strided_slice %239 {offsets = [0, 0], sizes = [16, 256], strides = [1, 1]} : vector<16x384xf32> to vector<16x256xf32>
    %242 = arith.addf %240, %241 : vector<16x256xf32>
    %243 = vector.broadcast %9 : vector<1x256xf32> to vector<16x256xf32>
    %244 = arith.addf %242, %243 : vector<16x256xf32>
    %245 = arith.negf %244 : vector<16x256xf32>
    %246 = math.exp %245 : vector<16x256xf32>
    %cst_39 = arith.constant 1.000000e+00 : f32
    %247 = vector.broadcast %cst_39 : f32 to vector<16x256xf32>
    %248 = arith.addf %247, %246 : vector<16x256xf32>
    %249 = arith.divf %247, %248 : vector<16x256xf32>
    %250 = vector.extract_strided_slice %238 {offsets = [0, 256], sizes = [16, 128], strides = [1, 1]} : vector<16x384xf32> to vector<16x128xf32>
    %251 = vector.broadcast %10 : vector<1x128xf32> to vector<16x128xf32>
    %252 = arith.addf %250, %251 : vector<16x128xf32>
    %253 = vector.extract_strided_slice %249 {offsets = [0, 0], sizes = [16, 128], strides = [1, 1]} : vector<16x256xf32> to vector<16x128xf32>
    %254 = vector.extract_strided_slice %239 {offsets = [0, 256], sizes = [16, 128], strides = [1, 1]} : vector<16x384xf32> to vector<16x128xf32>
    %255 = vector.broadcast %11 : vector<1x128xf32> to vector<16x128xf32>
    %256 = arith.addf %254, %255 : vector<16x128xf32>
    %257 = arith.mulf %253, %256 : vector<16x128xf32>
    %258 = arith.addf %252, %257 : vector<16x128xf32>
    %259 = math.tanh %258 : vector<16x128xf32>
    %260 = vector.extract_strided_slice %249 {offsets = [0, 128], sizes = [16, 128], strides = [1, 1]} : vector<16x256xf32> to vector<16x128xf32>
    %261 = arith.subf %212, %259 : vector<16x128xf32>
    %262 = arith.mulf %260, %261 : vector<16x128xf32>
    %263 = arith.addf %259, %262 : vector<16x128xf32>
    %c80 = arith.constant 80 : index
    %c0_40 = arith.constant 0 : index
    %264 = vector.load %arg11[%c80, %c0_40] : memref<128x384xf32, #tpu.memory_space<vmem>>, vector<16x384xf32>
    %265 = vector.extract_strided_slice %264 {offsets = [0, 0], sizes = [16, 256], strides = [1, 1]} : vector<16x384xf32> to vector<16x256xf32>
    %266 = vector.extract_strided_slice %237 {offsets = [0, 0], sizes = [16, 256], strides = [1, 1]} : vector<16x384xf32> to vector<16x256xf32>
    %267 = arith.addf %265, %266 : vector<16x256xf32>
    %268 = arith.negf %267 : vector<16x256xf32>
    %269 = math.exp %268 : vector<16x256xf32>
    %cst_41 = arith.constant 1.000000e+00 : f32
    %270 = vector.broadcast %cst_41 : f32 to vector<16x256xf32>
    %271 = arith.addf %270, %269 : vector<16x256xf32>
    %272 = arith.divf %270, %271 : vector<16x256xf32>
    %273 = vector.extract_strided_slice %264 {offsets = [0, 256], sizes = [16, 128], strides = [1, 1]} : vector<16x384xf32> to vector<16x128xf32>
    %274 = vector.extract_strided_slice %272 {offsets = [0, 0], sizes = [16, 128], strides = [1, 1]} : vector<16x256xf32> to vector<16x128xf32>
    %275 = vector.extract_strided_slice %237 {offsets = [0, 256], sizes = [16, 128], strides = [1, 1]} : vector<16x384xf32> to vector<16x128xf32>
    %276 = vector.broadcast %8 : vector<1x128xf32> to vector<16x128xf32>
    %277 = arith.addf %275, %276 : vector<16x128xf32>
    %278 = arith.mulf %274, %277 : vector<16x128xf32>
    %279 = arith.addf %273, %278 : vector<16x128xf32>
    %280 = math.tanh %279 : vector<16x128xf32>
    %281 = vector.extract_strided_slice %272 {offsets = [0, 128], sizes = [16, 128], strides = [1, 1]} : vector<16x256xf32> to vector<16x128xf32>
    %282 = arith.subf %233, %280 : vector<16x128xf32>
    %283 = arith.mulf %281, %282 : vector<16x128xf32>
    %284 = arith.addf %280, %283 : vector<16x128xf32>
    %285 = tpu.concatenate %284, %263 in 1 : vector<16x128xf32>, vector<16x128xf32> -> vector<16x256xf32>
    %286 = arith.truncf %285 : vector<16x256xf32> to vector<16x256xbf16>
    %cst_42 = arith.constant dense<0.000000e+00> : vector<16x1152xf32>
    %287 = tpu.matmul %286, %7, %cst_42 {dimension_numbers = #tpu.dot_dimension_numbers<[1], [0], [0], [1], [0, 0, 1, 1], [], []>} : vector<16x256xbf16>, vector<256x1152xbf16>, vector<16x1152xf32> -> vector<16x1152xf32>
    %288 = vector.extract_strided_slice %287 {offsets = [0, 0], sizes = [16, 384], strides = [1, 1]} : vector<16x1152xf32> to vector<16x384xf32>
    %289 = vector.extract_strided_slice %287 {offsets = [0, 384], sizes = [16, 384], strides = [1, 1]} : vector<16x1152xf32> to vector<16x384xf32>
    %290 = vector.extract_strided_slice %287 {offsets = [0, 768], sizes = [16, 384], strides = [1, 1]} : vector<16x1152xf32> to vector<16x384xf32>
    %291 = vector.extract_strided_slice %289 {offsets = [0, 0], sizes = [16, 256], strides = [1, 1]} : vector<16x384xf32> to vector<16x256xf32>
    %292 = vector.extract_strided_slice %290 {offsets = [0, 0], sizes = [16, 256], strides = [1, 1]} : vector<16x384xf32> to vector<16x256xf32>
    %293 = arith.addf %291, %292 : vector<16x256xf32>
    %294 = vector.broadcast %9 : vector<1x256xf32> to vector<16x256xf32>
    %295 = arith.addf %293, %294 : vector<16x256xf32>
    %296 = arith.negf %295 : vector<16x256xf32>
    %297 = math.exp %296 : vector<16x256xf32>
    %cst_43 = arith.constant 1.000000e+00 : f32
    %298 = vector.broadcast %cst_43 : f32 to vector<16x256xf32>
    %299 = arith.addf %298, %297 : vector<16x256xf32>
    %300 = arith.divf %298, %299 : vector<16x256xf32>
    %301 = vector.extract_strided_slice %289 {offsets = [0, 256], sizes = [16, 128], strides = [1, 1]} : vector<16x384xf32> to vector<16x128xf32>
    %302 = vector.broadcast %10 : vector<1x128xf32> to vector<16x128xf32>
    %303 = arith.addf %301, %302 : vector<16x128xf32>
    %304 = vector.extract_strided_slice %300 {offsets = [0, 0], sizes = [16, 128], strides = [1, 1]} : vector<16x256xf32> to vector<16x128xf32>
    %305 = vector.extract_strided_slice %290 {offsets = [0, 256], sizes = [16, 128], strides = [1, 1]} : vector<16x384xf32> to vector<16x128xf32>
    %306 = vector.broadcast %11 : vector<1x128xf32> to vector<16x128xf32>
    %307 = arith.addf %305, %306 : vector<16x128xf32>
    %308 = arith.mulf %304, %307 : vector<16x128xf32>
    %309 = arith.addf %303, %308 : vector<16x128xf32>
    %310 = math.tanh %309 : vector<16x128xf32>
    %311 = vector.extract_strided_slice %300 {offsets = [0, 128], sizes = [16, 128], strides = [1, 1]} : vector<16x256xf32> to vector<16x128xf32>
    %312 = arith.subf %263, %310 : vector<16x128xf32>
    %313 = arith.mulf %311, %312 : vector<16x128xf32>
    %314 = arith.addf %310, %313 : vector<16x128xf32>
    %c96 = arith.constant 96 : index
    %c0_44 = arith.constant 0 : index
    %315 = vector.load %arg11[%c96, %c0_44] : memref<128x384xf32, #tpu.memory_space<vmem>>, vector<16x384xf32>
    %316 = vector.extract_strided_slice %315 {offsets = [0, 0], sizes = [16, 256], strides = [1, 1]} : vector<16x384xf32> to vector<16x256xf32>
    %317 = vector.extract_strided_slice %288 {offsets = [0, 0], sizes = [16, 256], strides = [1, 1]} : vector<16x384xf32> to vector<16x256xf32>
    %318 = arith.addf %316, %317 : vector<16x256xf32>
    %319 = arith.negf %318 : vector<16x256xf32>
    %320 = math.exp %319 : vector<16x256xf32>
    %cst_45 = arith.constant 1.000000e+00 : f32
    %321 = vector.broadcast %cst_45 : f32 to vector<16x256xf32>
    %322 = arith.addf %321, %320 : vector<16x256xf32>
    %323 = arith.divf %321, %322 : vector<16x256xf32>
    %324 = vector.extract_strided_slice %315 {offsets = [0, 256], sizes = [16, 128], strides = [1, 1]} : vector<16x384xf32> to vector<16x128xf32>
    %325 = vector.extract_strided_slice %323 {offsets = [0, 0], sizes = [16, 128], strides = [1, 1]} : vector<16x256xf32> to vector<16x128xf32>
    %326 = vector.extract_strided_slice %288 {offsets = [0, 256], sizes = [16, 128], strides = [1, 1]} : vector<16x384xf32> to vector<16x128xf32>
    %327 = vector.broadcast %8 : vector<1x128xf32> to vector<16x128xf32>
    %328 = arith.addf %326, %327 : vector<16x128xf32>
    %329 = arith.mulf %325, %328 : vector<16x128xf32>
    %330 = arith.addf %324, %329 : vector<16x128xf32>
    %331 = math.tanh %330 : vector<16x128xf32>
    %332 = vector.extract_strided_slice %323 {offsets = [0, 128], sizes = [16, 128], strides = [1, 1]} : vector<16x256xf32> to vector<16x128xf32>
    %333 = arith.subf %284, %331 : vector<16x128xf32>
    %334 = arith.mulf %332, %333 : vector<16x128xf32>
    %335 = arith.addf %331, %334 : vector<16x128xf32>
    %336 = tpu.concatenate %335, %314 in 1 : vector<16x128xf32>, vector<16x128xf32> -> vector<16x256xf32>
    %337 = arith.truncf %336 : vector<16x256xf32> to vector<16x256xbf16>
    %cst_46 = arith.constant dense<0.000000e+00> : vector<16x1152xf32>
    %338 = tpu.matmul %337, %7, %cst_46 {dimension_numbers = #tpu.dot_dimension_numbers<[1], [0], [0], [1], [0, 0, 1, 1], [], []>} : vector<16x256xbf16>, vector<256x1152xbf16>, vector<16x1152xf32> -> vector<16x1152xf32>
    %339 = vector.extract_strided_slice %338 {offsets = [0, 0], sizes = [16, 384], strides = [1, 1]} : vector<16x1152xf32> to vector<16x384xf32>
    %340 = vector.extract_strided_slice %338 {offsets = [0, 384], sizes = [16, 384], strides = [1, 1]} : vector<16x1152xf32> to vector<16x384xf32>
    %341 = vector.extract_strided_slice %338 {offsets = [0, 768], sizes = [16, 384], strides = [1, 1]} : vector<16x1152xf32> to vector<16x384xf32>
    %342 = vector.extract_strided_slice %340 {offsets = [0, 0], sizes = [16, 256], strides = [1, 1]} : vector<16x384xf32> to vector<16x256xf32>
    %343 = vector.extract_strided_slice %341 {offsets = [0, 0], sizes = [16, 256], strides = [1, 1]} : vector<16x384xf32> to vector<16x256xf32>
    %344 = arith.addf %342, %343 : vector<16x256xf32>
    %345 = vector.broadcast %9 : vector<1x256xf32> to vector<16x256xf32>
    %346 = arith.addf %344, %345 : vector<16x256xf32>
    %347 = arith.negf %346 : vector<16x256xf32>
    %348 = math.exp %347 : vector<16x256xf32>
    %cst_47 = arith.constant 1.000000e+00 : f32
    %349 = vector.broadcast %cst_47 : f32 to vector<16x256xf32>
    %350 = arith.addf %349, %348 : vector<16x256xf32>
    %351 = arith.divf %349, %350 : vector<16x256xf32>
    %352 = vector.extract_strided_slice %340 {offsets = [0, 256], sizes = [16, 128], strides = [1, 1]} : vector<16x384xf32> to vector<16x128xf32>
    %353 = vector.broadcast %10 : vector<1x128xf32> to vector<16x128xf32>
    %354 = arith.addf %352, %353 : vector<16x128xf32>
    %355 = vector.extract_strided_slice %351 {offsets = [0, 0], sizes = [16, 128], strides = [1, 1]} : vector<16x256xf32> to vector<16x128xf32>
    %356 = vector.extract_strided_slice %341 {offsets = [0, 256], sizes = [16, 128], strides = [1, 1]} : vector<16x384xf32> to vector<16x128xf32>
    %357 = vector.broadcast %11 : vector<1x128xf32> to vector<16x128xf32>
    %358 = arith.addf %356, %357 : vector<16x128xf32>
    %359 = arith.mulf %355, %358 : vector<16x128xf32>
    %360 = arith.addf %354, %359 : vector<16x128xf32>
    %361 = math.tanh %360 : vector<16x128xf32>
    %362 = vector.extract_strided_slice %351 {offsets = [0, 128], sizes = [16, 128], strides = [1, 1]} : vector<16x256xf32> to vector<16x128xf32>
    %363 = arith.subf %314, %361 : vector<16x128xf32>
    %364 = arith.mulf %362, %363 : vector<16x128xf32>
    %365 = arith.addf %361, %364 : vector<16x128xf32>
    %c112 = arith.constant 112 : index
    %c0_48 = arith.constant 0 : index
    %366 = vector.load %arg11[%c112, %c0_48] : memref<128x384xf32, #tpu.memory_space<vmem>>, vector<16x384xf32>
    %367 = vector.extract_strided_slice %366 {offsets = [0, 0], sizes = [16, 256], strides = [1, 1]} : vector<16x384xf32> to vector<16x256xf32>
    %368 = vector.extract_strided_slice %339 {offsets = [0, 0], sizes = [16, 256], strides = [1, 1]} : vector<16x384xf32> to vector<16x256xf32>
    %369 = arith.addf %367, %368 : vector<16x256xf32>
    %370 = arith.negf %369 : vector<16x256xf32>
    %371 = math.exp %370 : vector<16x256xf32>
    %cst_49 = arith.constant 1.000000e+00 : f32
    %372 = vector.broadcast %cst_49 : f32 to vector<16x256xf32>
    %373 = arith.addf %372, %371 : vector<16x256xf32>
    %374 = arith.divf %372, %373 : vector<16x256xf32>
    %375 = vector.extract_strided_slice %366 {offsets = [0, 256], sizes = [16, 128], strides = [1, 1]} : vector<16x384xf32> to vector<16x128xf32>
    %376 = vector.extract_strided_slice %374 {offsets = [0, 0], sizes = [16, 128], strides = [1, 1]} : vector<16x256xf32> to vector<16x128xf32>
    %377 = vector.extract_strided_slice %339 {offsets = [0, 256], sizes = [16, 128], strides = [1, 1]} : vector<16x384xf32> to vector<16x128xf32>
    %378 = vector.broadcast %8 : vector<1x128xf32> to vector<16x128xf32>
    %379 = arith.addf %377, %378 : vector<16x128xf32>
    %380 = arith.mulf %376, %379 : vector<16x128xf32>
    %381 = arith.addf %375, %380 : vector<16x128xf32>
    %382 = math.tanh %381 : vector<16x128xf32>
    %383 = vector.extract_strided_slice %374 {offsets = [0, 128], sizes = [16, 128], strides = [1, 1]} : vector<16x256xf32> to vector<16x128xf32>
    %384 = arith.subf %335, %382 : vector<16x128xf32>
    %385 = arith.mulf %383, %384 : vector<16x128xf32>
    %386 = arith.addf %382, %385 : vector<16x128xf32>
    %387 = tpu.concatenate %386, %365 in 1 : vector<16x128xf32>, vector<16x128xf32> -> vector<16x256xf32>
    %388 = arith.truncf %387 : vector<16x256xf32> to vector<16x256xbf16>
    %cst_50 = arith.constant dense<0.000000e+00> : vector<16x1152xf32>
    %389 = tpu.matmul %388, %7, %cst_50 {dimension_numbers = #tpu.dot_dimension_numbers<[1], [0], [0], [1], [0, 0, 1, 1], [], []>} : vector<16x256xbf16>, vector<256x1152xbf16>, vector<16x1152xf32> -> vector<16x1152xf32>
    %390 = vector.extract_strided_slice %389 {offsets = [0, 384], sizes = [16, 384], strides = [1, 1]} : vector<16x1152xf32> to vector<16x384xf32>
    %391 = vector.extract_strided_slice %389 {offsets = [0, 768], sizes = [16, 384], strides = [1, 1]} : vector<16x1152xf32> to vector<16x384xf32>
    %392 = vector.extract_strided_slice %390 {offsets = [0, 0], sizes = [16, 256], strides = [1, 1]} : vector<16x384xf32> to vector<16x256xf32>
    %393 = vector.extract_strided_slice %391 {offsets = [0, 0], sizes = [16, 256], strides = [1, 1]} : vector<16x384xf32> to vector<16x256xf32>
    %394 = arith.addf %392, %393 : vector<16x256xf32>
    %395 = vector.broadcast %9 : vector<1x256xf32> to vector<16x256xf32>
    %396 = arith.addf %394, %395 : vector<16x256xf32>
    %397 = arith.negf %396 : vector<16x256xf32>
    %398 = math.exp %397 : vector<16x256xf32>
    %cst_51 = arith.constant 1.000000e+00 : f32
    %399 = vector.broadcast %cst_51 : f32 to vector<16x256xf32>
    %400 = arith.addf %399, %398 : vector<16x256xf32>
    %401 = arith.divf %399, %400 : vector<16x256xf32>
    %402 = vector.extract_strided_slice %390 {offsets = [0, 256], sizes = [16, 128], strides = [1, 1]} : vector<16x384xf32> to vector<16x128xf32>
    %403 = vector.broadcast %10 : vector<1x128xf32> to vector<16x128xf32>
    %404 = arith.addf %402, %403 : vector<16x128xf32>
    %405 = vector.extract_strided_slice %401 {offsets = [0, 0], sizes = [16, 128], strides = [1, 1]} : vector<16x256xf32> to vector<16x128xf32>
    %406 = vector.extract_strided_slice %391 {offsets = [0, 256], sizes = [16, 128], strides = [1, 1]} : vector<16x384xf32> to vector<16x128xf32>
    %407 = vector.broadcast %11 : vector<1x128xf32> to vector<16x128xf32>
    %408 = arith.addf %406, %407 : vector<16x128xf32>
    %409 = arith.mulf %405, %408 : vector<16x128xf32>
    %410 = arith.addf %404, %409 : vector<16x128xf32>
    %411 = math.tanh %410 : vector<16x128xf32>
    %412 = vector.extract_strided_slice %401 {offsets = [0, 128], sizes = [16, 128], strides = [1, 1]} : vector<16x256xf32> to vector<16x128xf32>
    %413 = arith.subf %365, %411 : vector<16x128xf32>
    %414 = arith.mulf %412, %413 : vector<16x128xf32>
    %415 = arith.addf %411, %414 : vector<16x128xf32>
    %416 = arith.truncf %415 : vector<16x128xf32> to vector<16x128xbf16>
    %c0_52 = arith.constant 0 : index
    %c0_53 = arith.constant 0 : index
    %417 = vector.load %arg8[%c0_52, %c0_53] : memref<128x128xbf16, #tpu.memory_space<vmem>>, vector<128x128xbf16>
    %cst_54 = arith.constant dense<0.000000e+00> : vector<16x128xf32>
    %418 = tpu.matmul %416, %417, %cst_54 {dimension_numbers = #tpu.dot_dimension_numbers<[1], [0], [0], [1], [0, 0, 1, 1], [], []>} : vector<16x128xbf16>, vector<128x128xbf16>, vector<16x128xf32> -> vector<16x128xf32>
    %c0_55 = arith.constant 0 : index
    %c0_56 = arith.constant 0 : index
    %419 = vector.load %arg9[%c0_55, %c0_56] : memref<1x128xf32, #tpu.memory_space<vmem>>, vector<1x128xf32>
    %420 = vector.broadcast %419 : vector<1x128xf32> to vector<16x128xf32>
    %421 = arith.addf %418, %420 : vector<16x128xf32>
    %cst_57 = arith.constant dense<0xFF800000> : vector<16xf32>
    %422 = vector.multi_reduction <maximumf>, %421, %cst_57 [1] : vector<16x128xf32> to vector<16xf32>
    %423 = vector.shape_cast %422 : vector<16xf32> to vector<16x1xf32>
    %424 = vector.broadcast %423 : vector<16x1xf32> to vector<16x128xf32>
    %425 = arith.subf %421, %424 : vector<16x128xf32>
    %426 = math.exp %425 : vector<16x128xf32>
    %cst_58 = arith.constant dense<0.000000e+00> : vector<16xf32>
    %427 = vector.multi_reduction <add>, %426, %cst_58 [1] : vector<16x128xf32> to vector<16xf32>
    %428 = vector.shape_cast %427 : vector<16xf32> to vector<16x1xf32>
    %429 = math.log %428 : vector<16x1xf32>
    %430 = arith.addf %429, %423 : vector<16x1xf32>
    %431 = vector.broadcast %430 : vector<16x1xf32> to vector<16x128xf32>
    %432 = arith.subf %421, %431 : vector<16x128xf32>
    %c0_59 = arith.constant 0 : index
    %c0_60 = arith.constant 0 : index
    %433 = vector.load %arg10[%c0_59, %c0_60] : memref<16x128xf32, #tpu.memory_space<vmem>>, vector<16x128xf32>
    tpu.vector_store %arg10[%c0_59, %c0_60], %432 {strides = array<i32>} : memref<16x128xf32, #tpu.memory_space<vmem>>, vector<16x128xf32>,
    return
  }
}

</mosaic_0001>

<bundles_post_ra>
// kernel: moj_model_forward.1
= control target key start
LH: loop header
LB: loop body
LE: loop exit
PB: predicated region body
PF: predicated region fallthrough
CT: control target
= control target key end

     0   :  { %v5576_v1 = vmov 0   ;;  %vm5579_vm0 = vmmov 0   ;;  %s10231_s1 = inlined_call_operand.vmem [shape: bf16[128,384], index: 1, kind: input, shape index: {}]   ;;  %s10232_s0 = inlined_call_operand.vmem [shape: bf16[128,128], index: 0, kind: input, shape index: {}]   ;;  %s10233_s2 = inlined_call_operand.vmem [shape: bf16[256,1152], index: 2, kind: input, shape index: {}]   ;;  %s10234_s3 = inlined_call_operand.vmem [shape: f32[1,384], index: 3, kind: input, shape index: {}]   ;;  %s10235_s4 = inlined_call_operand.vmem [shape: f32[1,128], index: 4, kind: input, shape index: {}]   ;;  %s10236_s5 = inlined_call_operand.vmem [shape: f32[1,256], index: 5, kind: input, shape index: {}]   ;;  %s10237_s7 = inlined_call_operand.vmem [shape: f32[1,128], index: 7, kind: input, shape index: {}]   ;;  %s10238_s6 = inlined_call_operand.vmem [shape: f32[1,128], index: 6, kind: input, shape index: {}]   ;;  %s10239_s8 = inlined_call_operand.vmem [shape: bf16[128,128], index: 8, kind: input, shape index: {}]   ;;  %s10240_s9 = inlined_call_operand.vmem [shape: f32[1,128], index: 9, kind: input, shape index: {}]   ;;  %s10241_s10 = inlined_call_operand.vmem [shape: f32[16,128], index: 10, kind: output, shape index: {}]  }
   0x1   :  { %v4549_v0 = vld [vmem:[%s10231_s1 + $0xac] ss:$12 sps:$4 sm:$0xff]   ;;  %309 = vmatprep.mubr.bf16.mxu0 %v5576_v1  ;;  %v4551_v2 = vld [vmem:[%s10231_s1 + $0xa8] ss:$12 sps:$4 sm:$0xff]   ;;  %v4554_v4 = vld [vmem:[%s10231_s1 + $0x90] ss:$12 sps:$4 sm:$0xff]  }
   0x2   :  { %277 = vmatprep.subr.bf16.mxu0 %v4549_v0  ;;  %v4552_v3 = vld [vmem:[%s10231_s1 + $0x94] ss:$12 sps:$4 sm:$0xff]   ;;  %v4555_v5 = vld [vmem:[%s10231_s1 + $0x7c] ss:$12 sps:$4 sm:$0xff]   ;;  %v4557_v6 = vld [vmem:[%s10231_s1 + $0x78] ss:$12 sps:$4 sm:$0xff]  }
   0x3   :  { %278 = vmatpush1.bf16.msra.mxu0 %v4551_v2  ;;  %v4558_v7 = vld [vmem:[%s10231_s1 + $0x64] ss:$12 sps:$4 sm:$0xff]   ;;  %v4560_v9 = vld [vmem:[%s10231_s1 + $0x60] ss:$12 sps:$4 sm:$0xff]   ;;  %v4563_v14 = vld [vmem:[%s10231_s1 + $0x48] ss:$12 sps:$4 sm:$0xff]  }
   0x4   :  { %279 = vmatprep.subr.bf16.mxu0 %v4552_v3  ;;  %v4570_v8 = vld [vmem:[%s10231_s1 + $0xb0] ss:$12 sps:$4 sm:$0xff]   ;;  %v4561_v10 = vld [vmem:[%s10231_s1 + $0x4c] ss:$12 sps:$4 sm:$0xff]   ;;  %v4575_v12 = vld [vmem:[%s10232_s0] sm:$0xff]  }
   0x5   :  { %4493 = vmatprep.subr.bf16.mxu1 %v4570_v8  ;;  %v4574_v11 = vld [vmem:[%s10231_s1 + $0x98] ss:$12 sps:$4 sm:$0xff]   ;;  %v4576_v13 = vld [vmem:[%s10231_s1 + $0x80] ss:$12 sps:$4 sm:$0xff]   ;;  %4509 = vmatprep.mubr.bf16.mxu1 %v4575_v12  ;;  %v4577_v16 = vld [vmem:[%s10231_s1 + $0x68] ss:$12 sps:$4 sm:$0xff]  }
   0x6   :  { %4494 = vmatpush3.bf16.msra.mxu1 %v4570_v8  ;;  %v4564_v15 = vld [vmem:[%s10231_s1 + $0x34] ss:$12 sps:$4 sm:$0xff]   ;;  %v4566_v17 = vld [vmem:[%s10231_s1 + $0x30] ss:$12 sps:$4 sm:$0xff]   ;;  %v4569_v20 = vld [vmem:[%s10231_s1 + $0x18] ss:$12 sps:$4 sm:$0xff]  }
   0x7   :  { %280 = vmatpush1.bf16.msra.mxu0 %v4554_v4  ;;  %4495 = vmatprep.subr.bf16.mxu1 %v4574_v11  ;;  %v4567_v18 = vld [vmem:[%s10231_s1 + $0x1c] ss:$12 sps:$4 sm:$0xff]   ;;  %v4571_v21 = vld [vmem:[%s10231_s1 + $0x4] ss:$12 sps:$4 sm:$0xff]   ;;  %v4573_v23 = vld [vmem:[%s10231_s1] ss:$12 sps:$4 sm:$0xff]  }
   0x8   :  { %281 = vmatprep.subr.bf16.mxu0 %v4555_v5  ;;  %v4578_v19 = vld [vmem:[%s10231_s1 + $0x50] ss:$12 sps:$4 sm:$0xff]   ;;  %v4579_v22 = vld [vmem:[%s10231_s1 + $0x38] ss:$12 sps:$4 sm:$0xff]   ;;  %v4580_v25 = vld [vmem:[%s10231_s1 + $0x20] ss:$12 sps:$4 sm:$0xff]  }
   0x9   :  { %v4583_v24 = vld [vmem:[%s10233_s2 + $0x1fc] ss:$36 sps:$4 sm:$0xff]   ;;  %v4581_v27 = vld [vmem:[%s10231_s1 + $0x8] ss:$12 sps:$4 sm:$0xff]   ;;  %v5755_v35 = vld [vmem:[%s10233_s2 + $0x16c] ss:$36 sps:$4 sm:$0xff]  }
   0xa   :  { %4496 = vmatpush3.bf16.msra.mxu1 %v4574_v11  ;;  %v4587_v26 = vld [vmem:[%s10233_s2 + $0x1f8] ss:$36 sps:$4 sm:$0xff]   ;;  %v4585_v28 = vld [vmem:[%s10233_s2 + $0x204] ss:$36 sps:$4 sm:$0xff]   ;;  %v5741_v33 = vld [vmem:[%s10233_s2 + $0x1b0] ss:$36 sps:$4 sm:$0xff]  }
   0xb   :  { %282 = vmatpush1.bf16.msra.mxu0 %v4557_v6  ;;  %4497 = vmatprep.subr.bf16.mxu1 %v4576_v13  ;;  %v4582_v29 = vld [vmem:[%s10232_s0 + $0x8] sm:$0xff]   ;;  %v4588_v30 = vld [vmem:[%s10233_s2 + $0x200] ss:$36 sps:$4 sm:$0xff]   ;;  %v5731_v31 = vld [vmem:[%s10233_s2 + $0x1b4] ss:$36 sps:$4 sm:$0xff]  }
   0xc   :  { %283 = vmatprep.subr.bf16.mxu0 %v4558_v7  ;;  %v5736_v32 = vld [vmem:[%s10233_s2 + $0x1bc] ss:$36 sps:$4 sm:$0xff]   ;;  %v5760_v36 = vld [vmem:[%s10233_s2 + $0x174] ss:$36 sps:$4 sm:$0xff]   ;;  %v5765_v37 = vld [vmem:[%s10233_s2 + $0x168] ss:$36 sps:$4 sm:$0xff]  }
   0xd   :  { %v5746_v34 = vld [vmem:[%s10233_s2 + $0x1b8] ss:$36 sps:$4 sm:$0xff]   ;;  %v5770_v38 = vld [vmem:[%s10233_s2 + $0x170] ss:$36 sps:$4 sm:$0xff]   ;;  %v5782_v40 = vld [vmem:[%s10233_s2 + $0x124] ss:$36 sps:$4 sm:$0xff]  }
   0xe   :  { %4498 = vmatpush3.bf16.msra.mxu1 %v4576_v13  ;;  %v4601_v39 = vld [vmem:[%s10232_s0 + $0x10] sm:$0xff]   ;;  %v5792_v42 = vld [vmem:[%s10233_s2 + $0x120] ss:$36 sps:$4 sm:$0xff]   ;;  %v5797_v43 = vld [vmem:[%s10233_s2 + $0x128] ss:$36 sps:$4 sm:$0xff]  }
   0xf   :  { %284 = vmatpush1.bf16.msra.mxu0 %v4560_v9  ;;  %4499 = vmatprep.subr.bf16.mxu1 %v4577_v16  ;;  %v5787_v41 = vld [vmem:[%s10233_s2 + $0x12c] ss:$36 sps:$4 sm:$0xff]   ;;  %v5806_v44 = vld [vmem:[%s10233_s2 + $0xdc] ss:$36 sps:$4 sm:$0xff]   ;;  %v5811_v45 = vld [vmem:[%s10233_s2 + $0xe4] ss:$36 sps:$4 sm:$0xff]  }
  0x10   :  { %285 = vmatprep.subr.bf16.mxu0 %v4561_v10  ;;  %v5817_v46 = vld [vmem:[%s10233_s2 + $0xd8] ss:$36 sps:$4 sm:$0xff]   ;;  %v5822_v47 = vld [vmem:[%s10233_s2 + $0xe0] ss:$36 sps:$4 sm:$0xff]   ;;  %v5844_v51 = vld [vmem:[%s10233_s2 + $0x90] ss:$36 sps:$4 sm:$0xff]  }
  0x11   :  { %v4614_v48 = vld [vmem:[%s10232_s0 + $0x18] sm:$0xff]   ;;  %v5858_v53 = vld [vmem:[%s10233_s2 + $0x4c] ss:$36 sps:$4 sm:$0xff]   ;;  %v4627_v57 = vld [vmem:[%s10232_s0 + $0x20] sm:$0xff]  }
  0x12   :  { %4500 = vmatpush3.bf16.msra.mxu1 %v4577_v16  ;;  %v5834_v49 = vld [vmem:[%s10233_s2 + $0x94] ss:$36 sps:$4 sm:$0xff]   ;;  %v5839_v50 = vld [vmem:[%s10233_s2 + $0x9c] ss:$36 sps:$4 sm:$0xff]   ;;  %v5869_v55 = vld [vmem:[%s10233_s2 + $0x48] ss:$36 sps:$4 sm:$0xff]  }
  0x13   :  { %286 = vmatpush1.bf16.msra.mxu0 %v4563_v14  ;;  %4501 = vmatprep.subr.bf16.mxu1 %v4578_v19  ;;  %v5849_v52 = vld [vmem:[%s10233_s2 + $0x98] ss:$36 sps:$4 sm:$0xff]   ;;  %v5874_v56 = vld [vmem:[%s10233_s2 + $0x50] ss:$36 sps:$4 sm:$0xff]   ;;  %v5886_v58 = vld [vmem:[%s10233_s2 + $0x4] ss:$36 sps:$4 sm:$0xff]  }
  0x14   :  { %287 = vmatprep.subr.bf16.mxu0 %v4564_v15  ;;  %v5863_v54 = vld [vmem:[%s10233_s2 + $0x54] ss:$36 sps:$4 sm:$0xff]   ;;  %v5891_v59 = vld [vmem:[%s10233_s2 + $0xc] ss:$36 sps:$4 sm:$0xff]   ;;  %v5896_v60 = vld [vmem:[%s10233_s2] ss:$36 sps:$4 sm:$0xff]  }
  0x15   :  { %v5901_v61 = vld [vmem:[%s10233_s2 + $0x8] ss:$36 sps:$4 sm:$0xff]   ;;  %v5910_v62 = vld [vmem:[%s10233_s2 + $0x43c] ss:$36 sps:$4 sm:$0xff]   ;;  %v5938_v4 = vld [vmem:[%s10233_s2 + $0x3f4] ss:$36 sps:$4 sm:$0xff]  }
  0x16   :  { %4502 = vmatpush3.bf16.msra.mxu1 %v4578_v19  ;;  %v5915_v63 = vld [vmem:[%s10233_s2 + $0x444] ss:$36 sps:$4 sm:$0xff]   ;;  %v5921_v0 = vld [vmem:[%s10233_s2 + $0x438] ss:$36 sps:$4 sm:$0xff]   ;;  %v5948_v6 = vld [vmem:[%s10233_s2 + $0x3f0] ss:$36 sps:$4 sm:$0xff]  }
  0x17   :  { %288 = vmatpush1.bf16.msra.mxu0 %v4566_v17  ;;  %4503 = vmatprep.subr.bf16.mxu1 %v4579_v22  ;;  %v5926_v2 = vld [vmem:[%s10233_s2 + $0x440] ss:$36 sps:$4 sm:$0xff]   ;;  %v4640_v3 = vld [vmem:[%s10232_s0 + $0x28] sm:$0xff]   ;;  %v5953_v7 = vld [vmem:[%s10233_s2 + $0x3f8] ss:$36 sps:$4 sm:$0xff]  }
  0x18   :  { %289 = vmatprep.subr.bf16.mxu0 %v4567_v18  ;;  %10540 = vst [vmem:[#allocation3_spill] sm:$0xff] %v5926_v2  ;;  %v5943_v5 = vld [vmem:[%s10233_s2 + $0x3fc] ss:$36 sps:$4 sm:$0xff]   ;;  %10542 = vst [vmem:[#allocation5_spill] sm:$0xff] %v5953_v7  ;;  %v5962_v8 = vld [vmem:[%s10233_s2 + $0x3ac] ss:$36 sps:$4 sm:$0xff]  }
  0x19   :  { %10541 = vst [vmem:[#allocation4_spill] sm:$0xff] %v5943_v5  ;;  %v5967_v9 = vld [vmem:[%s10233_s2 + $0x3b4] ss:$36 sps:$4 sm:$0xff]   ;;  %v5973_v10 = vld [vmem:[%s10233_s2 + $0x3a8] ss:$36 sps:$4 sm:$0xff]  }
  0x1a   :  { %4504 = vmatpush3.bf16.msra.mxu1 %v4579_v22  ;;  %10543 = vst [vmem:[#allocation6_spill] sm:$0xff] %v5967_v9  ;;  %v5978_v11 = vld [vmem:[%s10233_s2 + $0x3b0] ss:$36 sps:$4 sm:$0xff]   ;;  %v5990_v13 = vld [vmem:[%s10233_s2 + $0x364] ss:$36 sps:$4 sm:$0xff]  }
  0x1b   :  { %290 = vmatpush1.bf16.msra.mxu0 %v4569_v20  ;;  %4505 = vmatprep.subr.bf16.mxu1 %v4580_v25  ;;  %10544 = vst [vmem:[#allocation7_spill] sm:$0xff] %v5978_v11  ;;  %v5995_v14 = vld [vmem:[%s10233_s2 + $0x36c] ss:$36 sps:$4 sm:$0xff]   ;;  %v6000_v15 = vld [vmem:[%s10233_s2 + $0x360] ss:$36 sps:$4 sm:$0xff]  }
  0x1c   :  { %291 = vmatprep.subr.bf16.mxu0 %v4571_v21  ;;  %10545 = vst [vmem:[#allocation8_spill] sm:$0xff] %v5995_v14  ;;  %v6005_v16 = vld [vmem:[%s10233_s2 + $0x368] ss:$36 sps:$4 sm:$0xff]   ;;  %v6014_v17 = vld [vmem:[%s10233_s2 + $0x31c] ss:$36 sps:$4 sm:$0xff]  }
  0x1d   :  { %10546 = vst [vmem:[#allocation9_spill] sm:$0xff] %v6005_v16  ;;  %v6019_v18 = vld [vmem:[%s10233_s2 + $0x324] ss:$36 sps:$4 sm:$0xff]   ;;  %v6025_v19 = vld [vmem:[%s10233_s2 + $0x318] ss:$36 sps:$4 sm:$0xff]  }
  0x1e   :  { %4506 = vmatpush3.bf16.msra.mxu1 %v4580_v25  ;;  %10547 = vst [vmem:[#allocation10_spill] sm:$0xff] %v6019_v18  ;;  %v6030_v20 = vld [vmem:[%s10233_s2 + $0x320] ss:$36 sps:$4 sm:$0xff]   ;;  %v4666_v21 = vld [vmem:[%s10232_s0 + $0x38] sm:$0xff]   ;;  %v6064_v25 = vld [vmem:[%s10233_s2 + $0x28c] ss:$36 sps:$4 sm:$0xff]  }
  0x1f   :  { %292 = vmatpush1.bf16.msra.mxu0 %v4573_v23  ;;  %4507 = vmatprep.subr.bf16.mxu1 %v4581_v27  ;;  %10548 = vst [vmem:[#allocation11_spill] sm:$0xff] %v6030_v20  ;;  %v6045_v22 = vld [vmem:[%s10233_s2 + $0x2dc] ss:$36 sps:$4 sm:$0xff]   ;;  %v6052_v23 = vld [vmem:[%s10233_s2 + $0x2d0] ss:$36 sps:$4 sm:$0xff]  }
  0x20   :  { %1483 = vmatprep.subr.bf16.mxu0 %v4583_v24  ;;  %10549 = vst [vmem:[#allocation12_spill] sm:$0xff] %v6045_v22  ;;  %v6057_v24 = vld [vmem:[%s10233_s2 + $0x2d8] ss:$36 sps:$4 sm:$0xff]  }
  0x21   :  { %10550 = vst [vmem:[#allocation13_spill] sm:$0xff] %v6057_v24 }
  0x22   :  { %310 = vmatmul.mubr.bf16.vlgmr.msra.gmra.mxu0 %v4575_v12  ;;  %4508 = vmatpush3.bf16.msra.mxu1 %v4581_v27  ;;  %v4653_v12 = vld [vmem:[%s10232_s0 + $0x30] sm:$0xff]   ;;  %v10242_v27 = vmov 0.0|0.0  }
  0x23   :  { %1484 = vmatpush1.bf16.msra.mxu0 %v4587_v26  ;;  %319 = vmatprep.mubr.bf16.mxu0 %v5576_v1  ;;  %v6069_v26 = vld [vmem:[%s10233_s2 + $0x294] ss:$36 sps:$4 sm:$0xff]  }
  0x24   :  { %1526 = vmatprep.subr.bf16.mxu1 %v4585_v28  ;;  %1485 = vmatprep.subr.bf16.mxu0 %v5731_v31  ;;  %10551 = vst [vmem:[#allocation14_spill] sm:$0xff] %v6069_v26  ;;  %v6078_v28 = vld [vmem:[%s10233_s2 + $0x288] ss:$36 sps:$4 sm:$0xff]  }
  0x25   :  { %4510 = vmatmul.mubr.bf16.vlgmr.msra.gmra.mxu1 %v4582_v29 }
  0x26   :  { %1527 = vmatpush1.bf16.msra.mxu1 %v4588_v30  ;;  %4513 = vmatprep.mubr.bf16.mxu1 %v4601_v39  ;;  %v6090_v30 = vld [vmem:[%s10233_s2 + $0x244] ss:$36 sps:$4 sm:$0xff]  }
  0x27   :  { %1528 = vmatprep.subr.bf16.mxu1 %v5736_v32  ;;  %1486 = vmatpush1.bf16.msra.mxu0 %v5741_v33 }
  0x28   :  { %1487 = vmatprep.subr.bf16.mxu0 %v5755_v35 }
  0x2a   :  { %320 = vmatmul.mubr.bf16.gmra.mxu0 %v4582_v29  ;;  %1529 = vmatpush1.bf16.msra.mxu1 %v5746_v34  ;;  %v6083_v29 = vld [vmem:[%s10233_s2 + $0x290] ss:$36 sps:$4 sm:$0xff]  }
  0x2b   :  { %329 = vmatprep.mubr.bf16.mxu0 %v5576_v1  ;;  %1530 = vmatprep.subr.bf16.mxu1 %v5760_v36  ;;  %10552 = vst [vmem:[#allocation15_spill] sm:$0xff] %v6083_v29 }
  0x2c   :  { %1488 = vmatpush1.bf16.msra.mxu0 %v5765_v37 }
  0x2d   :  { %1489 = vmatprep.subr.bf16.mxu0 %v5782_v40  ;;  %4514 = vmatmul.mubr.bf16.gmra.mxu1 %v4614_v48 }
  0x2e   :  { %1531 = vmatpush1.bf16.msra.mxu1 %v5770_v38  ;;  %4517 = vmatprep.mubr.bf16.mxu1 %v4627_v57 }
  0x2f   :  { %1532 = vmatprep.subr.bf16.mxu1 %v5787_v41 }
  0x30   :  { %1490 = vmatpush1.bf16.msra.mxu0 %v5792_v42 }
  0x31   :  { %1491 = vmatprep.subr.bf16.mxu0 %v5806_v44 }
  0x32   :  { %330 = vmatmul.mubr.bf16.gmra.mxu0 %v4601_v39  ;;  %1533 = vmatpush1.bf16.msra.mxu1 %v5797_v43  ;;  %v6095_v39 = vld [vmem:[%s10233_s2 + $0x24c] ss:$36 sps:$4 sm:$0xff]  }
  0x33   :  { %339 = vmatprep.mubr.bf16.mxu0 %v5576_v1  ;;  %1534 = vmatprep.subr.bf16.mxu1 %v5811_v45  ;;  %10553 = vst [vmem:[#allocation16_spill] sm:$0xff] %v6095_v39 }
  0x34   :  { %1492 = vmatpush1.bf16.msra.mxu0 %v5817_v46 }
  0x35   :  { %1493 = vmatprep.subr.bf16.mxu0 %v5834_v49  ;;  %4518 = vmatmul.mubr.bf16.gmra.mxu1 %v4640_v3 }
  0x36   :  { %1535 = vmatpush1.bf16.msra.mxu1 %v5822_v47  ;;  %4521 = vmatprep.mubr.bf16.mxu1 %v4653_v12 }
  0x37   :  { %1536 = vmatprep.subr.bf16.mxu1 %v5839_v50 }
  0x38   :  { %1494 = vmatpush1.bf16.msra.mxu0 %v5844_v51 }
  0x39   :  { %1495 = vmatprep.subr.bf16.mxu0 %v5858_v53 }
  0x3a   :  { %340 = vmatmul.mubr.bf16.gmra.mxu0 %v4614_v48  ;;  %1537 = vmatpush1.bf16.msra.mxu1 %v5849_v52  ;;  %v6102_v48 = vld [vmem:[%s10233_s2 + $0x240] ss:$36 sps:$4 sm:$0xff]  }
  0x3b   :  { %349 = vmatprep.mubr.bf16.mxu0 %v5576_v1  ;;  %1538 = vmatprep.subr.bf16.mxu1 %v5863_v54  ;;  %10554 = vst [vmem:[#allocation17_spill] sm:$0xff] %v6102_v48 }
  0x3c   :  { %1496 = vmatpush1.bf16.msra.mxu0 %v5869_v55 }
  0x3d   :  { %1497 = vmatprep.subr.bf16.mxu0 %v5886_v58  ;;  %4522 = vmatmul.mubr.bf16.gmra.mxu1 %v4666_v21 }
  0x3e   :  { %1539 = vmatpush1.bf16.msra.mxu1 %v5874_v56  ;;  %1558 = vmatprep.mubr.bf16.mxu1 %v10242_v27 }
  0x3f   :  { %1540 = vmatprep.subr.bf16.mxu1 %v5891_v59 }
  0x40   :  { %1498 = vmatpush1.bf16.msra.mxu0 %v5896_v60 }
  0x41   :  { %1499 = vmatprep.subr.bf16.mxu0 %v5910_v62 }
  0x42   :  { %350 = vmatmul.mubr.bf16.gmra.mxu0 %v4627_v57  ;;  %1541 = vmatpush1.bf16.msra.mxu1 %v5901_v61  ;;  %v6107_v57 = vld [vmem:[%s10233_s2 + $0x248] ss:$36 sps:$4 sm:$0xff]  }
  0x43   :  { %359 = vmatprep.mubr.bf16.mxu0 %v5576_v1  ;;  %1542 = vmatprep.subr.bf16.mxu1 %v5915_v63  ;;  %10555 = vst [vmem:[#allocation18_spill] sm:$0xff] %v6107_v57 }
  0x44   :  { %1500 = vmatpush2.bf16.msra.mxu0 %v5921_v0 }
  0x45   :  { %1501 = vmatprep.subr.bf16.mxu0 %v5938_v4 }
  0x46   :  { %1543 = vmatpush2.bf16.msra.mxu1 %v5926_v2 }
  0x47   :  { %1544 = vmatprep.subr.bf16.mxu1 %v5943_v5 }
  0x48   :  { %1502 = vmatpush2.bf16.msra.mxu0 %v5948_v6 }
  0x49   :  { %1503 = vmatprep.subr.bf16.mxu0 %v5962_v8 }
  0x4a   :  { %360 = vmatmul.mubr.bf16.gmra.mxu0 %v4640_v3  ;;  %1545 = vmatpush2.bf16.msra.mxu1 %v5953_v7  ;;  %v6114_v3 = vld [vmem:[%s10233_s2 + $0x20c] ss:$36 sps:$4 sm:$0xff]  }
  0x4b   :  { %369 = vmatprep.mubr.bf16.mxu0 %v5576_v1  ;;  %1546 = vmatprep.subr.bf16.mxu1 %v5967_v9  ;;  %10556 = vst [vmem:[#allocation19_spill] sm:$0xff] %v6114_v3 }
  0x4c   :  { %1504 = vmatpush2.bf16.msra.mxu0 %v5973_v10 }
  0x4d   :  { %1505 = vmatprep.subr.bf16.mxu0 %v5990_v13 }
  0x4e   :  { %1547 = vmatpush2.bf16.msra.mxu1 %v5978_v11 }
  0x4f   :  { %1548 = vmatprep.subr.bf16.mxu1 %v5995_v14 }
  0x50   :  { %1506 = vmatpush2.bf16.msra.mxu0 %v6000_v15 }
  0x51   :  { %1507 = vmatprep.subr.bf16.mxu0 %v6014_v17 }
  0x52   :  { %370 = vmatmul.mubr.bf16.gmra.mxu0 %v4653_v12  ;;  %1549 = vmatpush2.bf16.msra.mxu1 %v6005_v16  ;;  %v6119_v12 = vld [vmem:[%s10233_s2 + $0x214] ss:$36 sps:$4 sm:$0xff]  }
  0x53   :  { %379 = vmatprep.mubr.bf16.mxu0 %v5576_v1  ;;  %1550 = vmatprep.subr.bf16.mxu1 %v6019_v18  ;;  %v6040_v1 = vld [vmem:[%s10233_s2 + $0x2d4] ss:$36 sps:$4 sm:$0xff]   ;;  %10557 = vst [vmem:[#allocation20_spill] sm:$0xff] %v6119_v12 }
  0x54   :  { %1508 = vmatpush2.bf16.msra.mxu0 %v6025_v19 }
  0x55   :  { %1509 = vmatprep.subr.bf16.mxu0 %v6040_v1 }
  0x56   :  { %1551 = vmatpush2.bf16.msra.mxu1 %v6030_v20 }
  0x57   :  { %1552 = vmatprep.subr.bf16.mxu1 %v6045_v22 }
  0x58   :  { %1510 = vmatpush2.bf16.msra.mxu0 %v6052_v23 }
  0x59   :  { %1511 = vmatprep.subr.bf16.mxu0 %v6064_v25 }
  0x5a   :  { %380 = vmatmul.mubr.bf16.gmra.mxu0 %v4666_v21  ;;  %1553 = vmatpush2.bf16.msra.mxu1 %v6057_v24  ;;  %v86_v21 = vlaneseq }
  0x5b   :  { %1515 = vmatprep.mubr.bf16.mxu0 %v10242_v27  ;;  %1554 = vmatprep.subr.bf16.mxu1 %v6069_v26 }
  0x5c   :  { %1512 = vmatpush2.bf16.msra.mxu0 %v6078_v28  ;;  %v6125_v27 = vshrl.u32 %v86_v21, 7 }
  0x5d   :  { %1513 = vmatprep.subr.bf16.mxu0 %v6090_v30 }
  0x5e   :  { %1555 = vmatpush2.bf16.msra.mxu1 %v6083_v29  ;;  %10558 = vst [vmem:[#allocation21_spill] sm:$0xff] %v6125_v27  ;;  %v84_v29 = vld [vmem:[%s10234_s3] sm:$0x7]  ;;  %v10262_v22 = vsub.s32 1, %v6125_v27 }
  0x5f   :  { %1556 = vmatprep.subr.bf16.mxu1 %v6095_v39  ;;  %v10256_v39 = vsub.s32 0, %v6125_v27 }
  0x60   :  { %1514 = vmatpush2.bf16.msra.mxu0 %v6102_v48  ;;  %v6140_v16 = vrot.slane %v84_v29, %v10262_v22 }
  0x61   :  { %1569 = vmatprep.subr.bf16.mxu0 %v6114_v3  ;;  %v6133_v26 = vrot.slane %v84_v29, %v10256_v39 }
  0x62   :  { %1557 = vmatpush2.bf16.msra.mxu1 %v6107_v57  ;;  %10560 = vst [vmem:[#allocation23_spill] sm:$0xff] %v6140_v16 }
  0x63   :  { %1612 = vmatprep.subr.bf16.mxu1 %v6119_v12  ;;  %10559 = vst [vmem:[#allocation22_spill] sm:$0xff] %v6133_v26 }
  0xe2   :  { %v311_v24 = vpop.f32.mrf.mxu0 }
  0xe3   :  { %v312_v57 = vadd.f32 %v311_v24, %v6133_v26 }
  0xe4   :  { %v313_v20 = vpop.f32.mrf.mxu0 }
  0xe5   :  { %v4072_v12 = vmul.f32 -1.442695, %v312_v57  ;;  %v314_v39 = vadd.f32 %v313_v20, %v6140_v16 }
  0xe6   :  { %v315_v18 = vpop.f32.mrf.mxu0 }
  0xe7   :  { %4805 = vpow2.f32 %v4072_v12  ;;  %v316_v21 = vadd.f32 %v315_v18, %v6133_v26  ;;  %v4073_v24 = vmul.f32 -1.442695, %v314_v39  ;;  %v6144_v26 = vpop.f32.mrf.mxu1 }
  0xe8   :  { %v317_v11 = vpop.f32.mrf.mxu0  ;;  %10561 = vst [vmem:[#allocation24_spill] sm:$0xff] %v6144_v26 }
  0xe9   :  { %v4074_v14 = vmul.f32 -1.442695, %v316_v21  ;;  %v318_v9 = vadd.f32 %v317_v11, %v6140_v16  ;;  %v96_v21 = vsub.s32 2, %v6125_v27  ;;  %v424_v22 = vpop.f32.mrf.mxu1 }
  0xeb   :  { %4807 = vpow2.f32 %v4074_v14  ;;  %v4075_v7 = vmul.f32 -1.442695, %v318_v9  ;;  %v6147_v2 = vrot.slane %v84_v29, %v96_v21  ;;  %v6152_v9 = vld [vmem:[%s10235_s4] ss:$0 sm:$0xff] }
  0xec   :  { %4809 = vpow2.f32 %v4073_v24 }
  0xed   :  { %4811 = vpow2.f32 %v4075_v7  ;;  %10562 = vst [vmem:[#allocation25_spill] sm:$0xff] %v6147_v2  ;;  %v425_v24 = vadd.f32 %v424_v22, %v6147_v2 }
  0xf4   :  { %v4806_v5 = vpop.eup %4805 }
  0xf5   :  { %v717_v57 = vadd.f32 1.0, %v4806_v5  ;;  %v6154_v5 = vpop.f32.mrf.mxu1 }
  0xf6   :  { %10563 = vst [vmem:[#allocation26_spill] sm:$0xff] %v6154_v5 }
  0xf7   :  { %4813 = vrcp.f32 %v717_v57 }
  0xf8   :  { %v4808_v12 = vpop.eup %4807 }
  0xf9   :  { %v719_v18 = vadd.f32 1.0, %v4808_v12  ;;  %v4810_v14 = vpop.eup %4809  ;;  %v427_v12 = vpop.f32.mrf.mxu1 }
  0xfa   :  { %v4812_v20 = vpop.eup %4811  ;;  %v718_v11 = vadd.f32 1.0, %v4810_v14  ;;  %v428_v29 = vadd.f32 %v427_v12, %v6147_v2  ;;  %v10564_v12 = vmov 0.0|0.0  }
  0xfb   :  { %4815 = vrcp.f32 %v719_v18  ;;  %v720_v39 = vadd.f32 1.0, %v4812_v20 }
  0xfc   :  { %4817 = vrcp.f32 %v718_v11  ;;  %v6167_v11 = vld [vmem:[%s10233_s2 + $0x208] ss:$36 sps:$4 sm:$0xff]  }
  0xfd   :  { %4819 = vrcp.f32 %v720_v39  ;;  %v6200_v39 = vld [vmem:[%s10233_s2 + $0x1c8] ss:$36 sps:$4 sm:$0xff]  }
 0x104   :  { %v4814_v7 = vpop.eup %4813 }
 0x105   :  { %v735_v57 = vmul.f32 %v4814_v7, %v6152_v9 }
 0x107   :  { %v737_v18 = vadd.f32 %v735_v57, %v425_v24  ;;  %v6207_v24 = vld [vmem:[%s10233_s2 + $0x17c] ss:$36 sps:$4 sm:$0xff]   ;;  %v6212_v57 = vld [vmem:[%s10233_s2 + $0x184] ss:$36 sps:$4 sm:$0xff]  }
 0x108   :  { %v4816_v27 = vpop.eup %4815 }
 0x109   :  { %v736_v21 = vmul.f32 %v4816_v27, %v6152_v9  ;;  %4821 = vtanh.f32 %v737_v18  ;;  %v4818_v5 = vpop.eup %4817  ;;  %v6172_v27 = vld [vmem:[%s10233_s2 + $0x210] ss:$36 sps:$4 sm:$0xff]   ;;  %v6221_v18 = vld [vmem:[%s10233_s2 + $0x178] ss:$36 sps:$4 sm:$0xff]  }
 0x10a   :  { %v4820_v16 = vpop.eup %4819  ;;  %v741_v20 = vsub.f32 1.0, %v4818_v5  ;;  %v6195_v5 = vld [vmem:[%s10233_s2 + $0x1c0] ss:$36 sps:$4 sm:$0xff]   ;;  %10565 = vst [vmem:[#allocation27_spill] sm:$0xff] %v6221_v18 }
 0x10b   :  { %v738_v26 = vadd.f32 %v736_v21, %v428_v29  ;;  %v742_v3 = vsub.f32 1.0, %v4820_v16  ;;  %v6181_v16 = vld [vmem:[%s10233_s2 + $0x1c4] ss:$36 sps:$4 sm:$0xff]   ;;  %v6233_v21 = vld [vmem:[%s10233_s2 + $0x134] ss:$36 sps:$4 sm:$0xff]  }
 0x10c   :  { %v6226_v29 = vld [vmem:[%s10233_s2 + $0x180] ss:$36 sps:$4 sm:$0xff]   ;;  %10567 = vst [vmem:[#allocation29_spill] sm:$0xff] %v6233_v21 }
 0x10d   :  { %4823 = vtanh.f32 %v738_v26  ;;  %10566 = vst [vmem:[#allocation28_spill] sm:$0xff] %v6226_v29 }
 0x116   :  { %v4822_v14 = vpop.eup %4821 }
 0x117   :  { %v6160_v48 = vmul.f32 %v4822_v14, %v741_v20  ;;  %v6238_v14 = vld [vmem:[%s10233_s2 + $0x13c] ss:$36 sps:$4 sm:$0xff]   ;;  %v6245_v20 = vld [vmem:[%s10233_s2 + $0x130] ss:$36 sps:$4 sm:$0xff]  }
 0x118   :  { %10568 = vst [vmem:[#allocation30_spill] sm:$0xff] %v6238_v14  ;;  %10569 = vst [vmem:[#allocation31_spill] sm:$0xff] %v6245_v20 }
 0x11a   :  { %v4824_v22 = vpop.eup %4823 }
 0x11b   :  { %v6162_v7 = vmul.f32 %v4824_v22, %v742_v3  ;;  %v6186_v3 = vld [vmem:[%s10233_s2 + $0x1cc] ss:$36 sps:$4 sm:$0xff]   ;;  %v6250_v22 = vld [vmem:[%s10233_s2 + $0x138] ss:$36 sps:$4 sm:$0xff]  }
 0x11c   :  { %10570 = vst [vmem:[#allocation32_spill] sm:$0xff] %v6250_v22 }
 0x11d   :  { %v6176_v26 = vpack.c.bf16 %v6162_v7, %v6160_v48 }
 0x11f   :  { %1516 = vmatmul.mubr.bf16.vlgmr.msra.gmra.mxu0 %v6176_v26  ;;  %1559 = vmatmul.mubr.bf16.vlgmr.msra.gmra.mxu1 %v6176_v26 }
 0x120   :  { %1570 = vmatpush1.bf16.msra.mxu0 %v6167_v11  ;;  %1613 = vmatpush1.bf16.msra.mxu1 %v6172_v27 }
 0x121   :  { %1571 = vmatprep.subr.bf16.mxu0 %v6181_v16  ;;  %1614 = vmatprep.subr.bf16.mxu1 %v6186_v3 }
 0x122   :  { %1601 = vmatprep.mubr.bf16.mxu0 %v10564_v12  ;;  %1644 = vmatprep.mubr.bf16.mxu1 %v10564_v12 }
 0x124   :  { %1572 = vmatpush1.bf16.msra.mxu0 %v6195_v5  ;;  %1615 = vmatpush1.bf16.msra.mxu1 %v6200_v39 }
 0x125   :  { %1573 = vmatprep.subr.bf16.mxu0 %v6207_v24  ;;  %1616 = vmatprep.subr.bf16.mxu1 %v6212_v57 }
 0x128   :  { %1574 = vmatpush1.bf16.msra.mxu0 %v6221_v18  ;;  %1617 = vmatpush1.bf16.msra.mxu1 %v6226_v29  ;;  %v6257_v18 = vld [vmem:[%s10233_s2 + $0xec] ss:$36 sps:$4 sm:$0xff]   ;;  %v6262_v29 = vld [vmem:[%s10233_s2 + $0xf4] ss:$36 sps:$4 sm:$0xff]  }
 0x129   :  { %1575 = vmatprep.subr.bf16.mxu0 %v6233_v21  ;;  %1618 = vmatprep.subr.bf16.mxu1 %v6238_v14  ;;  %10571 = vst [vmem:[#allocation33_spill] sm:$0xff] %v6257_v18  ;;  %10572 = vst [vmem:[#allocation34_spill] sm:$0xff] %v6262_v29  ;;  %v6269_v21 = vld [vmem:[%s10233_s2 + $0xe8] ss:$36 sps:$4 sm:$0xff]   ;;  %v6274_v14 = vld [vmem:[%s10233_s2 + $0xf0] ss:$36 sps:$4 sm:$0xff]  }
 0x12a   :  { %10573 = vst [vmem:[#allocation35_spill] sm:$0xff] %v6269_v21  ;;  %10574 = vst [vmem:[#allocation36_spill] sm:$0xff] %v6274_v14 }
 0x12c   :  { %1576 = vmatpush1.bf16.msra.mxu0 %v6245_v20  ;;  %1619 = vmatpush1.bf16.msra.mxu1 %v6250_v22  ;;  %v6281_v20 = vld [vmem:[%s10233_s2 + $0xa4] ss:$36 sps:$4 sm:$0xff]   ;;  %v6286_v22 = vld [vmem:[%s10233_s2 + $0xac] ss:$36 sps:$4 sm:$0xff]  }
 0x12d   :  { %1577 = vmatprep.subr.bf16.mxu0 %v6257_v18  ;;  %1620 = vmatprep.subr.bf16.mxu1 %v6262_v29  ;;  %10575 = vst [vmem:[#allocation37_spill] sm:$0xff] %v6281_v20  ;;  %10576 = vst [vmem:[#allocation38_spill] sm:$0xff] %v6286_v22  ;;  %v6293_v18 = vld [vmem:[%s10233_s2 + $0xa0] ss:$36 sps:$4 sm:$0xff]   ;;  %v6298_v29 = vld [vmem:[%s10233_s2 + $0xa8] ss:$36 sps:$4 sm:$0xff]  }
 0x12e   :  { %10577 = vst [vmem:[#allocation39_spill] sm:$0xff] %v6293_v18  ;;  %10578 = vst [vmem:[#allocation40_spill] sm:$0xff] %v6298_v29 }
 0x130   :  { %1578 = vmatpush1.bf16.msra.mxu0 %v6269_v21  ;;  %1621 = vmatpush1.bf16.msra.mxu1 %v6274_v14  ;;  %v6305_v21 = vld [vmem:[%s10233_s2 + $0x5c] ss:$36 sps:$4 sm:$0xff]   ;;  %v6310_v14 = vld [vmem:[%s10233_s2 + $0x64] ss:$36 sps:$4 sm:$0xff]  }
 0x131   :  { %1579 = vmatprep.subr.bf16.mxu0 %v6281_v20  ;;  %1622 = vmatprep.subr.bf16.mxu1 %v6286_v22  ;;  %10579 = vst [vmem:[#allocation41_spill] sm:$0xff] %v6305_v21  ;;  %10580 = vst [vmem:[#allocation42_spill] sm:$0xff] %v6310_v14  ;;  %v6317_v20 = vld [vmem:[%s10233_s2 + $0x58] ss:$36 sps:$4 sm:$0xff]   ;;  %v6322_v22 = vld [vmem:[%s10233_s2 + $0x60] ss:$36 sps:$4 sm:$0xff]  }
 0x132   :  { %10581 = vst [vmem:[#allocation43_spill] sm:$0xff] %v6317_v20  ;;  %10582 = vst [vmem:[#allocation44_spill] sm:$0xff] %v6322_v22 }
 0x134   :  { %1580 = vmatpush1.bf16.msra.mxu0 %v6293_v18  ;;  %1623 = vmatpush1.bf16.msra.mxu1 %v6298_v29  ;;  %v6329_v18 = vld [vmem:[%s10233_s2 + $0x14] ss:$36 sps:$4 sm:$0xff]   ;;  %v6334_v29 = vld [vmem:[%s10233_s2 + $0x1c] ss:$36 sps:$4 sm:$0xff]  }
 0x135   :  { %1581 = vmatprep.subr.bf16.mxu0 %v6305_v21  ;;  %1624 = vmatprep.subr.bf16.mxu1 %v6310_v14  ;;  %10583 = vst [vmem:[#allocation45_spill] sm:$0xff] %v6329_v18  ;;  %10584 = vst [vmem:[#allocation46_spill] sm:$0xff] %v6334_v29  ;;  %v6341_v21 = vld [vmem:[%s10233_s2 + $0x10] ss:$36 sps:$4 sm:$0xff]   ;;  %v6346_v14 = vld [vmem:[%s10233_s2 + $0x18] ss:$36 sps:$4 sm:$0xff]  }
 0x136   :  { %10585 = vst [vmem:[#allocation47_spill] sm:$0xff] %v6341_v21  ;;  %10586 = vst [vmem:[#allocation48_spill] sm:$0xff] %v6346_v14 }
 0x138   :  { %1582 = vmatpush1.bf16.msra.mxu0 %v6317_v20  ;;  %1625 = vmatpush1.bf16.msra.mxu1 %v6322_v22  ;;  %v6353_v20 = vld [vmem:[%s10233_s2 + $0x44c] ss:$36 sps:$4 sm:$0xff]   ;;  %v6358_v22 = vld [vmem:[%s10233_s2 + $0x454] ss:$36 sps:$4 sm:$0xff]  }
 0x139   :  { %1583 = vmatprep.subr.bf16.mxu0 %v6329_v18  ;;  %1626 = vmatprep.subr.bf16.mxu1 %v6334_v29  ;;  %10587 = vst [vmem:[#allocation49_spill] sm:$0xff] %v6353_v20  ;;  %10588 = vst [vmem:[#allocation50_spill] sm:$0xff] %v6358_v22  ;;  %v6365_v18 = vld [vmem:[%s10233_s2 + $0x448] ss:$36 sps:$4 sm:$0xff]   ;;  %v6370_v29 = vld [vmem:[%s10233_s2 + $0x450] ss:$36 sps:$4 sm:$0xff]  }
 0x13a   :  { %10589 = vst [vmem:[#allocation51_spill] sm:$0xff] %v6365_v18  ;;  %10590 = vst [vmem:[#allocation52_spill] sm:$0xff] %v6370_v29 }
 0x13c   :  { %1584 = vmatpush1.bf16.msra.mxu0 %v6341_v21  ;;  %1627 = vmatpush1.bf16.msra.mxu1 %v6346_v14  ;;  %v6377_v21 = vld [vmem:[%s10233_s2 + $0x404] ss:$36 sps:$4 sm:$0xff]   ;;  %v6382_v14 = vld [vmem:[%s10233_s2 + $0x40c] ss:$36 sps:$4 sm:$0xff]  }
 0x13d   :  { %1585 = vmatprep.subr.bf16.mxu0 %v6353_v20  ;;  %1628 = vmatprep.subr.bf16.mxu1 %v6358_v22  ;;  %10591 = vst [vmem:[#allocation53_spill] sm:$0xff] %v6377_v21  ;;  %10592 = vst [vmem:[#allocation54_spill] sm:$0xff] %v6382_v14  ;;  %v6389_v20 = vld [vmem:[%s10233_s2 + $0x400] ss:$36 sps:$4 sm:$0xff]   ;;  %v6394_v22 = vld [vmem:[%s10233_s2 + $0x408] ss:$36 sps:$4 sm:$0xff]  }
 0x13e   :  { %10593 = vst [vmem:[#allocation55_spill] sm:$0xff] %v6389_v20  ;;  %10594 = vst [vmem:[#allocation56_spill] sm:$0xff] %v6394_v22 }
 0x140   :  { %1586 = vmatpush2.bf16.msra.mxu0 %v6365_v18  ;;  %1629 = vmatpush2.bf16.msra.mxu1 %v6370_v29  ;;  %v6401_v18 = vld [vmem:[%s10233_s2 + $0x3bc] ss:$36 sps:$4 sm:$0xff]   ;;  %v6406_v29 = vld [vmem:[%s10233_s2 + $0x3c4] ss:$36 sps:$4 sm:$0xff]  }
 0x141   :  { %1587 = vmatprep.subr.bf16.mxu0 %v6377_v21  ;;  %1630 = vmatprep.subr.bf16.mxu1 %v6382_v14  ;;  %10595 = vst [vmem:[#allocation57_spill] sm:$0xff] %v6401_v18  ;;  %10596 = vst [vmem:[#allocation58_spill] sm:$0xff] %v6406_v29  ;;  %v6413_v21 = vld [vmem:[%s10233_s2 + $0x3b8] ss:$36 sps:$4 sm:$0xff]   ;;  %v6418_v14 = vld [vmem:[%s10233_s2 + $0x3c0] ss:$36 sps:$4 sm:$0xff]  }
 0x142   :  { %10597 = vst [vmem:[#allocation59_spill] sm:$0xff] %v6413_v21  ;;  %10598 = vst [vmem:[#allocation60_spill] sm:$0xff] %v6418_v14 }
 0x144   :  { %1588 = vmatpush2.bf16.msra.mxu0 %v6389_v20  ;;  %1631 = vmatpush2.bf16.msra.mxu1 %v6394_v22  ;;  %v6425_v20 = vld [vmem:[%s10233_s2 + $0x374] ss:$36 sps:$4 sm:$0xff]   ;;  %v6430_v22 = vld [vmem:[%s10233_s2 + $0x37c] ss:$36 sps:$4 sm:$0xff]  }
 0x145   :  { %1589 = vmatprep.subr.bf16.mxu0 %v6401_v18  ;;  %1632 = vmatprep.subr.bf16.mxu1 %v6406_v29  ;;  %10599 = vst [vmem:[#allocation61_spill] sm:$0xff] %v6425_v20  ;;  %10600 = vst [vmem:[#allocation62_spill] sm:$0xff] %v6430_v22  ;;  %v6437_v18 = vld [vmem:[%s10233_s2 + $0x370] ss:$36 sps:$4 sm:$0xff]   ;;  %v6442_v29 = vld [vmem:[%s10233_s2 + $0x378] ss:$36 sps:$4 sm:$0xff]  }
 0x146   :  { %10601 = vst [vmem:[#allocation63_spill] sm:$0xff] %v6437_v18  ;;  %10602 = vst [vmem:[#allocation64_spill] sm:$0xff] %v6442_v29 }
 0x148   :  { %1590 = vmatpush2.bf16.msra.mxu0 %v6413_v21  ;;  %1633 = vmatpush2.bf16.msra.mxu1 %v6418_v14  ;;  %v6449_v21 = vld [vmem:[%s10233_s2 + $0x32c] ss:$36 sps:$4 sm:$0xff]   ;;  %v6454_v14 = vld [vmem:[%s10233_s2 + $0x334] ss:$36 sps:$4 sm:$0xff]  }
 0x149   :  { %1591 = vmatprep.subr.bf16.mxu0 %v6425_v20  ;;  %1634 = vmatprep.subr.bf16.mxu1 %v6430_v22  ;;  %10603 = vst [vmem:[#allocation65_spill] sm:$0xff] %v6449_v21  ;;  %10604 = vst [vmem:[#allocation66_spill] sm:$0xff] %v6454_v14  ;;  %v6461_v20 = vld [vmem:[%s10233_s2 + $0x328] ss:$36 sps:$4 sm:$0xff]   ;;  %v6466_v22 = vld [vmem:[%s10233_s2 + $0x330] ss:$36 sps:$4 sm:$0xff]  }
 0x14a   :  { %10605 = vst [vmem:[#allocation67_spill] sm:$0xff] %v6461_v20  ;;  %10606 = vst [vmem:[#allocation68_spill] sm:$0xff] %v6466_v22 }
 0x14c   :  { %1592 = vmatpush2.bf16.msra.mxu0 %v6437_v18  ;;  %1635 = vmatpush2.bf16.msra.mxu1 %v6442_v29  ;;  %v6473_v18 = vld [vmem:[%s10233_s2 + $0x2e4] ss:$36 sps:$4 sm:$0xff]   ;;  %v6478_v29 = vld [vmem:[%s10233_s2 + $0x2ec] ss:$36 sps:$4 sm:$0xff]  }
 0x14d   :  { %1593 = vmatprep.subr.bf16.mxu0 %v6449_v21  ;;  %1636 = vmatprep.subr.bf16.mxu1 %v6454_v14  ;;  %10607 = vst [vmem:[#allocation69_spill] sm:$0xff] %v6473_v18  ;;  %10608 = vst [vmem:[#allocation70_spill] sm:$0xff] %v6478_v29  ;;  %v6485_v21 = vld [vmem:[%s10233_s2 + $0x2e0] ss:$36 sps:$4 sm:$0xff]   ;;  %v6490_v14 = vld [vmem:[%s10233_s2 + $0x2e8] ss:$36 sps:$4 sm:$0xff]  }
 0x14e   :  { %10609 = vst [vmem:[#allocation71_spill] sm:$0xff] %v6485_v21  ;;  %10610 = vst [vmem:[#allocation72_spill] sm:$0xff] %v6490_v14 }
 0x150   :  { %1594 = vmatpush2.bf16.msra.mxu0 %v6461_v20  ;;  %1637 = vmatpush2.bf16.msra.mxu1 %v6466_v22  ;;  %v6497_v20 = vld [vmem:[%s10233_s2 + $0x29c] ss:$36 sps:$4 sm:$0xff]   ;;  %v6502_v22 = vld [vmem:[%s10233_s2 + $0x2a4] ss:$36 sps:$4 sm:$0xff]  }
 0x151   :  { %1595 = vmatprep.subr.bf16.mxu0 %v6473_v18  ;;  %1638 = vmatprep.subr.bf16.mxu1 %v6478_v29  ;;  %10611 = vst [vmem:[#allocation73_spill] sm:$0xff] %v6497_v20  ;;  %10612 = vst [vmem:[#allocation74_spill] sm:$0xff] %v6502_v22  ;;  %v6509_v18 = vld [vmem:[%s10233_s2 + $0x298] ss:$36 sps:$4 sm:$0xff]   ;;  %v6514_v29 = vld [vmem:[%s10233_s2 + $0x2a0] ss:$36 sps:$4 sm:$0xff]  }
 0x152   :  { %10613 = vst [vmem:[#allocation75_spill] sm:$0xff] %v6509_v18  ;;  %10614 = vst [vmem:[#allocation76_spill] sm:$0xff] %v6514_v29 }
 0x154   :  { %1596 = vmatpush2.bf16.msra.mxu0 %v6485_v21  ;;  %1639 = vmatpush2.bf16.msra.mxu1 %v6490_v14  ;;  %v6521_v21 = vld [vmem:[%s10233_s2 + $0x254] ss:$36 sps:$4 sm:$0xff]   ;;  %v6526_v14 = vld [vmem:[%s10233_s2 + $0x25c] ss:$36 sps:$4 sm:$0xff]  }
 0x155   :  { %1597 = vmatprep.subr.bf16.mxu0 %v6497_v20  ;;  %1640 = vmatprep.subr.bf16.mxu1 %v6502_v22  ;;  %10615 = vst [vmem:[#allocation77_spill] sm:$0xff] %v6521_v21  ;;  %10616 = vst [vmem:[#allocation78_spill] sm:$0xff] %v6526_v14  ;;  %v6533_v20 = vld [vmem:[%s10233_s2 + $0x250] ss:$36 sps:$4 sm:$0xff]   ;;  %v6538_v22 = vld [vmem:[%s10233_s2 + $0x258] ss:$36 sps:$4 sm:$0xff]  }
 0x156   :  { %10617 = vst [vmem:[#allocation79_spill] sm:$0xff] %v6538_v22 }
 0x158   :  { %1598 = vmatpush2.bf16.msra.mxu0 %v6509_v18  ;;  %1641 = vmatpush2.bf16.msra.mxu1 %v6514_v29  ;;  %v6545_v18 = vld [vmem:[%s10233_s2 + $0x458] ss:$36 sps:$4 sm:$0xff]  }
 0x159   :  { %1599 = vmatprep.subr.bf16.mxu0 %v6521_v21  ;;  %1642 = vmatprep.subr.bf16.mxu1 %v6526_v14  ;;  %10618 = vst [vmem:[#allocation80_spill] sm:$0xff] %v6545_v18  ;;  %v6552_v29 = vld [vmem:[%s10233_s2 + $0x218] ss:$36 sps:$4 sm:$0xff]   ;;  %v6558_v14 = vld [vmem:[%s10233_s2 + $0x410] ss:$36 sps:$4 sm:$0xff]  }
 0x15a   :  { %10619 = vst [vmem:[#allocation81_spill] sm:$0xff] %v6558_v14  ;;  %v6563_v21 = vld [vmem:[%s10233_s2 + $0x1fc] ss:$36 sps:$4 sm:$0xff]  }
 0x15b   :  { %10620 = vst [vmem:[#allocation82_spill] sm:$0xff] %v6563_v21 }
 0x15c   :  { %1600 = vmatpush2.bf16.msra.mxu0 %v6533_v20  ;;  %1643 = vmatpush2.bf16.msra.mxu1 %v6538_v22  ;;  %v6579_v22 = vld [vmem:[%s10233_s2 + $0x3c8] ss:$36 sps:$4 sm:$0xff]  }
 0x15d   :  { %4308 = vmatprep.subr.bf16.mxu0 %v6545_v18  ;;  %1817 = vmatprep.subr.bf16.mxu1 %v6563_v21  ;;  %v6572_v18 = vld [vmem:[%s10233_s2 + $0x1d0] ss:$36 sps:$4 sm:$0xff]   ;;  %10621 = vst [vmem:[#allocation83_spill] sm:$0xff] %v6579_v22  ;;  %v6584_v21 = vld [vmem:[%s10233_s2 + $0x1f8] ss:$36 sps:$4 sm:$0xff]  }
 0x15f   :  { %1602 = vmatmul.mubr.bf16.vlgmr.msra.gmra.mxu0 %v6176_v26  ;;  %1645 = vmatmul.mubr.bf16.vlgmr.msra.gmra.mxu1 %v6176_v26 }
 0x160   :  { %4309 = vmatpush3.bf16.msra.mxu0 %v6552_v29  ;;  %1687 = vmatprep.mubr.bf16.mxu0 %v10564_v12  ;;  %v6592_v12 = vld [vmem:[%s10233_s2 + $0x188] ss:$36 sps:$4 sm:$0xff]  }
 0x161   :  { %4310 = vmatprep.subr.bf16.mxu0 %v6558_v14  ;;  %1818 = vmatpush1.bf16.msra.mxu1 %v6584_v21  ;;  %v6598_v14 = vld [vmem:[%s10233_s2 + $0x380] ss:$36 sps:$4 sm:$0xff]  }
 0x162   :  { %1819 = vmatprep.subr.bf16.mxu1 %v5731_v31  ;;  %v6606_v31 = vld [vmem:[%s10233_s2 + $0x140] ss:$36 sps:$4 sm:$0xff]  }
 0x164   :  { %4311 = vmatpush3.bf16.msra.mxu0 %v6572_v18 }
 0x165   :  { %4312 = vmatprep.subr.bf16.mxu0 %v6579_v22  ;;  %1820 = vmatpush1.bf16.msra.mxu1 %v5741_v33  ;;  %v6612_v22 = vld [vmem:[%s10233_s2 + $0x338] ss:$36 sps:$4 sm:$0xff]  }
 0x166   :  { %1821 = vmatprep.subr.bf16.mxu1 %v5755_v35  ;;  %10622 = vst [vmem:[#allocation84_spill] sm:$0xff] %v6612_v22  ;;  %v6620_v33 = vld [vmem:[%s10233_s2 + $0xf8] ss:$36 sps:$4 sm:$0xff]   ;;  %v6626_v35 = vld [vmem:[%s10233_s2 + $0x2f0] ss:$36 sps:$4 sm:$0xff]  }
 0x167   :  { %10623 = vst [vmem:[#allocation85_spill] sm:$0xff] %v6626_v35 }
 0x168   :  { %4313 = vmatpush3.bf16.msra.mxu0 %v6592_v12 }
 0x169   :  { %4314 = vmatprep.subr.bf16.mxu0 %v6598_v14  ;;  %1822 = vmatpush1.bf16.msra.mxu1 %v5765_v37  ;;  %v6634_v37 = vld [vmem:[%s10233_s2 + $0xb0] ss:$36 sps:$4 sm:$0xff]  }
 0x16a   :  { %1823 = vmatprep.subr.bf16.mxu1 %v5782_v40  ;;  %v6640_v40 = vld [vmem:[%s10233_s2 + $0x2a8] ss:$36 sps:$4 sm:$0xff]  }
 0x16c   :  { %4315 = vmatpush3.bf16.msra.mxu0 %v6606_v31 }
 0x16d   :  { %4316 = vmatprep.subr.bf16.mxu0 %v6612_v22  ;;  %1824 = vmatpush1.bf16.msra.mxu1 %v5792_v42  ;;  %v6642_v22 = vpop.f32.mrf.mxu0  ;;  %v6650_v42 = vld [vmem:[%s10233_s2 + $0x68] ss:$36 sps:$4 sm:$0xff]  }
 0x16e   :  { %1825 = vmatprep.subr.bf16.mxu1 %v5806_v44  ;;  %v6656_v44 = vld [vmem:[%s10233_s2 + $0x260] ss:$36 sps:$4 sm:$0xff]  }
 0x170   :  { %4317 = vmatpush3.bf16.msra.mxu0 %v6620_v33 }
 0x171   :  { %4318 = vmatprep.subr.bf16.mxu0 %v6626_v35  ;;  %1826 = vmatpush1.bf16.msra.mxu1 %v5817_v46  ;;  %v6658_v35 = vpop.f32.mrf.mxu0  ;;  %v6666_v46 = vld [vmem:[%s10233_s2 + $0x20] ss:$36 sps:$4 sm:$0xff]  }
 0x172   :  { %1827 = vmatprep.subr.bf16.mxu1 %v5834_v49 }
 0x173   :  { %v6669_v49 = vpop.f32.mrf.mxu0 }
 0x174   :  { %4319 = vmatpush3.bf16.msra.mxu0 %v6634_v37 }
 0x175   :  { %4320 = vmatprep.subr.bf16.mxu0 %v6640_v40  ;;  %1828 = vmatpush1.bf16.msra.mxu1 %v5844_v51  ;;  %v6674_v51 = vpop.f32.mrf.mxu0 }
 0x176   :  { %1829 = vmatprep.subr.bf16.mxu1 %v5858_v53  ;;  %v6679_v53 = vld [vmem:[%s10233_s2 + $0x204] ss:$36 sps:$4 sm:$0xff]  }
 0x178   :  { %4321 = vmatpush3.bf16.msra.mxu0 %v6650_v42 }
 0x179   :  { %4322 = vmatprep.subr.bf16.mxu0 %v6656_v44  ;;  %1830 = vmatpush1.bf16.msra.mxu1 %v5869_v55  ;;  %v6688_v55 = vld [vmem:[%s10233_s2 + $0x200] ss:$36 sps:$4 sm:$0xff]  }
 0x17a   :  { %1831 = vmatprep.subr.bf16.mxu1 %v5886_v58  ;;  %v6691_v58 = vpop.f32.mrf.mxu0 }
 0x17c   :  { %4323 = vmatpush3.bf16.msra.mxu0 %v6666_v46 }
 0x17d   :  { %1860 = vmatprep.subr.bf16.mxu0 %v6679_v53  ;;  %1832 = vmatpush1.bf16.msra.mxu1 %v5896_v60  ;;  %v6697_v60 = vpop.f32.mrf.mxu0 }
 0x17e   :  { %1833 = vmatprep.subr.bf16.mxu1 %v5910_v62 }
 0x17f   :  { %1688 = vmatmul.mubr.bf16.vlgmr.msra.gmra.mxu0 %v6176_v26  ;;  %v6703_v62 = vpop.f32.mrf.mxu0 }
 0x180   :  { %1861 = vmatpush1.bf16.msra.mxu0 %v6688_v55 }
 0x181   :  { %1862 = vmatprep.subr.bf16.mxu0 %v5736_v32  ;;  %1834 = vmatpush2.bf16.msra.mxu1 %v5921_v0  ;;  %v6709_v32 = vpop.f32.mrf.mxu0 }
 0x182   :  { %1835 = vmatprep.subr.bf16.mxu1 %v5938_v4  ;;  %v10639_v4 = vld [vmem:[#allocation9_spill] sm:$0xff] }
 0x184   :  { %1863 = vmatpush1.bf16.msra.mxu0 %v5746_v34  ;;  %v6715_v34 = vpop.f32.mrf.mxu0 }
 0x185   :  { %1864 = vmatprep.subr.bf16.mxu0 %v5760_v36  ;;  %1836 = vmatpush2.bf16.msra.mxu1 %v5948_v6  ;;  %10624 = vst [vmem:[#allocation86_spill] sm:$0xff] %v6715_v34  ;;  %v7242_v34 = vld [vmem:[%s10233_s2 + $0x440] ss:$36 sps:$4 sm:$0xff]  }
 0x186   :  { %1837 = vmatprep.subr.bf16.mxu1 %v5962_v8  ;;  %v6721_v36 = vpop.f32.mrf.mxu0  ;;  %v10641_v8 = vld [vmem:[#allocation10_spill] sm:$0xff] }
 0x187   :  { %10625 = vst [vmem:[#allocation87_spill] sm:$0xff] %v6721_v36  ;;  %v7230_v36 = vld [vmem:[%s10233_s2 + $0x240] ss:$36 sps:$4 sm:$0xff]  }
 0x188   :  { %1865 = vmatpush1.bf16.msra.mxu0 %v5770_v38  ;;  %v6727_v38 = vpop.f32.mrf.mxu0 }
 0x189   :  { %1866 = vmatprep.subr.bf16.mxu0 %v5787_v41  ;;  %1838 = vmatpush2.bf16.msra.mxu1 %v5973_v10  ;;  %10626 = vst [vmem:[#allocation88_spill] sm:$0xff] %v6727_v38  ;;  %v10642_v10 = vld [vmem:[#allocation11_spill] sm:$0xff]  ;;  %v7236_v38 = vld [vmem:[%s10233_s2 + $0x20c] ss:$36 sps:$4 sm:$0xff]  }
 0x18a   :  { %1839 = vmatprep.subr.bf16.mxu1 %v5990_v13  ;;  %v6733_v41 = vpop.f32.mrf.mxu0 }
 0x18b   :  { %10627 = vst [vmem:[#allocation89_spill] sm:$0xff] %v6733_v41  ;;  %v7224_v41 = vld [vmem:[%s10233_s2 + $0x444] ss:$36 sps:$4 sm:$0xff]  }
 0x18c   :  { %1867 = vmatpush1.bf16.msra.mxu0 %v5797_v43  ;;  %v10628_v43 = vld [vmem:[#allocation17_spill] sm:$0xff] }
 0x18d   :  { %1868 = vmatprep.subr.bf16.mxu0 %v5811_v45  ;;  %1840 = vmatpush2.bf16.msra.mxu1 %v6000_v15  ;;  %v10629_v45 = vld [vmem:[#allocation19_spill] sm:$0xff]  ;;  %v10644_v15 = vld [vmem:[#allocation12_spill] sm:$0xff] }
 0x18e   :  { %1841 = vmatprep.subr.bf16.mxu1 %v6014_v17  ;;  %v10645_v17 = vld [vmem:[#allocation13_spill] sm:$0xff] }
 0x190   :  { %1869 = vmatpush1.bf16.msra.mxu0 %v5822_v47  ;;  %v10630_v47 = vld [vmem:[#allocation3_spill] sm:$0xff] }
 0x191   :  { %1870 = vmatprep.subr.bf16.mxu0 %v5839_v50  ;;  %1842 = vmatpush2.bf16.msra.mxu1 %v6025_v19  ;;  %v6739_v50 = vpop.f32.mrf.mxu0 }
 0x192   :  { %1843 = vmatprep.subr.bf16.mxu1 %v6040_v1  ;;  %10631 = vst [vmem:[#allocation17_spill] sm:$0xff] %v6739_v50  ;;  %v10647_v1 = vld [vmem:[#allocation14_spill] sm:$0xff] }
 0x194   :  { %1871 = vmatpush1.bf16.msra.mxu0 %v5849_v52  ;;  %v10632_v52 = vld [vmem:[#allocation4_spill] sm:$0xff] }
 0x195   :  { %1872 = vmatprep.subr.bf16.mxu0 %v5863_v54  ;;  %1844 = vmatpush2.bf16.msra.mxu1 %v6052_v23  ;;  %v10633_v54 = vld [vmem:[#allocation5_spill] sm:$0xff]  ;;  %v10648_v23 = vld [vmem:[#allocation15_spill] sm:$0xff] }
 0x196   :  { %1845 = vmatprep.subr.bf16.mxu1 %v6064_v25 }
 0x198   :  { %1873 = vmatpush1.bf16.msra.mxu0 %v5874_v56  ;;  %v6743_v56 = vpop.f32.mrf.mxu0 }
 0x199   :  { %1874 = vmatprep.subr.bf16.mxu0 %v5891_v59  ;;  %1846 = vmatpush2.bf16.msra.mxu1 %v6078_v28  ;;  %10634 = vst [vmem:[#allocation19_spill] sm:$0xff] %v6743_v56  ;;  %v10635_v59 = vld [vmem:[#allocation6_spill] sm:$0xff]  ;;  %v10650_v28 = vld [vmem:[#allocation16_spill] sm:$0xff] }
 0x19a   :  { %1847 = vmatprep.subr.bf16.mxu1 %v6090_v30  ;;  %v6747_v0 = vpop.f32.mrf.mxu0  ;;  %v10651_v30 = vld [vmem:[#allocation18_spill] sm:$0xff] }
 0x19b   :  { %10637 = vst [vmem:[#allocation3_spill] sm:$0xff] %v6747_v0 }
 0x19c   :  { %1875 = vmatpush1.bf16.msra.mxu0 %v5901_v61  ;;  %v10636_v61 = vld [vmem:[#allocation7_spill] sm:$0xff]  ;;  %v6751_v6 = vpop.f32.mrf.mxu0 }
 0x19d   :  { %1876 = vmatprep.subr.bf16.mxu0 %v5915_v63  ;;  %1848 = vmatpush2.bf16.msra.mxu1 %v10628_v43  ;;  %v10638_v63 = vld [vmem:[#allocation8_spill] sm:$0xff]  ;;  %10640 = vst [vmem:[#allocation4_spill] sm:$0xff] %v6751_v6 }
 0x19e   :  { %1903 = vmatprep.subr.bf16.mxu1 %v10629_v45  ;;  %v6755_v13 = vpop.f32.mrf.mxu0  ;;  %v10653_v43 = vld [vmem:[#allocation20_spill] sm:$0xff] }
 0x19f   :  { %10643 = vst [vmem:[#allocation5_spill] sm:$0xff] %v6755_v13 }
 0x1a0   :  { %1877 = vmatpush2.bf16.msra.mxu0 %v10630_v47  ;;  %v6759_v19 = vpop.f32.mrf.mxu0 }
 0x1a1   :  { %1878 = vmatprep.subr.bf16.mxu0 %v10632_v52  ;;  %10646 = vst [vmem:[#allocation6_spill] sm:$0xff] %v6759_v19 }
 0x1a2   :  { %v6763_v25 = vpop.f32.mrf.mxu0 }
 0x1a3   :  { %10649 = vst [vmem:[#allocation7_spill] sm:$0xff] %v6763_v25 }
 0x1a4   :  { %1879 = vmatpush2.bf16.msra.mxu0 %v10633_v54  ;;  %v6767_v26 = vpop.f32.mrf.mxu0  ;;  %v6776_v54 = vpop.f32.mrf.mxu1 }
 0x1a5   :  { %1880 = vmatprep.subr.bf16.mxu0 %v10635_v59  ;;  %10652 = vst [vmem:[#allocation8_spill] sm:$0xff] %v6767_v26  ;;  %10657 = vst [vmem:[#allocation12_spill] sm:$0xff] %v6776_v54  ;;  %v7218_v54 = vld [vmem:[%s10233_s2 + $0x8] ss:$36 sps:$4 sm:$0xff]  }
 0x1a6   :  { %v6770_v45 = vpop.f32.mrf.mxu0 }
 0x1a7   :  { %10654 = vst [vmem:[#allocation9_spill] sm:$0xff] %v6770_v45 }
 0x1a8   :  { %1881 = vmatpush2.bf16.msra.mxu0 %v10636_v61  ;;  %v6772_v47 = vpop.f32.mrf.mxu0  ;;  %v6780_v61 = vpop.f32.mrf.mxu1 }
 0x1a9   :  { %1882 = vmatprep.subr.bf16.mxu0 %v10638_v63  ;;  %10655 = vst [vmem:[#allocation10_spill] sm:$0xff] %v6772_v47 }
 0x1aa   :  { %v6774_v52 = vpop.f32.mrf.mxu0 }
 0x1ab   :  { %10656 = vst [vmem:[#allocation11_spill] sm:$0xff] %v6774_v52 }
 0x1ac   :  { %1883 = vmatpush2.bf16.msra.mxu0 %v10639_v4  ;;  %v6778_v59 = vpop.f32.mrf.mxu0  ;;  %v6784_v4 = vpop.f32.mrf.mxu1 }
 0x1ad   :  { %1884 = vmatprep.subr.bf16.mxu0 %v10641_v8  ;;  %10658 = vst [vmem:[#allocation13_spill] sm:$0xff] %v6778_v59  ;;  %10660 = vst [vmem:[#allocation15_spill] sm:$0xff] %v6784_v4 }
 0x1ae   :  { %v6782_v63 = vpop.f32.mrf.mxu0 }
 0x1af   :  { %10659 = vst [vmem:[#allocation14_spill] sm:$0xff] %v6782_v63 }
 0x1b0   :  { %1885 = vmatpush2.bf16.msra.mxu0 %v10642_v10  ;;  %v6786_v8 = vpop.f32.mrf.mxu0  ;;  %v6788_v10 = vpop.f32.mrf.mxu1 }
 0x1b1   :  { %1886 = vmatprep.subr.bf16.mxu0 %v10644_v15  ;;  %10661 = vst [vmem:[#allocation16_spill] sm:$0xff] %v6786_v8 }
 0x1b2   :  { %v6790_v15 = vpop.f32.mrf.mxu0 }
 0x1b3   :  { %10662 = vst [vmem:[#allocation18_spill] sm:$0xff] %v6790_v15 }
 0x1b4   :  { %1887 = vmatpush2.bf16.msra.mxu0 %v10645_v17  ;;  %v6792_v17 = vpop.f32.mrf.mxu1 }
 0x1b5   :  { %1888 = vmatprep.subr.bf16.mxu0 %v10647_v1  ;;  %10663 = vst [vmem:[#allocation20_spill] sm:$0xff] %v6792_v17  ;;  %v6794_v1 = vpop.f32.mrf.mxu0 }
 0x1b6   :  { %10664 = vst [vmem:[#allocation90_spill] sm:$0xff] %v6794_v1  ;;  %v10669_v1 = vld [vmem:[#allocation23_spill] sm:$0xff] }
 0x1b8   :  { %1889 = vmatpush2.bf16.msra.mxu0 %v10648_v23  ;;  %v10665_v23 = vld [vmem:[#allocation22_spill] sm:$0xff] }
 0x1b9   :  { %1890 = vmatprep.subr.bf16.mxu0 %v10650_v28  ;;  %v322_v28 = vadd.f32 %v6642_v22, %v10665_v23  ;;  %v326_v47 = vadd.f32 %v6669_v49, %v10665_v23  ;;  %v324_v22 = vadd.f32 %v6658_v35, %v10669_v1  ;;  %v328_v49 = vadd.f32 %v6674_v51, %v10669_v1 }
 0x1bc   :  { %1891 = vmatpush2.bf16.msra.mxu0 %v10651_v30  ;;  %v6798_v30 = vpop.f32.mrf.mxu1 }
 0x1bd   :  { %1946 = vmatprep.subr.bf16.mxu0 %v10653_v43  ;;  %10666 = vst [vmem:[#allocation91_spill] sm:$0xff] %v6798_v30 }
 0x1be   :  { %v6802_v52 = vpop.f32.mrf.mxu1 }
 0x1bf   :  { %10667 = vst [vmem:[#allocation92_spill] sm:$0xff] %v6802_v52 }
 0x1c0   :  { %v6804_v26 = vpop.f32.mrf.mxu1 }
 0x1c1   :  { %10668 = vst [vmem:[#allocation93_spill] sm:$0xff] %v6804_v26 }
 0x1c2   :  { %v6808_v19 = vpop.f32.mrf.mxu1 }
 0x1c3   :  { %10670 = vst [vmem:[#allocation94_spill] sm:$0xff] %v6808_v19 }
 0x1df   :  { %v1517_v43 = vpop.f32.mrf.mxu0 }
 0x1e0   :  { %v1773_v59 = vadd.f32 %v1517_v43, %v322_v28 }
 0x1e1   :  { %v1519_v63 = vpop.f32.mrf.mxu0 }
 0x1e2   :  { %v4227_v8 = vmul.f32 -1.442695, %v1773_v59  ;;  %v1774_v28 = vadd.f32 %v1519_v63, %v324_v22  ;;  %v6812_v59 = vpop.f32.mrf.mxu1 }
 0x1e3   :  { %v1521_v45 = vpop.f32.mrf.mxu0  ;;  %10671 = vst [vmem:[#allocation95_spill] sm:$0xff] %v6812_v59 }
 0x1e4   :  { %4825 = vpow2.f32 %v4227_v8  ;;  %v1775_v15 = vadd.f32 %v1521_v45, %v326_v47  ;;  %v4228_v52 = vmul.f32 -1.442695, %v1774_v28  ;;  %v6814_v47 = vpop.f32.mrf.mxu1 }
 0x1e5   :  { %v1523_v43 = vpop.f32.mrf.mxu0  ;;  %10672 = vst [vmem:[#allocation96_spill] sm:$0xff] %v6814_v47 }
 0x1e6   :  { %v4229_v17 = vmul.f32 -1.442695, %v1775_v15  ;;  %v1776_v25 = vadd.f32 %v1523_v43, %v328_v49  ;;  %v6816_v13 = vpop.f32.mrf.mxu1  ;;  %v10674_v49 = vld [vmem:[#allocation24_spill] sm:$0xff] }
 0x1e7   :  { %10673 = vst [vmem:[#allocation97_spill] sm:$0xff] %v6816_v13 }
 0x1e8   :  { %4827 = vpow2.f32 %v4229_v17  ;;  %v4230_v15 = vmul.f32 -1.442695, %v1776_v25  ;;  %v1560_v63 = vpop.f32.mrf.mxu1 }
 0x1e9   :  { %4829 = vpow2.f32 %v4228_v52  ;;  %v1801_v19 = vadd.f32 %v6152_v9, %v1560_v63 }
 0x1ea   :  { %v1562_v22 = vpop.f32.mrf.mxu1 }
 0x1ec   :  { %v1564_v43 = vpop.f32.mrf.mxu1 }
 0x1f1   :  { %v4826_v8 = vpop.eup %4825 }
 0x1f2   :  { %v1789_v45 = vadd.f32 1.0, %v4826_v8  ;;  %v433_v8 = vadd.f32 %v10674_v49, %v6147_v2 }
 0x1f4   :  { %4831 = vrcp.f32 %v1789_v45 }
 0x1f5   :  { %v4828_v17 = vpop.eup %4827  ;;  %4833 = vpow2.f32 %v4230_v15  ;;  %v10675_v15 = vld [vmem:[#allocation26_spill] sm:$0xff] }
 0x1f6   :  { %v1791_v35 = vadd.f32 1.0, %v4828_v17  ;;  %v4830_v51 = vpop.eup %4829  ;;  %v1802_v17 = vadd.f32 %v6152_v9, %v1564_v43 }
 0x1f7   :  { %v1790_v45 = vadd.f32 1.0, %v4830_v51 }
 0x1f8   :  { %4835 = vrcp.f32 %v1791_v35  ;;  %v436_v35 = vadd.f32 %v10675_v15, %v6147_v2 }
 0x201   :  { %v4832_v28 = vpop.eup %4831 }
 0x202   :  { %v1803_v47 = vmul.f32 %v4832_v28, %v1801_v19  ;;  %v4834_v52 = vpop.eup %4833 }
 0x203   :  { %v1792_v63 = vadd.f32 1.0, %v4834_v52  ;;  %v10676_v52 = vld [vmem:[#allocation21_spill] sm:$0xff] }
 0x204   :  { %v1805_v25 = vadd.f32 %v1803_v47, %v433_v8 }
 0x205   :  { %v4836_v59 = vpop.eup %4835 }
 0x206   :  { %4837 = vtanh.f32 %v1805_v25  ;;  %v1804_v13 = vmul.f32 %v4836_v59, %v1802_v17  ;;  %v696_v59 = vld [vmem:[%s10236_s5] sm:$0x3]  ;;  %v10677_v25 = vsub.s32 0, %v10676_v52 }
 0x207   :  { %4839 = vrcp.f32 %v1790_v45 }
 0x208   :  { %v1806_v26 = vadd.f32 %v1804_v13, %v436_v35  ;;  %v6835_v45 = vrot.slane %v696_v59, %v10677_v25 }
 0x20a   :  { %4841 = vtanh.f32 %v1806_v26  ;;  %v1566_v26 = vpop.f32.mrf.mxu1  ;;  %10678 = vst [vmem:[#allocation24_spill] sm:$0xff] %v6835_v45 }
 0x20b   :  { %4843 = vrcp.f32 %v1792_v63 }
 0x213   :  { %v4838_v30 = vpop.eup %4837 }
 0x214   :  { %v1809_v49 = vsub.f32 %v6160_v48, %v4838_v30  ;;  %v4840_v19 = vpop.eup %4839 }
 0x216   :  { %v1811_v28 = vmul.f32 %v4840_v19, %v1809_v49 }
 0x217   :  { %v4842_v47 = vpop.eup %4841 }
 0x218   :  { %v1810_v51 = vsub.f32 %v6162_v7, %v4842_v47  ;;  %v6826_v9 = vadd.f32 %v4838_v30, %v1811_v28  ;;  %v4844_v43 = vpop.eup %4843 }
 0x21a   :  { %v1812_v8 = vmul.f32 %v4844_v43, %v1810_v51 }
 0x21c   :  { %v6831_v13 = vadd.f32 %v4842_v47, %v1812_v8  ;;  %v10679_v8 = vsub.s32 1, %v10676_v52 }
 0x21e   :  { %v6841_v25 = vrot.slane %v696_v59, %v10679_v8  ;;  %v6848_v59 = vld [vmem:[%s10237_s7] ss:$0 sm:$0xff] }
 0x21f   :  { %v1646_v48 = vpop.f32.mrf.mxu1  ;;  %v1603_v49 = vpop.f32.mrf.mxu0 }
 0x220   :  { %v1696_v17 = vadd.f32 %v1646_v48, %v1562_v22  ;;  %10680 = vst [vmem:[#allocation26_spill] sm:$0xff] %v6841_v25 }
 0x221   :  { %v1648_v15 = vpop.f32.mrf.mxu1  ;;  %v1605_v47 = vpop.f32.mrf.mxu0 }
 0x222   :  { %v1711_v7 = vadd.f32 %v6835_v45, %v1696_v17  ;;  %v1697_v43 = vadd.f32 %v1648_v15, %v1603_v49 }
 0x223   :  { %v1650_v30 = vpop.f32.mrf.mxu1  ;;  %v1607_v22 = vpop.f32.mrf.mxu0 }
 0x224   :  { %v4221_v35 = vmul.f32 -1.442695, %v1711_v7  ;;  %v1698_v63 = vadd.f32 %v1650_v30, %v1566_v26  ;;  %v1712_v17 = vadd.f32 %v6841_v25, %v1697_v43 }
 0x225   :  { %v1652_v51 = vpop.f32.mrf.mxu1  ;;  %v1609_v15 = vpop.f32.mrf.mxu0 }
 0x226   :  { %4845 = vpow2.f32 %v4221_v35  ;;  %v1713_v19 = vadd.f32 %v6835_v45, %v1698_v63  ;;  %v1699_v48 = vadd.f32 %v1652_v51, %v1607_v22  ;;  %v4222_v30 = vmul.f32 -1.442695, %v1712_v17 }
 0x228   :  { %v4223_v28 = vmul.f32 -1.442695, %v1713_v19  ;;  %v1714_v26 = vadd.f32 %v6841_v25, %v1699_v48 }
 0x22a   :  { %4847 = vpow2.f32 %v4223_v28  ;;  %v4224_v63 = vmul.f32 -1.442695, %v1714_v26 }
 0x233   :  { %v4846_v6 = vpop.eup %4845 }
 0x234   :  { %v1727_v7 = vadd.f32 1.0, %v4846_v6  ;;  %v6853_v6 = vld [vmem:[%s10238_s6] ss:$0 sm:$0xff] }
 0x235   :  { %v1745_v17 = vadd.f32 %v6853_v6, %v1605_v47 }
 0x236   :  { %4849 = vrcp.f32 %v1727_v7 }
 0x237   :  { %v4848_v35 = vpop.eup %4847  ;;  %4851 = vpow2.f32 %v4222_v30 }
 0x238   :  { %v1729_v19 = vadd.f32 1.0, %v4848_v35  ;;  %4853 = vpow2.f32 %v4224_v63 }
 0x23a   :  { %4855 = vrcp.f32 %v1729_v19 }
 0x23f   :  { %v4324_v52 = vpop.f32.mrf.mxu0 }
 0x241   :  { %v4325_v49 = vpop.f32.mrf.mxu0 }
 0x242   :  { %v4326_v28 = vadd.f32 %v4325_v49, %v4324_v52  ;;  %v1746_v49 = vadd.f32 %v6853_v6, %v1609_v15 }
 0x243   :  { %v4327_v51 = vpop.f32.mrf.mxu0  ;;  %v4850_v8 = vpop.eup %4849 }
 0x244   :  { %v1753_v43 = vadd.f32 %v4326_v28, %v6848_v59  ;;  %v4852_v48 = vpop.eup %4851 }
 0x245   :  { %v4328_v22 = vpop.f32.mrf.mxu0  ;;  %v4854_v30 = vpop.eup %4853  ;;  %v1728_v52 = vadd.f32 1.0, %v4852_v48 }
 0x246   :  { %v1755_v26 = vmul.f32 %v4850_v8, %v1753_v43  ;;  %v4329_v7 = vadd.f32 %v4328_v22, %v4327_v51  ;;  %v1730_v0 = vadd.f32 1.0, %v4854_v30  ;;  %v10693_v30 = vld [vmem:[#allocation39_spill] sm:$0xff] }
 0x247   :  { %v4856_v19 = vpop.eup %4855  ;;  %10753 = vst [vmem:[#allocation39_spill] sm:$0xff] %v7242_v34 }
 0x248   :  { %v1757_v35 = vadd.f32 %v1755_v26, %v1745_v17  ;;  %v1754_v63 = vadd.f32 %v4329_v7, %v6848_v59  ;;  %v10692_v7 = vld [vmem:[#allocation38_spill] sm:$0xff] }
 0x249   :  { %10752 = vst [vmem:[#allocation38_spill] sm:$0xff] %v7236_v38 }
 0x24a   :  { %4857 = vtanh.f32 %v1757_v35  ;;  %v1756_v56 = vmul.f32 %v4856_v19, %v1754_v63  ;;  %v10694_v35 = vld [vmem:[#allocation40_spill] sm:$0xff]  ;;  %v10695_v63 = vld [vmem:[#allocation41_spill] sm:$0xff]  ;;  %v10696_v19 = vld [vmem:[#allocation42_spill] sm:$0xff] }
 0x24b   :  { %4859 = vrcp.f32 %v1728_v52  ;;  %v10697_v52 = vld [vmem:[#allocation43_spill] sm:$0xff] }
 0x24c   :  { %v1758_v50 = vadd.f32 %v1756_v56, %v1746_v49  ;;  %v10681_v56 = vld [vmem:[#allocation27_spill] sm:$0xff]  ;;  %v10698_v49 = vld [vmem:[#allocation44_spill] sm:$0xff] }
 0x24e   :  { %4861 = vtanh.f32 %v1758_v50  ;;  %v6869_v50 = vpack.c.bf16 %v6831_v13, %v6826_v9 }
 0x24f   :  { %4863 = vrcp.f32 %v1730_v0  ;;  %v10684_v0 = vld [vmem:[#allocation30_spill] sm:$0xff] }
 0x257   :  { %v4858_v28 = vpop.eup %4857 }
 0x258   :  { %v1761_v4 = vsub.f32 0.0, %v4858_v28  ;;  %v4860_v47 = vpop.eup %4859 }
 0x25a   :  { %v1763_v8 = vmul.f32 %v4860_v47, %v1761_v4  ;;  %v10685_v4 = vld [vmem:[#allocation31_spill] sm:$0xff]  ;;  %v10700_v47 = vld [vmem:[#allocation46_spill] sm:$0xff] }
 0x25b   :  { %v4862_v43 = vpop.eup %4861 }
 0x25c   :  { %v1762_v51 = vsub.f32 0.0, %v4862_v43  ;;  %v4864_v22 = vpop.eup %4863  ;;  %v6859_v26 = vadd.f32 %v4858_v28, %v1763_v8  ;;  %v10699_v28 = vld [vmem:[#allocation45_spill] sm:$0xff] }
 0x25d   :  { %v10703_v8 = vld [vmem:[#allocation49_spill] sm:$0xff] }
 0x25e   :  { %v1764_v17 = vmul.f32 %v4864_v22, %v1762_v51  ;;  %v10702_v51 = vld [vmem:[#allocation48_spill] sm:$0xff]  ;;  %v10704_v22 = vld [vmem:[#allocation50_spill] sm:$0xff] }
 0x260   :  { %v6861_v48 = vadd.f32 %v4862_v43, %v1764_v17  ;;  %v10701_v43 = vld [vmem:[#allocation47_spill] sm:$0xff] }
 0x261   :  { %v10705_v17 = vld [vmem:[#allocation51_spill] sm:$0xff] }
 0x262   :  { %v6865_v15 = vpack.c.bf16 %v6861_v48, %v6859_v26 }
 0x264   :  { %1849 = vmatprep.mubr.bf16.mxu1 %v6865_v15  ;;  %1892 = vmatprep.mubr.bf16.mxu0 %v6865_v15 }
 0x265   :  { %1850 = vmatmul.mubr.bf16.vlgmr.msra.gmra.mxu1 %v6869_v50  ;;  %1893 = vmatmul.mubr.bf16.vlgmr.msra.gmra.mxu0 %v6869_v50 }
 0x266   :  { %1904 = vmatpush1.bf16.msra.mxu1 %v6167_v11  ;;  %1947 = vmatpush1.bf16.msra.mxu0 %v6172_v27  ;;  %v10682_v11 = vld [vmem:[#allocation28_spill] sm:$0xff]  ;;  %v10683_v27 = vld [vmem:[#allocation29_spill] sm:$0xff] }
 0x267   :  { %1935 = vmatprep.mubr.bf16.mxu1 %v6865_v15  ;;  %1978 = vmatprep.mubr.bf16.mxu0 %v6865_v15 }
 0x268   :  { %1905 = vmatprep.subr.bf16.mxu1 %v6181_v16  ;;  %1948 = vmatprep.subr.bf16.mxu0 %v6186_v3  ;;  %v10686_v16 = vld [vmem:[#allocation32_spill] sm:$0xff]  ;;  %v10687_v3 = vld [vmem:[#allocation33_spill] sm:$0xff] }
 0x26a   :  { %1906 = vmatpush1.bf16.msra.mxu1 %v6195_v5  ;;  %1949 = vmatpush1.bf16.msra.mxu0 %v6200_v39  ;;  %v10688_v5 = vld [vmem:[#allocation34_spill] sm:$0xff]  ;;  %v10689_v39 = vld [vmem:[#allocation35_spill] sm:$0xff] }
 0x26b   :  { %1907 = vmatprep.subr.bf16.mxu1 %v6207_v24  ;;  %1950 = vmatprep.subr.bf16.mxu0 %v6212_v57  ;;  %v10690_v24 = vld [vmem:[#allocation36_spill] sm:$0xff]  ;;  %v10691_v57 = vld [vmem:[#allocation37_spill] sm:$0xff]  ;;  %10749 = vst [vmem:[#allocation35_spill] sm:$0xff] %v7218_v54 }
 0x26c   :  { %10750 = vst [vmem:[#allocation36_spill] sm:$0xff] %v7224_v41  ;;  %10751 = vst [vmem:[#allocation37_spill] sm:$0xff] %v7230_v36 }
 0x26e   :  { %1908 = vmatpush1.bf16.msra.mxu1 %v10681_v56  ;;  %1951 = vmatpush1.bf16.msra.mxu0 %v10682_v11  ;;  %v10706_v56 = vld [vmem:[#allocation52_spill] sm:$0xff]  ;;  %v10707_v11 = vld [vmem:[#allocation53_spill] sm:$0xff] }
 0x26f   :  { %1909 = vmatprep.subr.bf16.mxu1 %v10683_v27  ;;  %1952 = vmatprep.subr.bf16.mxu0 %v10684_v0  ;;  %v10708_v27 = vld [vmem:[#allocation54_spill] sm:$0xff]  ;;  %v10709_v0 = vld [vmem:[#allocation55_spill] sm:$0xff] }
 0x272   :  { %1910 = vmatpush1.bf16.msra.mxu1 %v10685_v4  ;;  %1953 = vmatpush1.bf16.msra.mxu0 %v10686_v16  ;;  %v10710_v4 = vld [vmem:[#allocation56_spill] sm:$0xff]  ;;  %v10711_v16 = vld [vmem:[#allocation57_spill] sm:$0xff] }
 0x273   :  { %1911 = vmatprep.subr.bf16.mxu1 %v10687_v3  ;;  %1954 = vmatprep.subr.bf16.mxu0 %v10688_v5  ;;  %v10712_v3 = vld [vmem:[#allocation58_spill] sm:$0xff]  ;;  %v10713_v5 = vld [vmem:[#allocation59_spill] sm:$0xff] }
 0x276   :  { %1912 = vmatpush1.bf16.msra.mxu1 %v10689_v39  ;;  %1955 = vmatpush1.bf16.msra.mxu0 %v10690_v24  ;;  %v10714_v39 = vld [vmem:[#allocation60_spill] sm:$0xff]  ;;  %v10715_v24 = vld [vmem:[#allocation61_spill] sm:$0xff] }
 0x277   :  { %1913 = vmatprep.subr.bf16.mxu1 %v10691_v57  ;;  %1956 = vmatprep.subr.bf16.mxu0 %v10692_v7  ;;  %v10716_v57 = vld [vmem:[#allocation62_spill] sm:$0xff]  ;;  %v10717_v7 = vld [vmem:[#allocation63_spill] sm:$0xff] }
 0x27a   :  { %1914 = vmatpush1.bf16.msra.mxu1 %v10693_v30  ;;  %1957 = vmatpush1.bf16.msra.mxu0 %v10694_v35  ;;  %v10718_v30 = vld [vmem:[#allocation64_spill] sm:$0xff]  ;;  %v10719_v35 = vld [vmem:[#allocation65_spill] sm:$0xff] }
 0x27b   :  { %1915 = vmatprep.subr.bf16.mxu1 %v10695_v63  ;;  %1958 = vmatprep.subr.bf16.mxu0 %v10696_v19  ;;  %v10720_v63 = vld [vmem:[#allocation66_spill] sm:$0xff]  ;;  %v10721_v19 = vld [vmem:[#allocation67_spill] sm:$0xff] }
 0x27e   :  { %1916 = vmatpush1.bf16.msra.mxu1 %v10697_v52  ;;  %1959 = vmatpush1.bf16.msra.mxu0 %v10698_v49  ;;  %v10722_v52 = vld [vmem:[#allocation68_spill] sm:$0xff]  ;;  %v10723_v49 = vld [vmem:[#allocation69_spill] sm:$0xff] }
 0x27f   :  { %1917 = vmatprep.subr.bf16.mxu1 %v10699_v28  ;;  %1960 = vmatprep.subr.bf16.mxu0 %v10700_v47  ;;  %v10724_v28 = vld [vmem:[#allocation70_spill] sm:$0xff]  ;;  %v10725_v47 = vld [vmem:[#allocation71_spill] sm:$0xff] }
 0x282   :  { %1918 = vmatpush1.bf16.msra.mxu1 %v10701_v43  ;;  %1961 = vmatpush1.bf16.msra.mxu0 %v10702_v51  ;;  %v10726_v43 = vld [vmem:[#allocation72_spill] sm:$0xff]  ;;  %v10727_v51 = vld [vmem:[#allocation73_spill] sm:$0xff] }
 0x283   :  { %1919 = vmatprep.subr.bf16.mxu1 %v10703_v8  ;;  %1962 = vmatprep.subr.bf16.mxu0 %v10704_v22  ;;  %v10728_v8 = vld [vmem:[#allocation74_spill] sm:$0xff]  ;;  %v10729_v22 = vld [vmem:[#allocation75_spill] sm:$0xff] }
 0x286   :  { %1920 = vmatpush2.bf16.msra.mxu1 %v10705_v17  ;;  %1963 = vmatpush2.bf16.msra.mxu0 %v10706_v56  ;;  %v10730_v17 = vld [vmem:[#allocation76_spill] sm:$0xff]  ;;  %v10731_v56 = vld [vmem:[#allocation77_spill] sm:$0xff] }
 0x287   :  { %1921 = vmatprep.subr.bf16.mxu1 %v10707_v11  ;;  %1964 = vmatprep.subr.bf16.mxu0 %v10708_v27  ;;  %v10732_v11 = vld [vmem:[#allocation78_spill] sm:$0xff]  ;;  %v10733_v27 = vld [vmem:[#allocation79_spill] sm:$0xff] }
 0x28a   :  { %1922 = vmatpush2.bf16.msra.mxu1 %v10709_v0  ;;  %1965 = vmatpush2.bf16.msra.mxu0 %v10710_v4  ;;  %v10734_v0 = vld [vmem:[#allocation80_spill] sm:$0xff]  ;;  %v10735_v4 = vld [vmem:[#allocation82_spill] sm:$0xff] }
 0x28b   :  { %1923 = vmatprep.subr.bf16.mxu1 %v10711_v16  ;;  %1966 = vmatprep.subr.bf16.mxu0 %v10712_v3  ;;  %v10736_v16 = vld [vmem:[#allocation81_spill] sm:$0xff]  ;;  %v10737_v3 = vld [vmem:[#allocation83_spill] sm:$0xff] }
 0x28e   :  { %1924 = vmatpush2.bf16.msra.mxu1 %v10713_v5  ;;  %1967 = vmatpush2.bf16.msra.mxu0 %v10714_v39  ;;  %v10738_v5 = vld [vmem:[#allocation84_spill] sm:$0xff]  ;;  %v10739_v39 = vld [vmem:[#allocation85_spill] sm:$0xff] }
 0x28f   :  { %1925 = vmatprep.subr.bf16.mxu1 %v10715_v24  ;;  %1968 = vmatprep.subr.bf16.mxu0 %v10716_v57  ;;  %v7006_v24 = vld [vmem:[%s10233_s2 + $0x94] ss:$36 sps:$4 sm:$0xff]   ;;  %v7020_v57 = vld [vmem:[%s10233_s2 + $0x4c] ss:$36 sps:$4 sm:$0xff]  }
 0x292   :  { %1926 = vmatpush2.bf16.msra.mxu1 %v10717_v7  ;;  %1969 = vmatpush2.bf16.msra.mxu0 %v10718_v30  ;;  %v7080_v7 = vld [vmem:[%s10233_s2 + $0x174] ss:$36 sps:$4 sm:$0xff]  }
 0x293   :  { %1927 = vmatprep.subr.bf16.mxu1 %v10719_v35  ;;  %1970 = vmatprep.subr.bf16.mxu0 %v10720_v63  ;;  %v7086_v30 = vld [vmem:[%s10233_s2 + $0x3f0] ss:$36 sps:$4 sm:$0xff]  }
 0x294   :  { %v7092_v35 = vld [vmem:[%s10233_s2 + $0x3ac] ss:$36 sps:$4 sm:$0xff]  }
 0x295   :  { %v7098_v63 = vld [vmem:[%s10233_s2 + $0x170] ss:$36 sps:$4 sm:$0xff]  }
 0x296   :  { %1928 = vmatpush2.bf16.msra.mxu1 %v10721_v19  ;;  %1971 = vmatpush2.bf16.msra.mxu0 %v10722_v52  ;;  %v7104_v19 = vld [vmem:[%s10233_s2 + $0x12c] ss:$36 sps:$4 sm:$0xff]  }
 0x297   :  { %1929 = vmatprep.subr.bf16.mxu1 %v10723_v49  ;;  %1972 = vmatprep.subr.bf16.mxu0 %v10724_v28  ;;  %v7110_v52 = vld [vmem:[%s10233_s2 + $0x3a8] ss:$36 sps:$4 sm:$0xff]  }
 0x298   :  { %v7116_v49 = vld [vmem:[%s10233_s2 + $0x364] ss:$36 sps:$4 sm:$0xff]  }
 0x299   :  { %v7122_v28 = vld [vmem:[%s10233_s2 + $0x128] ss:$36 sps:$4 sm:$0xff]  }
 0x29a   :  { %1930 = vmatpush2.bf16.msra.mxu1 %v10725_v47  ;;  %1973 = vmatpush2.bf16.msra.mxu0 %v10726_v43  ;;  %v7128_v47 = vld [vmem:[%s10233_s2 + $0xe4] ss:$36 sps:$4 sm:$0xff]  }
 0x29b   :  { %1931 = vmatprep.subr.bf16.mxu1 %v10727_v51  ;;  %1974 = vmatprep.subr.bf16.mxu0 %v10728_v8  ;;  %v7134_v43 = vld [vmem:[%s10233_s2 + $0x360] ss:$36 sps:$4 sm:$0xff]  }
 0x29c   :  { %v7140_v51 = vld [vmem:[%s10233_s2 + $0x31c] ss:$36 sps:$4 sm:$0xff]  }
 0x29d   :  { %v7146_v8 = vld [vmem:[%s10233_s2 + $0xe0] ss:$36 sps:$4 sm:$0xff]  }
 0x29e   :  { %1932 = vmatpush2.bf16.msra.mxu1 %v10729_v22  ;;  %1975 = vmatpush2.bf16.msra.mxu0 %v10730_v17  ;;  %v7152_v22 = vld [vmem:[%s10233_s2 + $0x9c] ss:$36 sps:$4 sm:$0xff]  }
 0x29f   :  { %1933 = vmatprep.subr.bf16.mxu1 %v10731_v56  ;;  %1976 = vmatprep.subr.bf16.mxu0 %v10732_v11  ;;  %v7158_v17 = vld [vmem:[%s10233_s2 + $0x318] ss:$36 sps:$4 sm:$0xff]  }
 0x2a0   :  { %v7164_v56 = vld [vmem:[%s10233_s2 + $0x2d4] ss:$36 sps:$4 sm:$0xff]  }
 0x2a1   :  { %10740 = vst [vmem:[#allocation21_spill] sm:$0xff] %v7164_v56  ;;  %v7170_v11 = vld [vmem:[%s10233_s2 + $0x98] ss:$36 sps:$4 sm:$0xff]  }
 0x2a2   :  { %1934 = vmatpush2.bf16.msra.mxu1 %v6533_v20  ;;  %1977 = vmatpush2.bf16.msra.mxu0 %v10733_v27  ;;  %v6950_v20 = vld [vmem:[%s10233_s2 + $0x1b4] ss:$36 sps:$4 sm:$0xff]   ;;  %10741 = vst [vmem:[#allocation27_spill] sm:$0xff] %v7170_v11 }
 0x2a3   :  { %4330 = vmatprep.subr.bf16.mxu1 %v10734_v0  ;;  %2128 = vmatprep.subr.bf16.mxu0 %v10735_v4  ;;  %v7176_v27 = vld [vmem:[%s10233_s2 + $0x54] ss:$36 sps:$4 sm:$0xff]   ;;  %v7188_v4 = vld [vmem:[%s10233_s2 + $0x28c] ss:$36 sps:$4 sm:$0xff]  }
 0x2a4   :  { %10742 = vst [vmem:[#allocation28_spill] sm:$0xff] %v7176_v27  ;;  %v7182_v0 = vld [vmem:[%s10233_s2 + $0x2d0] ss:$36 sps:$4 sm:$0xff]   ;;  %10744 = vst [vmem:[#allocation30_spill] sm:$0xff] %v7188_v4 }
 0x2a5   :  { %1936 = vmatmul.mubr.bf16.vlgmr.msra.gmra.mxu1 %v6869_v50  ;;  %1979 = vmatmul.mubr.bf16.vlgmr.msra.gmra.mxu0 %v6869_v50  ;;  %10743 = vst [vmem:[#allocation29_spill] sm:$0xff] %v7182_v0 }
 0x2a6   :  { %4331 = vmatpush3.bf16.msra.mxu1 %v6552_v29  ;;  %2021 = vmatprep.mubr.bf16.mxu1 %v6865_v15  ;;  %v6958_v29 = vld [vmem:[%s10233_s2 + $0x1b0] ss:$36 sps:$4 sm:$0xff]   ;;  %v6978_v15 = vld [vmem:[%s10233_s2 + $0x124] ss:$36 sps:$4 sm:$0xff]  }
 0x2a7   :  { %4332 = vmatprep.subr.bf16.mxu1 %v10736_v16  ;;  %2129 = vmatpush1.bf16.msra.mxu0 %v6584_v21  ;;  %v6964_v21 = vld [vmem:[%s10233_s2 + $0x16c] ss:$36 sps:$4 sm:$0xff]  }
 0x2a8   :  { %2130 = vmatprep.subr.bf16.mxu0 %v6950_v20  ;;  %v7194_v16 = vld [vmem:[%s10233_s2 + $0x50] ss:$36 sps:$4 sm:$0xff]  }
 0x2a9   :  { %10745 = vst [vmem:[#allocation31_spill] sm:$0xff] %v7194_v16 }
 0x2aa   :  { %4333 = vmatpush3.bf16.msra.mxu1 %v6572_v18  ;;  %v6972_v18 = vld [vmem:[%s10233_s2 + $0x168] ss:$36 sps:$4 sm:$0xff]  }
 0x2ab   :  { %4334 = vmatprep.subr.bf16.mxu1 %v10737_v3  ;;  %2131 = vmatpush1.bf16.msra.mxu0 %v6958_v29  ;;  %v7200_v3 = vld [vmem:[%s10233_s2 + $0xc] ss:$36 sps:$4 sm:$0xff]  }
 0x2ac   :  { %2132 = vmatprep.subr.bf16.mxu0 %v6964_v21  ;;  %10746 = vst [vmem:[#allocation32_spill] sm:$0xff] %v7200_v3 }
 0x2ae   :  { %4335 = vmatpush3.bf16.msra.mxu1 %v6592_v12  ;;  %v6992_v12 = vld [vmem:[%s10233_s2 + $0xdc] ss:$36 sps:$4 sm:$0xff]  }
 0x2af   :  { %4336 = vmatprep.subr.bf16.mxu1 %v6598_v14  ;;  %2133 = vmatpush1.bf16.msra.mxu0 %v6972_v18  ;;  %v6986_v14 = vld [vmem:[%s10233_s2 + $0x120] ss:$36 sps:$4 sm:$0xff]  }
 0x2b0   :  { %2134 = vmatprep.subr.bf16.mxu0 %v6978_v15 }
 0x2b2   :  { %4337 = vmatpush3.bf16.msra.mxu1 %v6606_v31  ;;  %v7000_v31 = vld [vmem:[%s10233_s2 + $0xd8] ss:$36 sps:$4 sm:$0xff]  }
 0x2b3   :  { %4338 = vmatprep.subr.bf16.mxu1 %v10738_v5  ;;  %2135 = vmatpush1.bf16.msra.mxu0 %v6986_v14  ;;  %v7206_v5 = vld [vmem:[%s10233_s2 + $0x288] ss:$36 sps:$4 sm:$0xff]  }
 0x2b4   :  { %2136 = vmatprep.subr.bf16.mxu0 %v6992_v12  ;;  %10747 = vst [vmem:[#allocation33_spill] sm:$0xff] %v7206_v5 }
 0x2b6   :  { %4339 = vmatpush3.bf16.msra.mxu1 %v6620_v33  ;;  %v7014_v33 = vld [vmem:[%s10233_s2 + $0x90] ss:$36 sps:$4 sm:$0xff]  }
 0x2b7   :  { %4340 = vmatprep.subr.bf16.mxu1 %v10739_v39  ;;  %2137 = vmatpush1.bf16.msra.mxu0 %v7000_v31  ;;  %v7212_v39 = vld [vmem:[%s10233_s2 + $0x244] ss:$36 sps:$4 sm:$0xff]  }
 0x2b8   :  { %2138 = vmatprep.subr.bf16.mxu0 %v7006_v24  ;;  %10748 = vst [vmem:[#allocation34_spill] sm:$0xff] %v7212_v39 }
 0x2ba   :  { %4341 = vmatpush3.bf16.msra.mxu1 %v6634_v37  ;;  %v7028_v37 = vld [vmem:[%s10233_s2 + $0x48] ss:$36 sps:$4 sm:$0xff]  }
 0x2bb   :  { %4342 = vmatprep.subr.bf16.mxu1 %v6640_v40  ;;  %2139 = vmatpush1.bf16.msra.mxu0 %v7014_v33  ;;  %v7034_v40 = vld [vmem:[%s10233_s2 + $0x4] ss:$36 sps:$4 sm:$0xff]  }
 0x2bc   :  { %2140 = vmatprep.subr.bf16.mxu0 %v7020_v57 }
 0x2be   :  { %4343 = vmatpush3.bf16.msra.mxu1 %v6650_v42  ;;  %v7042_v42 = vld [vmem:[%s10233_s2] ss:$36 sps:$4 sm:$0xff]  }
 0x2bf   :  { %4344 = vmatprep.subr.bf16.mxu1 %v6656_v44  ;;  %2141 = vmatpush1.bf16.msra.mxu0 %v7028_v37  ;;  %v7048_v44 = vld [vmem:[%s10233_s2 + $0x43c] ss:$36 sps:$4 sm:$0xff]  }
 0x2c0   :  { %2142 = vmatprep.subr.bf16.mxu0 %v7034_v40 }
 0x2c2   :  { %4345 = vmatpush3.bf16.msra.mxu1 %v6666_v46  ;;  %v7056_v46 = vld [vmem:[%s10233_s2 + $0x1bc] ss:$36 sps:$4 sm:$0xff]  }
 0x2c3   :  { %2171 = vmatprep.subr.bf16.mxu1 %v6679_v53  ;;  %2143 = vmatpush1.bf16.msra.mxu0 %v7042_v42  ;;  %v7062_v53 = vld [vmem:[%s10233_s2 + $0x438] ss:$36 sps:$4 sm:$0xff]  }
 0x2c4   :  { %2144 = vmatprep.subr.bf16.mxu0 %v7048_v44 }
 0x2c5   :  { %2022 = vmatmul.mubr.bf16.vlgmr.msra.gmra.mxu1 %v6869_v50  ;;  %v7068_v50 = vld [vmem:[%s10233_s2 + $0x3f4] ss:$36 sps:$4 sm:$0xff]  }
 0x2c6   :  { %2172 = vmatpush1.bf16.msra.mxu1 %v6688_v55  ;;  %v7074_v55 = vld [vmem:[%s10233_s2 + $0x1b8] ss:$36 sps:$4 sm:$0xff]  }
 0x2c7   :  { %2173 = vmatprep.subr.bf16.mxu1 %v7056_v46  ;;  %2145 = vmatpush2.bf16.msra.mxu0 %v7062_v53 }
 0x2c8   :  { %2146 = vmatprep.subr.bf16.mxu0 %v7068_v50 }
 0x2ca   :  { %2174 = vmatpush1.bf16.msra.mxu1 %v7074_v55 }
 0x2cb   :  { %2175 = vmatprep.subr.bf16.mxu1 %v7080_v7  ;;  %2147 = vmatpush2.bf16.msra.mxu0 %v7086_v30 }
 0x2cc   :  { %2148 = vmatprep.subr.bf16.mxu0 %v7092_v35 }
 0x2ce   :  { %2176 = vmatpush1.bf16.msra.mxu1 %v7098_v63 }
 0x2cf   :  { %2177 = vmatprep.subr.bf16.mxu1 %v7104_v19  ;;  %2149 = vmatpush2.bf16.msra.mxu0 %v7110_v52 }
 0x2d0   :  { %2150 = vmatprep.subr.bf16.mxu0 %v7116_v49 }
 0x2d2   :  { %2178 = vmatpush1.bf16.msra.mxu1 %v7122_v28 }
 0x2d3   :  { %2179 = vmatprep.subr.bf16.mxu1 %v7128_v47  ;;  %2151 = vmatpush2.bf16.msra.mxu0 %v7134_v43 }
 0x2d4   :  { %2152 = vmatprep.subr.bf16.mxu0 %v7140_v51 }
 0x2d6   :  { %2180 = vmatpush1.bf16.msra.mxu1 %v7146_v8 }
 0x2d7   :  { %2181 = vmatprep.subr.bf16.mxu1 %v7152_v22  ;;  %2153 = vmatpush2.bf16.msra.mxu0 %v7158_v17 }
 0x2d8   :  { %2154 = vmatprep.subr.bf16.mxu0 %v7164_v56 }
 0x2da   :  { %2182 = vmatpush1.bf16.msra.mxu1 %v7170_v11 }
 0x2db   :  { %2183 = vmatprep.subr.bf16.mxu1 %v7176_v27  ;;  %2155 = vmatpush2.bf16.msra.mxu0 %v7182_v0  ;;  %v334_v0 = vadd.f32 %v6697_v60, %v10669_v1  ;;  %v7346_v60 = vld [vmem:[%s10235_s4] ss:$0 sm:$0xff] }
 0x2dc   :  { %2156 = vmatprep.subr.bf16.mxu0 %v7188_v4  ;;  %10769 = vst [vmem:[#allocation55_spill] sm:$0xff] %v7346_v60 }
 0x2de   :  { %2184 = vmatpush1.bf16.msra.mxu1 %v7194_v16 }
 0x2df   :  { %2185 = vmatprep.subr.bf16.mxu1 %v7200_v3  ;;  %2157 = vmatpush2.bf16.msra.mxu0 %v7206_v5  ;;  %v336_v5 = vadd.f32 %v6703_v62, %v10665_v23 }
 0x2e0   :  { %2158 = vmatprep.subr.bf16.mxu0 %v7212_v39 }
 0x2e2   :  { %2186 = vmatpush1.bf16.msra.mxu1 %v7218_v54 }
 0x2e3   :  { %2187 = vmatprep.subr.bf16.mxu1 %v7224_v41  ;;  %2159 = vmatpush2.bf16.msra.mxu0 %v7230_v36  ;;  %v7248_v41 = vld [vmem:[%s10233_s2 + $0x3fc] ss:$36 sps:$4 sm:$0xff]  }
 0x2e4   :  { %2214 = vmatprep.subr.bf16.mxu0 %v7236_v38  ;;  %10754 = vst [vmem:[#allocation40_spill] sm:$0xff] %v7248_v41  ;;  %v7254_v36 = vld [vmem:[%s10233_s2 + $0x3f8] ss:$36 sps:$4 sm:$0xff]  }
 0x2e5   :  { %10755 = vst [vmem:[#allocation41_spill] sm:$0xff] %v7254_v36  ;;  %v7260_v38 = vld [vmem:[%s10233_s2 + $0x3b4] ss:$36 sps:$4 sm:$0xff]  }
 0x2e6   :  { %2188 = vmatpush2.bf16.msra.mxu1 %v7242_v34  ;;  %10756 = vst [vmem:[#allocation42_spill] sm:$0xff] %v7260_v38  ;;  %v7266_v34 = vld [vmem:[%s10233_s2 + $0x3b0] ss:$36 sps:$4 sm:$0xff]  }
 0x2e7   :  { %2189 = vmatprep.subr.bf16.mxu1 %v7248_v41  ;;  %10757 = vst [vmem:[#allocation43_spill] sm:$0xff] %v7266_v34  ;;  %v7272_v41 = vld [vmem:[%s10233_s2 + $0x36c] ss:$36 sps:$4 sm:$0xff]  }
 0x2e8   :  { %10758 = vst [vmem:[#allocation44_spill] sm:$0xff] %v7272_v41 }
 0x2ea   :  { %2190 = vmatpush2.bf16.msra.mxu1 %v7254_v36  ;;  %v7278_v36 = vld [vmem:[%s10233_s2 + $0x368] ss:$36 sps:$4 sm:$0xff]  }
 0x2eb   :  { %2191 = vmatprep.subr.bf16.mxu1 %v7260_v38  ;;  %10759 = vst [vmem:[#allocation45_spill] sm:$0xff] %v7278_v36  ;;  %v7284_v38 = vld [vmem:[%s10233_s2 + $0x324] ss:$36 sps:$4 sm:$0xff]  }
 0x2ec   :  { %10760 = vst [vmem:[#allocation46_spill] sm:$0xff] %v7284_v38 }
 0x2ee   :  { %2192 = vmatpush2.bf16.msra.mxu1 %v7266_v34  ;;  %v7290_v34 = vld [vmem:[%s10233_s2 + $0x320] ss:$36 sps:$4 sm:$0xff]  }
 0x2ef   :  { %2193 = vmatprep.subr.bf16.mxu1 %v7272_v41  ;;  %10761 = vst [vmem:[#allocation47_spill] sm:$0xff] %v7290_v34  ;;  %v7296_v41 = vld [vmem:[%s10233_s2 + $0x2dc] ss:$36 sps:$4 sm:$0xff]  }
 0x2f0   :  { %10762 = vst [vmem:[#allocation48_spill] sm:$0xff] %v7296_v41 }
 0x2f2   :  { %2194 = vmatpush2.bf16.msra.mxu1 %v7278_v36  ;;  %v7302_v36 = vld [vmem:[%s10233_s2 + $0x2d8] ss:$36 sps:$4 sm:$0xff]  }
 0x2f3   :  { %2195 = vmatprep.subr.bf16.mxu1 %v7284_v38  ;;  %10763 = vst [vmem:[#allocation49_spill] sm:$0xff] %v7302_v36  ;;  %v7308_v38 = vld [vmem:[%s10233_s2 + $0x294] ss:$36 sps:$4 sm:$0xff]  }
 0x2f4   :  { %10764 = vst [vmem:[#allocation50_spill] sm:$0xff] %v7308_v38 }
 0x2f6   :  { %2196 = vmatpush2.bf16.msra.mxu1 %v7290_v34  ;;  %v7314_v34 = vld [vmem:[%s10233_s2 + $0x290] ss:$36 sps:$4 sm:$0xff]  }
 0x2f7   :  { %2197 = vmatprep.subr.bf16.mxu1 %v7296_v41  ;;  %10765 = vst [vmem:[#allocation51_spill] sm:$0xff] %v7314_v34  ;;  %v7320_v41 = vld [vmem:[%s10233_s2 + $0x24c] ss:$36 sps:$4 sm:$0xff]  }
 0x2f8   :  { %10766 = vst [vmem:[#allocation52_spill] sm:$0xff] %v7320_v41 }
 0x2fa   :  { %2198 = vmatpush2.bf16.msra.mxu1 %v7302_v36  ;;  %v7326_v36 = vld [vmem:[%s10233_s2 + $0x248] ss:$36 sps:$4 sm:$0xff]  }
 0x2fb   :  { %2199 = vmatprep.subr.bf16.mxu1 %v7308_v38  ;;  %10767 = vst [vmem:[#allocation53_spill] sm:$0xff] %v7326_v36  ;;  %v7332_v38 = vld [vmem:[%s10233_s2 + $0x214] ss:$36 sps:$4 sm:$0xff]  }
 0x2fc   :  { %10768 = vst [vmem:[#allocation54_spill] sm:$0xff] %v7332_v38 }
 0x2fe   :  { %2200 = vmatpush2.bf16.msra.mxu1 %v7314_v34  ;;  %v332_v34 = vadd.f32 %v6691_v58, %v10665_v23  ;;  %v338_v58 = vadd.f32 %v6709_v32, %v10669_v1 }
 0x2ff   :  { %2201 = vmatprep.subr.bf16.mxu1 %v7320_v41 }
 0x302   :  { %2202 = vmatpush2.bf16.msra.mxu1 %v7326_v36 }
 0x303   :  { %2257 = vmatprep.subr.bf16.mxu1 %v7332_v38 }
 0x325   :  { %v1851_v54 = vpop.f32.mrf.mxu1 }
 0x326   :  { %v2084_v39 = vadd.f32 %v1851_v54, %v332_v34 }
 0x327   :  { %v1853_v41 = vpop.f32.mrf.mxu1 }
 0x328   :  { %v4235_v3 = vmul.f32 -1.442695, %v2084_v39  ;;  %v2085_v27 = vadd.f32 %v1853_v41, %v334_v0 }
 0x329   :  { %v1855_v16 = vpop.f32.mrf.mxu1 }
 0x32a   :  { %4865 = vpow2.f32 %v4235_v3  ;;  %v2086_v36 = vadd.f32 %v1855_v16, %v336_v5  ;;  %v4236_v11 = vmul.f32 -1.442695, %v2085_v27 }
 0x32b   :  { %v1857_v38 = vpop.f32.mrf.mxu1 }
 0x32c   :  { %v4237_v4 = vmul.f32 -1.442695, %v2086_v36  ;;  %v2087_v34 = vadd.f32 %v1857_v38, %v338_v58  ;;  %v1894_v36 = vpop.f32.mrf.mxu0 }
 0x32d   :  { %v2112_v32 = vadd.f32 %v7346_v60, %v1894_v36 }
 0x32e   :  { %4867 = vpow2.f32 %v4237_v4  ;;  %v4238_v62 = vmul.f32 -1.442695, %v2087_v34  ;;  %v1896_v4 = vpop.f32.mrf.mxu0 }
 0x32f   :  { %4869 = vpow2.f32 %v4236_v11  ;;  %v441_v11 = vadd.f32 %v6780_v61, %v6147_v2 }
 0x330   :  { %v1898_v41 = vpop.f32.mrf.mxu0 }
 0x331   :  { %v2113_v58 = vadd.f32 %v7346_v60, %v1898_v41 }
 0x337   :  { %v4866_v54 = vpop.eup %4865 }
 0x338   :  { %v2100_v56 = vadd.f32 1.0, %v4866_v54  ;;  %v444_v54 = vadd.f32 %v6788_v10, %v6147_v2 }
 0x33a   :  { %4871 = vrcp.f32 %v2100_v56 }
 0x33b   :  { %v4868_v39 = vpop.eup %4867  ;;  %4873 = vpow2.f32 %v4238_v62 }
 0x33c   :  { %v2102_v3 = vadd.f32 1.0, %v4868_v39  ;;  %v4870_v16 = vpop.eup %4869 }
 0x33d   :  { %v2101_v5 = vadd.f32 1.0, %v4870_v16 }
 0x33e   :  { %4875 = vrcp.f32 %v2102_v3 }
 0x347   :  { %v4872_v38 = vpop.eup %4871 }
 0x348   :  { %v2114_v56 = vmul.f32 %v4872_v38, %v2112_v32  ;;  %v4874_v27 = vpop.eup %4873 }
 0x349   :  { %v2103_v3 = vadd.f32 1.0, %v4874_v27 }
 0x34a   :  { %v2116_v0 = vadd.f32 %v2114_v56, %v441_v11 }
 0x34b   :  { %v4876_v34 = vpop.eup %4875 }
 0x34c   :  { %4877 = vtanh.f32 %v2116_v0  ;;  %v2115_v62 = vmul.f32 %v4876_v34, %v2113_v58  ;;  %v1900_v0 = vpop.f32.mrf.mxu0 }
 0x34d   :  { %4879 = vrcp.f32 %v2101_v5 }
 0x34e   :  { %v2117_v39 = vadd.f32 %v2115_v62, %v444_v54 }
 0x350   :  { %4881 = vtanh.f32 %v2117_v39 }
 0x351   :  { %4883 = vrcp.f32 %v2103_v3 }
 0x359   :  { %v4878_v36 = vpop.eup %4877 }
 0x35a   :  { %v2120_v61 = vsub.f32 %v6826_v9, %v4878_v36  ;;  %v4880_v32 = vpop.eup %4879 }
 0x35c   :  { %v2122_v38 = vmul.f32 %v4880_v32, %v2120_v61 }
 0x35d   :  { %v4882_v11 = vpop.eup %4881 }
 0x35e   :  { %v2121_v16 = vsub.f32 %v6831_v13, %v4882_v11  ;;  %v7356_v41 = vadd.f32 %v4878_v36, %v2122_v38  ;;  %v4884_v56 = vpop.eup %4883 }
 0x360   :  { %v2123_v60 = vmul.f32 %v4884_v56, %v2121_v16 }
 0x362   :  { %v7358_v10 = vadd.f32 %v4882_v11, %v2123_v60 }
 0x365   :  { %v1980_v5 = vpop.f32.mrf.mxu0  ;;  %v1937_v39 = vpop.f32.mrf.mxu1 }
 0x366   :  { %v2030_v58 = vadd.f32 %v1980_v5, %v1896_v4 }
 0x367   :  { %v1982_v27 = vpop.f32.mrf.mxu0  ;;  %v1939_v36 = vpop.f32.mrf.mxu1 }
 0x368   :  { %v2034_v34 = vadd.f32 %v2030_v58, %v6835_v45  ;;  %v2031_v32 = vadd.f32 %v1982_v27, %v1937_v39 }
 0x369   :  { %v1984_v54 = vpop.f32.mrf.mxu0  ;;  %v1941_v60 = vpop.f32.mrf.mxu1 }
 0x36a   :  { %v4231_v62 = vmul.f32 -1.442695, %v2034_v34  ;;  %v2032_v9 = vadd.f32 %v1984_v54, %v1900_v0  ;;  %v2035_v11 = vadd.f32 %v2031_v32, %v6841_v25 }
 0x36b   :  { %v1986_v61 = vpop.f32.mrf.mxu0  ;;  %v1943_v54 = vpop.f32.mrf.mxu1 }
 0x36c   :  { %4885 = vpow2.f32 %v4231_v62  ;;  %v2036_v3 = vadd.f32 %v2032_v9, %v6835_v45  ;;  %v2033_v38 = vadd.f32 %v1986_v61, %v1941_v60  ;;  %v4232_v5 = vmul.f32 -1.442695, %v2035_v11 }
 0x36d   :  { %v2062_v60 = vadd.f32 %v6853_v6, %v1939_v36 }
 0x36e   :  { %v4233_v13 = vmul.f32 -1.442695, %v2036_v3  ;;  %v2037_v16 = vadd.f32 %v2033_v38, %v6841_v25 }
 0x370   :  { %4887 = vpow2.f32 %v4233_v13  ;;  %v4234_v0 = vmul.f32 -1.442695, %v2037_v16 }
 0x379   :  { %v4886_v4 = vpop.eup %4885 }
 0x37a   :  { %v2050_v56 = vadd.f32 1.0, %v4886_v4 }
 0x37c   :  { %4889 = vrcp.f32 %v2050_v56 }
 0x37d   :  { %v4888_v58 = vpop.eup %4887  ;;  %4891 = vpow2.f32 %v4232_v5 }
 0x37e   :  { %v2052_v34 = vadd.f32 1.0, %v4888_v58  ;;  %4893 = vpow2.f32 %v4234_v0  ;;  %v2063_v0 = vadd.f32 %v6853_v6, %v1943_v54 }
 0x380   :  { %4895 = vrcp.f32 %v2052_v34 }
 0x385   :  { %v4346_v62 = vpop.f32.mrf.mxu1 }
 0x387   :  { %v4347_v9 = vpop.f32.mrf.mxu1 }
 0x388   :  { %v4348_v27 = vadd.f32 %v4347_v9, %v4346_v62 }
 0x389   :  { %v4349_v39 = vpop.f32.mrf.mxu1  ;;  %v4890_v13 = vpop.eup %4889 }
 0x38a   :  { %v2064_v3 = vadd.f32 %v4348_v27, %v6848_v59  ;;  %v4892_v32 = vpop.eup %4891 }
 0x38b   :  { %v4350_v61 = vpop.f32.mrf.mxu1  ;;  %v4894_v4 = vpop.eup %4893  ;;  %v2051_v58 = vadd.f32 1.0, %v4892_v32 }
 0x38c   :  { %v2066_v38 = vmul.f32 %v4890_v13, %v2064_v3  ;;  %v4351_v11 = vadd.f32 %v4350_v61, %v4349_v39  ;;  %v2053_v62 = vadd.f32 1.0, %v4894_v4  ;;  %v7409_v4 = vld [vmem:[%s10233_s2 + $0x1cc] ss:$36 sps:$4 sm:$0xff]  }
 0x38d   :  { %v4896_v5 = vpop.eup %4895 }
 0x38e   :  { %v2068_v16 = vadd.f32 %v2066_v38, %v2062_v60  ;;  %v2065_v56 = vadd.f32 %v4351_v11, %v6848_v59  ;;  %v7380_v38 = vpack.c.bf16 %v7358_v10, %v7356_v41  ;;  %v7403_v11 = vld [vmem:[%s10233_s2 + $0x1c4] ss:$36 sps:$4 sm:$0xff]  }
 0x390   :  { %4897 = vtanh.f32 %v2068_v16  ;;  %v2067_v34 = vmul.f32 %v4896_v5, %v2065_v56  ;;  %v7415_v16 = vld [vmem:[%s10233_s2 + $0x1c0] ss:$36 sps:$4 sm:$0xff]   ;;  %v7421_v56 = vld [vmem:[%s10233_s2 + $0x1c8] ss:$36 sps:$4 sm:$0xff]  }
 0x391   :  { %4899 = vrcp.f32 %v2051_v58  ;;  %v7427_v5 = vld [vmem:[%s10233_s2 + $0x17c] ss:$36 sps:$4 sm:$0xff]   ;;  %v7433_v58 = vld [vmem:[%s10233_s2 + $0x184] ss:$36 sps:$4 sm:$0xff]  }
 0x392   :  { %v2069_v9 = vadd.f32 %v2067_v34, %v2063_v0  ;;  %v7439_v0 = vld [vmem:[%s10233_s2 + $0x178] ss:$36 sps:$4 sm:$0xff]   ;;  %v7445_v34 = vld [vmem:[%s10233_s2 + $0x180] ss:$36 sps:$4 sm:$0xff]  }
 0x394   :  { %4901 = vtanh.f32 %v2069_v9  ;;  %v7457_v9 = vld [vmem:[%s10233_s2 + $0x13c] ss:$36 sps:$4 sm:$0xff]  }
 0x395   :  { %4903 = vrcp.f32 %v2053_v62  ;;  %v7451_v62 = vld [vmem:[%s10233_s2 + $0x134] ss:$36 sps:$4 sm:$0xff]  }
 0x39d   :  { %v4898_v27 = vpop.eup %4897 }
 0x39e   :  { %v2072_v36 = vsub.f32 %v6859_v26, %v4898_v27  ;;  %v4900_v3 = vpop.eup %4899  ;;  %v7389_v26 = vld [vmem:[%s10233_s2 + $0x208] ss:$36 sps:$4 sm:$0xff]  }
 0x3a0   :  { %v2074_v61 = vmul.f32 %v4900_v3, %v2072_v36  ;;  %v7469_v36 = vld [vmem:[%s10233_s2 + $0x138] ss:$36 sps:$4 sm:$0xff]   ;;  %v7475_v3 = vld [vmem:[%s10233_s2 + $0xec] ss:$36 sps:$4 sm:$0xff]  }
 0x3a1   :  { %v4902_v39 = vpop.eup %4901 }
 0x3a2   :  { %v2073_v13 = vsub.f32 %v6861_v48, %v4902_v39  ;;  %v4904_v59 = vpop.eup %4903  ;;  %v7370_v32 = vadd.f32 %v4898_v27, %v2074_v61  ;;  %v7395_v48 = vld [vmem:[%s10233_s2 + $0x210] ss:$36 sps:$4 sm:$0xff]  }
 0x3a3   :  { %v7463_v27 = vld [vmem:[%s10233_s2 + $0x130] ss:$36 sps:$4 sm:$0xff]  }
 0x3a4   :  { %v2075_v60 = vmul.f32 %v4904_v59, %v2073_v13  ;;  %v7487_v13 = vld [vmem:[%s10233_s2 + $0xe8] ss:$36 sps:$4 sm:$0xff]   ;;  %v7493_v61 = vld [vmem:[%s10233_s2 + $0xf0] ss:$36 sps:$4 sm:$0xff]  }
 0x3a5   :  { %10770 = vst [vmem:[#allocation56_spill] sm:$0xff] %v7487_v13  ;;  %10771 = vst [vmem:[#allocation57_spill] sm:$0xff] %v7493_v61  ;;  %v7499_v59 = vld [vmem:[%s10233_s2 + $0xa4] ss:$36 sps:$4 sm:$0xff]  }
 0x3a6   :  { %v7372_v6 = vadd.f32 %v4902_v39, %v2075_v60  ;;  %v7481_v39 = vld [vmem:[%s10233_s2 + $0xf4] ss:$36 sps:$4 sm:$0xff]   ;;  %10772 = vst [vmem:[#allocation58_spill] sm:$0xff] %v7499_v59  ;;  %v7505_v60 = vld [vmem:[%s10233_s2 + $0xac] ss:$36 sps:$4 sm:$0xff]  }
 0x3a7   :  { %10773 = vst [vmem:[#allocation59_spill] sm:$0xff] %v7505_v60 }
 0x3a8   :  { %v7376_v54 = vpack.c.bf16 %v7372_v6, %v7370_v32 }
 0x3aa   :  { %2160 = vmatprep.mubr.bf16.mxu0 %v7376_v54  ;;  %2203 = vmatprep.mubr.bf16.mxu1 %v7376_v54 }
 0x3ab   :  { %2161 = vmatmul.mubr.bf16.vlgmr.msra.gmra.mxu0 %v7380_v38  ;;  %2204 = vmatmul.mubr.bf16.vlgmr.msra.gmra.mxu1 %v7380_v38 }
 0x3ac   :  { %2215 = vmatpush1.bf16.msra.mxu0 %v7389_v26  ;;  %2258 = vmatpush1.bf16.msra.mxu1 %v7395_v48 }
 0x3ad   :  { %2246 = vmatprep.mubr.bf16.mxu0 %v7376_v54  ;;  %2289 = vmatprep.mubr.bf16.mxu1 %v7376_v54 }
 0x3ae   :  { %2216 = vmatprep.subr.bf16.mxu0 %v7403_v11  ;;  %2259 = vmatprep.subr.bf16.mxu1 %v7409_v4 }
 0x3b0   :  { %2217 = vmatpush1.bf16.msra.mxu0 %v7415_v16  ;;  %2260 = vmatpush1.bf16.msra.mxu1 %v7421_v56 }
 0x3b1   :  { %2218 = vmatprep.subr.bf16.mxu0 %v7427_v5  ;;  %2261 = vmatprep.subr.bf16.mxu1 %v7433_v58 }
 0x3b4   :  { %2219 = vmatpush1.bf16.msra.mxu0 %v7439_v0  ;;  %2262 = vmatpush1.bf16.msra.mxu1 %v7445_v34 }
 0x3b5   :  { %2220 = vmatprep.subr.bf16.mxu0 %v7451_v62  ;;  %2263 = vmatprep.subr.bf16.mxu1 %v7457_v9 }
 0x3b8   :  { %2221 = vmatpush1.bf16.msra.mxu0 %v7463_v27  ;;  %2264 = vmatpush1.bf16.msra.mxu1 %v7469_v36 }
 0x3b9   :  { %2222 = vmatprep.subr.bf16.mxu0 %v7475_v3  ;;  %2265 = vmatprep.subr.bf16.mxu1 %v7481_v39 }
 0x3bc   :  { %2223 = vmatpush1.bf16.msra.mxu0 %v7487_v13  ;;  %2266 = vmatpush1.bf16.msra.mxu1 %v7493_v61  ;;  %v7511_v13 = vld [vmem:[%s10233_s2 + $0xa0] ss:$36 sps:$4 sm:$0xff]   ;;  %v7517_v61 = vld [vmem:[%s10233_s2 + $0xa8] ss:$36 sps:$4 sm:$0xff]  }
 0x3bd   :  { %2224 = vmatprep.subr.bf16.mxu0 %v7499_v59  ;;  %2267 = vmatprep.subr.bf16.mxu1 %v7505_v60  ;;  %10774 = vst [vmem:[#allocation60_spill] sm:$0xff] %v7511_v13  ;;  %10775 = vst [vmem:[#allocation61_spill] sm:$0xff] %v7517_v61  ;;  %v7523_v59 = vld [vmem:[%s10233_s2 + $0x5c] ss:$36 sps:$4 sm:$0xff]   ;;  %v7529_v60 = vld [vmem:[%s10233_s2 + $0x64] ss:$36 sps:$4 sm:$0xff]  }
 0x3be   :  { %10776 = vst [vmem:[#allocation62_spill] sm:$0xff] %v7523_v59  ;;  %10777 = vst [vmem:[#allocation63_spill] sm:$0xff] %v7529_v60 }
 0x3c0   :  { %2225 = vmatpush1.bf16.msra.mxu0 %v7511_v13  ;;  %2268 = vmatpush1.bf16.msra.mxu1 %v7517_v61  ;;  %v7535_v13 = vld [vmem:[%s10233_s2 + $0x58] ss:$36 sps:$4 sm:$0xff]   ;;  %v7541_v61 = vld [vmem:[%s10233_s2 + $0x60] ss:$36 sps:$4 sm:$0xff]  }
 0x3c1   :  { %2226 = vmatprep.subr.bf16.mxu0 %v7523_v59  ;;  %2269 = vmatprep.subr.bf16.mxu1 %v7529_v60  ;;  %10778 = vst [vmem:[#allocation64_spill] sm:$0xff] %v7535_v13  ;;  %10779 = vst [vmem:[#allocation65_spill] sm:$0xff] %v7541_v61  ;;  %v7547_v59 = vld [vmem:[%s10233_s2 + $0x14] ss:$36 sps:$4 sm:$0xff]   ;;  %v7553_v60 = vld [vmem:[%s10233_s2 + $0x1c] ss:$36 sps:$4 sm:$0xff]  }
 0x3c2   :  { %10780 = vst [vmem:[#allocation66_spill] sm:$0xff] %v7547_v59  ;;  %10781 = vst [vmem:[#allocation67_spill] sm:$0xff] %v7553_v60 }
 0x3c4   :  { %2227 = vmatpush1.bf16.msra.mxu0 %v7535_v13  ;;  %2270 = vmatpush1.bf16.msra.mxu1 %v7541_v61  ;;  %v7559_v13 = vld [vmem:[%s10233_s2 + $0x10] ss:$36 sps:$4 sm:$0xff]   ;;  %v7565_v61 = vld [vmem:[%s10233_s2 + $0x18] ss:$36 sps:$4 sm:$0xff]  }
 0x3c5   :  { %2228 = vmatprep.subr.bf16.mxu0 %v7547_v59  ;;  %2271 = vmatprep.subr.bf16.mxu1 %v7553_v60  ;;  %10782 = vst [vmem:[#allocation68_spill] sm:$0xff] %v7559_v13  ;;  %10783 = vst [vmem:[#allocation69_spill] sm:$0xff] %v7565_v61  ;;  %v7571_v59 = vld [vmem:[%s10233_s2 + $0x44c] ss:$36 sps:$4 sm:$0xff]   ;;  %v7577_v60 = vld [vmem:[%s10233_s2 + $0x454] ss:$36 sps:$4 sm:$0xff]  }
 0x3c6   :  { %10784 = vst [vmem:[#allocation70_spill] sm:$0xff] %v7571_v59  ;;  %10785 = vst [vmem:[#allocation71_spill] sm:$0xff] %v7577_v60 }
 0x3c8   :  { %2229 = vmatpush1.bf16.msra.mxu0 %v7559_v13  ;;  %2272 = vmatpush1.bf16.msra.mxu1 %v7565_v61  ;;  %v7583_v13 = vld [vmem:[%s10233_s2 + $0x448] ss:$36 sps:$4 sm:$0xff]   ;;  %v7589_v61 = vld [vmem:[%s10233_s2 + $0x450] ss:$36 sps:$4 sm:$0xff]  }
 0x3c9   :  { %2230 = vmatprep.subr.bf16.mxu0 %v7571_v59  ;;  %2273 = vmatprep.subr.bf16.mxu1 %v7577_v60  ;;  %10786 = vst [vmem:[#allocation72_spill] sm:$0xff] %v7583_v13  ;;  %10787 = vst [vmem:[#allocation73_spill] sm:$0xff] %v7589_v61  ;;  %v7595_v59 = vld [vmem:[%s10233_s2 + $0x404] ss:$36 sps:$4 sm:$0xff]   ;;  %v7601_v60 = vld [vmem:[%s10233_s2 + $0x40c] ss:$36 sps:$4 sm:$0xff]  }
 0x3ca   :  { %10788 = vst [vmem:[#allocation74_spill] sm:$0xff] %v7595_v59  ;;  %10789 = vst [vmem:[#allocation75_spill] sm:$0xff] %v7601_v60 }
 0x3cc   :  { %2231 = vmatpush2.bf16.msra.mxu0 %v7583_v13  ;;  %2274 = vmatpush2.bf16.msra.mxu1 %v7589_v61  ;;  %v7607_v13 = vld [vmem:[%s10233_s2 + $0x400] ss:$36 sps:$4 sm:$0xff]   ;;  %v7613_v61 = vld [vmem:[%s10233_s2 + $0x408] ss:$36 sps:$4 sm:$0xff]  }
 0x3cd   :  { %2232 = vmatprep.subr.bf16.mxu0 %v7595_v59  ;;  %2275 = vmatprep.subr.bf16.mxu1 %v7601_v60  ;;  %10790 = vst [vmem:[#allocation76_spill] sm:$0xff] %v7607_v13  ;;  %10791 = vst [vmem:[#allocation77_spill] sm:$0xff] %v7613_v61  ;;  %v7619_v59 = vld [vmem:[%s10233_s2 + $0x3bc] ss:$36 sps:$4 sm:$0xff]   ;;  %v7625_v60 = vld [vmem:[%s10233_s2 + $0x3c4] ss:$36 sps:$4 sm:$0xff]  }
 0x3ce   :  { %10792 = vst [vmem:[#allocation78_spill] sm:$0xff] %v7619_v59  ;;  %10793 = vst [vmem:[#allocation79_spill] sm:$0xff] %v7625_v60 }
 0x3d0   :  { %2233 = vmatpush2.bf16.msra.mxu0 %v7607_v13  ;;  %2276 = vmatpush2.bf16.msra.mxu1 %v7613_v61  ;;  %v7631_v13 = vld [vmem:[%s10233_s2 + $0x3b8] ss:$36 sps:$4 sm:$0xff]   ;;  %v7637_v61 = vld [vmem:[%s10233_s2 + $0x3c0] ss:$36 sps:$4 sm:$0xff]  }
 0x3d1   :  { %2234 = vmatprep.subr.bf16.mxu0 %v7619_v59  ;;  %2277 = vmatprep.subr.bf16.mxu1 %v7625_v60  ;;  %10794 = vst [vmem:[#allocation80_spill] sm:$0xff] %v7631_v13  ;;  %10795 = vst [vmem:[#allocation82_spill] sm:$0xff] %v7637_v61  ;;  %v7643_v59 = vld [vmem:[%s10233_s2 + $0x374] ss:$36 sps:$4 sm:$0xff]   ;;  %v7649_v60 = vld [vmem:[%s10233_s2 + $0x37c] ss:$36 sps:$4 sm:$0xff]  }
 0x3d2   :  { %10796 = vst [vmem:[#allocation81_spill] sm:$0xff] %v7643_v59  ;;  %10797 = vst [vmem:[#allocation83_spill] sm:$0xff] %v7649_v60 }
 0x3d4   :  { %2235 = vmatpush2.bf16.msra.mxu0 %v7631_v13  ;;  %2278 = vmatpush2.bf16.msra.mxu1 %v7637_v61  ;;  %v7655_v13 = vld [vmem:[%s10233_s2 + $0x370] ss:$36 sps:$4 sm:$0xff]   ;;  %v7661_v61 = vld [vmem:[%s10233_s2 + $0x378] ss:$36 sps:$4 sm:$0xff]  }
 0x3d5   :  { %2236 = vmatprep.subr.bf16.mxu0 %v7643_v59  ;;  %2279 = vmatprep.subr.bf16.mxu1 %v7649_v60  ;;  %10798 = vst [vmem:[#allocation84_spill] sm:$0xff] %v7655_v13  ;;  %10799 = vst [vmem:[#allocation85_spill] sm:$0xff] %v7661_v61  ;;  %v7667_v59 = vld [vmem:[%s10233_s2 + $0x32c] ss:$36 sps:$4 sm:$0xff]   ;;  %v7673_v60 = vld [vmem:[%s10233_s2 + $0x334] ss:$36 sps:$4 sm:$0xff]  }
 0x3d6   :  { %10800 = vst [vmem:[#allocation98_spill] sm:$0xff] %v7667_v59  ;;  %10801 = vst [vmem:[#allocation99_spill] sm:$0xff] %v7673_v60 }
 0x3d8   :  { %2237 = vmatpush2.bf16.msra.mxu0 %v7655_v13  ;;  %2280 = vmatpush2.bf16.msra.mxu1 %v7661_v61  ;;  %v7679_v13 = vld [vmem:[%s10233_s2 + $0x328] ss:$36 sps:$4 sm:$0xff]   ;;  %v7685_v61 = vld [vmem:[%s10233_s2 + $0x330] ss:$36 sps:$4 sm:$0xff]  }
 0x3d9   :  { %2238 = vmatprep.subr.bf16.mxu0 %v7667_v59  ;;  %2281 = vmatprep.subr.bf16.mxu1 %v7673_v60  ;;  %10802 = vst [vmem:[#allocation100_spill] sm:$0xff] %v7679_v13  ;;  %10803 = vst [vmem:[#allocation101_spill] sm:$0xff] %v7685_v61  ;;  %v7691_v59 = vld [vmem:[%s10233_s2 + $0x2e4] ss:$36 sps:$4 sm:$0xff]   ;;  %v7697_v60 = vld [vmem:[%s10233_s2 + $0x2ec] ss:$36 sps:$4 sm:$0xff]  }
 0x3da   :  { %10804 = vst [vmem:[#allocation102_spill] sm:$0xff] %v7691_v59  ;;  %10805 = vst [vmem:[#allocation103_spill] sm:$0xff] %v7697_v60 }
 0x3dc   :  { %2239 = vmatpush2.bf16.msra.mxu0 %v7679_v13  ;;  %2282 = vmatpush2.bf16.msra.mxu1 %v7685_v61  ;;  %v7703_v13 = vld [vmem:[%s10233_s2 + $0x2e0] ss:$36 sps:$4 sm:$0xff]   ;;  %v7709_v61 = vld [vmem:[%s10233_s2 + $0x2e8] ss:$36 sps:$4 sm:$0xff]  }
 0x3dd   :  { %2240 = vmatprep.subr.bf16.mxu0 %v7691_v59  ;;  %2283 = vmatprep.subr.bf16.mxu1 %v7697_v60  ;;  %10806 = vst [vmem:[#allocation104_spill] sm:$0xff] %v7703_v13  ;;  %10807 = vst [vmem:[#allocation105_spill] sm:$0xff] %v7709_v61  ;;  %v7715_v59 = vld [vmem:[%s10233_s2 + $0x29c] ss:$36 sps:$4 sm:$0xff]   ;;  %v7721_v60 = vld [vmem:[%s10233_s2 + $0x2a4] ss:$36 sps:$4 sm:$0xff]  }
 0x3de   :  { %10808 = vst [vmem:[#allocation106_spill] sm:$0xff] %v7715_v59  ;;  %10809 = vst [vmem:[#allocation107_spill] sm:$0xff] %v7721_v60 }
 0x3e0   :  { %2241 = vmatpush2.bf16.msra.mxu0 %v7703_v13  ;;  %2284 = vmatpush2.bf16.msra.mxu1 %v7709_v61  ;;  %v7727_v13 = vld [vmem:[%s10233_s2 + $0x298] ss:$36 sps:$4 sm:$0xff]   ;;  %v7733_v61 = vld [vmem:[%s10233_s2 + $0x2a0] ss:$36 sps:$4 sm:$0xff]  }
 0x3e1   :  { %2242 = vmatprep.subr.bf16.mxu0 %v7715_v59  ;;  %2285 = vmatprep.subr.bf16.mxu1 %v7721_v60  ;;  %10810 = vst [vmem:[#allocation108_spill] sm:$0xff] %v7727_v13  ;;  %10811 = vst [vmem:[#allocation109_spill] sm:$0xff] %v7733_v61  ;;  %v7739_v59 = vld [vmem:[%s10233_s2 + $0x254] ss:$36 sps:$4 sm:$0xff]   ;;  %v7745_v60 = vld [vmem:[%s10233_s2 + $0x25c] ss:$36 sps:$4 sm:$0xff]  }
 0x3e2   :  { %10812 = vst [vmem:[#allocation110_spill] sm:$0xff] %v7739_v59  ;;  %10813 = vst [vmem:[#allocation111_spill] sm:$0xff] %v7745_v60 }
 0x3e4   :  { %2243 = vmatpush2.bf16.msra.mxu0 %v7727_v13  ;;  %2286 = vmatpush2.bf16.msra.mxu1 %v7733_v61  ;;  %v7751_v13 = vld [vmem:[%s10233_s2 + $0x250] ss:$36 sps:$4 sm:$0xff]   ;;  %v7757_v61 = vld [vmem:[%s10233_s2 + $0x258] ss:$36 sps:$4 sm:$0xff]  }
 0x3e5   :  { %2244 = vmatprep.subr.bf16.mxu0 %v7739_v59  ;;  %2287 = vmatprep.subr.bf16.mxu1 %v7745_v60  ;;  %10814 = vst [vmem:[#allocation112_spill] sm:$0xff] %v7757_v61  ;;  %v7763_v59 = vld [vmem:[%s10233_s2 + $0x458] ss:$36 sps:$4 sm:$0xff]  }
 0x3e6   :  { %10815 = vst [vmem:[#allocation113_spill] sm:$0xff] %v7763_v59  ;;  %v7769_v60 = vld [vmem:[%s10233_s2 + $0x1fc] ss:$36 sps:$4 sm:$0xff]  }
 0x3e7   :  { %10816 = vst [vmem:[#allocation114_spill] sm:$0xff] %v7769_v60 }
 0x3e8   :  { %2245 = vmatpush2.bf16.msra.mxu0 %v7751_v13  ;;  %2288 = vmatpush2.bf16.msra.mxu1 %v7757_v61  ;;  %v7777_v61 = vld [vmem:[%s10233_s2 + $0x218] ss:$36 sps:$4 sm:$0xff]  }
 0x3e9   :  { %4352 = vmatprep.subr.bf16.mxu0 %v7763_v59  ;;  %2439 = vmatprep.subr.bf16.mxu1 %v7769_v60  ;;  %v7784_v59 = vld [vmem:[%s10233_s2 + $0x410] ss:$36 sps:$4 sm:$0xff]   ;;  %v7790_v60 = vld [vmem:[%s10233_s2 + $0x1f8] ss:$36 sps:$4 sm:$0xff]  }
 0x3ea   :  { %10817 = vst [vmem:[#allocation115_spill] sm:$0xff] %v7784_v59 }
 0x3eb   :  { %2247 = vmatmul.mubr.bf16.vlgmr.msra.gmra.mxu0 %v7380_v38  ;;  %2290 = vmatmul.mubr.bf16.vlgmr.msra.gmra.mxu1 %v7380_v38 }
 0x3ec   :  { %4353 = vmatpush3.bf16.msra.mxu0 %v7777_v61  ;;  %2332 = vmatprep.mubr.bf16.mxu0 %v7376_v54  ;;  %v7797_v54 = vld [vmem:[%s10233_s2 + $0x1d0] ss:$36 sps:$4 sm:$0xff]  }
 0x3ed   :  { %4354 = vmatprep.subr.bf16.mxu0 %v7784_v59  ;;  %2440 = vmatpush1.bf16.msra.mxu1 %v7790_v60  ;;  %10818 = vst [vmem:[#allocation116_spill] sm:$0xff] %v7797_v54  ;;  %v7803_v59 = vld [vmem:[%s10233_s2 + $0x3c8] ss:$36 sps:$4 sm:$0xff]  }
 0x3ee   :  { %2441 = vmatprep.subr.bf16.mxu1 %v6950_v20  ;;  %v7811_v20 = vld [vmem:[%s10233_s2 + $0x188] ss:$36 sps:$4 sm:$0xff]  }
 0x3f0   :  { %4355 = vmatpush3.bf16.msra.mxu0 %v7797_v54  ;;  %v7817_v54 = vld [vmem:[%s10233_s2 + $0x380] ss:$36 sps:$4 sm:$0xff]  }
 0x3f1   :  { %4356 = vmatprep.subr.bf16.mxu0 %v7803_v59  ;;  %2442 = vmatpush1.bf16.msra.mxu1 %v6958_v29  ;;  %v7825_v29 = vld [vmem:[%s10233_s2 + $0x140] ss:$36 sps:$4 sm:$0xff]  }
 0x3f2   :  { %2443 = vmatprep.subr.bf16.mxu1 %v6964_v21  ;;  %v7831_v21 = vld [vmem:[%s10233_s2 + $0x338] ss:$36 sps:$4 sm:$0xff]  }
 0x3f4   :  { %4357 = vmatpush3.bf16.msra.mxu0 %v7811_v20 }
 0x3f5   :  { %4358 = vmatprep.subr.bf16.mxu0 %v7817_v54  ;;  %2444 = vmatpush1.bf16.msra.mxu1 %v6972_v18  ;;  %v7839_v18 = vld [vmem:[%s10233_s2 + $0xf8] ss:$36 sps:$4 sm:$0xff]  }
 0x3f6   :  { %2445 = vmatprep.subr.bf16.mxu1 %v6978_v15  ;;  %v7845_v15 = vld [vmem:[%s10233_s2 + $0x2f0] ss:$36 sps:$4 sm:$0xff]  }
 0x3f8   :  { %4359 = vmatpush3.bf16.msra.mxu0 %v7825_v29 }
 0x3f9   :  { %4360 = vmatprep.subr.bf16.mxu0 %v7831_v21  ;;  %2446 = vmatpush1.bf16.msra.mxu1 %v6986_v14  ;;  %v7853_v14 = vld [vmem:[%s10233_s2 + $0xb0] ss:$36 sps:$4 sm:$0xff]  }
 0x3fa   :  { %2447 = vmatprep.subr.bf16.mxu1 %v6992_v12  ;;  %v7859_v12 = vld [vmem:[%s10233_s2 + $0x2a8] ss:$36 sps:$4 sm:$0xff]  }
 0x3fc   :  { %4361 = vmatpush3.bf16.msra.mxu0 %v7839_v18 }
 0x3fd   :  { %4362 = vmatprep.subr.bf16.mxu0 %v7845_v15  ;;  %2448 = vmatpush1.bf16.msra.mxu1 %v7000_v31  ;;  %v7867_v31 = vld [vmem:[%s10233_s2 + $0x68] ss:$36 sps:$4 sm:$0xff]  }
 0x3fe   :  { %2449 = vmatprep.subr.bf16.mxu1 %v7006_v24  ;;  %v7873_v24 = vld [vmem:[%s10233_s2 + $0x260] ss:$36 sps:$4 sm:$0xff]  }
 0x400   :  { %4363 = vmatpush3.bf16.msra.mxu0 %v7853_v14 }
 0x401   :  { %4364 = vmatprep.subr.bf16.mxu0 %v7859_v12  ;;  %2450 = vmatpush1.bf16.msra.mxu1 %v7014_v33  ;;  %v7881_v33 = vld [vmem:[%s10233_s2 + $0x20] ss:$36 sps:$4 sm:$0xff]  }
 0x402   :  { %2451 = vmatprep.subr.bf16.mxu1 %v7020_v57  ;;  %v7887_v57 = vld [vmem:[%s10233_s2 + $0x204] ss:$36 sps:$4 sm:$0xff]  }
 0x404   :  { %4365 = vmatpush3.bf16.msra.mxu0 %v7867_v31 }
 0x405   :  { %4366 = vmatprep.subr.bf16.mxu0 %v7873_v24  ;;  %2452 = vmatpush1.bf16.msra.mxu1 %v7028_v37  ;;  %v7896_v37 = vld [vmem:[%s10233_s2 + $0x200] ss:$36 sps:$4 sm:$0xff]  }
 0x406   :  { %2453 = vmatprep.subr.bf16.mxu1 %v7034_v40  ;;  %v10819_v40 = vld [vmem:[#allocation21_spill] sm:$0xff] }
 0x408   :  { %4367 = vmatpush3.bf16.msra.mxu0 %v7881_v33 }
 0x409   :  { %2482 = vmatprep.subr.bf16.mxu0 %v7887_v57  ;;  %2454 = vmatpush1.bf16.msra.mxu1 %v7042_v42  ;;  %v10820_v42 = vld [vmem:[#allocation27_spill] sm:$0xff] }
 0x40a   :  { %2455 = vmatprep.subr.bf16.mxu1 %v7048_v44  ;;  %v10821_v44 = vld [vmem:[#allocation28_spill] sm:$0xff] }
 0x40b   :  { %2333 = vmatmul.mubr.bf16.vlgmr.msra.gmra.mxu0 %v7380_v38  ;;  %v10840_v38 = vld [vmem:[#allocation47_spill] sm:$0xff] }
 0x40c   :  { %2483 = vmatpush1.bf16.msra.mxu0 %v7896_v37 }
 0x40d   :  { %2484 = vmatprep.subr.bf16.mxu0 %v7056_v46  ;;  %2456 = vmatpush2.bf16.msra.mxu1 %v7062_v53  ;;  %v10822_v46 = vld [vmem:[#allocation29_spill] sm:$0xff]  ;;  %v10823_v53 = vld [vmem:[#allocation30_spill] sm:$0xff] }
 0x40e   :  { %2457 = vmatprep.subr.bf16.mxu1 %v7068_v50  ;;  %v10824_v50 = vld [vmem:[#allocation31_spill] sm:$0xff] }
 0x410   :  { %2485 = vmatpush1.bf16.msra.mxu0 %v7074_v55  ;;  %v10825_v55 = vld [vmem:[#allocation32_spill] sm:$0xff] }
 0x411   :  { %2486 = vmatprep.subr.bf16.mxu0 %v7080_v7  ;;  %2458 = vmatpush2.bf16.msra.mxu1 %v7086_v30  ;;  %v10826_v7 = vld [vmem:[#allocation33_spill] sm:$0xff]  ;;  %v10827_v30 = vld [vmem:[#allocation34_spill] sm:$0xff] }
 0x412   :  { %2459 = vmatprep.subr.bf16.mxu1 %v7092_v35  ;;  %v10828_v35 = vld [vmem:[#allocation35_spill] sm:$0xff] }
 0x414   :  { %2487 = vmatpush1.bf16.msra.mxu0 %v7098_v63  ;;  %v10829_v63 = vld [vmem:[#allocation36_spill] sm:$0xff] }
 0x415   :  { %2488 = vmatprep.subr.bf16.mxu0 %v7104_v19  ;;  %2460 = vmatpush2.bf16.msra.mxu1 %v7110_v52  ;;  %v10830_v19 = vld [vmem:[#allocation37_spill] sm:$0xff]  ;;  %v10831_v52 = vld [vmem:[#allocation38_spill] sm:$0xff] }
 0x416   :  { %2461 = vmatprep.subr.bf16.mxu1 %v7116_v49  ;;  %v10832_v49 = vld [vmem:[#allocation39_spill] sm:$0xff] }
 0x418   :  { %2489 = vmatpush1.bf16.msra.mxu0 %v7122_v28  ;;  %v10833_v28 = vld [vmem:[#allocation40_spill] sm:$0xff] }
 0x419   :  { %2490 = vmatprep.subr.bf16.mxu0 %v7128_v47  ;;  %2462 = vmatpush2.bf16.msra.mxu1 %v7134_v43  ;;  %v10834_v47 = vld [vmem:[#allocation41_spill] sm:$0xff]  ;;  %v10835_v43 = vld [vmem:[#allocation42_spill] sm:$0xff] }
 0x41a   :  { %2463 = vmatprep.subr.bf16.mxu1 %v7140_v51  ;;  %v10836_v51 = vld [vmem:[#allocation43_spill] sm:$0xff] }
 0x41c   :  { %2491 = vmatpush1.bf16.msra.mxu0 %v7146_v8  ;;  %v10837_v8 = vld [vmem:[#allocation44_spill] sm:$0xff] }
 0x41d   :  { %2492 = vmatprep.subr.bf16.mxu0 %v7152_v22  ;;  %2464 = vmatpush2.bf16.msra.mxu1 %v7158_v17  ;;  %v10838_v22 = vld [vmem:[#allocation45_spill] sm:$0xff]  ;;  %v10839_v17 = vld [vmem:[#allocation46_spill] sm:$0xff] }
 0x41e   :  { %2465 = vmatprep.subr.bf16.mxu1 %v10819_v40  ;;  %v10841_v40 = vld [vmem:[#allocation48_spill] sm:$0xff] }
 0x420   :  { %2493 = vmatpush1.bf16.msra.mxu0 %v10820_v42  ;;  %v10842_v42 = vld [vmem:[#allocation49_spill] sm:$0xff] }
 0x421   :  { %2494 = vmatprep.subr.bf16.mxu0 %v10821_v44  ;;  %2466 = vmatpush2.bf16.msra.mxu1 %v10822_v46  ;;  %v10843_v44 = vld [vmem:[#allocation50_spill] sm:$0xff]  ;;  %v10844_v46 = vld [vmem:[#allocation51_spill] sm:$0xff] }
 0x422   :  { %2467 = vmatprep.subr.bf16.mxu1 %v10823_v53  ;;  %v10845_v53 = vld [vmem:[#allocation52_spill] sm:$0xff] }
 0x424   :  { %2495 = vmatpush1.bf16.msra.mxu0 %v10824_v50  ;;  %v10846_v50 = vld [vmem:[#allocation53_spill] sm:$0xff] }
 0x425   :  { %2496 = vmatprep.subr.bf16.mxu0 %v10825_v55  ;;  %2468 = vmatpush2.bf16.msra.mxu1 %v10826_v7  ;;  %v10847_v55 = vld [vmem:[#allocation54_spill] sm:$0xff] }
 0x426   :  { %2469 = vmatprep.subr.bf16.mxu1 %v10827_v30  ;;  %v10848_v7 = vld [vmem:[#allocation86_spill] sm:$0xff] }
 0x427   :  { %v342_v30 = vadd.f32 %v10848_v7, %v10665_v23 }
 0x428   :  { %2497 = vmatpush1.bf16.msra.mxu0 %v10828_v35 }
 0x429   :  { %2498 = vmatprep.subr.bf16.mxu0 %v10829_v63  ;;  %2470 = vmatpush2.bf16.msra.mxu1 %v10830_v19 }
 0x42a   :  { %2525 = vmatprep.subr.bf16.mxu1 %v10831_v52  ;;  %v10849_v52 = vld [vmem:[#allocation88_spill] sm:$0xff] }
 0x42c   :  { %2499 = vmatpush2.bf16.msra.mxu0 %v10832_v49  ;;  %v346_v49 = vadd.f32 %v10849_v52, %v10665_v23 }
 0x42d   :  { %2500 = vmatprep.subr.bf16.mxu0 %v10833_v28 }
 0x430   :  { %2501 = vmatpush2.bf16.msra.mxu0 %v10834_v47 }
 0x431   :  { %2502 = vmatprep.subr.bf16.mxu0 %v10835_v43 }
 0x434   :  { %2503 = vmatpush2.bf16.msra.mxu0 %v10836_v51 }
 0x435   :  { %2504 = vmatprep.subr.bf16.mxu0 %v10837_v8  ;;  %v10850_v8 = vld [vmem:[#allocation87_spill] sm:$0xff] }
 0x438   :  { %2505 = vmatpush2.bf16.msra.mxu0 %v10838_v22  ;;  %v344_v22 = vadd.f32 %v10850_v8, %v10669_v1 }
 0x439   :  { %2506 = vmatprep.subr.bf16.mxu0 %v10839_v17 }
 0x43c   :  { %2507 = vmatpush2.bf16.msra.mxu0 %v10840_v38 }
 0x43d   :  { %2508 = vmatprep.subr.bf16.mxu0 %v10841_v40  ;;  %v10851_v40 = vld [vmem:[#allocation89_spill] sm:$0xff] }
 0x440   :  { %2509 = vmatpush2.bf16.msra.mxu0 %v10842_v42  ;;  %v348_v42 = vadd.f32 %v10851_v40, %v10669_v1 }
 0x441   :  { %2510 = vmatprep.subr.bf16.mxu0 %v10843_v44 }
 0x444   :  { %2511 = vmatpush2.bf16.msra.mxu0 %v10844_v46 }
 0x445   :  { %2512 = vmatprep.subr.bf16.mxu0 %v10845_v53 }
 0x448   :  { %2513 = vmatpush2.bf16.msra.mxu0 %v10846_v50 }
 0x449   :  { %2568 = vmatprep.subr.bf16.mxu0 %v10847_v55 }
 0x46b   :  { %v2162_v35 = vpop.f32.mrf.mxu0 }
 0x46c   :  { %v2395_v63 = vadd.f32 %v2162_v35, %v342_v30  ;;  %v2205_v35 = vpop.f32.mrf.mxu1 }
 0x46d   :  { %v2164_v19 = vpop.f32.mrf.mxu0 }
 0x46e   :  { %v4243_v28 = vmul.f32 -1.442695, %v2395_v63  ;;  %v2396_v17 = vadd.f32 %v2164_v19, %v344_v22  ;;  %v2207_v63 = vpop.f32.mrf.mxu1 }
 0x46f   :  { %v2166_v47 = vpop.f32.mrf.mxu0 }
 0x470   :  { %4905 = vpow2.f32 %v4243_v28  ;;  %v2397_v43 = vadd.f32 %v2166_v47, %v346_v49  ;;  %v4244_v44 = vmul.f32 -1.442695, %v2396_v17  ;;  %v10852_v49 = vld [vmem:[#allocation55_spill] sm:$0xff]  ;;  %v2209_v47 = vpop.f32.mrf.mxu1 }
 0x471   :  { %v2168_v38 = vpop.f32.mrf.mxu0  ;;  %v2423_v19 = vadd.f32 %v10852_v49, %v2205_v35  ;;  %v2424_v40 = vadd.f32 %v10852_v49, %v2209_v47 }
 0x472   :  { %v4245_v51 = vmul.f32 -1.442695, %v2397_v43  ;;  %v2398_v46 = vadd.f32 %v2168_v38, %v348_v42  ;;  %v10853_v43 = vld [vmem:[#allocation12_spill] sm:$0xff] }
 0x474   :  { %4907 = vpow2.f32 %v4245_v51  ;;  %v4246_v55 = vmul.f32 -1.442695, %v2398_v46  ;;  %v449_v51 = vadd.f32 %v10853_v43, %v6147_v2 }
 0x475   :  { %4909 = vpow2.f32 %v4244_v44  ;;  %v10854_v44 = vld [vmem:[#allocation15_spill] sm:$0xff] }
 0x476   :  { %v452_v46 = vadd.f32 %v10854_v44, %v6147_v2 }
 0x47d   :  { %v4906_v53 = vpop.eup %4905 }
 0x47e   :  { %v2411_v50 = vadd.f32 1.0, %v4906_v53 }
 0x480   :  { %4911 = vrcp.f32 %v2411_v50 }
 0x481   :  { %v4908_v7 = vpop.eup %4907  ;;  %4913 = vpow2.f32 %v4246_v55 }
 0x482   :  { %v2413_v30 = vadd.f32 1.0, %v4908_v7  ;;  %v4910_v52 = vpop.eup %4909 }
 0x483   :  { %v2412_v38 = vadd.f32 1.0, %v4910_v52 }
 0x484   :  { %4915 = vrcp.f32 %v2413_v30 }
 0x48d   :  { %v4912_v28 = vpop.eup %4911 }
 0x48e   :  { %v2425_v8 = vmul.f32 %v4912_v28, %v2423_v19  ;;  %v4914_v22 = vpop.eup %4913 }
 0x48f   :  { %v2414_v55 = vadd.f32 1.0, %v4914_v22 }
 0x490   :  { %v2427_v17 = vadd.f32 %v2425_v8, %v449_v51  ;;  %v2211_v8 = vpop.f32.mrf.mxu1 }
 0x491   :  { %v4916_v42 = vpop.eup %4915 }
 0x492   :  { %4917 = vtanh.f32 %v2427_v17  ;;  %v2426_v53 = vmul.f32 %v4916_v42, %v2424_v40 }
 0x493   :  { %4919 = vrcp.f32 %v2412_v38 }
 0x494   :  { %v2428_v50 = vadd.f32 %v2426_v53, %v452_v46 }
 0x496   :  { %4921 = vtanh.f32 %v2428_v50 }
 0x497   :  { %4923 = vrcp.f32 %v2414_v55 }
 0x49f   :  { %v4918_v7 = vpop.eup %4917 }
 0x4a0   :  { %v2431_v30 = vsub.f32 %v7356_v41, %v4918_v7  ;;  %v4920_v35 = vpop.eup %4919 }
 0x4a2   :  { %v2433_v19 = vmul.f32 %v4920_v35, %v2431_v30 }
 0x4a3   :  { %v4922_v28 = vpop.eup %4921 }
 0x4a4   :  { %v2432_v52 = vsub.f32 %v7358_v10, %v4922_v28  ;;  %v7962_v49 = vadd.f32 %v4918_v7, %v2433_v19  ;;  %v4924_v47 = vpop.eup %4923 }
 0x4a6   :  { %v2434_v43 = vmul.f32 %v4924_v47, %v2432_v52 }
 0x4a8   :  { %v7964_v51 = vadd.f32 %v4922_v28, %v2434_v43 }
 0x4ab   :  { %v2291_v17 = vpop.f32.mrf.mxu1  ;;  %v2248_v46 = vpop.f32.mrf.mxu0 }
 0x4ac   :  { %v2341_v38 = vadd.f32 %v2291_v17, %v2207_v63 }
 0x4ad   :  { %v2293_v22 = vpop.f32.mrf.mxu1  ;;  %v2250_v50 = vpop.f32.mrf.mxu0 }
 0x4ae   :  { %v2345_v40 = vadd.f32 %v2341_v38, %v6835_v45  ;;  %v2342_v7 = vadd.f32 %v2293_v22, %v2248_v46 }
 0x4af   :  { %v2295_v42 = vpop.f32.mrf.mxu1  ;;  %v2252_v30 = vpop.f32.mrf.mxu0 }
 0x4b0   :  { %v4239_v44 = vmul.f32 -1.442695, %v2345_v40  ;;  %v2343_v41 = vadd.f32 %v2295_v42, %v2211_v8  ;;  %v2346_v19 = vadd.f32 %v2342_v7, %v6841_v25  ;;  %v7979_v7 = vld [vmem:[%s10238_s6] ss:$0 sm:$0xff] }
 0x4b1   :  { %v2297_v55 = vpop.f32.mrf.mxu1  ;;  %v2254_v38 = vpop.f32.mrf.mxu0 }
 0x4b2   :  { %4925 = vpow2.f32 %v4239_v44  ;;  %v2347_v53 = vadd.f32 %v2343_v41, %v6835_v45  ;;  %v2344_v35 = vadd.f32 %v2297_v55, %v2252_v30  ;;  %v4240_v47 = vmul.f32 -1.442695, %v2346_v19  ;;  %v7973_v41 = vld [vmem:[%s10237_s7] ss:$0 sm:$0xff] }
 0x4b3   :  { %v2373_v30 = vadd.f32 %v7979_v7, %v2250_v50 }
 0x4b4   :  { %v4241_v10 = vmul.f32 -1.442695, %v2347_v53  ;;  %v2348_v28 = vadd.f32 %v2344_v35, %v6841_v25 }
 0x4b6   :  { %4927 = vpow2.f32 %v4241_v10  ;;  %v4242_v8 = vmul.f32 -1.442695, %v2348_v28 }
 0x4bf   :  { %v4926_v63 = vpop.eup %4925 }
 0x4c0   :  { %v2361_v52 = vadd.f32 1.0, %v4926_v63 }
 0x4c2   :  { %4929 = vrcp.f32 %v2361_v52 }
 0x4c3   :  { %v4928_v43 = vpop.eup %4927  ;;  %4931 = vpow2.f32 %v4240_v47 }
 0x4c4   :  { %v2363_v17 = vadd.f32 1.0, %v4928_v43  ;;  %4933 = vpow2.f32 %v4242_v8  ;;  %v2374_v8 = vadd.f32 %v7979_v7, %v2254_v38 }
 0x4c6   :  { %4935 = vrcp.f32 %v2363_v17 }
 0x4cb   :  { %v4368_v40 = vpop.f32.mrf.mxu0 }
 0x4cd   :  { %v4369_v42 = vpop.f32.mrf.mxu0 }
 0x4ce   :  { %v4370_v22 = vadd.f32 %v4369_v42, %v4368_v40 }
 0x4cf   :  { %v4371_v44 = vpop.f32.mrf.mxu0  ;;  %v4930_v53 = vpop.eup %4929 }
 0x4d0   :  { %v2375_v46 = vadd.f32 %v7973_v41, %v4370_v22  ;;  %v4932_v55 = vpop.eup %4931 }
 0x4d1   :  { %v4372_v10 = vpop.f32.mrf.mxu0  ;;  %v4934_v63 = vpop.eup %4933  ;;  %v2362_v43 = vadd.f32 1.0, %v4932_v55 }
 0x4d2   :  { %v2377_v35 = vmul.f32 %v4930_v53, %v2375_v46  ;;  %v4373_v19 = vadd.f32 %v4372_v10, %v4371_v44  ;;  %v2364_v40 = vadd.f32 1.0, %v4934_v63  ;;  %v7996_v63 = vpack.c.bf16 %v7964_v51, %v7962_v49 }
 0x4d3   :  { %v4936_v47 = vpop.eup %4935 }
 0x4d4   :  { %v2379_v28 = vadd.f32 %v2377_v35, %v2373_v30  ;;  %v2376_v52 = vadd.f32 %v7973_v41, %v4373_v19 }
 0x4d6   :  { %4937 = vtanh.f32 %v2379_v28  ;;  %v2378_v17 = vmul.f32 %v4936_v47, %v2376_v52  ;;  %v10873_v28 = vld [vmem:[#allocation74_spill] sm:$0xff]  ;;  %v10874_v52 = vld [vmem:[#allocation75_spill] sm:$0xff]  ;;  %v10875_v47 = vld [vmem:[#allocation76_spill] sm:$0xff] }
 0x4d7   :  { %4939 = vrcp.f32 %v2362_v43  ;;  %v10876_v43 = vld [vmem:[#allocation77_spill] sm:$0xff] }
 0x4d8   :  { %v2380_v42 = vadd.f32 %v2378_v17, %v2374_v8  ;;  %v10877_v8 = vld [vmem:[#allocation78_spill] sm:$0xff]  ;;  %v10878_v17 = vld [vmem:[#allocation79_spill] sm:$0xff] }
 0x4da   :  { %4941 = vtanh.f32 %v2380_v42  ;;  %v10880_v42 = vld [vmem:[#allocation82_spill] sm:$0xff] }
 0x4db   :  { %4943 = vrcp.f32 %v2364_v40  ;;  %v10879_v40 = vld [vmem:[#allocation80_spill] sm:$0xff] }
 0x4e3   :  { %v4938_v22 = vpop.eup %4937 }
 0x4e4   :  { %v2383_v50 = vsub.f32 %v7370_v32, %v4938_v22  ;;  %v4940_v46 = vpop.eup %4939  ;;  %v10855_v32 = vld [vmem:[#allocation56_spill] sm:$0xff] }
 0x4e6   :  { %v2385_v10 = vmul.f32 %v4940_v46, %v2383_v50  ;;  %v10882_v50 = vld [vmem:[#allocation83_spill] sm:$0xff]  ;;  %v10883_v46 = vld [vmem:[#allocation84_spill] sm:$0xff] }
 0x4e7   :  { %v4942_v44 = vpop.eup %4941 }
 0x4e8   :  { %v2384_v53 = vsub.f32 %v7372_v6, %v4942_v44  ;;  %v4944_v30 = vpop.eup %4943  ;;  %v7986_v55 = vadd.f32 %v4938_v22, %v2385_v10  ;;  %v10856_v6 = vld [vmem:[#allocation57_spill] sm:$0xff]  ;;  %v10886_v10 = vld [vmem:[#allocation99_spill] sm:$0xff] }
 0x4e9   :  { %v10881_v22 = vld [vmem:[#allocation81_spill] sm:$0xff] }
 0x4ea   :  { %v2386_v35 = vmul.f32 %v4944_v30, %v2384_v53  ;;  %v10885_v53 = vld [vmem:[#allocation98_spill] sm:$0xff]  ;;  %v10887_v30 = vld [vmem:[#allocation100_spill] sm:$0xff] }
 0x4ec   :  { %v7988_v38 = vadd.f32 %v4942_v44, %v2386_v35  ;;  %v10884_v44 = vld [vmem:[#allocation85_spill] sm:$0xff] }
 0x4ed   :  { %v10888_v35 = vld [vmem:[#allocation101_spill] sm:$0xff] }
 0x4ee   :  { %v7992_v19 = vpack.c.bf16 %v7988_v38, %v7986_v55 }
 0x4f0   :  { %2471 = vmatprep.mubr.bf16.mxu1 %v7992_v19  ;;  %2514 = vmatprep.mubr.bf16.mxu0 %v7992_v19 }
 0x4f1   :  { %2472 = vmatmul.mubr.bf16.vlgmr.msra.gmra.mxu1 %v7996_v63  ;;  %2515 = vmatmul.mubr.bf16.vlgmr.msra.gmra.mxu0 %v7996_v63 }
 0x4f2   :  { %2526 = vmatpush1.bf16.msra.mxu1 %v7389_v26  ;;  %2569 = vmatpush1.bf16.msra.mxu0 %v7395_v48  ;;  %v10857_v26 = vld [vmem:[#allocation58_spill] sm:$0xff]  ;;  %v10858_v48 = vld [vmem:[#allocation59_spill] sm:$0xff] }
 0x4f3   :  { %2557 = vmatprep.mubr.bf16.mxu1 %v7992_v19  ;;  %2600 = vmatprep.mubr.bf16.mxu0 %v7992_v19 }
 0x4f4   :  { %2527 = vmatprep.subr.bf16.mxu1 %v7403_v11  ;;  %2570 = vmatprep.subr.bf16.mxu0 %v7409_v4  ;;  %v10859_v11 = vld [vmem:[#allocation60_spill] sm:$0xff]  ;;  %v10860_v4 = vld [vmem:[#allocation61_spill] sm:$0xff] }
 0x4f6   :  { %2528 = vmatpush1.bf16.msra.mxu1 %v7415_v16  ;;  %2571 = vmatpush1.bf16.msra.mxu0 %v7421_v56  ;;  %v10861_v16 = vld [vmem:[#allocation62_spill] sm:$0xff]  ;;  %v10862_v56 = vld [vmem:[#allocation63_spill] sm:$0xff] }
 0x4f7   :  { %2529 = vmatprep.subr.bf16.mxu1 %v7427_v5  ;;  %2572 = vmatprep.subr.bf16.mxu0 %v7433_v58  ;;  %v10863_v5 = vld [vmem:[#allocation64_spill] sm:$0xff]  ;;  %v10864_v58 = vld [vmem:[#allocation65_spill] sm:$0xff] }
 0x4fa   :  { %2530 = vmatpush1.bf16.msra.mxu1 %v7439_v0  ;;  %2573 = vmatpush1.bf16.msra.mxu0 %v7445_v34  ;;  %v10865_v0 = vld [vmem:[#allocation66_spill] sm:$0xff]  ;;  %v10866_v34 = vld [vmem:[#allocation67_spill] sm:$0xff] }
 0x4fb   :  { %2531 = vmatprep.subr.bf16.mxu1 %v7451_v62  ;;  %2574 = vmatprep.subr.bf16.mxu0 %v7457_v9  ;;  %v10867_v62 = vld [vmem:[#allocation68_spill] sm:$0xff]  ;;  %v10868_v9 = vld [vmem:[#allocation69_spill] sm:$0xff] }
 0x4fe   :  { %2532 = vmatpush1.bf16.msra.mxu1 %v7463_v27  ;;  %2575 = vmatpush1.bf16.msra.mxu0 %v7469_v36  ;;  %v10869_v27 = vld [vmem:[#allocation70_spill] sm:$0xff]  ;;  %v10870_v36 = vld [vmem:[#allocation71_spill] sm:$0xff] }
 0x4ff   :  { %2533 = vmatprep.subr.bf16.mxu1 %v7475_v3  ;;  %2576 = vmatprep.subr.bf16.mxu0 %v7481_v39  ;;  %v10871_v3 = vld [vmem:[#allocation72_spill] sm:$0xff]  ;;  %v10872_v39 = vld [vmem:[#allocation73_spill] sm:$0xff] }
 0x502   :  { %2534 = vmatpush1.bf16.msra.mxu1 %v10855_v32  ;;  %2577 = vmatpush1.bf16.msra.mxu0 %v10856_v6  ;;  %v10889_v32 = vld [vmem:[#allocation102_spill] sm:$0xff]  ;;  %v10890_v6 = vld [vmem:[#allocation103_spill] sm:$0xff] }
 0x503   :  { %2535 = vmatprep.subr.bf16.mxu1 %v10857_v26  ;;  %2578 = vmatprep.subr.bf16.mxu0 %v10858_v48  ;;  %v10891_v26 = vld [vmem:[#allocation104_spill] sm:$0xff]  ;;  %v10892_v48 = vld [vmem:[#allocation105_spill] sm:$0xff] }
 0x506   :  { %2536 = vmatpush1.bf16.msra.mxu1 %v10859_v11  ;;  %2579 = vmatpush1.bf16.msra.mxu0 %v10860_v4  ;;  %v10893_v11 = vld [vmem:[#allocation106_spill] sm:$0xff]  ;;  %v10894_v4 = vld [vmem:[#allocation107_spill] sm:$0xff] }
 0x507   :  { %2537 = vmatprep.subr.bf16.mxu1 %v10861_v16  ;;  %2580 = vmatprep.subr.bf16.mxu0 %v10862_v56  ;;  %v10895_v16 = vld [vmem:[#allocation108_spill] sm:$0xff]  ;;  %v10896_v56 = vld [vmem:[#allocation109_spill] sm:$0xff] }
 0x50a   :  { %2538 = vmatpush1.bf16.msra.mxu1 %v10863_v5  ;;  %2581 = vmatpush1.bf16.msra.mxu0 %v10864_v58  ;;  %v10897_v5 = vld [vmem:[#allocation110_spill] sm:$0xff]  ;;  %v10898_v58 = vld [vmem:[#allocation111_spill] sm:$0xff] }
 0x50b   :  { %2539 = vmatprep.subr.bf16.mxu1 %v10865_v0  ;;  %2582 = vmatprep.subr.bf16.mxu0 %v10866_v34  ;;  %v10899_v0 = vld [vmem:[#allocation112_spill] sm:$0xff]  ;;  %v10900_v34 = vld [vmem:[#allocation113_spill] sm:$0xff] }
 0x50e   :  { %2540 = vmatpush1.bf16.msra.mxu1 %v10867_v62  ;;  %2583 = vmatpush1.bf16.msra.mxu0 %v10868_v9  ;;  %v10901_v62 = vld [vmem:[#allocation114_spill] sm:$0xff]  ;;  %v10902_v9 = vld [vmem:[#allocation115_spill] sm:$0xff] }
 0x50f   :  { %2541 = vmatprep.subr.bf16.mxu1 %v10869_v27  ;;  %2584 = vmatprep.subr.bf16.mxu0 %v10870_v36  ;;  %v10903_v27 = vld [vmem:[#allocation116_spill] sm:$0xff]  ;;  %v8207_v36 = vld [vmem:[%s10233_s2 + $0x174] ss:$36 sps:$4 sm:$0xff]  }
 0x512   :  { %2542 = vmatpush2.bf16.msra.mxu1 %v10871_v3  ;;  %2585 = vmatpush2.bf16.msra.mxu0 %v10872_v39  ;;  %v8213_v3 = vld [vmem:[%s10233_s2 + $0x3f0] ss:$36 sps:$4 sm:$0xff]  }
 0x513   :  { %2543 = vmatprep.subr.bf16.mxu1 %v10873_v28  ;;  %2586 = vmatprep.subr.bf16.mxu0 %v10874_v52  ;;  %v8219_v39 = vld [vmem:[%s10233_s2 + $0x3ac] ss:$36 sps:$4 sm:$0xff]  }
 0x514   :  { %v8225_v28 = vld [vmem:[%s10233_s2 + $0x170] ss:$36 sps:$4 sm:$0xff]  }
 0x515   :  { %v8231_v52 = vld [vmem:[%s10233_s2 + $0x12c] ss:$36 sps:$4 sm:$0xff]  }
 0x516   :  { %2544 = vmatpush2.bf16.msra.mxu1 %v10875_v47  ;;  %2587 = vmatpush2.bf16.msra.mxu0 %v10876_v43  ;;  %v8237_v47 = vld [vmem:[%s10233_s2 + $0x3a8] ss:$36 sps:$4 sm:$0xff]  }
 0x517   :  { %2545 = vmatprep.subr.bf16.mxu1 %v10877_v8  ;;  %2588 = vmatprep.subr.bf16.mxu0 %v10878_v17  ;;  %v8243_v43 = vld [vmem:[%s10233_s2 + $0x364] ss:$36 sps:$4 sm:$0xff]  }
 0x518   :  { %v8249_v8 = vld [vmem:[%s10233_s2 + $0x128] ss:$36 sps:$4 sm:$0xff]  }
 0x519   :  { %v8255_v17 = vld [vmem:[%s10233_s2 + $0xe4] ss:$36 sps:$4 sm:$0xff]  }
 0x51a   :  { %2546 = vmatpush2.bf16.msra.mxu1 %v10879_v40  ;;  %2589 = vmatpush2.bf16.msra.mxu0 %v10880_v42  ;;  %v8261_v40 = vld [vmem:[%s10233_s2 + $0x360] ss:$36 sps:$4 sm:$0xff]  }
 0x51b   :  { %2547 = vmatprep.subr.bf16.mxu1 %v10881_v22  ;;  %2590 = vmatprep.subr.bf16.mxu0 %v10882_v50  ;;  %v8267_v42 = vld [vmem:[%s10233_s2 + $0x31c] ss:$36 sps:$4 sm:$0xff]  }
 0x51c   :  { %v8273_v22 = vld [vmem:[%s10233_s2 + $0xe0] ss:$36 sps:$4 sm:$0xff]  }
 0x51d   :  { %v8279_v50 = vld [vmem:[%s10233_s2 + $0x9c] ss:$36 sps:$4 sm:$0xff]  }
 0x51e   :  { %2548 = vmatpush2.bf16.msra.mxu1 %v10883_v46  ;;  %2591 = vmatpush2.bf16.msra.mxu0 %v10884_v44  ;;  %v8285_v46 = vld [vmem:[%s10233_s2 + $0x318] ss:$36 sps:$4 sm:$0xff]  }
 0x51f   :  { %2549 = vmatprep.subr.bf16.mxu1 %v10885_v53  ;;  %2592 = vmatprep.subr.bf16.mxu0 %v10886_v10  ;;  %v8291_v44 = vld [vmem:[%s10233_s2 + $0x2d4] ss:$36 sps:$4 sm:$0xff]  }
 0x520   :  { %v8297_v53 = vld [vmem:[%s10233_s2 + $0x98] ss:$36 sps:$4 sm:$0xff]  }
 0x521   :  { %v8303_v10 = vld [vmem:[%s10233_s2 + $0x54] ss:$36 sps:$4 sm:$0xff]  }
 0x522   :  { %2550 = vmatpush2.bf16.msra.mxu1 %v10887_v30  ;;  %2593 = vmatpush2.bf16.msra.mxu0 %v10888_v35  ;;  %10904 = vst [vmem:[#allocation21_spill] sm:$0xff] %v8303_v10  ;;  %v8309_v30 = vld [vmem:[%s10233_s2 + $0x2d0] ss:$36 sps:$4 sm:$0xff]  }
 0x523   :  { %2551 = vmatprep.subr.bf16.mxu1 %v10889_v32  ;;  %2594 = vmatprep.subr.bf16.mxu0 %v10890_v6  ;;  %10905 = vst [vmem:[#allocation27_spill] sm:$0xff] %v8309_v30  ;;  %v8315_v35 = vld [vmem:[%s10233_s2 + $0x28c] ss:$36 sps:$4 sm:$0xff]  }
 0x524   :  { %10906 = vst [vmem:[#allocation28_spill] sm:$0xff] %v8315_v35  ;;  %v8321_v32 = vld [vmem:[%s10233_s2 + $0x50] ss:$36 sps:$4 sm:$0xff]  }
 0x525   :  { %10907 = vst [vmem:[#allocation29_spill] sm:$0xff] %v8321_v32  ;;  %v8327_v6 = vld [vmem:[%s10233_s2 + $0xc] ss:$36 sps:$4 sm:$0xff]  }
 0x526   :  { %2552 = vmatpush2.bf16.msra.mxu1 %v10891_v26  ;;  %2595 = vmatpush2.bf16.msra.mxu0 %v10892_v48  ;;  %10908 = vst [vmem:[#allocation30_spill] sm:$0xff] %v8327_v6  ;;  %v8333_v26 = vld [vmem:[%s10233_s2 + $0x288] ss:$36 sps:$4 sm:$0xff]  }
 0x527   :  { %2553 = vmatprep.subr.bf16.mxu1 %v10893_v11  ;;  %2596 = vmatprep.subr.bf16.mxu0 %v10894_v4  ;;  %10909 = vst [vmem:[#allocation31_spill] sm:$0xff] %v8333_v26  ;;  %v8339_v48 = vld [vmem:[%s10233_s2 + $0x244] ss:$36 sps:$4 sm:$0xff]  }
 0x528   :  { %10910 = vst [vmem:[#allocation32_spill] sm:$0xff] %v8339_v48  ;;  %v8345_v11 = vld [vmem:[%s10233_s2 + $0x8] ss:$36 sps:$4 sm:$0xff]  }
 0x529   :  { %10911 = vst [vmem:[#allocation33_spill] sm:$0xff] %v8345_v11  ;;  %v8351_v4 = vld [vmem:[%s10233_s2 + $0x444] ss:$36 sps:$4 sm:$0xff]  }
 0x52a   :  { %2554 = vmatpush2.bf16.msra.mxu1 %v10895_v16  ;;  %2597 = vmatpush2.bf16.msra.mxu0 %v10896_v56  ;;  %10912 = vst [vmem:[#allocation34_spill] sm:$0xff] %v8351_v4  ;;  %v8357_v16 = vld [vmem:[%s10233_s2 + $0x240] ss:$36 sps:$4 sm:$0xff]   ;;  %v8363_v56 = vld [vmem:[%s10233_s2 + $0x20c] ss:$36 sps:$4 sm:$0xff]  }
 0x52b   :  { %2555 = vmatprep.subr.bf16.mxu1 %v10897_v5  ;;  %2598 = vmatprep.subr.bf16.mxu0 %v10898_v58  ;;  %10913 = vst [vmem:[#allocation35_spill] sm:$0xff] %v8357_v16  ;;  %10914 = vst [vmem:[#allocation36_spill] sm:$0xff] %v8363_v56  ;;  %v8369_v5 = vld [vmem:[%s10233_s2 + $0x440] ss:$36 sps:$4 sm:$0xff]  }
 0x52c   :  { %10915 = vst [vmem:[#allocation37_spill] sm:$0xff] %v8369_v5  ;;  %v8375_v58 = vld [vmem:[%s10233_s2 + $0x3fc] ss:$36 sps:$4 sm:$0xff]  }
 0x52d   :  { %10916 = vst [vmem:[#allocation38_spill] sm:$0xff] %v8375_v58 }
 0x52e   :  { %2556 = vmatpush2.bf16.msra.mxu1 %v7751_v13  ;;  %2599 = vmatpush2.bf16.msra.mxu0 %v10899_v0  ;;  %v8077_v13 = vld [vmem:[%s10233_s2 + $0x1b4] ss:$36 sps:$4 sm:$0xff]  }
 0x52f   :  { %4374 = vmatprep.subr.bf16.mxu1 %v10900_v34  ;;  %2750 = vmatprep.subr.bf16.mxu0 %v10901_v62  ;;  %v8381_v0 = vld [vmem:[%s10233_s2 + $0x3f8] ss:$36 sps:$4 sm:$0xff]   ;;  %v8393_v62 = vld [vmem:[%s10233_s2 + $0x3b0] ss:$36 sps:$4 sm:$0xff]  }
 0x530   :  { %10917 = vst [vmem:[#allocation39_spill] sm:$0xff] %v8381_v0  ;;  %v8387_v34 = vld [vmem:[%s10233_s2 + $0x3b4] ss:$36 sps:$4 sm:$0xff]   ;;  %10919 = vst [vmem:[#allocation41_spill] sm:$0xff] %v8393_v62 }
 0x531   :  { %2558 = vmatmul.mubr.bf16.vlgmr.msra.gmra.mxu1 %v7996_v63  ;;  %2601 = vmatmul.mubr.bf16.vlgmr.msra.gmra.mxu0 %v7996_v63  ;;  %10918 = vst [vmem:[#allocation40_spill] sm:$0xff] %v8387_v34 }
 0x532   :  { %4375 = vmatpush3.bf16.msra.mxu1 %v7777_v61  ;;  %2643 = vmatprep.mubr.bf16.mxu1 %v7992_v19  ;;  %v8085_v61 = vld [vmem:[%s10233_s2 + $0x1b0] ss:$36 sps:$4 sm:$0xff]   ;;  %v8105_v19 = vld [vmem:[%s10233_s2 + $0x124] ss:$36 sps:$4 sm:$0xff]  }
 0x533   :  { %4376 = vmatprep.subr.bf16.mxu1 %v10902_v9  ;;  %2751 = vmatpush1.bf16.msra.mxu0 %v7790_v60  ;;  %v8091_v60 = vld [vmem:[%s10233_s2 + $0x16c] ss:$36 sps:$4 sm:$0xff]  }
 0x534   :  { %2752 = vmatprep.subr.bf16.mxu0 %v8077_v13  ;;  %v8399_v9 = vld [vmem:[%s10233_s2 + $0x36c] ss:$36 sps:$4 sm:$0xff]  }
 0x535   :  { %10920 = vst [vmem:[#allocation42_spill] sm:$0xff] %v8399_v9 }
 0x536   :  { %4377 = vmatpush3.bf16.msra.mxu1 %v10903_v27  ;;  %v8405_v27 = vld [vmem:[%s10233_s2 + $0x368] ss:$36 sps:$4 sm:$0xff]  }
 0x537   :  { %4378 = vmatprep.subr.bf16.mxu1 %v7803_v59  ;;  %2753 = vmatpush1.bf16.msra.mxu0 %v8085_v61  ;;  %v8099_v59 = vld [vmem:[%s10233_s2 + $0x168] ss:$36 sps:$4 sm:$0xff]   ;;  %10921 = vst [vmem:[#allocation43_spill] sm:$0xff] %v8405_v27 }
 0x538   :  { %2754 = vmatprep.subr.bf16.mxu0 %v8091_v60 }
 0x53a   :  { %4379 = vmatpush3.bf16.msra.mxu1 %v7811_v20  ;;  %v8119_v20 = vld [vmem:[%s10233_s2 + $0xdc] ss:$36 sps:$4 sm:$0xff]  }
 0x53b   :  { %4380 = vmatprep.subr.bf16.mxu1 %v7817_v54  ;;  %2755 = vmatpush1.bf16.msra.mxu0 %v8099_v59  ;;  %v8113_v54 = vld [vmem:[%s10233_s2 + $0x120] ss:$36 sps:$4 sm:$0xff]  }
 0x53c   :  { %2756 = vmatprep.subr.bf16.mxu0 %v8105_v19 }
 0x53e   :  { %4381 = vmatpush3.bf16.msra.mxu1 %v7825_v29  ;;  %v8127_v29 = vld [vmem:[%s10233_s2 + $0xd8] ss:$36 sps:$4 sm:$0xff]  }
 0x53f   :  { %4382 = vmatprep.subr.bf16.mxu1 %v7831_v21  ;;  %2757 = vmatpush1.bf16.msra.mxu0 %v8113_v54  ;;  %v8133_v21 = vld [vmem:[%s10233_s2 + $0x94] ss:$36 sps:$4 sm:$0xff]  }
 0x540   :  { %2758 = vmatprep.subr.bf16.mxu0 %v8119_v20 }
 0x542   :  { %4383 = vmatpush3.bf16.msra.mxu1 %v7839_v18  ;;  %v8141_v18 = vld [vmem:[%s10233_s2 + $0x90] ss:$36 sps:$4 sm:$0xff]  }
 0x543   :  { %4384 = vmatprep.subr.bf16.mxu1 %v7845_v15  ;;  %2759 = vmatpush1.bf16.msra.mxu0 %v8127_v29  ;;  %v8147_v15 = vld [vmem:[%s10233_s2 + $0x4c] ss:$36 sps:$4 sm:$0xff]  }
 0x544   :  { %2760 = vmatprep.subr.bf16.mxu0 %v8133_v21 }
 0x546   :  { %4385 = vmatpush3.bf16.msra.mxu1 %v7853_v14  ;;  %v8155_v14 = vld [vmem:[%s10233_s2 + $0x48] ss:$36 sps:$4 sm:$0xff]  }
 0x547   :  { %4386 = vmatprep.subr.bf16.mxu1 %v7859_v12  ;;  %2761 = vmatpush1.bf16.msra.mxu0 %v8141_v18  ;;  %v8161_v12 = vld [vmem:[%s10233_s2 + $0x4] ss:$36 sps:$4 sm:$0xff]  }
 0x548   :  { %2762 = vmatprep.subr.bf16.mxu0 %v8147_v15 }
 0x54a   :  { %4387 = vmatpush3.bf16.msra.mxu1 %v7867_v31  ;;  %v8169_v31 = vld [vmem:[%s10233_s2] ss:$36 sps:$4 sm:$0xff]  }
 0x54b   :  { %4388 = vmatprep.subr.bf16.mxu1 %v7873_v24  ;;  %2763 = vmatpush1.bf16.msra.mxu0 %v8155_v14  ;;  %v8175_v24 = vld [vmem:[%s10233_s2 + $0x43c] ss:$36 sps:$4 sm:$0xff]  }
 0x54c   :  { %2764 = vmatprep.subr.bf16.mxu0 %v8161_v12 }
 0x54e   :  { %4389 = vmatpush3.bf16.msra.mxu1 %v7881_v33  ;;  %v8183_v33 = vld [vmem:[%s10233_s2 + $0x1bc] ss:$36 sps:$4 sm:$0xff]  }
 0x54f   :  { %2793 = vmatprep.subr.bf16.mxu1 %v7887_v57  ;;  %2765 = vmatpush1.bf16.msra.mxu0 %v8169_v31  ;;  %v8189_v57 = vld [vmem:[%s10233_s2 + $0x438] ss:$36 sps:$4 sm:$0xff]  }
 0x550   :  { %2766 = vmatprep.subr.bf16.mxu0 %v8175_v24 }
 0x551   :  { %2644 = vmatmul.mubr.bf16.vlgmr.msra.gmra.mxu1 %v7996_v63  ;;  %v8195_v63 = vld [vmem:[%s10233_s2 + $0x3f4] ss:$36 sps:$4 sm:$0xff]  }
 0x552   :  { %2794 = vmatpush1.bf16.msra.mxu1 %v7896_v37  ;;  %v8201_v37 = vld [vmem:[%s10233_s2 + $0x1b8] ss:$36 sps:$4 sm:$0xff]  }
 0x553   :  { %2795 = vmatprep.subr.bf16.mxu1 %v8183_v33  ;;  %2767 = vmatpush2.bf16.msra.mxu0 %v8189_v57 }
 0x554   :  { %2768 = vmatprep.subr.bf16.mxu0 %v8195_v63 }
 0x556   :  { %2796 = vmatpush1.bf16.msra.mxu1 %v8201_v37 }
 0x557   :  { %2797 = vmatprep.subr.bf16.mxu1 %v8207_v36  ;;  %2769 = vmatpush2.bf16.msra.mxu0 %v8213_v3 }
 0x558   :  { %2770 = vmatprep.subr.bf16.mxu0 %v8219_v39 }
 0x55a   :  { %2798 = vmatpush1.bf16.msra.mxu1 %v8225_v28 }
 0x55b   :  { %2799 = vmatprep.subr.bf16.mxu1 %v8231_v52  ;;  %2771 = vmatpush2.bf16.msra.mxu0 %v8237_v47 }
 0x55c   :  { %2772 = vmatprep.subr.bf16.mxu0 %v8243_v43 }
 0x55e   :  { %2800 = vmatpush1.bf16.msra.mxu1 %v8249_v8 }
 0x55f   :  { %2801 = vmatprep.subr.bf16.mxu1 %v8255_v17  ;;  %2773 = vmatpush2.bf16.msra.mxu0 %v8261_v40 }
 0x560   :  { %2774 = vmatprep.subr.bf16.mxu0 %v8267_v42 }
 0x562   :  { %2802 = vmatpush1.bf16.msra.mxu1 %v8273_v22 }
 0x563   :  { %2803 = vmatprep.subr.bf16.mxu1 %v8279_v50  ;;  %2775 = vmatpush2.bf16.msra.mxu0 %v8285_v46 }
 0x564   :  { %2776 = vmatprep.subr.bf16.mxu0 %v8291_v44 }
 0x566   :  { %2804 = vmatpush1.bf16.msra.mxu1 %v8297_v53 }
 0x567   :  { %2805 = vmatprep.subr.bf16.mxu1 %v8303_v10  ;;  %2777 = vmatpush2.bf16.msra.mxu0 %v8309_v30 }
 0x568   :  { %2778 = vmatprep.subr.bf16.mxu0 %v8315_v35  ;;  %v10934_v35 = vld [vmem:[#allocation4_spill] sm:$0xff] }
 0x56a   :  { %2806 = vmatpush1.bf16.msra.mxu1 %v8321_v32 }
 0x56b   :  { %2807 = vmatprep.subr.bf16.mxu1 %v8327_v6  ;;  %2779 = vmatpush2.bf16.msra.mxu0 %v8333_v26  ;;  %v10933_v26 = vld [vmem:[#allocation19_spill] sm:$0xff] }
 0x56c   :  { %2780 = vmatprep.subr.bf16.mxu0 %v8339_v48  ;;  %v354_v6 = vadd.f32 %v10933_v26, %v10669_v1 }
 0x56e   :  { %2808 = vmatpush1.bf16.msra.mxu1 %v8345_v11 }
 0x56f   :  { %2809 = vmatprep.subr.bf16.mxu1 %v8351_v4  ;;  %2781 = vmatpush2.bf16.msra.mxu0 %v8357_v16 }
 0x570   :  { %2836 = vmatprep.subr.bf16.mxu0 %v8363_v56  ;;  %v10932_v56 = vld [vmem:[#allocation3_spill] sm:$0xff] }
 0x571   :  { %v356_v16 = vadd.f32 %v10932_v56, %v10665_v23 }
 0x572   :  { %2810 = vmatpush2.bf16.msra.mxu1 %v8369_v5 }
 0x573   :  { %2811 = vmatprep.subr.bf16.mxu1 %v8375_v58 }
 0x576   :  { %2812 = vmatpush2.bf16.msra.mxu1 %v8381_v0 }
 0x577   :  { %2813 = vmatprep.subr.bf16.mxu1 %v8387_v34  ;;  %v8411_v34 = vld [vmem:[%s10233_s2 + $0x324] ss:$36 sps:$4 sm:$0xff]  }
 0x578   :  { %10922 = vst [vmem:[#allocation44_spill] sm:$0xff] %v8411_v34 }
 0x57a   :  { %2814 = vmatpush2.bf16.msra.mxu1 %v8393_v62  ;;  %v8417_v62 = vld [vmem:[%s10233_s2 + $0x320] ss:$36 sps:$4 sm:$0xff]  }
 0x57b   :  { %2815 = vmatprep.subr.bf16.mxu1 %v8399_v9  ;;  %10923 = vst [vmem:[#allocation45_spill] sm:$0xff] %v8417_v62  ;;  %v8423_v9 = vld [vmem:[%s10233_s2 + $0x2dc] ss:$36 sps:$4 sm:$0xff]  }
 0x57c   :  { %10924 = vst [vmem:[#allocation46_spill] sm:$0xff] %v8423_v9 }
 0x57e   :  { %2816 = vmatpush2.bf16.msra.mxu1 %v8405_v27  ;;  %v8429_v27 = vld [vmem:[%s10233_s2 + $0x2d8] ss:$36 sps:$4 sm:$0xff]  }
 0x57f   :  { %2817 = vmatprep.subr.bf16.mxu1 %v8411_v34  ;;  %10925 = vst [vmem:[#allocation47_spill] sm:$0xff] %v8429_v27  ;;  %v8435_v34 = vld [vmem:[%s10233_s2 + $0x294] ss:$36 sps:$4 sm:$0xff]  }
 0x580   :  { %10926 = vst [vmem:[#allocation48_spill] sm:$0xff] %v8435_v34 }
 0x582   :  { %2818 = vmatpush2.bf16.msra.mxu1 %v8417_v62  ;;  %v8441_v62 = vld [vmem:[%s10233_s2 + $0x290] ss:$36 sps:$4 sm:$0xff]  }
 0x583   :  { %2819 = vmatprep.subr.bf16.mxu1 %v8423_v9  ;;  %10927 = vst [vmem:[#allocation49_spill] sm:$0xff] %v8441_v62  ;;  %v8447_v9 = vld [vmem:[%s10233_s2 + $0x24c] ss:$36 sps:$4 sm:$0xff]  }
 0x584   :  { %10928 = vst [vmem:[#allocation50_spill] sm:$0xff] %v8447_v9 }
 0x586   :  { %2820 = vmatpush2.bf16.msra.mxu1 %v8429_v27  ;;  %v8453_v27 = vld [vmem:[%s10233_s2 + $0x248] ss:$36 sps:$4 sm:$0xff]  }
 0x587   :  { %2821 = vmatprep.subr.bf16.mxu1 %v8435_v34  ;;  %10929 = vst [vmem:[#allocation51_spill] sm:$0xff] %v8453_v27  ;;  %v8459_v34 = vld [vmem:[%s10233_s2 + $0x214] ss:$36 sps:$4 sm:$0xff]  }
 0x588   :  { %10930 = vst [vmem:[#allocation52_spill] sm:$0xff] %v8459_v34 }
 0x58a   :  { %2822 = vmatpush2.bf16.msra.mxu1 %v8441_v62  ;;  %v10931_v62 = vld [vmem:[#allocation17_spill] sm:$0xff] }
 0x58b   :  { %2823 = vmatprep.subr.bf16.mxu1 %v8447_v9  ;;  %v352_v0 = vadd.f32 %v10931_v62, %v10665_v23  ;;  %v358_v62 = vadd.f32 %v10934_v35, %v10669_v1 }
 0x58e   :  { %2824 = vmatpush2.bf16.msra.mxu1 %v8453_v27 }
 0x58f   :  { %2879 = vmatprep.subr.bf16.mxu1 %v8459_v34 }
 0x5b1   :  { %v2473_v58 = vpop.f32.mrf.mxu1 }
 0x5b2   :  { %v2706_v5 = vadd.f32 %v2473_v58, %v352_v0 }
 0x5b3   :  { %v2475_v9 = vpop.f32.mrf.mxu1 }
 0x5b4   :  { %v4251_v4 = vmul.f32 -1.442695, %v2706_v5  ;;  %v2707_v32 = vadd.f32 %v2475_v9, %v354_v6  ;;  %v8473_v6 = vld [vmem:[%s10235_s4] ss:$0 sm:$0xff] }
 0x5b5   :  { %v2477_v11 = vpop.f32.mrf.mxu1  ;;  %10935 = vst [vmem:[#allocation53_spill] sm:$0xff] %v8473_v6 }
 0x5b6   :  { %4945 = vpow2.f32 %v4251_v4  ;;  %v2708_v27 = vadd.f32 %v2477_v11, %v356_v16  ;;  %v4252_v30 = vmul.f32 -1.442695, %v2707_v32 }
 0x5b7   :  { %v2479_v34 = vpop.f32.mrf.mxu1 }
 0x5b8   :  { %v4253_v48 = vmul.f32 -1.442695, %v2708_v27  ;;  %v2709_v58 = vadd.f32 %v2479_v34, %v358_v62 }
 0x5ba   :  { %4947 = vpow2.f32 %v4253_v48  ;;  %v4254_v56 = vmul.f32 -1.442695, %v2709_v58  ;;  %v2516_v48 = vpop.f32.mrf.mxu0 }
 0x5bb   :  { %4949 = vpow2.f32 %v4252_v30  ;;  %v2734_v35 = vadd.f32 %v8473_v6, %v2516_v48  ;;  %v10936_v30 = vld [vmem:[#allocation91_spill] sm:$0xff] }
 0x5bc   :  { %v2518_v11 = vpop.f32.mrf.mxu0  ;;  %v457_v34 = vadd.f32 %v10936_v30, %v6147_v2 }
 0x5be   :  { %v2520_v26 = vpop.f32.mrf.mxu0 }
 0x5bf   :  { %v2735_v58 = vadd.f32 %v8473_v6, %v2520_v26 }
 0x5c3   :  { %v4946_v0 = vpop.eup %4945 }
 0x5c4   :  { %v2722_v10 = vadd.f32 1.0, %v4946_v0 }
 0x5c6   :  { %4951 = vrcp.f32 %v2722_v10 }
 0x5c7   :  { %v4948_v5 = vpop.eup %4947  ;;  %4953 = vpow2.f32 %v4254_v56  ;;  %v10937_v56 = vld [vmem:[#allocation93_spill] sm:$0xff] }
 0x5c8   :  { %v2724_v4 = vadd.f32 1.0, %v4948_v5  ;;  %v4950_v16 = vpop.eup %4949  ;;  %v460_v5 = vadd.f32 %v10937_v56, %v6147_v2 }
 0x5c9   :  { %v2723_v62 = vadd.f32 1.0, %v4950_v16 }
 0x5ca   :  { %4955 = vrcp.f32 %v2724_v4 }
 0x5d3   :  { %v4952_v32 = vpop.eup %4951 }
 0x5d4   :  { %v2736_v10 = vmul.f32 %v4952_v32, %v2734_v35  ;;  %v4954_v9 = vpop.eup %4953 }
 0x5d5   :  { %v2725_v48 = vadd.f32 1.0, %v4954_v9 }
 0x5d6   :  { %v2738_v27 = vadd.f32 %v2736_v10, %v457_v34 }
 0x5d7   :  { %v4956_v0 = vpop.eup %4955 }
 0x5d8   :  { %4957 = vtanh.f32 %v2738_v27  ;;  %v2737_v4 = vmul.f32 %v4956_v0, %v2735_v58  ;;  %v2522_v27 = vpop.f32.mrf.mxu0 }
 0x5d9   :  { %4959 = vrcp.f32 %v2723_v62 }
 0x5da   :  { %v2739_v1 = vadd.f32 %v2737_v4, %v460_v5 }
 0x5dc   :  { %4961 = vtanh.f32 %v2739_v1 }
 0x5dd   :  { %4963 = vrcp.f32 %v2725_v48 }
 0x5e5   :  { %v4958_v23 = vpop.eup %4957 }
 0x5e6   :  { %v2742_v30 = vsub.f32 %v7962_v49, %v4958_v23  ;;  %v4960_v35 = vpop.eup %4959 }
 0x5e8   :  { %v2744_v32 = vmul.f32 %v4960_v35, %v2742_v30 }
 0x5e9   :  { %v4962_v34 = vpop.eup %4961 }
 0x5ea   :  { %v2743_v16 = vsub.f32 %v7964_v51, %v4962_v34  ;;  %v8483_v26 = vadd.f32 %v4958_v23, %v2744_v32  ;;  %v4964_v10 = vpop.eup %4963 }
 0x5ec   :  { %v2745_v6 = vmul.f32 %v4964_v10, %v2743_v16 }
 0x5ee   :  { %v8485_v56 = vadd.f32 %v4962_v34, %v2745_v6 }
 0x5f1   :  { %v2602_v62 = vpop.f32.mrf.mxu0  ;;  %v2559_v4 = vpop.f32.mrf.mxu1 }
 0x5f2   :  { %v2652_v58 = vadd.f32 %v2602_v62, %v2518_v11 }
 0x5f3   :  { %v2604_v9 = vpop.f32.mrf.mxu0  ;;  %v2561_v23 = vpop.f32.mrf.mxu1 }
 0x5f4   :  { %v2656_v1 = vadd.f32 %v2652_v58, %v6835_v45  ;;  %v2653_v35 = vadd.f32 %v2604_v9, %v2559_v4 }
 0x5f5   :  { %v2606_v0 = vpop.f32.mrf.mxu0  ;;  %v2563_v6 = vpop.f32.mrf.mxu1 }
 0x5f6   :  { %v4247_v5 = vmul.f32 -1.442695, %v2656_v1  ;;  %v2654_v49 = vadd.f32 %v2606_v0, %v2522_v27  ;;  %v2657_v34 = vadd.f32 %v2653_v35, %v6841_v25 }
 0x5f7   :  { %v2608_v30 = vpop.f32.mrf.mxu0  ;;  %v2565_v0 = vpop.f32.mrf.mxu1 }
 0x5f8   :  { %4965 = vpow2.f32 %v4247_v5  ;;  %v2658_v48 = vadd.f32 %v2654_v49, %v6835_v45  ;;  %v2655_v32 = vadd.f32 %v2608_v30, %v2563_v6  ;;  %v4248_v62 = vmul.f32 -1.442695, %v2657_v34 }
 0x5f9   :  { %v2684_v6 = vadd.f32 %v7979_v7, %v2561_v23 }
 0x5fa   :  { %v4249_v51 = vmul.f32 -1.442695, %v2658_v48  ;;  %v2659_v16 = vadd.f32 %v2655_v32, %v6841_v25 }
 0x5fc   :  { %4967 = vpow2.f32 %v4249_v51  ;;  %v4250_v27 = vmul.f32 -1.442695, %v2659_v16 }
 0x605   :  { %v4966_v11 = vpop.eup %4965 }
 0x606   :  { %v2672_v10 = vadd.f32 1.0, %v4966_v11 }
 0x608   :  { %4969 = vrcp.f32 %v2672_v10 }
 0x609   :  { %v4968_v58 = vpop.eup %4967  ;;  %4971 = vpow2.f32 %v4248_v62 }
 0x60a   :  { %v2674_v1 = vadd.f32 1.0, %v4968_v58  ;;  %4973 = vpow2.f32 %v4250_v27  ;;  %v2685_v27 = vadd.f32 %v7979_v7, %v2565_v0 }
 0x60c   :  { %4975 = vrcp.f32 %v2674_v1 }
 0x611   :  { %v4390_v5 = vpop.f32.mrf.mxu1 }
 0x613   :  { %v4391_v49 = vpop.f32.mrf.mxu1 }
 0x614   :  { %v4392_v9 = vadd.f32 %v4391_v49, %v4390_v5 }
 0x615   :  { %v4393_v4 = vpop.f32.mrf.mxu1  ;;  %v4970_v51 = vpop.eup %4969 }
 0x616   :  { %v2686_v48 = vadd.f32 %v7973_v41, %v4392_v9  ;;  %v4972_v35 = vpop.eup %4971 }
 0x617   :  { %v4394_v30 = vpop.f32.mrf.mxu1  ;;  %v4974_v11 = vpop.eup %4973  ;;  %v2673_v58 = vadd.f32 1.0, %v4972_v35 }
 0x618   :  { %v2688_v32 = vmul.f32 %v4970_v51, %v2686_v48  ;;  %v4395_v34 = vadd.f32 %v4394_v30, %v4393_v4  ;;  %v2675_v5 = vadd.f32 1.0, %v4974_v11  ;;  %v8536_v11 = vld [vmem:[%s10233_s2 + $0x1cc] ss:$36 sps:$4 sm:$0xff]  }
 0x619   :  { %v4976_v62 = vpop.eup %4975 }
 0x61a   :  { %v2690_v16 = vadd.f32 %v2688_v32, %v2684_v6  ;;  %v2687_v10 = vadd.f32 %v7973_v41, %v4395_v34  ;;  %v8507_v32 = vpack.c.bf16 %v8485_v56, %v8483_v26  ;;  %v8530_v34 = vld [vmem:[%s10233_s2 + $0x1c4] ss:$36 sps:$4 sm:$0xff]  }
 0x61c   :  { %4977 = vtanh.f32 %v2690_v16  ;;  %v2689_v1 = vmul.f32 %v4976_v62, %v2687_v10  ;;  %v8542_v16 = vld [vmem:[%s10233_s2 + $0x1c0] ss:$36 sps:$4 sm:$0xff]   ;;  %v8548_v10 = vld [vmem:[%s10233_s2 + $0x1c8] ss:$36 sps:$4 sm:$0xff]  }
 0x61d   :  { %4979 = vrcp.f32 %v2673_v58  ;;  %v8554_v62 = vld [vmem:[%s10233_s2 + $0x17c] ss:$36 sps:$4 sm:$0xff]   ;;  %v8560_v58 = vld [vmem:[%s10233_s2 + $0x184] ss:$36 sps:$4 sm:$0xff]  }
 0x61e   :  { %v2691_v49 = vadd.f32 %v2689_v1, %v2685_v27  ;;  %v8566_v27 = vld [vmem:[%s10233_s2 + $0x178] ss:$36 sps:$4 sm:$0xff]   ;;  %v8572_v1 = vld [vmem:[%s10233_s2 + $0x180] ss:$36 sps:$4 sm:$0xff]  }
 0x620   :  { %4981 = vtanh.f32 %v2691_v49  ;;  %v8584_v49 = vld [vmem:[%s10233_s2 + $0x13c] ss:$36 sps:$4 sm:$0xff]  }
 0x621   :  { %4983 = vrcp.f32 %v2675_v5  ;;  %v8578_v5 = vld [vmem:[%s10233_s2 + $0x134] ss:$36 sps:$4 sm:$0xff]  }
 0x629   :  { %v4978_v9 = vpop.eup %4977 }
 0x62a   :  { %v2694_v23 = vsub.f32 %v7986_v55, %v4978_v9  ;;  %v4980_v48 = vpop.eup %4979  ;;  %v8516_v55 = vld [vmem:[%s10233_s2 + $0x208] ss:$36 sps:$4 sm:$0xff]  }
 0x62c   :  { %v2696_v30 = vmul.f32 %v4980_v48, %v2694_v23  ;;  %v8596_v23 = vld [vmem:[%s10233_s2 + $0x138] ss:$36 sps:$4 sm:$0xff]   ;;  %v8602_v48 = vld [vmem:[%s10233_s2 + $0xec] ss:$36 sps:$4 sm:$0xff]  }
 0x62d   :  { %v4982_v4 = vpop.eup %4981 }
 0x62e   :  { %v2695_v51 = vsub.f32 %v7988_v38, %v4982_v4  ;;  %v4984_v41 = vpop.eup %4983  ;;  %v8497_v35 = vadd.f32 %v4978_v9, %v2696_v30  ;;  %v8522_v38 = vld [vmem:[%s10233_s2 + $0x210] ss:$36 sps:$4 sm:$0xff]  }
 0x62f   :  { %v8590_v9 = vld [vmem:[%s10233_s2 + $0x130] ss:$36 sps:$4 sm:$0xff]  }
 0x630   :  { %v2697_v6 = vmul.f32 %v4984_v41, %v2695_v51  ;;  %v8614_v51 = vld [vmem:[%s10233_s2 + $0xe8] ss:$36 sps:$4 sm:$0xff]   ;;  %v8620_v30 = vld [vmem:[%s10233_s2 + $0xf0] ss:$36 sps:$4 sm:$0xff]  }
 0x631   :  { %10938 = vst [vmem:[#allocation54_spill] sm:$0xff] %v8614_v51  ;;  %10939 = vst [vmem:[#allocation86_spill] sm:$0xff] %v8620_v30  ;;  %v8626_v41 = vld [vmem:[%s10233_s2 + $0xa4] ss:$36 sps:$4 sm:$0xff]  }
 0x632   :  { %v8499_v7 = vadd.f32 %v4982_v4, %v2697_v6  ;;  %v8608_v4 = vld [vmem:[%s10233_s2 + $0xf4] ss:$36 sps:$4 sm:$0xff]   ;;  %10940 = vst [vmem:[#allocation88_spill] sm:$0xff] %v8626_v41  ;;  %v8632_v6 = vld [vmem:[%s10233_s2 + $0xac] ss:$36 sps:$4 sm:$0xff]  }
 0x633   :  { %10941 = vst [vmem:[#allocation87_spill] sm:$0xff] %v8632_v6 }
 0x634   :  { %v8503_v0 = vpack.c.bf16 %v8499_v7, %v8497_v35 }
 0x636   :  { %2782 = vmatprep.mubr.bf16.mxu0 %v8503_v0  ;;  %2825 = vmatprep.mubr.bf16.mxu1 %v8503_v0 }
 0x637   :  { %2783 = vmatmul.mubr.bf16.vlgmr.msra.gmra.mxu0 %v8507_v32  ;;  %2826 = vmatmul.mubr.bf16.vlgmr.msra.gmra.mxu1 %v8507_v32 }
 0x638   :  { %2837 = vmatpush1.bf16.msra.mxu0 %v8516_v55  ;;  %2880 = vmatpush1.bf16.msra.mxu1 %v8522_v38 }
 0x639   :  { %2868 = vmatprep.mubr.bf16.mxu0 %v8503_v0  ;;  %2911 = vmatprep.mubr.bf16.mxu1 %v8503_v0 }
 0x63a   :  { %2838 = vmatprep.subr.bf16.mxu0 %v8530_v34  ;;  %2881 = vmatprep.subr.bf16.mxu1 %v8536_v11 }
 0x63c   :  { %2839 = vmatpush1.bf16.msra.mxu0 %v8542_v16  ;;  %2882 = vmatpush1.bf16.msra.mxu1 %v8548_v10 }
 0x63d   :  { %2840 = vmatprep.subr.bf16.mxu0 %v8554_v62  ;;  %2883 = vmatprep.subr.bf16.mxu1 %v8560_v58 }
 0x640   :  { %2841 = vmatpush1.bf16.msra.mxu0 %v8566_v27  ;;  %2884 = vmatpush1.bf16.msra.mxu1 %v8572_v1 }
 0x641   :  { %2842 = vmatprep.subr.bf16.mxu0 %v8578_v5  ;;  %2885 = vmatprep.subr.bf16.mxu1 %v8584_v49 }
 0x644   :  { %2843 = vmatpush1.bf16.msra.mxu0 %v8590_v9  ;;  %2886 = vmatpush1.bf16.msra.mxu1 %v8596_v23 }
 0x645   :  { %2844 = vmatprep.subr.bf16.mxu0 %v8602_v48  ;;  %2887 = vmatprep.subr.bf16.mxu1 %v8608_v4 }
 0x648   :  { %2845 = vmatpush1.bf16.msra.mxu0 %v8614_v51  ;;  %2888 = vmatpush1.bf16.msra.mxu1 %v8620_v30  ;;  %v8638_v51 = vld [vmem:[%s10233_s2 + $0xa0] ss:$36 sps:$4 sm:$0xff]   ;;  %v8644_v30 = vld [vmem:[%s10233_s2 + $0xa8] ss:$36 sps:$4 sm:$0xff]  }
 0x649   :  { %2846 = vmatprep.subr.bf16.mxu0 %v8626_v41  ;;  %2889 = vmatprep.subr.bf16.mxu1 %v8632_v6  ;;  %10942 = vst [vmem:[#allocation89_spill] sm:$0xff] %v8638_v51  ;;  %10943 = vst [vmem:[#allocation55_spill] sm:$0xff] %v8644_v30  ;;  %v8650_v41 = vld [vmem:[%s10233_s2 + $0x5c] ss:$36 sps:$4 sm:$0xff]   ;;  %v8656_v6 = vld [vmem:[%s10233_s2 + $0x64] ss:$36 sps:$4 sm:$0xff]  }
 0x64a   :  { %10944 = vst [vmem:[#allocation12_spill] sm:$0xff] %v8650_v41  ;;  %10945 = vst [vmem:[#allocation15_spill] sm:$0xff] %v8656_v6 }
 0x64c   :  { %2847 = vmatpush1.bf16.msra.mxu0 %v8638_v51  ;;  %2890 = vmatpush1.bf16.msra.mxu1 %v8644_v30  ;;  %v8662_v51 = vld [vmem:[%s10233_s2 + $0x58] ss:$36 sps:$4 sm:$0xff]   ;;  %v8668_v30 = vld [vmem:[%s10233_s2 + $0x60] ss:$36 sps:$4 sm:$0xff]  }
 0x64d   :  { %2848 = vmatprep.subr.bf16.mxu0 %v8650_v41  ;;  %2891 = vmatprep.subr.bf16.mxu1 %v8656_v6  ;;  %10946 = vst [vmem:[#allocation56_spill] sm:$0xff] %v8662_v51  ;;  %10947 = vst [vmem:[#allocation57_spill] sm:$0xff] %v8668_v30  ;;  %v8674_v41 = vld [vmem:[%s10233_s2 + $0x14] ss:$36 sps:$4 sm:$0xff]   ;;  %v8680_v6 = vld [vmem:[%s10233_s2 + $0x1c] ss:$36 sps:$4 sm:$0xff]  }
 0x64e   :  { %10948 = vst [vmem:[#allocation58_spill] sm:$0xff] %v8674_v41  ;;  %10949 = vst [vmem:[#allocation59_spill] sm:$0xff] %v8680_v6 }
 0x650   :  { %2849 = vmatpush1.bf16.msra.mxu0 %v8662_v51  ;;  %2892 = vmatpush1.bf16.msra.mxu1 %v8668_v30  ;;  %v8686_v51 = vld [vmem:[%s10233_s2 + $0x10] ss:$36 sps:$4 sm:$0xff]   ;;  %v8692_v30 = vld [vmem:[%s10233_s2 + $0x18] ss:$36 sps:$4 sm:$0xff]  }
 0x651   :  { %2850 = vmatprep.subr.bf16.mxu0 %v8674_v41  ;;  %2893 = vmatprep.subr.bf16.mxu1 %v8680_v6  ;;  %10950 = vst [vmem:[#allocation60_spill] sm:$0xff] %v8686_v51  ;;  %10951 = vst [vmem:[#allocation61_spill] sm:$0xff] %v8692_v30  ;;  %v8698_v41 = vld [vmem:[%s10233_s2 + $0x44c] ss:$36 sps:$4 sm:$0xff]   ;;  %v8704_v6 = vld [vmem:[%s10233_s2 + $0x454] ss:$36 sps:$4 sm:$0xff]  }
 0x652   :  { %10952 = vst [vmem:[#allocation62_spill] sm:$0xff] %v8698_v41  ;;  %10953 = vst [vmem:[#allocation63_spill] sm:$0xff] %v8704_v6 }
 0x654   :  { %2851 = vmatpush1.bf16.msra.mxu0 %v8686_v51  ;;  %2894 = vmatpush1.bf16.msra.mxu1 %v8692_v30  ;;  %v8710_v51 = vld [vmem:[%s10233_s2 + $0x448] ss:$36 sps:$4 sm:$0xff]   ;;  %v8716_v30 = vld [vmem:[%s10233_s2 + $0x450] ss:$36 sps:$4 sm:$0xff]  }
 0x655   :  { %2852 = vmatprep.subr.bf16.mxu0 %v8698_v41  ;;  %2895 = vmatprep.subr.bf16.mxu1 %v8704_v6  ;;  %10954 = vst [vmem:[#allocation64_spill] sm:$0xff] %v8710_v51  ;;  %10955 = vst [vmem:[#allocation65_spill] sm:$0xff] %v8716_v30  ;;  %v8722_v41 = vld [vmem:[%s10233_s2 + $0x404] ss:$36 sps:$4 sm:$0xff]   ;;  %v8728_v6 = vld [vmem:[%s10233_s2 + $0x40c] ss:$36 sps:$4 sm:$0xff]  }
 0x656   :  { %10956 = vst [vmem:[#allocation66_spill] sm:$0xff] %v8722_v41  ;;  %10957 = vst [vmem:[#allocation67_spill] sm:$0xff] %v8728_v6 }
 0x658   :  { %2853 = vmatpush2.bf16.msra.mxu0 %v8710_v51  ;;  %2896 = vmatpush2.bf16.msra.mxu1 %v8716_v30  ;;  %v8734_v51 = vld [vmem:[%s10233_s2 + $0x400] ss:$36 sps:$4 sm:$0xff]   ;;  %v8740_v30 = vld [vmem:[%s10233_s2 + $0x408] ss:$36 sps:$4 sm:$0xff]  }
 0x659   :  { %2854 = vmatprep.subr.bf16.mxu0 %v8722_v41  ;;  %2897 = vmatprep.subr.bf16.mxu1 %v8728_v6  ;;  %10958 = vst [vmem:[#allocation68_spill] sm:$0xff] %v8734_v51  ;;  %10959 = vst [vmem:[#allocation69_spill] sm:$0xff] %v8740_v30  ;;  %v8746_v41 = vld [vmem:[%s10233_s2 + $0x3bc] ss:$36 sps:$4 sm:$0xff]   ;;  %v8752_v6 = vld [vmem:[%s10233_s2 + $0x3c4] ss:$36 sps:$4 sm:$0xff]  }
 0x65a   :  { %10960 = vst [vmem:[#allocation70_spill] sm:$0xff] %v8746_v41  ;;  %10961 = vst [vmem:[#allocation71_spill] sm:$0xff] %v8752_v6 }
 0x65c   :  { %2855 = vmatpush2.bf16.msra.mxu0 %v8734_v51  ;;  %2898 = vmatpush2.bf16.msra.mxu1 %v8740_v30  ;;  %v8758_v51 = vld [vmem:[%s10233_s2 + $0x3b8] ss:$36 sps:$4 sm:$0xff]   ;;  %v8764_v30 = vld [vmem:[%s10233_s2 + $0x3c0] ss:$36 sps:$4 sm:$0xff]  }
 0x65d   :  { %2856 = vmatprep.subr.bf16.mxu0 %v8746_v41  ;;  %2899 = vmatprep.subr.bf16.mxu1 %v8752_v6  ;;  %10962 = vst [vmem:[#allocation72_spill] sm:$0xff] %v8758_v51  ;;  %10963 = vst [vmem:[#allocation73_spill] sm:$0xff] %v8764_v30  ;;  %v8770_v41 = vld [vmem:[%s10233_s2 + $0x374] ss:$36 sps:$4 sm:$0xff]   ;;  %v8776_v6 = vld [vmem:[%s10233_s2 + $0x37c] ss:$36 sps:$4 sm:$0xff]  }
 0x65e   :  { %10964 = vst [vmem:[#allocation74_spill] sm:$0xff] %v8770_v41  ;;  %10965 = vst [vmem:[#allocation75_spill] sm:$0xff] %v8776_v6 }
 0x660   :  { %2857 = vmatpush2.bf16.msra.mxu0 %v8758_v51  ;;  %2900 = vmatpush2.bf16.msra.mxu1 %v8764_v30  ;;  %v8782_v51 = vld [vmem:[%s10233_s2 + $0x370] ss:$36 sps:$4 sm:$0xff]   ;;  %v8788_v30 = vld [vmem:[%s10233_s2 + $0x378] ss:$36 sps:$4 sm:$0xff]  }
 0x661   :  { %2858 = vmatprep.subr.bf16.mxu0 %v8770_v41  ;;  %2901 = vmatprep.subr.bf16.mxu1 %v8776_v6  ;;  %10966 = vst [vmem:[#allocation76_spill] sm:$0xff] %v8782_v51  ;;  %10967 = vst [vmem:[#allocation77_spill] sm:$0xff] %v8788_v30  ;;  %v8794_v41 = vld [vmem:[%s10233_s2 + $0x32c] ss:$36 sps:$4 sm:$0xff]   ;;  %v8800_v6 = vld [vmem:[%s10233_s2 + $0x334] ss:$36 sps:$4 sm:$0xff]  }
 0x662   :  { %10968 = vst [vmem:[#allocation78_spill] sm:$0xff] %v8794_v41  ;;  %10969 = vst [vmem:[#allocation79_spill] sm:$0xff] %v8800_v6 }
 0x664   :  { %2859 = vmatpush2.bf16.msra.mxu0 %v8782_v51  ;;  %2902 = vmatpush2.bf16.msra.mxu1 %v8788_v30  ;;  %v8806_v51 = vld [vmem:[%s10233_s2 + $0x328] ss:$36 sps:$4 sm:$0xff]   ;;  %v8812_v30 = vld [vmem:[%s10233_s2 + $0x330] ss:$36 sps:$4 sm:$0xff]  }
 0x665   :  { %2860 = vmatprep.subr.bf16.mxu0 %v8794_v41  ;;  %2903 = vmatprep.subr.bf16.mxu1 %v8800_v6  ;;  %10970 = vst [vmem:[#allocation80_spill] sm:$0xff] %v8806_v51  ;;  %10971 = vst [vmem:[#allocation82_spill] sm:$0xff] %v8812_v30  ;;  %v8818_v41 = vld [vmem:[%s10233_s2 + $0x2e4] ss:$36 sps:$4 sm:$0xff]   ;;  %v8824_v6 = vld [vmem:[%s10233_s2 + $0x2ec] ss:$36 sps:$4 sm:$0xff]  }
 0x666   :  { %10972 = vst [vmem:[#allocation81_spill] sm:$0xff] %v8818_v41  ;;  %10973 = vst [vmem:[#allocation83_spill] sm:$0xff] %v8824_v6 }
 0x668   :  { %2861 = vmatpush2.bf16.msra.mxu0 %v8806_v51  ;;  %2904 = vmatpush2.bf16.msra.mxu1 %v8812_v30  ;;  %v8830_v51 = vld [vmem:[%s10233_s2 + $0x2e0] ss:$36 sps:$4 sm:$0xff]   ;;  %v8836_v30 = vld [vmem:[%s10233_s2 + $0x2e8] ss:$36 sps:$4 sm:$0xff]  }
 0x669   :  { %2862 = vmatprep.subr.bf16.mxu0 %v8818_v41  ;;  %2905 = vmatprep.subr.bf16.mxu1 %v8824_v6  ;;  %10974 = vst [vmem:[#allocation84_spill] sm:$0xff] %v8830_v51  ;;  %10975 = vst [vmem:[#allocation85_spill] sm:$0xff] %v8836_v30  ;;  %v8842_v41 = vld [vmem:[%s10233_s2 + $0x29c] ss:$36 sps:$4 sm:$0xff]   ;;  %v8848_v6 = vld [vmem:[%s10233_s2 + $0x2a4] ss:$36 sps:$4 sm:$0xff]  }
 0x66a   :  { %10976 = vst [vmem:[#allocation98_spill] sm:$0xff] %v8842_v41  ;;  %10977 = vst [vmem:[#allocation99_spill] sm:$0xff] %v8848_v6 }
 0x66c   :  { %2863 = vmatpush2.bf16.msra.mxu0 %v8830_v51  ;;  %2906 = vmatpush2.bf16.msra.mxu1 %v8836_v30  ;;  %v8854_v51 = vld [vmem:[%s10233_s2 + $0x298] ss:$36 sps:$4 sm:$0xff]   ;;  %v8860_v30 = vld [vmem:[%s10233_s2 + $0x2a0] ss:$36 sps:$4 sm:$0xff]  }
 0x66d   :  { %2864 = vmatprep.subr.bf16.mxu0 %v8842_v41  ;;  %2907 = vmatprep.subr.bf16.mxu1 %v8848_v6  ;;  %10978 = vst [vmem:[#allocation100_spill] sm:$0xff] %v8854_v51  ;;  %10979 = vst [vmem:[#allocation101_spill] sm:$0xff] %v8860_v30  ;;  %v8866_v41 = vld [vmem:[%s10233_s2 + $0x254] ss:$36 sps:$4 sm:$0xff]   ;;  %v8872_v6 = vld [vmem:[%s10233_s2 + $0x25c] ss:$36 sps:$4 sm:$0xff]  }
 0x66e   :  { %10980 = vst [vmem:[#allocation102_spill] sm:$0xff] %v8866_v41  ;;  %10981 = vst [vmem:[#allocation103_spill] sm:$0xff] %v8872_v6 }
 0x670   :  { %2865 = vmatpush2.bf16.msra.mxu0 %v8854_v51  ;;  %2908 = vmatpush2.bf16.msra.mxu1 %v8860_v30  ;;  %v8878_v51 = vld [vmem:[%s10233_s2 + $0x250] ss:$36 sps:$4 sm:$0xff]   ;;  %v8884_v30 = vld [vmem:[%s10233_s2 + $0x258] ss:$36 sps:$4 sm:$0xff]  }
 0x671   :  { %2866 = vmatprep.subr.bf16.mxu0 %v8866_v41  ;;  %2909 = vmatprep.subr.bf16.mxu1 %v8872_v6  ;;  %10982 = vst [vmem:[#allocation104_spill] sm:$0xff] %v8884_v30  ;;  %v8890_v41 = vld [vmem:[%s10233_s2 + $0x458] ss:$36 sps:$4 sm:$0xff]  }
 0x672   :  { %10983 = vst [vmem:[#allocation105_spill] sm:$0xff] %v8890_v41  ;;  %v8896_v6 = vld [vmem:[%s10233_s2 + $0x1fc] ss:$36 sps:$4 sm:$0xff]  }
 0x673   :  { %10984 = vst [vmem:[#allocation106_spill] sm:$0xff] %v8896_v6 }
 0x674   :  { %2867 = vmatpush2.bf16.msra.mxu0 %v8878_v51  ;;  %2910 = vmatpush2.bf16.msra.mxu1 %v8884_v30  ;;  %v8904_v30 = vld [vmem:[%s10233_s2 + $0x218] ss:$36 sps:$4 sm:$0xff]  }
 0x675   :  { %4396 = vmatprep.subr.bf16.mxu0 %v8890_v41  ;;  %3061 = vmatprep.subr.bf16.mxu1 %v8896_v6  ;;  %v8911_v41 = vld [vmem:[%s10233_s2 + $0x410] ss:$36 sps:$4 sm:$0xff]   ;;  %v8917_v6 = vld [vmem:[%s10233_s2 + $0x1f8] ss:$36 sps:$4 sm:$0xff]  }
 0x676   :  { %10985 = vst [vmem:[#allocation107_spill] sm:$0xff] %v8911_v41 }
 0x677   :  { %2869 = vmatmul.mubr.bf16.vlgmr.msra.gmra.mxu0 %v8507_v32  ;;  %2912 = vmatmul.mubr.bf16.vlgmr.msra.gmra.mxu1 %v8507_v32 }
 0x678   :  { %4397 = vmatpush3.bf16.msra.mxu0 %v8904_v30  ;;  %2954 = vmatprep.mubr.bf16.mxu0 %v8503_v0  ;;  %v8924_v0 = vld [vmem:[%s10233_s2 + $0x1d0] ss:$36 sps:$4 sm:$0xff]  }
 0x679   :  { %4398 = vmatprep.subr.bf16.mxu0 %v8911_v41  ;;  %3062 = vmatpush1.bf16.msra.mxu1 %v8917_v6  ;;  %10986 = vst [vmem:[#allocation108_spill] sm:$0xff] %v8924_v0  ;;  %v8930_v41 = vld [vmem:[%s10233_s2 + $0x3c8] ss:$36 sps:$4 sm:$0xff]  }
 0x67a   :  { %3063 = vmatprep.subr.bf16.mxu1 %v8077_v13  ;;  %v8938_v13 = vld [vmem:[%s10233_s2 + $0x188] ss:$36 sps:$4 sm:$0xff]  }
 0x67c   :  { %4399 = vmatpush3.bf16.msra.mxu0 %v8924_v0  ;;  %v8944_v0 = vld [vmem:[%s10233_s2 + $0x380] ss:$36 sps:$4 sm:$0xff]  }
 0x67d   :  { %4400 = vmatprep.subr.bf16.mxu0 %v8930_v41  ;;  %3064 = vmatpush1.bf16.msra.mxu1 %v8085_v61  ;;  %v8952_v61 = vld [vmem:[%s10233_s2 + $0x140] ss:$36 sps:$4 sm:$0xff]  }
 0x67e   :  { %3065 = vmatprep.subr.bf16.mxu1 %v8091_v60  ;;  %v8958_v60 = vld [vmem:[%s10233_s2 + $0x338] ss:$36 sps:$4 sm:$0xff]  }
 0x680   :  { %4401 = vmatpush3.bf16.msra.mxu0 %v8938_v13 }
 0x681   :  { %4402 = vmatprep.subr.bf16.mxu0 %v8944_v0  ;;  %3066 = vmatpush1.bf16.msra.mxu1 %v8099_v59  ;;  %v8966_v59 = vld [vmem:[%s10233_s2 + $0xf8] ss:$36 sps:$4 sm:$0xff]  }
 0x682   :  { %3067 = vmatprep.subr.bf16.mxu1 %v8105_v19  ;;  %v8972_v19 = vld [vmem:[%s10233_s2 + $0x2f0] ss:$36 sps:$4 sm:$0xff]  }
 0x684   :  { %4403 = vmatpush3.bf16.msra.mxu0 %v8952_v61 }
 0x685   :  { %4404 = vmatprep.subr.bf16.mxu0 %v8958_v60  ;;  %3068 = vmatpush1.bf16.msra.mxu1 %v8113_v54  ;;  %v8980_v54 = vld [vmem:[%s10233_s2 + $0xb0] ss:$36 sps:$4 sm:$0xff]  }
 0x686   :  { %3069 = vmatprep.subr.bf16.mxu1 %v8119_v20  ;;  %v8986_v20 = vld [vmem:[%s10233_s2 + $0x2a8] ss:$36 sps:$4 sm:$0xff]  }
 0x688   :  { %4405 = vmatpush3.bf16.msra.mxu0 %v8966_v59 }
 0x689   :  { %4406 = vmatprep.subr.bf16.mxu0 %v8972_v19  ;;  %3070 = vmatpush1.bf16.msra.mxu1 %v8127_v29  ;;  %v8994_v29 = vld [vmem:[%s10233_s2 + $0x68] ss:$36 sps:$4 sm:$0xff]  }
 0x68a   :  { %3071 = vmatprep.subr.bf16.mxu1 %v8133_v21  ;;  %v9000_v21 = vld [vmem:[%s10233_s2 + $0x260] ss:$36 sps:$4 sm:$0xff]  }
 0x68c   :  { %4407 = vmatpush3.bf16.msra.mxu0 %v8980_v54 }
 0x68d   :  { %4408 = vmatprep.subr.bf16.mxu0 %v8986_v20  ;;  %3072 = vmatpush1.bf16.msra.mxu1 %v8141_v18  ;;  %v9008_v18 = vld [vmem:[%s10233_s2 + $0x20] ss:$36 sps:$4 sm:$0xff]  }
 0x68e   :  { %3073 = vmatprep.subr.bf16.mxu1 %v8147_v15  ;;  %v9014_v15 = vld [vmem:[%s10233_s2 + $0x204] ss:$36 sps:$4 sm:$0xff]  }
 0x690   :  { %4409 = vmatpush3.bf16.msra.mxu0 %v8994_v29 }
 0x691   :  { %4410 = vmatprep.subr.bf16.mxu0 %v9000_v21  ;;  %3074 = vmatpush1.bf16.msra.mxu1 %v8155_v14  ;;  %v9023_v14 = vld [vmem:[%s10233_s2 + $0x200] ss:$36 sps:$4 sm:$0xff]  }
 0x692   :  { %3075 = vmatprep.subr.bf16.mxu1 %v8161_v12  ;;  %v10987_v12 = vld [vmem:[#allocation21_spill] sm:$0xff] }
 0x694   :  { %4411 = vmatpush3.bf16.msra.mxu0 %v9008_v18 }
 0x695   :  { %3104 = vmatprep.subr.bf16.mxu0 %v9014_v15  ;;  %3076 = vmatpush1.bf16.msra.mxu1 %v8169_v31  ;;  %v10988_v31 = vld [vmem:[#allocation27_spill] sm:$0xff] }
 0x696   :  { %3077 = vmatprep.subr.bf16.mxu1 %v8175_v24  ;;  %v10989_v24 = vld [vmem:[#allocation28_spill] sm:$0xff] }
 0x697   :  { %2955 = vmatmul.mubr.bf16.vlgmr.msra.gmra.mxu0 %v8507_v32  ;;  %v11010_v32 = vld [vmem:[#allocation49_spill] sm:$0xff] }
 0x698   :  { %3105 = vmatpush1.bf16.msra.mxu0 %v9023_v14 }
 0x699   :  { %3106 = vmatprep.subr.bf16.mxu0 %v8183_v33  ;;  %3078 = vmatpush2.bf16.msra.mxu1 %v8189_v57  ;;  %v10990_v33 = vld [vmem:[#allocation29_spill] sm:$0xff]  ;;  %v10991_v57 = vld [vmem:[#allocation30_spill] sm:$0xff] }
 0x69a   :  { %3079 = vmatprep.subr.bf16.mxu1 %v8195_v63  ;;  %v10992_v63 = vld [vmem:[#allocation31_spill] sm:$0xff] }
 0x69c   :  { %3107 = vmatpush1.bf16.msra.mxu0 %v8201_v37  ;;  %v10993_v37 = vld [vmem:[#allocation32_spill] sm:$0xff] }
 0x69d   :  { %3108 = vmatprep.subr.bf16.mxu0 %v8207_v36  ;;  %3080 = vmatpush2.bf16.msra.mxu1 %v8213_v3  ;;  %v10994_v36 = vld [vmem:[#allocation33_spill] sm:$0xff]  ;;  %v10995_v3 = vld [vmem:[#allocation34_spill] sm:$0xff] }
 0x69e   :  { %3081 = vmatprep.subr.bf16.mxu1 %v8219_v39  ;;  %v10996_v39 = vld [vmem:[#allocation35_spill] sm:$0xff] }
 0x6a0   :  { %3109 = vmatpush1.bf16.msra.mxu0 %v8225_v28  ;;  %v10997_v28 = vld [vmem:[#allocation36_spill] sm:$0xff] }
 0x6a1   :  { %3110 = vmatprep.subr.bf16.mxu0 %v8231_v52  ;;  %3082 = vmatpush2.bf16.msra.mxu1 %v8237_v47  ;;  %v10998_v52 = vld [vmem:[#allocation37_spill] sm:$0xff]  ;;  %v10999_v47 = vld [vmem:[#allocation38_spill] sm:$0xff] }
 0x6a2   :  { %3083 = vmatprep.subr.bf16.mxu1 %v8243_v43  ;;  %v11000_v43 = vld [vmem:[#allocation39_spill] sm:$0xff] }
 0x6a4   :  { %3111 = vmatpush1.bf16.msra.mxu0 %v8249_v8  ;;  %v11001_v8 = vld [vmem:[#allocation40_spill] sm:$0xff] }
 0x6a5   :  { %3112 = vmatprep.subr.bf16.mxu0 %v8255_v17  ;;  %3084 = vmatpush2.bf16.msra.mxu1 %v8261_v40  ;;  %v11002_v17 = vld [vmem:[#allocation41_spill] sm:$0xff]  ;;  %v11003_v40 = vld [vmem:[#allocation42_spill] sm:$0xff] }
 0x6a6   :  { %3085 = vmatprep.subr.bf16.mxu1 %v8267_v42  ;;  %v11004_v42 = vld [vmem:[#allocation43_spill] sm:$0xff] }
 0x6a8   :  { %3113 = vmatpush1.bf16.msra.mxu0 %v8273_v22  ;;  %v11005_v22 = vld [vmem:[#allocation44_spill] sm:$0xff] }
 0x6a9   :  { %3114 = vmatprep.subr.bf16.mxu0 %v8279_v50  ;;  %3086 = vmatpush2.bf16.msra.mxu1 %v8285_v46  ;;  %v11006_v50 = vld [vmem:[#allocation45_spill] sm:$0xff]  ;;  %v11007_v46 = vld [vmem:[#allocation46_spill] sm:$0xff] }
 0x6aa   :  { %3087 = vmatprep.subr.bf16.mxu1 %v8291_v44  ;;  %v11008_v44 = vld [vmem:[#allocation47_spill] sm:$0xff] }
 0x6ac   :  { %3115 = vmatpush1.bf16.msra.mxu0 %v8297_v53  ;;  %v11009_v53 = vld [vmem:[#allocation48_spill] sm:$0xff] }
 0x6ad   :  { %3116 = vmatprep.subr.bf16.mxu0 %v10987_v12  ;;  %3088 = vmatpush2.bf16.msra.mxu1 %v10988_v31  ;;  %v11011_v12 = vld [vmem:[#allocation50_spill] sm:$0xff]  ;;  %v11012_v31 = vld [vmem:[#allocation51_spill] sm:$0xff] }
 0x6ae   :  { %3089 = vmatprep.subr.bf16.mxu1 %v10989_v24  ;;  %v11013_v24 = vld [vmem:[#allocation52_spill] sm:$0xff] }
 0x6b0   :  { %3117 = vmatpush1.bf16.msra.mxu0 %v10990_v33  ;;  %v11014_v33 = vld [vmem:[#allocation22_spill] sm:$0xff] }
 0x6b1   :  { %3118 = vmatprep.subr.bf16.mxu0 %v10991_v57  ;;  %3090 = vmatpush2.bf16.msra.mxu1 %v10992_v63  ;;  %v11015_v57 = vld [vmem:[#allocation5_spill] sm:$0xff] }
 0x6b2   :  { %3091 = vmatprep.subr.bf16.mxu1 %v10993_v37  ;;  %v362_v63 = vadd.f32 %v11015_v57, %v11014_v33 }
 0x6b4   :  { %3119 = vmatpush1.bf16.msra.mxu0 %v10994_v36 }
 0x6b5   :  { %3120 = vmatprep.subr.bf16.mxu0 %v10995_v3  ;;  %3092 = vmatpush2.bf16.msra.mxu1 %v10996_v39  ;;  %v11016_v39 = vld [vmem:[#allocation7_spill] sm:$0xff] }
 0x6b6   :  { %3147 = vmatprep.subr.bf16.mxu1 %v10997_v28  ;;  %v366_v28 = vadd.f32 %v11016_v39, %v11014_v33 }
 0x6b8   :  { %3121 = vmatpush2.bf16.msra.mxu0 %v10998_v52 }
 0x6b9   :  { %3122 = vmatprep.subr.bf16.mxu0 %v10999_v47 }
 0x6bc   :  { %3123 = vmatpush2.bf16.msra.mxu0 %v11000_v43 }
 0x6bd   :  { %3124 = vmatprep.subr.bf16.mxu0 %v11001_v8 }
 0x6c0   :  { %3125 = vmatpush2.bf16.msra.mxu0 %v11002_v17  ;;  %v11017_v17 = vld [vmem:[#allocation23_spill] sm:$0xff] }
 0x6c1   :  { %3126 = vmatprep.subr.bf16.mxu0 %v11003_v40  ;;  %v11018_v40 = vld [vmem:[#allocation6_spill] sm:$0xff] }
 0x6c4   :  { %3127 = vmatpush2.bf16.msra.mxu0 %v11004_v42  ;;  %v364_v42 = vadd.f32 %v11018_v40, %v11017_v17 }
 0x6c5   :  { %3128 = vmatprep.subr.bf16.mxu0 %v11005_v22 }
 0x6c8   :  { %3129 = vmatpush2.bf16.msra.mxu0 %v11006_v50 }
 0x6c9   :  { %3130 = vmatprep.subr.bf16.mxu0 %v11007_v46  ;;  %v11019_v46 = vld [vmem:[#allocation8_spill] sm:$0xff] }
 0x6cc   :  { %3131 = vmatpush2.bf16.msra.mxu0 %v11008_v44  ;;  %v368_v44 = vadd.f32 %v11019_v46, %v11017_v17 }
 0x6cd   :  { %3132 = vmatprep.subr.bf16.mxu0 %v11009_v53 }
 0x6d0   :  { %3133 = vmatpush2.bf16.msra.mxu0 %v11010_v32 }
 0x6d1   :  { %3134 = vmatprep.subr.bf16.mxu0 %v11011_v12 }
 0x6d4   :  { %3135 = vmatpush2.bf16.msra.mxu0 %v11012_v31 }
 0x6d5   :  { %3190 = vmatprep.subr.bf16.mxu0 %v11013_v24 }
 0x6f7   :  { %v2784_v37 = vpop.f32.mrf.mxu0 }
 0x6f8   :  { %v3017_v36 = vadd.f32 %v2784_v37, %v362_v63  ;;  %v2827_v37 = vpop.f32.mrf.mxu1 }
 0x6f9   :  { %v2786_v3 = vpop.f32.mrf.mxu0 }
 0x6fa   :  { %v4259_v52 = vmul.f32 -1.442695, %v3017_v36  ;;  %v3018_v22 = vadd.f32 %v2786_v3, %v364_v42  ;;  %v2829_v36 = vpop.f32.mrf.mxu1 }
 0x6fb   :  { %v2788_v47 = vpop.f32.mrf.mxu0 }
 0x6fc   :  { %4985 = vpow2.f32 %v4259_v52  ;;  %v3019_v43 = vadd.f32 %v2788_v47, %v366_v28  ;;  %v4260_v53 = vmul.f32 -1.442695, %v3018_v22  ;;  %v11020_v28 = vld [vmem:[#allocation53_spill] sm:$0xff]  ;;  %v2831_v47 = vpop.f32.mrf.mxu1 }
 0x6fd   :  { %v2790_v50 = vpop.f32.mrf.mxu0  ;;  %v3045_v3 = vadd.f32 %v11020_v28, %v2827_v37  ;;  %v3046_v46 = vadd.f32 %v11020_v28, %v2831_v47 }
 0x6fe   :  { %v4261_v8 = vmul.f32 -1.442695, %v3019_v43  ;;  %v3020_v32 = vadd.f32 %v2790_v50, %v368_v44  ;;  %v11021_v43 = vld [vmem:[#allocation20_spill] sm:$0xff] }
 0x700   :  { %4987 = vpow2.f32 %v4261_v8  ;;  %v4262_v24 = vmul.f32 -1.442695, %v3020_v32  ;;  %v465_v8 = vadd.f32 %v11021_v43, %v6147_v2 }
 0x701   :  { %4989 = vpow2.f32 %v4260_v53  ;;  %v11022_v53 = vld [vmem:[#allocation92_spill] sm:$0xff] }
 0x702   :  { %v468_v32 = vadd.f32 %v11022_v53, %v6147_v2 }
 0x709   :  { %v4986_v12 = vpop.eup %4985 }
 0x70a   :  { %v3033_v31 = vadd.f32 1.0, %v4986_v12 }
 0x70c   :  { %4991 = vrcp.f32 %v3033_v31 }
 0x70d   :  { %v4988_v57 = vpop.eup %4987  ;;  %4993 = vpow2.f32 %v4262_v24 }
 0x70e   :  { %v3035_v63 = vadd.f32 1.0, %v4988_v57  ;;  %v4990_v39 = vpop.eup %4989 }
 0x70f   :  { %v3034_v50 = vadd.f32 1.0, %v4990_v39 }
 0x710   :  { %4995 = vrcp.f32 %v3035_v63 }
 0x719   :  { %v4992_v52 = vpop.eup %4991 }
 0x71a   :  { %v3047_v40 = vmul.f32 %v4992_v52, %v3045_v3  ;;  %v4994_v42 = vpop.eup %4993 }
 0x71b   :  { %v3036_v24 = vadd.f32 1.0, %v4994_v42 }
 0x71c   :  { %v3049_v22 = vadd.f32 %v3047_v40, %v465_v8  ;;  %v2833_v40 = vpop.f32.mrf.mxu1 }
 0x71d   :  { %v4996_v44 = vpop.eup %4995 }
 0x71e   :  { %4997 = vtanh.f32 %v3049_v22  ;;  %v3048_v12 = vmul.f32 %v4996_v44, %v3046_v46 }
 0x71f   :  { %4999 = vrcp.f32 %v3034_v50 }
 0x720   :  { %v3050_v31 = vadd.f32 %v3048_v12, %v468_v32 }
 0x722   :  { %5001 = vtanh.f32 %v3050_v31 }
 0x723   :  { %5003 = vrcp.f32 %v3036_v24 }
 0x72b   :  { %v4998_v57 = vpop.eup %4997 }
 0x72c   :  { %v3053_v63 = vsub.f32 %v8483_v26, %v4998_v57  ;;  %v5000_v37 = vpop.eup %4999 }
 0x72e   :  { %v3055_v3 = vmul.f32 %v5000_v37, %v3053_v63 }
 0x72f   :  { %v5002_v52 = vpop.eup %5001 }
 0x730   :  { %v3054_v39 = vsub.f32 %v8485_v56, %v5002_v52  ;;  %v9089_v28 = vadd.f32 %v4998_v57, %v3055_v3  ;;  %v5004_v47 = vpop.eup %5003 }
 0x732   :  { %v3056_v43 = vmul.f32 %v5004_v47, %v3054_v39 }
 0x734   :  { %v9091_v8 = vadd.f32 %v5002_v52, %v3056_v43 }
 0x737   :  { %v2913_v22 = vpop.f32.mrf.mxu1  ;;  %v2870_v32 = vpop.f32.mrf.mxu0 }
 0x738   :  { %v2963_v50 = vadd.f32 %v2913_v22, %v2829_v36 }
 0x739   :  { %v2915_v42 = vpop.f32.mrf.mxu1  ;;  %v2872_v31 = vpop.f32.mrf.mxu0 }
 0x73a   :  { %v2967_v46 = vadd.f32 %v2963_v50, %v6835_v45  ;;  %v2964_v57 = vadd.f32 %v2915_v42, %v2870_v32 }
 0x73b   :  { %v2917_v44 = vpop.f32.mrf.mxu1  ;;  %v2874_v63 = vpop.f32.mrf.mxu0 }
 0x73c   :  { %v4255_v53 = vmul.f32 -1.442695, %v2967_v46  ;;  %v2965_v26 = vadd.f32 %v2917_v44, %v2833_v40  ;;  %v2968_v3 = vadd.f32 %v2964_v57, %v6841_v25  ;;  %v9106_v57 = vld [vmem:[%s10238_s6] ss:$0 sm:$0xff] }
 0x73d   :  { %v2919_v24 = vpop.f32.mrf.mxu1  ;;  %v2876_v50 = vpop.f32.mrf.mxu0 }
 0x73e   :  { %5005 = vpow2.f32 %v4255_v53  ;;  %v2969_v12 = vadd.f32 %v2965_v26, %v6835_v45  ;;  %v2966_v37 = vadd.f32 %v2919_v24, %v2874_v63  ;;  %v4256_v47 = vmul.f32 -1.442695, %v2968_v3  ;;  %v9100_v26 = vld [vmem:[%s10237_s7] ss:$0 sm:$0xff] }
 0x73f   :  { %v2995_v63 = vadd.f32 %v9106_v57, %v2872_v31 }
 0x740   :  { %v4257_v56 = vmul.f32 -1.442695, %v2969_v12  ;;  %v2970_v52 = vadd.f32 %v2966_v37, %v6841_v25 }
 0x742   :  { %5007 = vpow2.f32 %v4257_v56  ;;  %v4258_v40 = vmul.f32 -1.442695, %v2970_v52 }
 0x74b   :  { %v5006_v36 = vpop.eup %5005 }
 0x74c   :  { %v2983_v39 = vadd.f32 1.0, %v5006_v36 }
 0x74e   :  { %5009 = vrcp.f32 %v2983_v39 }
 0x74f   :  { %v5008_v43 = vpop.eup %5007  ;;  %5011 = vpow2.f32 %v4256_v47 }
 0x750   :  { %v2985_v22 = vadd.f32 1.0, %v5008_v43  ;;  %5013 = vpow2.f32 %v4258_v40  ;;  %v2996_v40 = vadd.f32 %v9106_v57, %v2876_v50 }
 0x752   :  { %5015 = vrcp.f32 %v2985_v22 }
 0x757   :  { %v4412_v46 = vpop.f32.mrf.mxu0 }
 0x759   :  { %v4413_v44 = vpop.f32.mrf.mxu0 }
 0x75a   :  { %v4414_v42 = vadd.f32 %v4413_v44, %v4412_v46 }
 0x75b   :  { %v4415_v53 = vpop.f32.mrf.mxu0  ;;  %v5010_v12 = vpop.eup %5009 }
 0x75c   :  { %v2997_v32 = vadd.f32 %v9100_v26, %v4414_v42  ;;  %v5012_v24 = vpop.eup %5011 }
 0x75d   :  { %v4416_v56 = vpop.f32.mrf.mxu0  ;;  %v5014_v36 = vpop.eup %5013  ;;  %v2984_v43 = vadd.f32 1.0, %v5012_v24 }
 0x75e   :  { %v2999_v37 = vmul.f32 %v5010_v12, %v2997_v32  ;;  %v4417_v3 = vadd.f32 %v4416_v56, %v4415_v53  ;;  %v2986_v46 = vadd.f32 1.0, %v5014_v36  ;;  %v9123_v36 = vpack.c.bf16 %v9091_v8, %v9089_v28 }
 0x75f   :  { %v5016_v47 = vpop.eup %5015 }
 0x760   :  { %v3001_v52 = vadd.f32 %v2999_v37, %v2995_v63  ;;  %v2998_v39 = vadd.f32 %v9100_v26, %v4417_v3 }
 0x762   :  { %5017 = vtanh.f32 %v3001_v52  ;;  %v3000_v22 = vmul.f32 %v5016_v47, %v2998_v39  ;;  %v11041_v52 = vld [vmem:[#allocation66_spill] sm:$0xff]  ;;  %v11042_v39 = vld [vmem:[#allocation67_spill] sm:$0xff]  ;;  %v11043_v47 = vld [vmem:[#allocation68_spill] sm:$0xff] }
 0x763   :  { %5019 = vrcp.f32 %v2984_v43  ;;  %v11044_v43 = vld [vmem:[#allocation69_spill] sm:$0xff] }
 0x764   :  { %v3002_v44 = vadd.f32 %v3000_v22, %v2996_v40  ;;  %v11045_v40 = vld [vmem:[#allocation70_spill] sm:$0xff]  ;;  %v11046_v22 = vld [vmem:[#allocation71_spill] sm:$0xff] }
 0x766   :  { %5021 = vtanh.f32 %v3002_v44  ;;  %v11048_v44 = vld [vmem:[#allocation73_spill] sm:$0xff] }
 0x767   :  { %5023 = vrcp.f32 %v2986_v46  ;;  %v11047_v46 = vld [vmem:[#allocation72_spill] sm:$0xff] }
 0x76f   :  { %v5018_v42 = vpop.eup %5017 }
 0x770   :  { %v3005_v31 = vsub.f32 %v8497_v35, %v5018_v42  ;;  %v5020_v32 = vpop.eup %5019  ;;  %v11023_v35 = vld [vmem:[#allocation54_spill] sm:$0xff] }
 0x772   :  { %v3007_v56 = vmul.f32 %v5020_v32, %v3005_v31  ;;  %v11050_v31 = vld [vmem:[#allocation75_spill] sm:$0xff]  ;;  %v11051_v32 = vld [vmem:[#allocation76_spill] sm:$0xff] }
 0x773   :  { %v5022_v53 = vpop.eup %5021 }
 0x774   :  { %v3006_v12 = vsub.f32 %v8499_v7, %v5022_v53  ;;  %v5024_v63 = vpop.eup %5023  ;;  %v9113_v24 = vadd.f32 %v5018_v42, %v3007_v56  ;;  %v11024_v7 = vld [vmem:[#allocation86_spill] sm:$0xff]  ;;  %v11054_v56 = vld [vmem:[#allocation79_spill] sm:$0xff] }
 0x775   :  { %v11049_v42 = vld [vmem:[#allocation74_spill] sm:$0xff] }
 0x776   :  { %v3008_v37 = vmul.f32 %v5024_v63, %v3006_v12  ;;  %v11053_v12 = vld [vmem:[#allocation78_spill] sm:$0xff]  ;;  %v11055_v63 = vld [vmem:[#allocation80_spill] sm:$0xff] }
 0x778   :  { %v9115_v50 = vadd.f32 %v5022_v53, %v3008_v37  ;;  %v11052_v53 = vld [vmem:[#allocation77_spill] sm:$0xff]  ;;  %v11056_v37 = vld [vmem:[#allocation82_spill] sm:$0xff] }
 0x77a   :  { %v9119_v3 = vpack.c.bf16 %v9115_v50, %v9113_v24 }
 0x77c   :  { %3093 = vmatprep.mubr.bf16.mxu1 %v9119_v3  ;;  %3136 = vmatprep.mubr.bf16.mxu0 %v9119_v3 }
 0x77d   :  { %3094 = vmatmul.mubr.bf16.vlgmr.msra.gmra.mxu1 %v9123_v36  ;;  %3137 = vmatmul.mubr.bf16.vlgmr.msra.gmra.mxu0 %v9123_v36 }
 0x77e   :  { %3148 = vmatpush1.bf16.msra.mxu1 %v8516_v55  ;;  %3191 = vmatpush1.bf16.msra.mxu0 %v8522_v38  ;;  %v11025_v55 = vld [vmem:[#allocation88_spill] sm:$0xff]  ;;  %v11026_v38 = vld [vmem:[#allocation87_spill] sm:$0xff] }
 0x77f   :  { %3179 = vmatprep.mubr.bf16.mxu1 %v9119_v3  ;;  %3222 = vmatprep.mubr.bf16.mxu0 %v9119_v3 }
 0x780   :  { %3149 = vmatprep.subr.bf16.mxu1 %v8530_v34  ;;  %3192 = vmatprep.subr.bf16.mxu0 %v8536_v11  ;;  %v11027_v34 = vld [vmem:[#allocation89_spill] sm:$0xff]  ;;  %v11028_v11 = vld [vmem:[#allocation55_spill] sm:$0xff] }
 0x782   :  { %3150 = vmatpush1.bf16.msra.mxu1 %v8542_v16  ;;  %3193 = vmatpush1.bf16.msra.mxu0 %v8548_v10  ;;  %v11029_v16 = vld [vmem:[#allocation12_spill] sm:$0xff]  ;;  %v11030_v10 = vld [vmem:[#allocation15_spill] sm:$0xff] }
 0x783   :  { %3151 = vmatprep.subr.bf16.mxu1 %v8554_v62  ;;  %3194 = vmatprep.subr.bf16.mxu0 %v8560_v58  ;;  %v11031_v62 = vld [vmem:[#allocation56_spill] sm:$0xff]  ;;  %v11032_v58 = vld [vmem:[#allocation57_spill] sm:$0xff] }
 0x786   :  { %3152 = vmatpush1.bf16.msra.mxu1 %v8566_v27  ;;  %3195 = vmatpush1.bf16.msra.mxu0 %v8572_v1  ;;  %v11033_v27 = vld [vmem:[#allocation58_spill] sm:$0xff]  ;;  %v11034_v1 = vld [vmem:[#allocation59_spill] sm:$0xff] }
 0x787   :  { %3153 = vmatprep.subr.bf16.mxu1 %v8578_v5  ;;  %3196 = vmatprep.subr.bf16.mxu0 %v8584_v49  ;;  %v11035_v5 = vld [vmem:[#allocation60_spill] sm:$0xff]  ;;  %v11036_v49 = vld [vmem:[#allocation61_spill] sm:$0xff] }
 0x78a   :  { %3154 = vmatpush1.bf16.msra.mxu1 %v8590_v9  ;;  %3197 = vmatpush1.bf16.msra.mxu0 %v8596_v23  ;;  %v11037_v9 = vld [vmem:[#allocation62_spill] sm:$0xff]  ;;  %v11038_v23 = vld [vmem:[#allocation63_spill] sm:$0xff] }
 0x78b   :  { %3155 = vmatprep.subr.bf16.mxu1 %v8602_v48  ;;  %3198 = vmatprep.subr.bf16.mxu0 %v8608_v4  ;;  %v11039_v48 = vld [vmem:[#allocation64_spill] sm:$0xff]  ;;  %v11040_v4 = vld [vmem:[#allocation65_spill] sm:$0xff] }
 0x78e   :  { %3156 = vmatpush1.bf16.msra.mxu1 %v11023_v35  ;;  %3199 = vmatpush1.bf16.msra.mxu0 %v11024_v7  ;;  %v11057_v35 = vld [vmem:[#allocation81_spill] sm:$0xff]  ;;  %v11058_v7 = vld [vmem:[#allocation83_spill] sm:$0xff] }
 0x78f   :  { %3157 = vmatprep.subr.bf16.mxu1 %v11025_v55  ;;  %3200 = vmatprep.subr.bf16.mxu0 %v11026_v38  ;;  %v11059_v55 = vld [vmem:[#allocation84_spill] sm:$0xff]  ;;  %v11060_v38 = vld [vmem:[#allocation85_spill] sm:$0xff] }
 0x792   :  { %3158 = vmatpush1.bf16.msra.mxu1 %v11027_v34  ;;  %3201 = vmatpush1.bf16.msra.mxu0 %v11028_v11  ;;  %v11061_v34 = vld [vmem:[#allocation98_spill] sm:$0xff]  ;;  %v11062_v11 = vld [vmem:[#allocation99_spill] sm:$0xff] }
 0x793   :  { %3159 = vmatprep.subr.bf16.mxu1 %v11029_v16  ;;  %3202 = vmatprep.subr.bf16.mxu0 %v11030_v10  ;;  %v11063_v16 = vld [vmem:[#allocation100_spill] sm:$0xff]  ;;  %v11064_v10 = vld [vmem:[#allocation101_spill] sm:$0xff] }
 0x796   :  { %3160 = vmatpush1.bf16.msra.mxu1 %v11031_v62  ;;  %3203 = vmatpush1.bf16.msra.mxu0 %v11032_v58  ;;  %v11065_v62 = vld [vmem:[#allocation102_spill] sm:$0xff]  ;;  %v11066_v58 = vld [vmem:[#allocation103_spill] sm:$0xff] }
 0x797   :  { %3161 = vmatprep.subr.bf16.mxu1 %v11033_v27  ;;  %3204 = vmatprep.subr.bf16.mxu0 %v11034_v1  ;;  %v11067_v27 = vld [vmem:[#allocation104_spill] sm:$0xff]  ;;  %v11068_v1 = vld [vmem:[#allocation105_spill] sm:$0xff] }
 0x79a   :  { %3162 = vmatpush1.bf16.msra.mxu1 %v11035_v5  ;;  %3205 = vmatpush1.bf16.msra.mxu0 %v11036_v49  ;;  %v11069_v5 = vld [vmem:[#allocation106_spill] sm:$0xff]  ;;  %v11070_v49 = vld [vmem:[#allocation107_spill] sm:$0xff] }
 0x79b   :  { %3163 = vmatprep.subr.bf16.mxu1 %v11037_v9  ;;  %3206 = vmatprep.subr.bf16.mxu0 %v11038_v23  ;;  %v11071_v9 = vld [vmem:[#allocation108_spill] sm:$0xff]  ;;  %v5432_v23 = vld [vmem:[%s10233_s2 + $0x1b0] ss:$36 sps:$4 sm:$0xff]  }
 0x79e   :  { %3164 = vmatpush2.bf16.msra.mxu1 %v11039_v48  ;;  %3207 = vmatpush2.bf16.msra.mxu0 %v11040_v4  ;;  %v5451_v48 = vld [vmem:[%s10233_s2 + $0x3f0] ss:$36 sps:$4 sm:$0xff]  }
 0x79f   :  { %3165 = vmatprep.subr.bf16.mxu1 %v11041_v52  ;;  %3208 = vmatprep.subr.bf16.mxu0 %v11042_v39  ;;  %v5452_v4 = vld [vmem:[%s10233_s2 + $0x3ac] ss:$36 sps:$4 sm:$0xff]  }
 0x7a0   :  { %v9295_v52 = vld [vmem:[%s10233_s2 + $0x170] ss:$36 sps:$4 sm:$0xff]  }
 0x7a1   :  { %v9301_v39 = vld [vmem:[%s10233_s2 + $0x12c] ss:$36 sps:$4 sm:$0xff]  }
 0x7a2   :  { %3166 = vmatpush2.bf16.msra.mxu1 %v11043_v47  ;;  %3209 = vmatpush2.bf16.msra.mxu0 %v11044_v43  ;;  %v5455_v47 = vld [vmem:[%s10233_s2 + $0x3a8] ss:$36 sps:$4 sm:$0xff]  }
 0x7a3   :  { %3167 = vmatprep.subr.bf16.mxu1 %v11045_v40  ;;  %3210 = vmatprep.subr.bf16.mxu0 %v11046_v22  ;;  %v5456_v43 = vld [vmem:[%s10233_s2 + $0x364] ss:$36 sps:$4 sm:$0xff]  }
 0x7a4   :  { %v9313_v40 = vld [vmem:[%s10233_s2 + $0x128] ss:$36 sps:$4 sm:$0xff]  }
 0x7a5   :  { %v9319_v22 = vld [vmem:[%s10233_s2 + $0xe4] ss:$36 sps:$4 sm:$0xff]  }
 0x7a6   :  { %3168 = vmatpush2.bf16.msra.mxu1 %v11047_v46  ;;  %3211 = vmatpush2.bf16.msra.mxu0 %v11048_v44  ;;  %v5459_v46 = vld [vmem:[%s10233_s2 + $0x360] ss:$36 sps:$4 sm:$0xff]  }
 0x7a7   :  { %3169 = vmatprep.subr.bf16.mxu1 %v11049_v42  ;;  %3212 = vmatprep.subr.bf16.mxu0 %v11050_v31  ;;  %v5460_v44 = vld [vmem:[%s10233_s2 + $0x31c] ss:$36 sps:$4 sm:$0xff]  }
 0x7a8   :  { %v9331_v42 = vld [vmem:[%s10233_s2 + $0xe0] ss:$36 sps:$4 sm:$0xff]  }
 0x7a9   :  { %v9337_v31 = vld [vmem:[%s10233_s2 + $0x9c] ss:$36 sps:$4 sm:$0xff]  }
 0x7aa   :  { %3170 = vmatpush2.bf16.msra.mxu1 %v11051_v32  ;;  %3213 = vmatpush2.bf16.msra.mxu0 %v11052_v53  ;;  %v5463_v32 = vld [vmem:[%s10233_s2 + $0x318] ss:$36 sps:$4 sm:$0xff]  }
 0x7ab   :  { %3171 = vmatprep.subr.bf16.mxu1 %v11053_v12  ;;  %3214 = vmatprep.subr.bf16.mxu0 %v11054_v56  ;;  %v5464_v53 = vld [vmem:[%s10233_s2 + $0x2d4] ss:$36 sps:$4 sm:$0xff]  }
 0x7ac   :  { %v9349_v12 = vld [vmem:[%s10233_s2 + $0x98] ss:$36 sps:$4 sm:$0xff]  }
 0x7ad   :  { %v9355_v56 = vld [vmem:[%s10233_s2 + $0x54] ss:$36 sps:$4 sm:$0xff]  }
 0x7ae   :  { %3172 = vmatpush2.bf16.msra.mxu1 %v11055_v63  ;;  %3215 = vmatpush2.bf16.msra.mxu0 %v11056_v37  ;;  %v5467_v63 = vld [vmem:[%s10233_s2 + $0x2d0] ss:$36 sps:$4 sm:$0xff]  }
 0x7af   :  { %3173 = vmatprep.subr.bf16.mxu1 %v11057_v35  ;;  %3216 = vmatprep.subr.bf16.mxu0 %v11058_v7  ;;  %v5468_v37 = vld [vmem:[%s10233_s2 + $0x28c] ss:$36 sps:$4 sm:$0xff]  }
 0x7b0   :  { %v9367_v35 = vld [vmem:[%s10233_s2 + $0x50] ss:$36 sps:$4 sm:$0xff]  }
 0x7b1   :  { %v9373_v7 = vld [vmem:[%s10233_s2 + $0xc] ss:$36 sps:$4 sm:$0xff]  }
 0x7b2   :  { %3174 = vmatpush2.bf16.msra.mxu1 %v11059_v55  ;;  %3217 = vmatpush2.bf16.msra.mxu0 %v11060_v38  ;;  %v5471_v55 = vld [vmem:[%s10233_s2 + $0x288] ss:$36 sps:$4 sm:$0xff]  }
 0x7b3   :  { %3175 = vmatprep.subr.bf16.mxu1 %v11061_v34  ;;  %3218 = vmatprep.subr.bf16.mxu0 %v11062_v11  ;;  %v5472_v38 = vld [vmem:[%s10233_s2 + $0x244] ss:$36 sps:$4 sm:$0xff]  }
 0x7b4   :  { %v9385_v34 = vld [vmem:[%s10233_s2 + $0x8] ss:$36 sps:$4 sm:$0xff]  }
 0x7b5   :  { %v9391_v11 = vld [vmem:[%s10233_s2 + $0x444] ss:$36 sps:$4 sm:$0xff]  }
 0x7b6   :  { %3176 = vmatpush2.bf16.msra.mxu1 %v11063_v16  ;;  %3219 = vmatpush2.bf16.msra.mxu0 %v11064_v10  ;;  %v5475_v16 = vld [vmem:[%s10233_s2 + $0x240] ss:$36 sps:$4 sm:$0xff]   ;;  %v9400_v10 = vld [vmem:[%s10233_s2 + $0x20c] ss:$36 sps:$4 sm:$0xff]  }
 0x7b7   :  { %3177 = vmatprep.subr.bf16.mxu1 %v11065_v62  ;;  %3220 = vmatprep.subr.bf16.mxu0 %v11066_v58  ;;  %v9406_v62 = vld [vmem:[%s10233_s2 + $0x440] ss:$36 sps:$4 sm:$0xff]  }
 0x7b8   :  { %v9412_v58 = vld [vmem:[%s10233_s2 + $0x3fc] ss:$36 sps:$4 sm:$0xff]  }
 0x7ba   :  { %3178 = vmatpush2.bf16.msra.mxu1 %v8878_v51  ;;  %3221 = vmatpush2.bf16.msra.mxu0 %v11067_v27  ;;  %v5431_v51 = vld [vmem:[%s10233_s2 + $0x1b4] ss:$36 sps:$4 sm:$0xff]  }
 0x7bb   :  { %4418 = vmatprep.subr.bf16.mxu1 %v11068_v1  ;;  %3372 = vmatprep.subr.bf16.mxu0 %v11069_v5  ;;  %v9418_v27 = vld [vmem:[%s10233_s2 + $0x3f8] ss:$36 sps:$4 sm:$0xff]   ;;  %v9430_v5 = vld [vmem:[%s10233_s2 + $0x3b0] ss:$36 sps:$4 sm:$0xff]  }
 0x7bc   :  { %v9424_v1 = vld [vmem:[%s10233_s2 + $0x3b4] ss:$36 sps:$4 sm:$0xff]  }
 0x7bd   :  { %3180 = vmatmul.mubr.bf16.vlgmr.msra.gmra.mxu1 %v9123_v36  ;;  %3223 = vmatmul.mubr.bf16.vlgmr.msra.gmra.mxu0 %v9123_v36 }
 0x7be   :  { %4419 = vmatpush3.bf16.msra.mxu1 %v8904_v30  ;;  %3265 = vmatprep.mubr.bf16.mxu1 %v9119_v3  ;;  %v5433_v30 = vld [vmem:[%s10233_s2 + $0x16c] ss:$36 sps:$4 sm:$0xff]   ;;  %v5448_v3 = vld [vmem:[%s10233_s2 + $0x3f4] ss:$36 sps:$4 sm:$0xff]  }
 0x7bf   :  { %4420 = vmatprep.subr.bf16.mxu1 %v11070_v49  ;;  %3373 = vmatpush1.bf16.msra.mxu0 %v8917_v6  ;;  %v5434_v6 = vld [vmem:[%s10233_s2 + $0x168] ss:$36 sps:$4 sm:$0xff]  }
 0x7c0   :  { %3374 = vmatprep.subr.bf16.mxu0 %v5431_v51  ;;  %v9436_v49 = vld [vmem:[%s10233_s2 + $0x36c] ss:$36 sps:$4 sm:$0xff]  }
 0x7c1   :  { %v9442_v51 = vld [vmem:[%s10233_s2 + $0x368] ss:$36 sps:$4 sm:$0xff]  }
 0x7c2   :  { %4421 = vmatpush3.bf16.msra.mxu1 %v11071_v9  ;;  %v9448_v9 = vld [vmem:[%s10233_s2 + $0x324] ss:$36 sps:$4 sm:$0xff]  }
 0x7c3   :  { %4422 = vmatprep.subr.bf16.mxu1 %v8930_v41  ;;  %3375 = vmatpush1.bf16.msra.mxu0 %v5432_v23  ;;  %v5435_v41 = vld [vmem:[%s10233_s2 + $0x124] ss:$36 sps:$4 sm:$0xff]  }
 0x7c4   :  { %3376 = vmatprep.subr.bf16.mxu0 %v5433_v30  ;;  %v9454_v23 = vld [vmem:[%s10233_s2 + $0x320] ss:$36 sps:$4 sm:$0xff]  }
 0x7c5   :  { %v9460_v30 = vld [vmem:[%s10233_s2 + $0x2dc] ss:$36 sps:$4 sm:$0xff]  }
 0x7c6   :  { %4423 = vmatpush3.bf16.msra.mxu1 %v8938_v13  ;;  %v5436_v13 = vld [vmem:[%s10233_s2 + $0x120] ss:$36 sps:$4 sm:$0xff]  }
 0x7c7   :  { %4424 = vmatprep.subr.bf16.mxu1 %v8944_v0  ;;  %3377 = vmatpush1.bf16.msra.mxu0 %v5434_v6  ;;  %v5437_v0 = vld [vmem:[%s10233_s2 + $0xdc] ss:$36 sps:$4 sm:$0xff]  }
 0x7c8   :  { %3378 = vmatprep.subr.bf16.mxu0 %v5435_v41  ;;  %v9466_v6 = vld [vmem:[%s10233_s2 + $0x2d8] ss:$36 sps:$4 sm:$0xff]  }
 0x7c9   :  { %v9472_v41 = vld [vmem:[%s10233_s2 + $0x294] ss:$36 sps:$4 sm:$0xff]  }
 0x7ca   :  { %4425 = vmatpush3.bf16.msra.mxu1 %v8952_v61  ;;  %v5438_v61 = vld [vmem:[%s10233_s2 + $0xd8] ss:$36 sps:$4 sm:$0xff]  }
 0x7cb   :  { %4426 = vmatprep.subr.bf16.mxu1 %v8958_v60  ;;  %3379 = vmatpush1.bf16.msra.mxu0 %v5436_v13  ;;  %v5439_v60 = vld [vmem:[%s10233_s2 + $0x94] ss:$36 sps:$4 sm:$0xff]  }
 0x7cc   :  { %3380 = vmatprep.subr.bf16.mxu0 %v5437_v0  ;;  %v9478_v13 = vld [vmem:[%s10233_s2 + $0x290] ss:$36 sps:$4 sm:$0xff]  }
 0x7cd   :  { %v9484_v0 = vld [vmem:[%s10233_s2 + $0x24c] ss:$36 sps:$4 sm:$0xff]  }
 0x7ce   :  { %4427 = vmatpush3.bf16.msra.mxu1 %v8966_v59  ;;  %v5440_v59 = vld [vmem:[%s10233_s2 + $0x90] ss:$36 sps:$4 sm:$0xff]  }
 0x7cf   :  { %4428 = vmatprep.subr.bf16.mxu1 %v8972_v19  ;;  %3381 = vmatpush1.bf16.msra.mxu0 %v5438_v61  ;;  %v5441_v19 = vld [vmem:[%s10233_s2 + $0x4c] ss:$36 sps:$4 sm:$0xff]  }
 0x7d0   :  { %3382 = vmatprep.subr.bf16.mxu0 %v5439_v60  ;;  %v9490_v61 = vld [vmem:[%s10233_s2 + $0x248] ss:$36 sps:$4 sm:$0xff]   ;;  %v9496_v60 = vld [vmem:[%s10233_s2 + $0x214] ss:$36 sps:$4 sm:$0xff]  }
 0x7d2   :  { %4429 = vmatpush3.bf16.msra.mxu1 %v8980_v54  ;;  %v5442_v54 = vld [vmem:[%s10233_s2 + $0x48] ss:$36 sps:$4 sm:$0xff]  }
 0x7d3   :  { %4430 = vmatprep.subr.bf16.mxu1 %v8986_v20  ;;  %3383 = vmatpush1.bf16.msra.mxu0 %v5440_v59  ;;  %v5443_v20 = vld [vmem:[%s10233_s2 + $0x4] ss:$36 sps:$4 sm:$0xff]   ;;  %v11072_v59 = vld [vmem:[#allocation9_spill] sm:$0xff] }
 0x7d4   :  { %3384 = vmatprep.subr.bf16.mxu0 %v5441_v19  ;;  %v372_v19 = vadd.f32 %v11072_v59, %v11014_v33 }
 0x7d6   :  { %4431 = vmatpush3.bf16.msra.mxu1 %v8994_v29  ;;  %v5444_v29 = vld [vmem:[%s10233_s2] ss:$36 sps:$4 sm:$0xff]  }
 0x7d7   :  { %4432 = vmatprep.subr.bf16.mxu1 %v9000_v21  ;;  %3385 = vmatpush1.bf16.msra.mxu0 %v5442_v54  ;;  %v5445_v21 = vld [vmem:[%s10233_s2 + $0x43c] ss:$36 sps:$4 sm:$0xff]  }
 0x7d8   :  { %3386 = vmatprep.subr.bf16.mxu0 %v5443_v20 }
 0x7da   :  { %4433 = vmatpush3.bf16.msra.mxu1 %v9008_v18  ;;  %v9265_v18 = vld [vmem:[%s10233_s2 + $0x1bc] ss:$36 sps:$4 sm:$0xff]  }
 0x7db   :  { %3415 = vmatprep.subr.bf16.mxu1 %v9014_v15  ;;  %3387 = vmatpush1.bf16.msra.mxu0 %v5444_v29  ;;  %v5447_v15 = vld [vmem:[%s10233_s2 + $0x438] ss:$36 sps:$4 sm:$0xff]  }
 0x7dc   :  { %3388 = vmatprep.subr.bf16.mxu0 %v5445_v21  ;;  %v11073_v21 = vld [vmem:[#allocation11_spill] sm:$0xff] }
 0x7dd   :  { %3266 = vmatmul.mubr.bf16.vlgmr.msra.gmra.mxu1 %v9123_v36  ;;  %v9283_v36 = vld [vmem:[%s10233_s2 + $0x174] ss:$36 sps:$4 sm:$0xff]  }
 0x7de   :  { %3416 = vmatpush1.bf16.msra.mxu1 %v9023_v14  ;;  %v9277_v14 = vld [vmem:[%s10233_s2 + $0x1b8] ss:$36 sps:$4 sm:$0xff]  }
 0x7df   :  { %3417 = vmatprep.subr.bf16.mxu1 %v9265_v18  ;;  %3389 = vmatpush2.bf16.msra.mxu0 %v5447_v15  ;;  %v376_v15 = vadd.f32 %v11073_v21, %v11014_v33  ;;  %v9879_v33 = vld [vmem:[%s10233_s2 + $0x29c] ss:$36 sps:$4 sm:$0xff]  }
 0x7e0   :  { %3390 = vmatprep.subr.bf16.mxu0 %v5448_v3  ;;  %11111 = vst [vmem:[#allocation45_spill] sm:$0xff] %v9879_v33 }
 0x7e2   :  { %3418 = vmatpush1.bf16.msra.mxu1 %v9277_v14 }
 0x7e3   :  { %3419 = vmatprep.subr.bf16.mxu1 %v9283_v36  ;;  %3391 = vmatpush2.bf16.msra.mxu0 %v5451_v48 }
 0x7e4   :  { %3392 = vmatprep.subr.bf16.mxu0 %v5452_v4 }
 0x7e6   :  { %3420 = vmatpush1.bf16.msra.mxu1 %v9295_v52 }
 0x7e7   :  { %3421 = vmatprep.subr.bf16.mxu1 %v9301_v39  ;;  %3393 = vmatpush2.bf16.msra.mxu0 %v5455_v47 }
 0x7e8   :  { %3394 = vmatprep.subr.bf16.mxu0 %v5456_v43  ;;  %v11074_v43 = vld [vmem:[#allocation10_spill] sm:$0xff] }
 0x7ea   :  { %3422 = vmatpush1.bf16.msra.mxu1 %v9313_v40 }
 0x7eb   :  { %3423 = vmatprep.subr.bf16.mxu1 %v9319_v22  ;;  %3395 = vmatpush2.bf16.msra.mxu0 %v5459_v46  ;;  %v374_v46 = vadd.f32 %v11074_v43, %v11017_v17 }
 0x7ec   :  { %3396 = vmatprep.subr.bf16.mxu0 %v5460_v44 }
 0x7ee   :  { %3424 = vmatpush1.bf16.msra.mxu1 %v9331_v42 }
 0x7ef   :  { %3425 = vmatprep.subr.bf16.mxu1 %v9337_v31  ;;  %3397 = vmatpush2.bf16.msra.mxu0 %v5463_v32 }
 0x7f0   :  { %3398 = vmatprep.subr.bf16.mxu0 %v5464_v53  ;;  %v11075_v53 = vld [vmem:[#allocation13_spill] sm:$0xff] }
 0x7f2   :  { %3426 = vmatpush1.bf16.msra.mxu1 %v9349_v12 }
 0x7f3   :  { %3427 = vmatprep.subr.bf16.mxu1 %v9355_v56  ;;  %3399 = vmatpush2.bf16.msra.mxu0 %v5467_v63  ;;  %v378_v63 = vadd.f32 %v11075_v53, %v11017_v17  ;;  %v9867_v17 = vld [vmem:[%s10233_s2 + $0x2e0] ss:$36 sps:$4 sm:$0xff]  }
 0x7f4   :  { %3400 = vmatprep.subr.bf16.mxu0 %v5468_v37  ;;  %11109 = vst [vmem:[#allocation43_spill] sm:$0xff] %v9867_v17 }
 0x7f6   :  { %3428 = vmatpush1.bf16.msra.mxu1 %v9367_v35 }
 0x7f7   :  { %3429 = vmatprep.subr.bf16.mxu1 %v9373_v7  ;;  %3401 = vmatpush2.bf16.msra.mxu0 %v5471_v55 }
 0x7f8   :  { %3402 = vmatprep.subr.bf16.mxu0 %v5472_v38 }
 0x7fa   :  { %3430 = vmatpush1.bf16.msra.mxu1 %v9385_v34 }
 0x7fb   :  { %3431 = vmatprep.subr.bf16.mxu1 %v9391_v11  ;;  %3403 = vmatpush2.bf16.msra.mxu0 %v5475_v16 }
 0x7fc   :  { %3458 = vmatprep.subr.bf16.mxu0 %v9400_v10 }
 0x7fe   :  { %3432 = vmatpush2.bf16.msra.mxu1 %v9406_v62 }
 0x7ff   :  { %3433 = vmatprep.subr.bf16.mxu1 %v9412_v58 }
 0x802   :  { %3434 = vmatpush2.bf16.msra.mxu1 %v9418_v27 }
 0x803   :  { %3435 = vmatprep.subr.bf16.mxu1 %v9424_v1 }
 0x806   :  { %3436 = vmatpush2.bf16.msra.mxu1 %v9430_v5 }
 0x807   :  { %3437 = vmatprep.subr.bf16.mxu1 %v9436_v49 }
 0x80a   :  { %3438 = vmatpush2.bf16.msra.mxu1 %v9442_v51 }
 0x80b   :  { %3439 = vmatprep.subr.bf16.mxu1 %v9448_v9 }
 0x80e   :  { %3440 = vmatpush2.bf16.msra.mxu1 %v9454_v23 }
 0x80f   :  { %3441 = vmatprep.subr.bf16.mxu1 %v9460_v30 }
 0x812   :  { %3442 = vmatpush2.bf16.msra.mxu1 %v9466_v6 }
 0x813   :  { %3443 = vmatprep.subr.bf16.mxu1 %v9472_v41 }
 0x816   :  { %3444 = vmatpush2.bf16.msra.mxu1 %v9478_v13 }
 0x817   :  { %3445 = vmatprep.subr.bf16.mxu1 %v9484_v0 }
 0x81a   :  { %3446 = vmatpush2.bf16.msra.mxu1 %v9490_v61 }
 0x81b   :  { %3501 = vmatprep.subr.bf16.mxu1 %v9496_v60 }
 0x83d   :  { %v3095_v54 = vpop.f32.mrf.mxu1 }
 0x83e   :  { %v3328_v20 = vadd.f32 %v3095_v54, %v372_v19 }
 0x83f   :  { %v3097_v29 = vpop.f32.mrf.mxu1 }
 0x840   :  { %v4267_v3 = vmul.f32 -1.442695, %v3328_v20  ;;  %v3329_v44 = vadd.f32 %v3097_v29, %v374_v46  ;;  %v3138_v20 = vpop.f32.mrf.mxu0  ;;  %v9510_v29 = vld [vmem:[%s10235_s4] ss:$0 sm:$0xff] }
 0x841   :  { %v3099_v48 = vpop.f32.mrf.mxu1  ;;  %11076 = vst [vmem:[#allocation109_spill] sm:$0xff] %v9510_v29 }
 0x842   :  { %5025 = vpow2.f32 %v4267_v3  ;;  %v3330_v4 = vadd.f32 %v3099_v48, %v376_v15  ;;  %v4268_v37 = vmul.f32 -1.442695, %v3329_v44  ;;  %v3140_v21 = vpop.f32.mrf.mxu0  ;;  %v3356_v3 = vadd.f32 %v9510_v29, %v3138_v20 }
 0x843   :  { %v3101_v32 = vpop.f32.mrf.mxu1 }
 0x844   :  { %v4269_v47 = vmul.f32 -1.442695, %v3330_v4  ;;  %v3331_v55 = vadd.f32 %v3101_v32, %v378_v63  ;;  %v3142_v4 = vpop.f32.mrf.mxu0 }
 0x845   :  { %v3357_v63 = vadd.f32 %v9510_v29, %v3142_v4  ;;  %v9855_v29 = vld [vmem:[%s10233_s2 + $0x2e4] ss:$36 sps:$4 sm:$0xff]  }
 0x846   :  { %5027 = vpow2.f32 %v4269_v47  ;;  %v4270_v59 = vmul.f32 -1.442695, %v3331_v55  ;;  %v11077_v47 = vld [vmem:[#allocation95_spill] sm:$0xff]  ;;  %v11078_v55 = vld [vmem:[#allocation97_spill] sm:$0xff] }
 0x847   :  { %5029 = vpow2.f32 %v4268_v37  ;;  %v473_v43 = vadd.f32 %v11077_v47, %v6147_v2 }
 0x84f   :  { %v5026_v38 = vpop.eup %5025 }
 0x850   :  { %v3344_v16 = vadd.f32 1.0, %v5026_v38  ;;  %v476_v38 = vadd.f32 %v11078_v55, %v6147_v2  ;;  %v9843_v2 = vld [vmem:[%s10233_s2 + $0x328] ss:$36 sps:$4 sm:$0xff]  }
 0x852   :  { %5031 = vrcp.f32 %v3344_v16 }
 0x853   :  { %v5028_v19 = vpop.eup %5027  ;;  %5033 = vpow2.f32 %v4270_v59 }
 0x854   :  { %v3346_v54 = vadd.f32 1.0, %v5028_v19  ;;  %v5030_v15 = vpop.eup %5029 }
 0x855   :  { %v3345_v53 = vadd.f32 1.0, %v5030_v15 }
 0x856   :  { %5035 = vrcp.f32 %v3346_v54 }
 0x85f   :  { %v5032_v48 = vpop.eup %5031 }
 0x860   :  { %v3358_v46 = vmul.f32 %v5032_v48, %v3356_v3  ;;  %v5034_v44 = vpop.eup %5033 }
 0x861   :  { %v3347_v19 = vadd.f32 1.0, %v5034_v44 }
 0x862   :  { %v3360_v32 = vadd.f32 %v3358_v46, %v473_v43 }
 0x863   :  { %v5036_v37 = vpop.eup %5035 }
 0x864   :  { %5037 = vtanh.f32 %v3360_v32  ;;  %v3359_v16 = vmul.f32 %v5036_v37, %v3357_v63  ;;  %v3144_v32 = vpop.f32.mrf.mxu0 }
 0x865   :  { %5039 = vrcp.f32 %v3345_v53 }
 0x866   :  { %v3361_v59 = vadd.f32 %v3359_v16, %v476_v38 }
 0x868   :  { %5041 = vtanh.f32 %v3361_v59 }
 0x869   :  { %5043 = vrcp.f32 %v3347_v19 }
 0x871   :  { %v5038_v54 = vpop.eup %5037 }
 0x872   :  { %v3364_v20 = vsub.f32 %v9089_v28, %v5038_v54  ;;  %v5040_v3 = vpop.eup %5039 }
 0x874   :  { %v3366_v48 = vmul.f32 %v5040_v3, %v3364_v20 }
 0x875   :  { %v5042_v47 = vpop.eup %5041 }
 0x876   :  { %v3365_v15 = vsub.f32 %v9091_v8, %v5042_v47  ;;  %v9520_v4 = vadd.f32 %v5038_v54, %v3366_v48  ;;  %v5044_v43 = vpop.eup %5043 }
 0x878   :  { %11079 = vst [vmem:[#allocation110_spill] sm:$0xff] %v9520_v4  ;;  %v3367_v46 = vmul.f32 %v5044_v43, %v3365_v15 }
 0x87a   :  { %v9522_v55 = vadd.f32 %v5042_v47, %v3367_v46 }
 0x87c   :  { %11080 = vst [vmem:[#allocation111_spill] sm:$0xff] %v9522_v55 }
 0x87d   :  { %v3224_v53 = vpop.f32.mrf.mxu0  ;;  %v3181_v59 = vpop.f32.mrf.mxu1 }
 0x87e   :  { %v3274_v63 = vadd.f32 %v3224_v53, %v3140_v21 }
 0x87f   :  { %v3226_v44 = vpop.f32.mrf.mxu0  ;;  %v3183_v54 = vpop.f32.mrf.mxu1 }
 0x880   :  { %v3278_v37 = vadd.f32 %v3274_v63, %v6835_v45  ;;  %v3275_v3 = vadd.f32 %v3226_v44, %v3181_v59 }
 0x881   :  { %v3228_v38 = vpop.f32.mrf.mxu0  ;;  %v3185_v48 = vpop.f32.mrf.mxu1 }
 0x882   :  { %v4263_v16 = vmul.f32 -1.442695, %v3278_v37  ;;  %v3276_v28 = vadd.f32 %v3228_v38, %v3144_v32  ;;  %v3279_v15 = vadd.f32 %v3275_v3, %v6841_v25 }
 0x883   :  { %v3230_v20 = vpop.f32.mrf.mxu0  ;;  %v3187_v38 = vpop.f32.mrf.mxu1 }
 0x884   :  { %5045 = vpow2.f32 %v4263_v16  ;;  %v3280_v19 = vadd.f32 %v3276_v28, %v6835_v45  ;;  %v3277_v47 = vadd.f32 %v3230_v20, %v3185_v48  ;;  %v4264_v53 = vmul.f32 -1.442695, %v3279_v15  ;;  %v9807_v45 = vld [vmem:[%s10233_s2 + $0x374] ss:$36 sps:$4 sm:$0xff]  }
 0x885   :  { %v3306_v48 = vadd.f32 %v9106_v57, %v3183_v54 }
 0x886   :  { %v4265_v8 = vmul.f32 -1.442695, %v3280_v19  ;;  %v3281_v43 = vadd.f32 %v3277_v47, %v6841_v25  ;;  %v9795_v25 = vld [vmem:[%s10233_s2 + $0x3b8] ss:$36 sps:$4 sm:$0xff]  }
 0x888   :  { %5047 = vpow2.f32 %v4265_v8  ;;  %v4266_v32 = vmul.f32 -1.442695, %v3281_v43 }
 0x891   :  { %v5046_v21 = vpop.eup %5045 }
 0x892   :  { %v3294_v46 = vadd.f32 1.0, %v5046_v21 }
 0x894   :  { %5049 = vrcp.f32 %v3294_v46 }
 0x895   :  { %v5048_v63 = vpop.eup %5047  ;;  %5051 = vpow2.f32 %v4264_v53 }
 0x896   :  { %v3296_v37 = vadd.f32 1.0, %v5048_v63  ;;  %5053 = vpow2.f32 %v4266_v32  ;;  %v3307_v32 = vadd.f32 %v9106_v57, %v3187_v38 }
 0x898   :  { %5055 = vrcp.f32 %v3296_v37 }
 0x89d   :  { %v4434_v16 = vpop.f32.mrf.mxu1 }
 0x89f   :  { %v4435_v28 = vpop.f32.mrf.mxu1 }
 0x8a0   :  { %v4436_v44 = vadd.f32 %v4435_v28, %v4434_v16 }
 0x8a1   :  { %v4437_v59 = vpop.f32.mrf.mxu1  ;;  %v5050_v8 = vpop.eup %5049 }
 0x8a2   :  { %v3308_v19 = vadd.f32 %v9100_v26, %v4436_v44  ;;  %v5052_v3 = vpop.eup %5051 }
 0x8a3   :  { %v4438_v20 = vpop.f32.mrf.mxu1  ;;  %v5054_v21 = vpop.eup %5053  ;;  %v3295_v63 = vadd.f32 1.0, %v5052_v3 }
 0x8a4   :  { %v3310_v47 = vmul.f32 %v5050_v8, %v3308_v19  ;;  %v4439_v15 = vadd.f32 %v4438_v20, %v4437_v59  ;;  %v3297_v16 = vadd.f32 1.0, %v5054_v21  ;;  %v9573_v21 = vld [vmem:[%s10233_s2 + $0x1cc] ss:$36 sps:$4 sm:$0xff]  }
 0x8a5   :  { %v5056_v53 = vpop.eup %5055  ;;  %11084 = vst [vmem:[#allocation115_spill] sm:$0xff] %v9573_v21 }
 0x8a6   :  { %v3312_v43 = vadd.f32 %v3310_v47, %v3306_v48  ;;  %v3309_v46 = vadd.f32 %v9100_v26, %v4439_v15  ;;  %v9544_v47 = vpack.c.bf16 %v9522_v55, %v9520_v4  ;;  %v9567_v15 = vld [vmem:[%s10233_s2 + $0x1c4] ss:$36 sps:$4 sm:$0xff]   ;;  %v9819_v55 = vld [vmem:[%s10233_s2 + $0x370] ss:$36 sps:$4 sm:$0xff]  }
 0x8a7   :  { %v9831_v4 = vld [vmem:[%s10233_s2 + $0x32c] ss:$36 sps:$4 sm:$0xff]  }
 0x8a8   :  { %5057 = vtanh.f32 %v3312_v43  ;;  %v3311_v37 = vmul.f32 %v5056_v53, %v3309_v46  ;;  %v9579_v43 = vld [vmem:[%s10233_s2 + $0x1c0] ss:$36 sps:$4 sm:$0xff]   ;;  %v9585_v46 = vld [vmem:[%s10233_s2 + $0x1c8] ss:$36 sps:$4 sm:$0xff]  }
 0x8a9   :  { %5059 = vrcp.f32 %v3295_v63  ;;  %11085 = vst [vmem:[#allocation116_spill] sm:$0xff] %v9585_v46  ;;  %v9591_v53 = vld [vmem:[%s10233_s2 + $0x17c] ss:$36 sps:$4 sm:$0xff]   ;;  %v9597_v63 = vld [vmem:[%s10233_s2 + $0x184] ss:$36 sps:$4 sm:$0xff]  }
 0x8aa   :  { %v3313_v28 = vadd.f32 %v3311_v37, %v3307_v32  ;;  %11086 = vst [vmem:[#allocation17_spill] sm:$0xff] %v9597_v63  ;;  %v9603_v32 = vld [vmem:[%s10233_s2 + $0x178] ss:$36 sps:$4 sm:$0xff]   ;;  %v9609_v37 = vld [vmem:[%s10233_s2 + $0x180] ss:$36 sps:$4 sm:$0xff]  }
 0x8ab   :  { %11087 = vst [vmem:[#allocation3_spill] sm:$0xff] %v9609_v37 }
 0x8ac   :  { %5061 = vtanh.f32 %v3313_v28  ;;  %v9621_v28 = vld [vmem:[%s10233_s2 + $0x13c] ss:$36 sps:$4 sm:$0xff]  }
 0x8ad   :  { %5063 = vrcp.f32 %v3297_v16  ;;  %v9615_v16 = vld [vmem:[%s10233_s2 + $0x134] ss:$36 sps:$4 sm:$0xff]   ;;  %11088 = vst [vmem:[#allocation19_spill] sm:$0xff] %v9621_v28 }
 0x8b5   :  { %v5058_v44 = vpop.eup %5057 }
 0x8b6   :  { %v3316_v54 = vsub.f32 %v9113_v24, %v5058_v44  ;;  %v5060_v19 = vpop.eup %5059  ;;  %v9553_v24 = vld [vmem:[%s10233_s2 + $0x208] ss:$36 sps:$4 sm:$0xff]  }
 0x8b8   :  { %v3318_v20 = vmul.f32 %v5060_v19, %v3316_v54  ;;  %v9633_v54 = vld [vmem:[%s10233_s2 + $0x138] ss:$36 sps:$4 sm:$0xff]   ;;  %v9639_v19 = vld [vmem:[%s10233_s2 + $0xec] ss:$36 sps:$4 sm:$0xff]  }
 0x8b9   :  { %v5062_v59 = vpop.eup %5061  ;;  %11089 = vst [vmem:[#allocation4_spill] sm:$0xff] %v9633_v54 }
 0x8ba   :  { %v3317_v8 = vsub.f32 %v9115_v50, %v5062_v59  ;;  %v5064_v26 = vpop.eup %5063  ;;  %v9534_v3 = vadd.f32 %v5058_v44, %v3318_v20  ;;  %v9559_v50 = vld [vmem:[%s10233_s2 + $0x210] ss:$36 sps:$4 sm:$0xff]  }
 0x8bb   :  { %11083 = vst [vmem:[#allocation114_spill] sm:$0xff] %v9559_v50  ;;  %v9627_v44 = vld [vmem:[%s10233_s2 + $0x130] ss:$36 sps:$4 sm:$0xff]  }
 0x8bc   :  { %v3319_v48 = vmul.f32 %v5064_v26, %v3317_v8  ;;  %11081 = vst [vmem:[#allocation112_spill] sm:$0xff] %v9534_v3  ;;  %v9651_v8 = vld [vmem:[%s10233_s2 + $0xe8] ss:$36 sps:$4 sm:$0xff]   ;;  %v9657_v20 = vld [vmem:[%s10233_s2 + $0xf0] ss:$36 sps:$4 sm:$0xff]  }
 0x8bd   :  { %11091 = vst [vmem:[#allocation93_spill] sm:$0xff] %v9657_v20  ;;  %v9663_v26 = vld [vmem:[%s10233_s2 + $0xa4] ss:$36 sps:$4 sm:$0xff]  }
 0x8be   :  { %v9536_v57 = vadd.f32 %v5062_v59, %v3319_v48  ;;  %v9645_v59 = vld [vmem:[%s10233_s2 + $0xf4] ss:$36 sps:$4 sm:$0xff]   ;;  %v9669_v48 = vld [vmem:[%s10233_s2 + $0xac] ss:$36 sps:$4 sm:$0xff]  }
 0x8bf   :  { %11090 = vst [vmem:[#allocation91_spill] sm:$0xff] %v9645_v59  ;;  %11092 = vst [vmem:[#allocation21_spill] sm:$0xff] %v9669_v48 }
 0x8c0   :  { %11082 = vst [vmem:[#allocation113_spill] sm:$0xff] %v9536_v57  ;;  %v9540_v38 = vpack.c.bf16 %v9536_v57, %v9534_v3  ;;  %v9771_v57 = vld [vmem:[%s10233_s2 + $0x400] ss:$36 sps:$4 sm:$0xff]  }
 0x8c1   :  { %v9783_v3 = vld [vmem:[%s10233_s2 + $0x3bc] ss:$36 sps:$4 sm:$0xff]  }
 0x8c2   :  { %3404 = vmatprep.mubr.bf16.mxu0 %v9540_v38  ;;  %3447 = vmatprep.mubr.bf16.mxu1 %v9540_v38 }
 0x8c3   :  { %3405 = vmatmul.mubr.bf16.vlgmr.msra.gmra.mxu0 %v9544_v47  ;;  %3448 = vmatmul.mubr.bf16.vlgmr.msra.gmra.mxu1 %v9544_v47 }
 0x8c4   :  { %3459 = vmatpush1.bf16.msra.mxu0 %v9553_v24  ;;  %3502 = vmatpush1.bf16.msra.mxu1 %v9559_v50  ;;  %v9759_v50 = vld [vmem:[%s10233_s2 + $0x404] ss:$36 sps:$4 sm:$0xff]  }
 0x8c5   :  { %3490 = vmatprep.mubr.bf16.mxu0 %v9540_v38  ;;  %3533 = vmatprep.mubr.bf16.mxu1 %v9540_v38 }
 0x8c6   :  { %3460 = vmatprep.subr.bf16.mxu0 %v9567_v15  ;;  %3503 = vmatprep.subr.bf16.mxu1 %v9573_v21  ;;  %v9747_v21 = vld [vmem:[%s10233_s2 + $0x448] ss:$36 sps:$4 sm:$0xff]  }
 0x8c8   :  { %3461 = vmatpush1.bf16.msra.mxu0 %v9579_v43  ;;  %3504 = vmatpush1.bf16.msra.mxu1 %v9585_v46  ;;  %v9735_v46 = vld [vmem:[%s10233_s2 + $0x44c] ss:$36 sps:$4 sm:$0xff]  }
 0x8c9   :  { %3462 = vmatprep.subr.bf16.mxu0 %v9591_v53  ;;  %3505 = vmatprep.subr.bf16.mxu1 %v9597_v63  ;;  %v9723_v63 = vld [vmem:[%s10233_s2 + $0x10] ss:$36 sps:$4 sm:$0xff]  }
 0x8cc   :  { %3463 = vmatpush1.bf16.msra.mxu0 %v9603_v32  ;;  %3506 = vmatpush1.bf16.msra.mxu1 %v9609_v37  ;;  %v9711_v37 = vld [vmem:[%s10233_s2 + $0x14] ss:$36 sps:$4 sm:$0xff]  }
 0x8cd   :  { %3464 = vmatprep.subr.bf16.mxu0 %v9615_v16  ;;  %3507 = vmatprep.subr.bf16.mxu1 %v9621_v28  ;;  %v9699_v28 = vld [vmem:[%s10233_s2 + $0x58] ss:$36 sps:$4 sm:$0xff]  }
 0x8d0   :  { %3465 = vmatpush1.bf16.msra.mxu0 %v9627_v44  ;;  %3508 = vmatpush1.bf16.msra.mxu1 %v9633_v54  ;;  %v9687_v54 = vld [vmem:[%s10233_s2 + $0x5c] ss:$36 sps:$4 sm:$0xff]  }
 0x8d1   :  { %3466 = vmatprep.subr.bf16.mxu0 %v9639_v19  ;;  %3509 = vmatprep.subr.bf16.mxu1 %v9645_v59  ;;  %v9675_v59 = vld [vmem:[%s10233_s2 + $0xa0] ss:$36 sps:$4 sm:$0xff]  }
 0x8d4   :  { %3467 = vmatpush1.bf16.msra.mxu0 %v9651_v8  ;;  %3510 = vmatpush1.bf16.msra.mxu1 %v9657_v20  ;;  %v9681_v20 = vld [vmem:[%s10233_s2 + $0xa8] ss:$36 sps:$4 sm:$0xff]  }
 0x8d5   :  { %3468 = vmatprep.subr.bf16.mxu0 %v9663_v26  ;;  %3511 = vmatprep.subr.bf16.mxu1 %v9669_v48  ;;  %11093 = vst [vmem:[#allocation27_spill] sm:$0xff] %v9681_v20  ;;  %v9693_v48 = vld [vmem:[%s10233_s2 + $0x64] ss:$36 sps:$4 sm:$0xff]  }
 0x8d6   :  { %11094 = vst [vmem:[#allocation28_spill] sm:$0xff] %v9693_v48 }
 0x8d8   :  { %3469 = vmatpush1.bf16.msra.mxu0 %v9675_v59  ;;  %3512 = vmatpush1.bf16.msra.mxu1 %v9681_v20  ;;  %v9705_v20 = vld [vmem:[%s10233_s2 + $0x60] ss:$36 sps:$4 sm:$0xff]  }
 0x8d9   :  { %3470 = vmatprep.subr.bf16.mxu0 %v9687_v54  ;;  %3513 = vmatprep.subr.bf16.mxu1 %v9693_v48  ;;  %11095 = vst [vmem:[#allocation29_spill] sm:$0xff] %v9705_v20  ;;  %v9717_v48 = vld [vmem:[%s10233_s2 + $0x1c] ss:$36 sps:$4 sm:$0xff]  }
 0x8da   :  { %11096 = vst [vmem:[#allocation30_spill] sm:$0xff] %v9717_v48 }
 0x8dc   :  { %3471 = vmatpush1.bf16.msra.mxu0 %v9699_v28  ;;  %3514 = vmatpush1.bf16.msra.mxu1 %v9705_v20  ;;  %v9729_v20 = vld [vmem:[%s10233_s2 + $0x18] ss:$36 sps:$4 sm:$0xff]  }
 0x8dd   :  { %3472 = vmatprep.subr.bf16.mxu0 %v9711_v37  ;;  %3515 = vmatprep.subr.bf16.mxu1 %v9717_v48  ;;  %11097 = vst [vmem:[#allocation31_spill] sm:$0xff] %v9729_v20  ;;  %v9741_v48 = vld [vmem:[%s10233_s2 + $0x454] ss:$36 sps:$4 sm:$0xff]  }
 0x8de   :  { %11098 = vst [vmem:[#allocation32_spill] sm:$0xff] %v9741_v48 }
 0x8e0   :  { %3473 = vmatpush1.bf16.msra.mxu0 %v9723_v63  ;;  %3516 = vmatpush1.bf16.msra.mxu1 %v9729_v20  ;;  %v9753_v20 = vld [vmem:[%s10233_s2 + $0x450] ss:$36 sps:$4 sm:$0xff]  }
 0x8e1   :  { %3474 = vmatprep.subr.bf16.mxu0 %v9735_v46  ;;  %3517 = vmatprep.subr.bf16.mxu1 %v9741_v48  ;;  %11099 = vst [vmem:[#allocation33_spill] sm:$0xff] %v9753_v20  ;;  %v9765_v48 = vld [vmem:[%s10233_s2 + $0x40c] ss:$36 sps:$4 sm:$0xff]  }
 0x8e2   :  { %11100 = vst [vmem:[#allocation34_spill] sm:$0xff] %v9765_v48 }
 0x8e4   :  { %3475 = vmatpush2.bf16.msra.mxu0 %v9747_v21  ;;  %3518 = vmatpush2.bf16.msra.mxu1 %v9753_v20  ;;  %v9777_v20 = vld [vmem:[%s10233_s2 + $0x408] ss:$36 sps:$4 sm:$0xff]  }
 0x8e5   :  { %3476 = vmatprep.subr.bf16.mxu0 %v9759_v50  ;;  %3519 = vmatprep.subr.bf16.mxu1 %v9765_v48  ;;  %11101 = vst [vmem:[#allocation35_spill] sm:$0xff] %v9777_v20  ;;  %v9789_v48 = vld [vmem:[%s10233_s2 + $0x3c4] ss:$36 sps:$4 sm:$0xff]  }
 0x8e6   :  { %11102 = vst [vmem:[#allocation36_spill] sm:$0xff] %v9789_v48 }
 0x8e8   :  { %3477 = vmatpush2.bf16.msra.mxu0 %v9771_v57  ;;  %3520 = vmatpush2.bf16.msra.mxu1 %v9777_v20  ;;  %v9801_v20 = vld [vmem:[%s10233_s2 + $0x3c0] ss:$36 sps:$4 sm:$0xff]  }
 0x8e9   :  { %3478 = vmatprep.subr.bf16.mxu0 %v9783_v3  ;;  %3521 = vmatprep.subr.bf16.mxu1 %v9789_v48  ;;  %11103 = vst [vmem:[#allocation37_spill] sm:$0xff] %v9801_v20  ;;  %v9813_v48 = vld [vmem:[%s10233_s2 + $0x37c] ss:$36 sps:$4 sm:$0xff]  }
 0x8ea   :  { %11104 = vst [vmem:[#allocation38_spill] sm:$0xff] %v9813_v48 }
 0x8ec   :  { %3479 = vmatpush2.bf16.msra.mxu0 %v9795_v25  ;;  %3522 = vmatpush2.bf16.msra.mxu1 %v9801_v20  ;;  %v9825_v20 = vld [vmem:[%s10233_s2 + $0x378] ss:$36 sps:$4 sm:$0xff]  }
 0x8ed   :  { %3480 = vmatprep.subr.bf16.mxu0 %v9807_v45  ;;  %3523 = vmatprep.subr.bf16.mxu1 %v9813_v48  ;;  %11105 = vst [vmem:[#allocation39_spill] sm:$0xff] %v9825_v20  ;;  %v9837_v48 = vld [vmem:[%s10233_s2 + $0x334] ss:$36 sps:$4 sm:$0xff]  }
 0x8ee   :  { %11106 = vst [vmem:[#allocation40_spill] sm:$0xff] %v9837_v48 }
 0x8f0   :  { %3481 = vmatpush2.bf16.msra.mxu0 %v9819_v55  ;;  %3524 = vmatpush2.bf16.msra.mxu1 %v9825_v20  ;;  %v9849_v20 = vld [vmem:[%s10233_s2 + $0x330] ss:$36 sps:$4 sm:$0xff]  }
 0x8f1   :  { %3482 = vmatprep.subr.bf16.mxu0 %v9831_v4  ;;  %3525 = vmatprep.subr.bf16.mxu1 %v9837_v48  ;;  %11107 = vst [vmem:[#allocation41_spill] sm:$0xff] %v9849_v20  ;;  %v9861_v48 = vld [vmem:[%s10233_s2 + $0x2ec] ss:$36 sps:$4 sm:$0xff]  }
 0x8f2   :  { %11108 = vst [vmem:[#allocation42_spill] sm:$0xff] %v9861_v48 }
 0x8f4   :  { %3483 = vmatpush2.bf16.msra.mxu0 %v9843_v2  ;;  %3526 = vmatpush2.bf16.msra.mxu1 %v9849_v20  ;;  %v9873_v20 = vld [vmem:[%s10233_s2 + $0x2e8] ss:$36 sps:$4 sm:$0xff]  }
 0x8f5   :  { %3484 = vmatprep.subr.bf16.mxu0 %v9855_v29  ;;  %3527 = vmatprep.subr.bf16.mxu1 %v9861_v48  ;;  %11110 = vst [vmem:[#allocation44_spill] sm:$0xff] %v9873_v20  ;;  %v9885_v48 = vld [vmem:[%s10233_s2 + $0x2a4] ss:$36 sps:$4 sm:$0xff]  }
 0x8f6   :  { %11112 = vst [vmem:[#allocation46_spill] sm:$0xff] %v9885_v48 }
 0x8f8   :  { %3485 = vmatpush2.bf16.msra.mxu0 %v9867_v17  ;;  %3528 = vmatpush2.bf16.msra.mxu1 %v9873_v20  ;;  %v9891_v17 = vld [vmem:[%s10233_s2 + $0x298] ss:$36 sps:$4 sm:$0xff]   ;;  %v9897_v20 = vld [vmem:[%s10233_s2 + $0x2a0] ss:$36 sps:$4 sm:$0xff]  }
 0x8f9   :  { %3486 = vmatprep.subr.bf16.mxu0 %v9879_v33  ;;  %3529 = vmatprep.subr.bf16.mxu1 %v9885_v48  ;;  %11113 = vst [vmem:[#allocation47_spill] sm:$0xff] %v9891_v17  ;;  %11114 = vst [vmem:[#allocation48_spill] sm:$0xff] %v9897_v20  ;;  %v9903_v33 = vld [vmem:[%s10233_s2 + $0x254] ss:$36 sps:$4 sm:$0xff]   ;;  %v9909_v48 = vld [vmem:[%s10233_s2 + $0x25c] ss:$36 sps:$4 sm:$0xff]  }
 0x8fa   :  { %11115 = vst [vmem:[#allocation49_spill] sm:$0xff] %v9903_v33  ;;  %11116 = vst [vmem:[#allocation50_spill] sm:$0xff] %v9909_v48 }
 0x8fc   :  { %3487 = vmatpush2.bf16.msra.mxu0 %v9891_v17  ;;  %3530 = vmatpush2.bf16.msra.mxu1 %v9897_v20  ;;  %v9915_v17 = vld [vmem:[%s10233_s2 + $0x250] ss:$36 sps:$4 sm:$0xff]   ;;  %v9921_v20 = vld [vmem:[%s10233_s2 + $0x258] ss:$36 sps:$4 sm:$0xff]  }
 0x8fd   :  { %3488 = vmatprep.subr.bf16.mxu0 %v9903_v33  ;;  %3531 = vmatprep.subr.bf16.mxu1 %v9909_v48  ;;  %11117 = vst [vmem:[#allocation51_spill] sm:$0xff] %v9921_v20  ;;  %v9927_v33 = vld [vmem:[%s10233_s2 + $0x458] ss:$36 sps:$4 sm:$0xff]   ;;  %v5557_v48 = vld [vmem:[%s10233_s2 + $0x204] ss:$36 sps:$4 sm:$0xff]  }
 0x8fe   :  { %11118 = vst [vmem:[#allocation52_spill] sm:$0xff] %v9927_v33 }
 0x900   :  { %3489 = vmatpush2.bf16.msra.mxu0 %v9915_v17  ;;  %3532 = vmatpush2.bf16.msra.mxu1 %v9921_v20  ;;  %v9938_v20 = vld [vmem:[%s10233_s2 + $0x218] ss:$36 sps:$4 sm:$0xff]  }
 0x901   :  { %4440 = vmatprep.subr.bf16.mxu0 %v9927_v33  ;;  %3683 = vmatprep.subr.bf16.mxu1 %v5557_v48  ;;  %11119 = vst [vmem:[#allocation5_spill] sm:$0xff] %v9938_v20  ;;  %v9945_v33 = vld [vmem:[%s10233_s2 + $0x410] ss:$36 sps:$4 sm:$0xff]   ;;  %v5560_v48 = vld [vmem:[%s10233_s2 + $0x200] ss:$36 sps:$4 sm:$0xff]  }
 0x903   :  { %3491 = vmatmul.mubr.bf16.vlgmr.msra.gmra.mxu0 %v9544_v47  ;;  %3534 = vmatmul.mubr.bf16.vlgmr.msra.gmra.mxu1 %v9544_v47 }
 0x904   :  { %4441 = vmatpush3.bf16.msra.mxu0 %v9938_v20  ;;  %3576 = vmatprep.mubr.bf16.mxu0 %v9540_v38  ;;  %v9955_v20 = vld [vmem:[%s10233_s2 + $0x1d0] ss:$36 sps:$4 sm:$0xff]   ;;  %v9961_v38 = vld [vmem:[%s10233_s2 + $0x3c8] ss:$36 sps:$4 sm:$0xff]  }
 0x905   :  { %4442 = vmatprep.subr.bf16.mxu0 %v9945_v33  ;;  %3684 = vmatpush1.bf16.msra.mxu1 %v5560_v48  ;;  %v9975_v48 = vld [vmem:[%s10233_s2 + $0x380] ss:$36 sps:$4 sm:$0xff]  }
 0x906   :  { %3685 = vmatprep.subr.bf16.mxu1 %v9265_v18  ;;  %v9969_v18 = vld [vmem:[%s10233_s2 + $0x188] ss:$36 sps:$4 sm:$0xff]  }
 0x908   :  { %4443 = vmatpush3.bf16.msra.mxu0 %v9955_v20 }
 0x909   :  { %4444 = vmatprep.subr.bf16.mxu0 %v9961_v38  ;;  %3686 = vmatpush1.bf16.msra.mxu1 %v9277_v14  ;;  %v9983_v14 = vld [vmem:[%s10233_s2 + $0x140] ss:$36 sps:$4 sm:$0xff]  }
 0x90a   :  { %3687 = vmatprep.subr.bf16.mxu1 %v9283_v36  ;;  %v9989_v36 = vld [vmem:[%s10233_s2 + $0x338] ss:$36 sps:$4 sm:$0xff]  }
 0x90c   :  { %4445 = vmatpush3.bf16.msra.mxu0 %v9969_v18 }
 0x90d   :  { %4446 = vmatprep.subr.bf16.mxu0 %v9975_v48  ;;  %3688 = vmatpush1.bf16.msra.mxu1 %v9295_v52  ;;  %v9997_v52 = vld [vmem:[%s10233_s2 + $0xf8] ss:$36 sps:$4 sm:$0xff]  }
 0x90e   :  { %3689 = vmatprep.subr.bf16.mxu1 %v9301_v39  ;;  %v10003_v39 = vld [vmem:[%s10233_s2 + $0x2f0] ss:$36 sps:$4 sm:$0xff]  }
 0x910   :  { %4447 = vmatpush3.bf16.msra.mxu0 %v9983_v14 }
 0x911   :  { %4448 = vmatprep.subr.bf16.mxu0 %v9989_v36  ;;  %3690 = vmatpush1.bf16.msra.mxu1 %v9313_v40  ;;  %v10011_v40 = vld [vmem:[%s10233_s2 + $0xb0] ss:$36 sps:$4 sm:$0xff]  }
 0x912   :  { %3691 = vmatprep.subr.bf16.mxu1 %v9319_v22  ;;  %v10017_v22 = vld [vmem:[%s10233_s2 + $0x2a8] ss:$36 sps:$4 sm:$0xff]  }
 0x914   :  { %4449 = vmatpush3.bf16.msra.mxu0 %v9997_v52 }
 0x915   :  { %4450 = vmatprep.subr.bf16.mxu0 %v10003_v39  ;;  %3692 = vmatpush1.bf16.msra.mxu1 %v9331_v42  ;;  %v10025_v42 = vld [vmem:[%s10233_s2 + $0x68] ss:$36 sps:$4 sm:$0xff]  }
 0x916   :  { %3693 = vmatprep.subr.bf16.mxu1 %v9337_v31  ;;  %v10031_v31 = vld [vmem:[%s10233_s2 + $0x260] ss:$36 sps:$4 sm:$0xff]  }
 0x918   :  { %4451 = vmatpush3.bf16.msra.mxu0 %v10011_v40 }
 0x919   :  { %4452 = vmatprep.subr.bf16.mxu0 %v10017_v22  ;;  %3694 = vmatpush1.bf16.msra.mxu1 %v9349_v12  ;;  %v10039_v12 = vld [vmem:[%s10233_s2 + $0x20] ss:$36 sps:$4 sm:$0xff]  }
 0x91a   :  { %3695 = vmatprep.subr.bf16.mxu1 %v9355_v56  ;;  %v11120_v56 = vld [vmem:[#allocation43_spill] sm:$0xff] }
 0x91c   :  { %4453 = vmatpush3.bf16.msra.mxu0 %v10025_v42 }
 0x91d   :  { %4454 = vmatprep.subr.bf16.mxu0 %v10031_v31  ;;  %3696 = vmatpush1.bf16.msra.mxu1 %v9367_v35  ;;  %v11121_v35 = vld [vmem:[#allocation45_spill] sm:$0xff] }
 0x91e   :  { %3697 = vmatprep.subr.bf16.mxu1 %v9373_v7  ;;  %v11122_v7 = vld [vmem:[#allocation47_spill] sm:$0xff] }
 0x920   :  { %4455 = vmatpush3.bf16.msra.mxu0 %v10039_v12 }
 0x921   :  { %3724 = vmatprep.subr.bf16.mxu0 %v9400_v10  ;;  %3698 = vmatpush1.bf16.msra.mxu1 %v9385_v34  ;;  %v11123_v34 = vld [vmem:[#allocation49_spill] sm:$0xff] }
 0x922   :  { %3699 = vmatprep.subr.bf16.mxu1 %v9391_v11  ;;  %v11126_v11 = vld [vmem:[#allocation14_spill] sm:$0xff] }
 0x923   :  { %3577 = vmatmul.mubr.bf16.vlgmr.msra.gmra.mxu0 %v9544_v47 }
 0x924   :  { %3725 = vmatpush1.bf16.msra.mxu0 %v9553_v24 }
 0x925   :  { %3726 = vmatprep.subr.bf16.mxu0 %v9567_v15  ;;  %3700 = vmatpush2.bf16.msra.mxu1 %v9406_v62  ;;  %v11131_v15 = vld [vmem:[#allocation109_spill] sm:$0xff] }
 0x926   :  { %3701 = vmatprep.subr.bf16.mxu1 %v9412_v58 }
 0x928   :  { %3727 = vmatpush1.bf16.msra.mxu0 %v9579_v43 }
 0x929   :  { %3728 = vmatprep.subr.bf16.mxu0 %v9591_v53  ;;  %3702 = vmatpush2.bf16.msra.mxu1 %v9418_v27  ;;  %v11127_v27 = vld [vmem:[#allocation18_spill] sm:$0xff]  ;;  %v11132_v53 = vld [vmem:[#allocation25_spill] sm:$0xff] }
 0x92a   :  { %3703 = vmatprep.subr.bf16.mxu1 %v9424_v1 }
 0x92c   :  { %3729 = vmatpush1.bf16.msra.mxu0 %v9603_v32 }
 0x92d   :  { %3730 = vmatprep.subr.bf16.mxu0 %v9615_v16  ;;  %3704 = vmatpush2.bf16.msra.mxu1 %v9430_v5 }
 0x92e   :  { %3705 = vmatprep.subr.bf16.mxu1 %v9436_v49 }
 0x930   :  { %3731 = vmatpush1.bf16.msra.mxu0 %v9627_v44 }
 0x931   :  { %3732 = vmatprep.subr.bf16.mxu0 %v9639_v19  ;;  %3706 = vmatpush2.bf16.msra.mxu1 %v9442_v51 }
 0x932   :  { %3707 = vmatprep.subr.bf16.mxu1 %v9448_v9 }
 0x934   :  { %3733 = vmatpush1.bf16.msra.mxu0 %v9651_v8 }
 0x935   :  { %3734 = vmatprep.subr.bf16.mxu0 %v9663_v26  ;;  %3708 = vmatpush2.bf16.msra.mxu1 %v9454_v23  ;;  %v11128_v23 = vld [vmem:[#allocation23_spill] sm:$0xff] }
 0x936   :  { %3709 = vmatprep.subr.bf16.mxu1 %v9460_v30  ;;  %v11129_v30 = vld [vmem:[#allocation16_spill] sm:$0xff] }
 0x938   :  { %3735 = vmatpush1.bf16.msra.mxu0 %v9675_v59  ;;  %v11134_v59 = vld [vmem:[#allocation96_spill] sm:$0xff] }
 0x939   :  { %3736 = vmatprep.subr.bf16.mxu0 %v9687_v54  ;;  %3710 = vmatpush2.bf16.msra.mxu1 %v9466_v6  ;;  %v484_v8 = vadd.f32 %v11134_v59, %v11132_v53 }
 0x93a   :  { %3711 = vmatprep.subr.bf16.mxu1 %v9472_v41 }
 0x93c   :  { %3737 = vmatpush1.bf16.msra.mxu0 %v9699_v28 }
 0x93d   :  { %3738 = vmatprep.subr.bf16.mxu0 %v9711_v37  ;;  %3712 = vmatpush2.bf16.msra.mxu1 %v9478_v13  ;;  %v11130_v13 = vld [vmem:[#allocation90_spill] sm:$0xff] }
 0x93e   :  { %3713 = vmatprep.subr.bf16.mxu1 %v9484_v0  ;;  %v388_v0 = vadd.f32 %v11130_v13, %v11128_v23 }
 0x940   :  { %3739 = vmatpush1.bf16.msra.mxu0 %v9723_v63  ;;  %v11133_v63 = vld [vmem:[#allocation94_spill] sm:$0xff] }
 0x941   :  { %3740 = vmatprep.subr.bf16.mxu0 %v9735_v46  ;;  %3714 = vmatpush2.bf16.msra.mxu1 %v9490_v61  ;;  %v481_v32 = vadd.f32 %v11133_v63, %v11132_v53 }
 0x942   :  { %3767 = vmatprep.subr.bf16.mxu1 %v9496_v60 }
 0x944   :  { %3741 = vmatpush2.bf16.msra.mxu0 %v9747_v21 }
 0x945   :  { %3742 = vmatprep.subr.bf16.mxu0 %v9759_v50 }
 0x948   :  { %3743 = vmatpush2.bf16.msra.mxu0 %v9771_v57 }
 0x949   :  { %3744 = vmatprep.subr.bf16.mxu0 %v9783_v3 }
 0x94c   :  { %3745 = vmatpush2.bf16.msra.mxu0 %v9795_v25  ;;  %v11124_v25 = vld [vmem:[#allocation52_spill] sm:$0xff] }
 0x94d   :  { %3746 = vmatprep.subr.bf16.mxu0 %v9807_v45  ;;  %v11125_v45 = vld [vmem:[#allocation22_spill] sm:$0xff] }
 0x94e   :  { %v382_v10 = vadd.f32 %v11126_v11, %v11125_v45  ;;  %v386_v1 = vadd.f32 %v11127_v27, %v11125_v45 }
 0x950   :  { %3747 = vmatpush2.bf16.msra.mxu0 %v9819_v55 }
 0x951   :  { %3748 = vmatprep.subr.bf16.mxu0 %v9831_v4 }
 0x954   :  { %3749 = vmatpush2.bf16.msra.mxu0 %v9843_v2 }
 0x955   :  { %3750 = vmatprep.subr.bf16.mxu0 %v9855_v29 }
 0x958   :  { %3751 = vmatpush2.bf16.msra.mxu0 %v11120_v56 }
 0x959   :  { %3752 = vmatprep.subr.bf16.mxu0 %v11121_v35 }
 0x95c   :  { %3753 = vmatpush2.bf16.msra.mxu0 %v11122_v7 }
 0x95d   :  { %3754 = vmatprep.subr.bf16.mxu0 %v11123_v34  ;;  %v11135_v34 = vld [vmem:[#allocation110_spill] sm:$0xff] }
 0x960   :  { %3755 = vmatpush2.bf16.msra.mxu0 %v9915_v17  ;;  %v384_v17 = vadd.f32 %v11129_v30, %v11128_v23 }
 0x961   :  { %4462 = vmatprep.subr.bf16.mxu0 %v11124_v25 }
 0x983   :  { %v3406_v62 = vpop.f32.mrf.mxu0  ;;  %v3449_v47 = vpop.f32.mrf.mxu1 }
 0x984   :  { %v3639_v58 = vadd.f32 %v3406_v62, %v382_v10  ;;  %v3667_v21 = vadd.f32 %v11131_v15, %v3449_v47  ;;  %v11136_v62 = vld [vmem:[#allocation111_spill] sm:$0xff] }
 0x985   :  { %v3408_v2 = vpop.f32.mrf.mxu0  ;;  %v3451_v24 = vpop.f32.mrf.mxu1 }
 0x986   :  { %v4275_v5 = vmul.f32 -1.442695, %v3639_v58  ;;  %v3640_v6 = vadd.f32 %v3408_v2, %v384_v17  ;;  %v11137_v17 = vld [vmem:[#allocation24_spill] sm:$0xff] }
 0x987   :  { %v3410_v49 = vpop.f32.mrf.mxu0  ;;  %v3453_v46 = vpop.f32.mrf.mxu1 }
 0x988   :  { %5065 = vpow2.f32 %v4275_v5  ;;  %v3641_v51 = vadd.f32 %v3410_v49, %v386_v1  ;;  %v4276_v61 = vmul.f32 -1.442695, %v3640_v6  ;;  %v3668_v54 = vadd.f32 %v11131_v15, %v3453_v46 }
 0x989   :  { %v3412_v41 = vpop.f32.mrf.mxu0  ;;  %v3455_v49 = vpop.f32.mrf.mxu1 }
 0x98a   :  { %v4277_v9 = vmul.f32 -1.442695, %v3641_v51  ;;  %v3642_v60 = vadd.f32 %v3412_v41, %v388_v0 }
 0x98c   :  { %5067 = vpow2.f32 %v4277_v9  ;;  %v4278_v55 = vmul.f32 -1.442695, %v3642_v60 }
 0x98d   :  { %5069 = vpow2.f32 %v4276_v61 }
 0x995   :  { %v5066_v29 = vpop.eup %5065 }
 0x996   :  { %v3655_v4 = vadd.f32 1.0, %v5066_v29 }
 0x998   :  { %5071 = vrcp.f32 %v3655_v4 }
 0x999   :  { %v5068_v3 = vpop.eup %5067  ;;  %5073 = vpow2.f32 %v4278_v55 }
 0x99a   :  { %v3657_v57 = vadd.f32 1.0, %v5068_v3  ;;  %v5070_v50 = vpop.eup %5069 }
 0x99b   :  { %v3656_v44 = vadd.f32 1.0, %v5070_v50  ;;  %v11138_v50 = vld [vmem:[#allocation26_spill] sm:$0xff] }
 0x99c   :  { %5075 = vrcp.f32 %v3657_v57 }
 0x9a5   :  { %v5072_v43 = vpop.eup %5071 }
 0x9a6   :  { %v3669_v37 = vmul.f32 %v5072_v43, %v3667_v21  ;;  %v5074_v16 = vpop.eup %5073 }
 0x9a7   :  { %v3658_v35 = vadd.f32 1.0, %v5074_v16 }
 0x9a8   :  { %v3671_v28 = vadd.f32 %v3669_v37, %v481_v32 }
 0x9a9   :  { %v5076_v19 = vpop.eup %5075 }
 0x9aa   :  { %5077 = vtanh.f32 %v3671_v28  ;;  %v3670_v26 = vmul.f32 %v5076_v19, %v3668_v54  ;;  %v10119_v19 = vld [vmem:[%s10237_s7] ss:$0 sm:$0xff] }
 0x9ab   :  { %5079 = vrcp.f32 %v3656_v44 }
 0x9ac   :  { %v3672_v56 = vadd.f32 %v3670_v26, %v484_v8 }
 0x9ae   :  { %5081 = vtanh.f32 %v3672_v56 }
 0x9af   :  { %5083 = vrcp.f32 %v3658_v35  ;;  %v10125_v35 = vld [vmem:[%s10238_s6] ss:$0 sm:$0xff] }
 0x9b7   :  { %v5078_v7 = vpop.eup %5077 }
 0x9b8   :  { %v3675_v25 = vsub.f32 %v11135_v34, %v5078_v7  ;;  %v5080_v45 = vpop.eup %5079 }
 0x9ba   :  { %v3677_v11 = vmul.f32 %v5080_v45, %v3675_v25 }
 0x9bb   :  { %v5082_v10 = vpop.eup %5081 }
 0x9bc   :  { %v3676_v58 = vsub.f32 %v11136_v62, %v5082_v10  ;;  %v3679_v2 = vadd.f32 %v5078_v7, %v3677_v11  ;;  %v5084_v27 = vpop.eup %5083 }
 0x9be   :  { %v3678_v1 = vmul.f32 %v5084_v27, %v3676_v58 }
 0x9c0   :  { %v3680_v5 = vadd.f32 %v5082_v10, %v3678_v1 }
 0x9c2   :  { %v10110_v51 = vpack.c.bf16 %v3680_v5, %v3679_v2 }
 0x9c3   :  { %v3535_v9 = vpop.f32.mrf.mxu1  ;;  %v3492_v61 = vpop.f32.mrf.mxu0 }
 0x9c4   :  { %v3585_v23 = vadd.f32 %v3535_v9, %v3451_v24  ;;  %v11139_v9 = vld [vmem:[#allocation112_spill] sm:$0xff] }
 0x9c5   :  { %v3537_v30 = vpop.f32.mrf.mxu1  ;;  %v3494_v4 = vpop.f32.mrf.mxu0 }
 0x9c6   :  { %v3589_v6 = vadd.f32 %v3585_v23, %v11137_v17  ;;  %v3586_v3 = vadd.f32 %v3537_v30, %v3492_v61  ;;  %v3617_v7 = vadd.f32 %v10125_v35, %v3494_v4 }
 0x9c7   :  { %v3539_v41 = vpop.f32.mrf.mxu1  ;;  %v3496_v57 = vpop.f32.mrf.mxu0 }
 0x9c8   :  { %v4271_v13 = vmul.f32 -1.442695, %v3589_v6  ;;  %v3587_v0 = vadd.f32 %v3539_v41, %v3455_v49  ;;  %v3590_v15 = vadd.f32 %v3586_v3, %v11138_v50  ;;  %v11140_v41 = vld [vmem:[#allocation113_spill] sm:$0xff]  ;;  %v11141_v3 = vld [vmem:[#allocation114_spill] sm:$0xff] }
 0x9c9   :  { %v3541_v55 = vpop.f32.mrf.mxu1  ;;  %v3498_v37 = vpop.f32.mrf.mxu0 }
 0x9ca   :  { %5085 = vpow2.f32 %v4271_v13  ;;  %v3591_v60 = vadd.f32 %v3587_v0, %v11137_v17  ;;  %v3588_v47 = vadd.f32 %v3541_v55, %v3496_v57  ;;  %v4272_v46 = vmul.f32 -1.442695, %v3590_v15  ;;  %v11142_v57 = vld [vmem:[#allocation5_spill] sm:$0xff]  ;;  %v11144_v15 = vld [vmem:[#allocation116_spill] sm:$0xff] }
 0x9cb   :  { %v3618_v2 = vadd.f32 %v10125_v35, %v3498_v37  ;;  %v11165_v37 = vld [vmem:[#allocation40_spill] sm:$0xff] }
 0x9cc   :  { %v4273_v29 = vmul.f32 -1.442695, %v3591_v60  ;;  %v3592_v21 = vadd.f32 %v3588_v47, %v11138_v50  ;;  %v11143_v47 = vld [vmem:[#allocation115_spill] sm:$0xff] }
 0x9ce   :  { %5087 = vpow2.f32 %v4273_v29  ;;  %v4274_v63 = vmul.f32 -1.442695, %v3592_v21  ;;  %v11146_v21 = vld [vmem:[#allocation3_spill] sm:$0xff] }
 0x9d7   :  { %v5086_v24 = vpop.eup %5085 }
 0x9d8   :  { %v3605_v43 = vadd.f32 1.0, %v5086_v24  ;;  %v11145_v24 = vld [vmem:[#allocation17_spill] sm:$0xff] }
 0x9da   :  { %5089 = vrcp.f32 %v3605_v43  ;;  %v11147_v43 = vld [vmem:[#allocation19_spill] sm:$0xff] }
 0x9db   :  { %v5088_v53 = vpop.eup %5087  ;;  %5091 = vpow2.f32 %v4272_v46  ;;  %v11148_v46 = vld [vmem:[#allocation4_spill] sm:$0xff] }
 0x9dc   :  { %v3607_v32 = vadd.f32 1.0, %v5088_v53  ;;  %5093 = vpow2.f32 %v4274_v63  ;;  %v11159_v53 = vld [vmem:[#allocation34_spill] sm:$0xff]  ;;  %v11161_v63 = vld [vmem:[#allocation36_spill] sm:$0xff] }
 0x9de   :  { %5095 = vrcp.f32 %v3607_v32  ;;  %v11163_v32 = vld [vmem:[#allocation38_spill] sm:$0xff] }
 0x9e3   :  { %v4456_v16 = vpop.f32.mrf.mxu0 }
 0x9e5   :  { %v4457_v28 = vpop.f32.mrf.mxu0 }
 0x9e6   :  { %v4458_v44 = vadd.f32 %v4457_v28, %v4456_v16  ;;  %v11167_v16 = vld [vmem:[#allocation42_spill] sm:$0xff]  ;;  %v11168_v28 = vld [vmem:[#allocation44_spill] sm:$0xff] }
 0x9e7   :  { %v4459_v54 = vpop.f32.mrf.mxu0  ;;  %v5090_v8 = vpop.eup %5089 }
 0x9e8   :  { %v3619_v59 = vadd.f32 %v10119_v19, %v4458_v44  ;;  %v5092_v56 = vpop.eup %5091  ;;  %v11169_v44 = vld [vmem:[#allocation46_spill] sm:$0xff] }
 0x9e9   :  { %v4460_v26 = vpop.f32.mrf.mxu0  ;;  %v5094_v45 = vpop.eup %5093  ;;  %v3606_v58 = vadd.f32 1.0, %v5092_v56  ;;  %v5578_v56 = vmov 0.0  }
 0x9ea   :  { %v3621_v34 = vmul.f32 %v5090_v8, %v3619_v59  ;;  %v4461_v25 = vadd.f32 %v4460_v26, %v4459_v54  ;;  %v3608_v1 = vadd.f32 1.0, %v5094_v45  ;;  %v11170_v54 = vld [vmem:[#allocation48_spill] sm:$0xff]  ;;  %v11171_v59 = vld [vmem:[#allocation50_spill] sm:$0xff]  ;;  %v11172_v8 = vld [vmem:[#allocation51_spill] sm:$0xff] }
 0x9eb   :  { %v5096_v62 = vpop.eup %5095  ;;  %v4797_v26 = vld [vmem:[%s10239_s8 + $0x38] sm:$0xff]   ;;  %v4802_v45 = vld [vmem:[%s10239_s8 + $0x10] sm:$0xff]  }
 0x9ec   :  { %v3623_v11 = vadd.f32 %v3621_v34, %v3617_v7  ;;  %v3620_v10 = vadd.f32 %v10119_v19, %v4461_v25  ;;  %v4798_v7 = vld [vmem:[%s10239_s8 + $0x30] sm:$0xff]   ;;  %v4799_v34 = vld [vmem:[%s10239_s8 + $0x28] sm:$0xff]   ;;  %v4801_v25 = vld [vmem:[%s10239_s8 + $0x18] sm:$0xff]  }
 0x9ee   :  { %5097 = vtanh.f32 %v3623_v11  ;;  %v3622_v27 = vmul.f32 %v5096_v62, %v3620_v10  ;;  %v4803_v11 = vld [vmem:[%s10239_s8 + $0x8] sm:$0xff]   ;;  %v4804_v10 = vld [vmem:[%s10239_s8] sm:$0xff]  }
 0x9ef   :  { %5099 = vrcp.f32 %v3606_v58 }
 0x9f0   :  { %v3624_v5 = vadd.f32 %v3622_v27, %v3618_v2 }
 0x9f2   :  { %5101 = vtanh.f32 %v3624_v5 }
 0x9f3   :  { %5103 = vrcp.f32 %v3608_v1 }
 0x9fb   :  { %v5098_v49 = vpop.eup %5097 }
 0x9fc   :  { %v3627_v23 = vsub.f32 %v11139_v9, %v5098_v49  ;;  %v5100_v30 = vpop.eup %5099 }
 0x9fe   :  { %v3629_v0 = vmul.f32 %v5100_v30, %v3627_v23 }
 0x9ff   :  { %v5102_v6 = vpop.eup %5101 }
 0xa00   :  { %v3628_v13 = vsub.f32 %v11140_v41, %v5102_v6  ;;  %v5104_v61 = vpop.eup %5103  ;;  %v10132_v29 = vadd.f32 %v5098_v49, %v3629_v0 }
 0xa02   :  { %v3630_v60 = vmul.f32 %v5104_v61, %v3628_v13 }
 0xa04   :  { %v10134_v4 = vadd.f32 %v5102_v6, %v3630_v60 }
 0xa06   :  { %v3682_v55 = vpack.c.bf16 %v10134_v4, %v10132_v29 }
 0xa08   :  { %3715 = vmatprep.mubr.bf16.mxu1 %v3682_v55  ;;  %3756 = vmatprep.mubr.bf16.mxu0 %v3682_v55 }
 0xa09   :  { %3716 = vmatmul.mubr.bf16.vlgmr.msra.gmra.mxu1 %v10110_v51  ;;  %3757 = vmatmul.mubr.bf16.vlgmr.msra.gmra.mxu0 %v10110_v51 }
 0xa0a   :  { %3768 = vmatpush1.bf16.msra.mxu1 %v11141_v3  ;;  %4463 = vmatpush3.bf16.msra.mxu0 %v11142_v57 }
 0xa0b   :  { %3799 = vmatprep.mubr.bf16.mxu1 %v3682_v55  ;;  %3842 = vmatprep.mubr.bf16.mxu0 %v3682_v55 }
 0xa0c   :  { %3769 = vmatprep.subr.bf16.mxu1 %v11143_v47  ;;  %4464 = vmatprep.subr.bf16.mxu0 %v9945_v33  ;;  %v11149_v33 = vld [vmem:[#allocation91_spill] sm:$0xff] }
 0xa0e   :  { %3770 = vmatpush1.bf16.msra.mxu1 %v11144_v15  ;;  %4465 = vmatpush3.bf16.msra.mxu0 %v9955_v20  ;;  %v11150_v20 = vld [vmem:[#allocation93_spill] sm:$0xff] }
 0xa0f   :  { %3771 = vmatprep.subr.bf16.mxu1 %v11145_v24  ;;  %4466 = vmatprep.subr.bf16.mxu0 %v9961_v38  ;;  %v11151_v38 = vld [vmem:[#allocation21_spill] sm:$0xff] }
 0xa12   :  { %3772 = vmatpush1.bf16.msra.mxu1 %v11146_v21  ;;  %4467 = vmatpush3.bf16.msra.mxu0 %v9969_v18  ;;  %v11152_v18 = vld [vmem:[#allocation27_spill] sm:$0xff] }
 0xa13   :  { %3773 = vmatprep.subr.bf16.mxu1 %v11147_v43  ;;  %4468 = vmatprep.subr.bf16.mxu0 %v9975_v48  ;;  %v11153_v48 = vld [vmem:[#allocation28_spill] sm:$0xff] }
 0xa16   :  { %3774 = vmatpush1.bf16.msra.mxu1 %v11148_v46  ;;  %4469 = vmatpush3.bf16.msra.mxu0 %v9983_v14  ;;  %v11154_v14 = vld [vmem:[#allocation29_spill] sm:$0xff] }
 0xa17   :  { %3775 = vmatprep.subr.bf16.mxu1 %v11149_v33  ;;  %4470 = vmatprep.subr.bf16.mxu0 %v9989_v36  ;;  %v11155_v36 = vld [vmem:[#allocation30_spill] sm:$0xff] }
 0xa1a   :  { %3776 = vmatpush1.bf16.msra.mxu1 %v11150_v20  ;;  %4471 = vmatpush3.bf16.msra.mxu0 %v9997_v52  ;;  %v11156_v52 = vld [vmem:[#allocation31_spill] sm:$0xff] }
 0xa1b   :  { %3777 = vmatprep.subr.bf16.mxu1 %v11151_v38  ;;  %4472 = vmatprep.subr.bf16.mxu0 %v10003_v39  ;;  %v11157_v39 = vld [vmem:[#allocation32_spill] sm:$0xff] }
 0xa1e   :  { %3778 = vmatpush1.bf16.msra.mxu1 %v11152_v18  ;;  %4473 = vmatpush3.bf16.msra.mxu0 %v10011_v40  ;;  %v11158_v40 = vld [vmem:[#allocation33_spill] sm:$0xff] }
 0xa1f   :  { %3779 = vmatprep.subr.bf16.mxu1 %v11153_v48  ;;  %4474 = vmatprep.subr.bf16.mxu0 %v10017_v22  ;;  %v11160_v22 = vld [vmem:[#allocation35_spill] sm:$0xff] }
 0xa22   :  { %3780 = vmatpush1.bf16.msra.mxu1 %v11154_v14  ;;  %4475 = vmatpush3.bf16.msra.mxu0 %v10025_v42  ;;  %v11162_v42 = vld [vmem:[#allocation37_spill] sm:$0xff] }
 0xa23   :  { %3781 = vmatprep.subr.bf16.mxu1 %v11155_v36  ;;  %4476 = vmatprep.subr.bf16.mxu0 %v10031_v31  ;;  %v11164_v31 = vld [vmem:[#allocation39_spill] sm:$0xff] }
 0xa26   :  { %3782 = vmatpush1.bf16.msra.mxu1 %v11156_v52  ;;  %4477 = vmatpush3.bf16.msra.mxu0 %v10039_v12  ;;  %v11166_v12 = vld [vmem:[#allocation41_spill] sm:$0xff] }
 0xa27   :  { %3783 = vmatprep.subr.bf16.mxu1 %v11157_v39  ;;  %4525 = vmatprep.subr.bf16.mxu0 %v5578_v56 }
 0xa29   :  { %3843 = vmatmul.mubr.bf16.vlgmr.msra.gmra.mxu0 %v10110_v51 }
 0xa2a   :  { %3784 = vmatpush2.bf16.msra.mxu1 %v11158_v40  ;;  %4526 = vmatpush3.bf16.msra.mxu0 %v4797_v26 }
 0xa2b   :  { %3785 = vmatprep.subr.bf16.mxu1 %v11159_v53  ;;  %4527 = vmatprep.subr.bf16.mxu0 %v5578_v56 }
 0xa2c   :  { %4541 = vmatprep.mubr.msk.bf16.mxu0 %vm5579_vm0, %v5578_v56 }
 0xa2e   :  { %3786 = vmatpush2.bf16.msra.mxu1 %v11160_v22  ;;  %4528 = vmatpush3.bf16.msra.mxu0 %v4798_v7 }
 0xa2f   :  { %3787 = vmatprep.subr.bf16.mxu1 %v11161_v63  ;;  %4529 = vmatprep.subr.bf16.mxu0 %v5578_v56 }
 0xa32   :  { %3788 = vmatpush2.bf16.msra.mxu1 %v11162_v42  ;;  %4530 = vmatpush3.bf16.msra.mxu0 %v4799_v34 }
 0xa33   :  { %3789 = vmatprep.subr.bf16.mxu1 %v11163_v32  ;;  %4531 = vmatprep.subr.bf16.mxu0 %v5578_v56 }
 0xa36   :  { %3790 = vmatpush2.bf16.msra.mxu1 %v11164_v31 }
 0xa37   :  { %3791 = vmatprep.subr.bf16.mxu1 %v11165_v37 }
 0xa3a   :  { %3792 = vmatpush2.bf16.msra.mxu1 %v11166_v12 }
 0xa3b   :  { %3793 = vmatprep.subr.bf16.mxu1 %v11167_v16 }
 0xa3e   :  { %3794 = vmatpush2.bf16.msra.mxu1 %v11168_v28 }
 0xa3f   :  { %3795 = vmatprep.subr.bf16.mxu1 %v11169_v44 }
 0xa42   :  { %3796 = vmatpush2.bf16.msra.mxu1 %v11170_v54 }
 0xa43   :  { %3797 = vmatprep.subr.bf16.mxu1 %v11171_v59 }
 0xa46   :  { %3798 = vmatpush2.bf16.msra.mxu1 %v11172_v8 }
 0xa49   :  { %3800 = vmatmul.mubr.bf16.vlgmr.msra.gmra.mxu1 %v10110_v51  ;;  %v4800_v51 = vld [vmem:[%s10239_s8 + $0x20] sm:$0xff]  }
 0xa4a   :  { %4532 = vmatpush3.bf16.msra.mxu0 %v4800_v51 }
 0xa4b   :  { %4533 = vmatprep.subr.bf16.mxu0 %v5578_v56 }
 0xa4e   :  { %4534 = vmatpush3.bf16.msra.mxu0 %v4801_v25 }
 0xa4f   :  { %4535 = vmatprep.subr.bf16.mxu0 %v5578_v56 }
 0xa52   :  { %4536 = vmatpush3.bf16.msra.mxu0 %v4802_v45  ;;  %v4283_v45 = vld [vmem:[%s10240_s9] ss:$0 sm:$0xff] }
 0xa53   :  { %4537 = vmatprep.subr.bf16.mxu0 %v5578_v56 }
 0xa56   :  { %4538 = vmatpush3.bf16.msra.mxu0 %v4803_v11 }
 0xa57   :  { %4539 = vmatprep.subr.bf16.mxu0 %v5578_v56 }
 0xa5a   :  { %4540 = vmatpush3.bf16.msra.mxu0 %v4804_v10 }
 0xac9   :  { %v3717_v62 = vpop.f32.mrf.mxu1  ;;  %v3758_v30 = vpop.f32.mrf.mxu0 }
 0xacb   :  { %v3718_v58 = vpop.f32.mrf.mxu1  ;;  %v3760_v0 = vpop.f32.mrf.mxu0 }
 0xacc   :  { %v3883_v53 = vadd.f32 %v10125_v35, %v3760_v0 }
 0xacd   :  { %v3720_v2 = vpop.f32.mrf.mxu1  ;;  %v3762_v3 = vpop.f32.mrf.mxu0 }
 0xacf   :  { %v3721_v27 = vpop.f32.mrf.mxu1  ;;  %v3764_v15 = vpop.f32.mrf.mxu0 }
 0xad0   :  { %v3884_v12 = vadd.f32 %v10125_v35, %v3764_v15 }
 0xae9   :  { %v4478_v43 = vpop.f32.mrf.mxu0 }
 0xb09   :  { %v3801_v1 = vpop.f32.mrf.mxu1 }
 0xb0a   :  { %v3851_v5 = vadd.f32 %v3801_v1, %v3718_v58 }
 0xb0b   :  { %v3803_v49 = vpop.f32.mrf.mxu1 }
 0xb0c   :  { %v3855_v9 = vadd.f32 %v3851_v5, %v11137_v17  ;;  %v3852_v55 = vadd.f32 %v3803_v49, %v3758_v30 }
 0xb0d   :  { %v3805_v23 = vpop.f32.mrf.mxu1 }
 0xb0e   :  { %v4279_v6 = vmul.f32 -1.442695, %v3855_v9  ;;  %v3853_v41 = vadd.f32 %v3805_v23, %v3721_v27  ;;  %v3856_v47 = vadd.f32 %v3852_v55, %v11138_v50 }
 0xb0f   :  { %v3807_v60 = vpop.f32.mrf.mxu1 }
 0xb10   :  { %5105 = vpow2.f32 %v4279_v6  ;;  %v3857_v13 = vadd.f32 %v3853_v41, %v11137_v17  ;;  %v3854_v57 = vadd.f32 %v3807_v60, %v3762_v3  ;;  %v4280_v46 = vmul.f32 -1.442695, %v3856_v47  ;;  %v4479_v17 = vpop.f32.mrf.mxu0 }
 0xb11   :  { %v4480_v14 = vadd.f32 %v4479_v17, %v4478_v43 }
 0xb12   :  { %v4281_v61 = vmul.f32 -1.442695, %v3857_v13  ;;  %v3858_v24 = vadd.f32 %v3854_v57, %v11138_v50  ;;  %v4481_v48 = vpop.f32.mrf.mxu0 }
 0xb13   :  { %v3885_v52 = vadd.f32 %v10119_v19, %v4480_v14 }
 0xb14   :  { %5107 = vpow2.f32 %v4281_v61  ;;  %v4282_v20 = vmul.f32 -1.442695, %v3858_v24  ;;  %v4482_v36 = vpop.f32.mrf.mxu0 }
 0xb15   :  { %v4483_v39 = vadd.f32 %v4482_v36, %v4481_v48 }
 0xb17   :  { %v3886_v42 = vadd.f32 %v10119_v19, %v4483_v39 }
 0xb1d   :  { %v5106_v21 = vpop.eup %5105 }
 0xb1e   :  { %v3871_v33 = vadd.f32 1.0, %v5106_v21 }
 0xb20   :  { %5109 = vrcp.f32 %v3871_v33 }
 0xb21   :  { %v5108_v38 = vpop.eup %5107  ;;  %5111 = vpow2.f32 %v4280_v46 }
 0xb22   :  { %v3873_v18 = vadd.f32 1.0, %v5108_v38  ;;  %5113 = vpow2.f32 %v4282_v20 }
 0xb24   :  { %5115 = vrcp.f32 %v3873_v18 }
 0xb2d   :  { %v5110_v40 = vpop.eup %5109 }
 0xb2e   :  { %v5112_v50 = vpop.eup %5111  ;;  %v3887_v22 = vmul.f32 %v5110_v40, %v3885_v52 }
 0xb2f   :  { %v5114_v63 = vpop.eup %5113  ;;  %v3872_v37 = vadd.f32 1.0, %v5112_v50 }
 0xb30   :  { %v3889_v32 = vadd.f32 %v3887_v22, %v3883_v53  ;;  %v3874_v44 = vadd.f32 1.0, %v5114_v63 }
 0xb31   :  { %v5116_v31 = vpop.eup %5115 }
 0xb32   :  { %5117 = vtanh.f32 %v3889_v32  ;;  %v3888_v16 = vmul.f32 %v5116_v31, %v3886_v42 }
 0xb33   :  { %5119 = vrcp.f32 %v3872_v37 }
 0xb34   :  { %v3890_v28 = vadd.f32 %v3888_v16, %v3884_v12 }
 0xb36   :  { %5121 = vtanh.f32 %v3890_v28 }
 0xb37   :  { %5123 = vrcp.f32 %v3874_v44 }
 0xb3f   :  { %v5118_v54 = vpop.eup %5117 }
 0xb40   :  { %v3893_v59 = vsub.f32 %v10132_v29, %v5118_v54  ;;  %v5120_v8 = vpop.eup %5119 }
 0xb42   :  { %v3895_v19 = vmul.f32 %v5120_v8, %v3893_v59 }
 0xb43   :  { %v5122_v26 = vpop.eup %5121 }
 0xb44   :  { %v3894_v56 = vsub.f32 %v10134_v4, %v5122_v26  ;;  %v5124_v7 = vpop.eup %5123  ;;  %v3897_v51 = vadd.f32 %v5118_v54, %v3895_v19 }
 0xb46   :  { %v3896_v34 = vmul.f32 %v5124_v7, %v3894_v56 }
 0xb48   :  { %v3898_v25 = vadd.f32 %v5122_v26, %v3896_v34 }
 0xb4a   :  { %v3899_v35 = vpack.c.bf16 %v3898_v25, %v3897_v51 }
 0xb4c   :  { %4542 = vmatmul.mubr.bf16.vlgmr.msra.gmra.mxu0 %v3899_v35 }
 0xc0c   :  { %v4005_v11 = vpop.f32.mrf.mxu0 }
 0xc0d   :  { %v4006_v10 = vadd.f32 %v4283_v45, %v4005_v11 }
 0xc0e   :  { %v4543_v62 = vpop.f32.mrf.mxu0 }
 0xc0f   :  { %4012 = vmax.xlane.f32.xlu0 %v4006_v10 }
 0xc10   :  { %v4008_v29 = vpop.f32.mrf.mxu0 }
 0xc11   :  { %v4009_v58 = vadd.f32 %v4283_v45, %v4008_v29 }
 0xc12   :  { %v4544_v2 = vpop.f32.mrf.mxu0 }
 0xc13   :  { %4014 = vmax.xlane.f32.xlu0 %v4009_v58 }
 0xc98   :  { %v4013_v4 = vpop.xlane.xlu0 %4012 }
 0xc99   :  { %v4016_v27 = vsub.f32 %v4006_v10, %v4013_v4 }
 0xc9b   :  { %v4018_v1 = vmul.f32 1.442695, %v4016_v27 }
 0xc9c   :  { %v4015_v5 = vpop.xlane.xlu0 %4014 }
 0xc9d   :  { %5125 = vpow2.f32 %v4018_v1  ;;  %v4017_v49 = vsub.f32 %v4009_v58, %v4015_v5 }
 0xc9f   :  { %v4020_v9 = vmul.f32 1.442695, %v4017_v49 }
 0xca1   :  { %5127 = vpow2.f32 %v4020_v9 }
 0xcaa   :  { %v5126_v23 = vpop.eup %5125 }
 0xcab   :  { %4022 = vadd.xlane.f32.xlu1 %v5126_v23 }
 0xcae   :  { %v5128_v30 = vpop.eup %5127 }
 0xcaf   :  { %4024 = vadd.xlane.f32.xlu1 %v5128_v30 }
 0xd34   :  { %v4023_v6 = vpop.xlane.xlu1 %4022 }
 0xd35   :  { %5129 = vlog2.f32 %v4023_v6 }
 0xd38   :  { %v4025_v41 = vpop.xlane.xlu1 %4024 }
 0xd39   :  { %5131 = vlog2.f32 %v4025_v41 }
 0xd42   :  { %v5130_v13 = vpop.eup %5129 }
 0xd43   :  { %v4027_v0 = vmul.f32 0.6931472, %v5130_v13 }
 0xd45   :  { %v4030_v61 = vadd.f32 %v4027_v0, %v4013_v4 }
 0xd46   :  { %v5132_v60 = vpop.eup %5131 }
 0xd47   :  { %v4032_v55 = vsub.f32 %v4006_v10, %v4030_v61  ;;  %v4029_v3 = vmul.f32 0.6931472, %v5132_v60 }
 0xd49   :  { %4034 = vst [vmem:[%s10241_s10] sm:$0xff] %v4032_v55  ;;  %v4031_v57 = vadd.f32 %v4029_v3, %v4015_v5 }
 0xd4b   :  { %v4033_v47 = vsub.f32 %v4009_v58, %v4031_v57 }
 0xd4d   :  { %4035 = vst [vmem:[%s10241_s10 + $0x8] sm:$0xff] %v4033_v47 }

</bundles_post_ra>
